<compile_context>
chip_gen: v6e
topology: v6e:2x2x1
jax: 0.10.0
libtpu: 0.0.40
codegen_flags: <defaults>
</compile_context>

<pallas_src>
import functools

import jax
import jax.numpy as jnp
from jax import lax
from jax.experimental import pallas as pl
from jax.experimental.pallas import tpu as pltpu

EPS = 1e-5


def _round_up(x, m):
    return (x + m - 1) // m * m


def _bn_train(y, gamma, beta, count=None):
    """Training-mode BatchNorm over the rows of a (rows, C) f32 matrix.

    If `count` is given, the extra rows beyond the true batch are exact zeros
    (conv / alignment padding), so sums over all rows equal sums over the true
    rows and we just divide by `count` (biased variance, like PyTorch BN)."""
    if count is None:
        mu = jnp.mean(y, axis=0, keepdims=True)
        var = jnp.mean(jnp.square(y - mu), axis=0, keepdims=True)
    else:
        inv = 1.0 / float(count)
        mu = jnp.sum(y, axis=0, keepdims=True) * inv
        var = jnp.sum(y * y, axis=0, keepdims=True) * inv - mu * mu
    return (y - mu) * lax.rsqrt(var + EPS) * gamma + beta


# ------------------------- fused block kernel (one pallas_call) ------------------------- #

def _make_block_kernel(cfg):
    N, H, W = cfg['N'], cfg['H'], cfg['W']
    Ho, Wo, s = cfg['Ho'], cfg['Wo'], cfg['s']
    Hc, Wcp = cfg['Hc'], cfg['Wcp']
    P = s * s
    w_in, w_b, w_out, w_se = cfg['w_in'], cfg['w_b'], cfg['w_out'], cfg['w_se']
    proj = cfg['proj']
    Mo = N * Ho * Wo          # rows of the block output
    M_true = N * H * W        # true (unpadded) input pixels -> BN_a denominator
    R = P * N * Hc * Wcp      # rows of the padded / polyphase input

    def kernel(*refs):
        it = iter(refs)
        xp_ref = next(it)       # (P*N, Hc, Wcp, w_in)  polyphase zero-padded input
        mask_ref = next(it)     # (R, 1)                1 for real pixels, 0 for padding
        a_w = next(it); a_g = next(it); a_b = next(it)
        b_w = next(it); b_g = next(it); b_b = next(it)
        if w_se:
            se_w1 = next(it); se_b1 = next(it); se_w2 = next(it); se_b2 = next(it)
        c_w = next(it); c_g = next(it); c_b = next(it)
        if proj:
            p_w = next(it); p_g = next(it); p_b = next(it)
        o_ref = next(it)        # (N, Ho, Wo, w_out)
        h_scr = next(it)        # VMEM scratch (P*N, Hc, Wcp, w_b)

        # ---- conv_a (1x1) + BN (exact full-batch stats) + ReLU; re-zero padding ----
        xa = xp_ref[...].reshape(R, w_in)
        ya = jnp.dot(xa.astype(jnp.bfloat16), a_w[...],
                     preferred_element_type=jnp.float32)            # (R, w_b) f32
        ha = jnp.maximum(_bn_train(ya, a_g[...], a_b[...], count=M_true), 0.0)
        ha = ha * mask_ref[...]                    # BN shifts zeros; restore zero padding
        h_scr[...] = ha.reshape(P * N, Hc, Wcp, w_b)

        # ---- conv_b: 3x3 grouped conv (stride s) as 9 shifted block-diagonal matmuls ----
        acc = jnp.zeros((Mo, w_b), jnp.float32)
        for kh in range(3):
            for kw in range(3):
                p = (kh % s) * s + (kw % s)        # polyphase component of this tap
                i0, j0 = kh // s, kw // s          # contiguous offsets inside it
                win = h_scr[p * N:(p + 1) * N, i0:i0 + Ho, j0:j0 + Wo, :]
                win = win.reshape(Mo, w_b).astype(jnp.bfloat16)
                acc = acc + jnp.dot(win, b_w[kh * 3 + kw],
                                    preferred_element_type=jnp.float32)
        hb = jnp.maximum(_bn_train(acc, b_g[...], b_b[...]), 0.0)    # (Mo, w_b)

        # ---- Squeeze-Excite fused into the conv_b epilogue (no extra HBM pass) ----
        if w_se:
            hb3 = hb.reshape(N, Ho * Wo, w_b)
            pooled = jnp.mean(hb3, axis=1)                           # (N, w_b)
            z = jnp.maximum(
                jnp.dot(pooled.astype(jnp.bfloat16), se_w1[...],
                        preferred_element_type=jnp.float32) + se_b1[...], 0.0)
            gate = jax.nn.sigmoid(
                jnp.dot(z.astype(jnp.bfloat16), se_w2[...],
                        preferred_element_type=jnp.float32) + se_b2[...])
            hb = (hb3 * gate[:, None, :]).reshape(Mo, w_b)

        # ---- residual / projection branch, reusing the input already in VMEM ----
        if proj:
            if s == 2:
                # x[:, ::2, ::2, :] == odd/odd polyphase component of the padded input.
                xr = xp_ref[3 * N:4 * N, 0:Ho, 0:Wo, :]
            else:
                xr = xp_ref[0:N, 1:1 + Ho, 1:1 + Wo, :]
            yp = jnp.dot(xr.reshape(Mo, w_in).astype(jnp.bfloat16), p_w[...],
                         preferred_element_type=jnp.float32)
            skip = _bn_train(yp, p_g[...], p_b[...])
        else:
            # identity path requires stride==1 and w_in==w_out (asserted in the wrapper)
            skip = xp_ref[0:N, 1:1 + Ho, 1:1 + Wo, :].reshape(Mo, w_out)

        # ---- conv_c (1x1) + BN + residual add + final ReLU ----
        yc = jnp.dot(hb.astype(jnp.bfloat16), c_w[...],
                     preferred_element_type=jnp.float32)
        yc = _bn_train(yc, c_g[...], c_b[...])
        o_ref[...] = jnp.maximum(yc + skip, 0.0).reshape(N, Ho, Wo, w_out)

    return kernel


# --------------------------------- block wrapper --------------------------------- #

def _block_forward(x, p):
    # x: (N, H, W, w_in) NHWC
    N, H, W, _ = x.shape
    s = p['stride']
    assert s in (1, 2) and H % s == 0 and W % s == 0
    Ho, Wo = H // s, W // s
    if not p['proj']:
        # review correctness concern #2: identity residual only valid in this case
        assert s == 1 and p['w_in'] == p['w_out']

    # Zero-pad (pad=1) and polyphase-split the (small) block input on the host/XLA side,
    # so every 3x3 tap inside the kernel becomes a contiguous slice (no strided loads)
    # and the strided projection branch is just another slice of the same resident data.
    x_pad = jnp.pad(x, ((0, 0), (1, 1), (1, 1), (0, 0)))
    ones = jnp.pad(jnp.ones((N, H, W, 1), jnp.float32), ((0, 0), (1, 1), (1, 1), (0, 0)))
    if s == 1:
        comps, mcomps = [x_pad], [ones]
    else:
        comps = [x_pad[:, a::s, b::s, :] for a in range(s) for b in range(s)]
        mcomps = [ones[:, a::s, b::s, :] for a in range(s) for b in range(s)]
    Hc, Wc = comps[0].shape[1], comps[0].shape[2]
    Wcp = _round_up(Wc, 8)                      # sublane-aligned so in-kernel reshapes are free
    pad_w = ((0, 0), (0, 0), (0, Wcp - Wc), (0, 0))
    xp = jnp.concatenate([jnp.pad(c, pad_w) for c in comps], axis=0)      # (P*N, Hc, Wcp, w_in)
    mask = jnp.concatenate([jnp.pad(m, pad_w) for m in mcomps], axis=0).reshape(-1, 1)

    cfg = dict(N=N, H=H, W=W, Ho=Ho, Wo=Wo, s=s, Hc=Hc, Wcp=Wcp,
               w_in=p['w_in'], w_b=p['w_b'], w_out=p['w_out'], w_se=p['w_se'],
               proj=p['proj'])

    inputs = [xp, mask, p['a_w'], p['a_g'], p['a_b'], p['b_w'], p['b_g'], p['b_b']]
    if p['w_se']:
        inputs += [p['se_w1'], p['se_b1'], p['se_w2'], p['se_b2']]
    inputs += [p['c_w'], p['c_g'], p['c_b']]
    if p['proj']:
        inputs += [p['p_w'], p['p_g'], p['p_b']]

    vspec = pl.BlockSpec(memory_space=pltpu.MemorySpace.VMEM)
    return pl.pallas_call(
        _make_block_kernel(cfg),
        out_shape=jax.ShapeDtypeStruct((N, Ho, Wo, p['w_out']), jnp.float32),
        in_specs=[vspec] * len(inputs),
        out_specs=vspec,
        scratch_shapes=[pltpu.VMEM((s * s * N, Hc, Wcp, p['w_b']), jnp.float32)],
        compiler_params=pltpu.CompilerParams(vmem_limit_bytes=48 * 1024 * 1024),
    )(*inputs)


# ------------------------------- parameter init ------------------------------- #

def _block_diag_taps(key, groups, gw, dtype):
    """Grouped 3x3 weights -> 9 block-diagonal (w_b, w_b) tap matrices (one per kh,kw)."""
    w = jax.random.normal(key, (groups, 3, 3, gw, gw), jnp.float32) * (2.0 / (9 * gw)) ** 0.5
    w_b = groups * gw
    taps = []
    for kh in range(3):
        for kw in range(3):
            bd = jnp.zeros((w_b, w_b), jnp.float32)
            for g in range(groups):
                bd = bd.at[g * gw:(g + 1) * gw, g * gw:(g + 1) * gw].set(w[g, kh, kw])
            taps.append(bd)
    return jnp.stack(taps, axis=0).astype(dtype)


def _init_block(key, w_in, w_out, stride, bm, gw, se_r):
    w_b = int(round(w_out * bm))
    assert w_b % gw == 0, "group width must divide bottleneck width"
    groups = w_b // gw
    w_se = int(round(w_in * se_r)) if se_r else 0
    k = jax.random.split(key, 6)
    p = dict(stride=stride, w_in=w_in, w_out=w_out, w_b=w_b, groups=groups, gw=gw, w_se=w_se)
    # matmul weights stored bf16 (MXU operands); BN affine params stay f32
    p['a_w'] = (jax.random.normal(k[0], (w_in, w_b), jnp.float32) * (2.0 / w_in) ** 0.5).astype(jnp.bfloat16)
    p['a_g'] = jnp.ones((1, w_b), jnp.float32); p['a_b'] = jnp.zeros((1, w_b), jnp.float32)
    p['b_w'] = _block_diag_taps(k[1], groups, gw, jnp.bfloat16)
    p['b_g'] = jnp.ones((1, w_b), jnp.float32); p['b_b'] = jnp.zeros((1, w_b), jnp.float32)
    if w_se:
        p['se_w1'] = (jax.random.normal(k[2], (w_b, w_se), jnp.float32) * (1.0 / w_b) ** 0.5).astype(jnp.bfloat16)
        p['se_b1'] = jnp.zeros((1, w_se), jnp.float32)
        p['se_w2'] = (jax.random.normal(k[3], (w_se, w_b), jnp.float32) * (1.0 / w_se) ** 0.5).astype(jnp.bfloat16)
        p['se_b2'] = jnp.zeros((1, w_b), jnp.float32)
    p['c_w'] = (jax.random.normal(k[4], (w_b, w_out), jnp.float32) * (2.0 / w_b) ** 0.5).astype(jnp.bfloat16)
    p['c_g'] = jnp.ones((1, w_out), jnp.float32); p['c_b'] = jnp.zeros((1, w_out), jnp.float32)
    p['proj'] = (w_in != w_out) or (stride != 1)
    if p['proj']:
        p['p_w'] = (jax.random.normal(k[5], (w_in, w_out), jnp.float32) * (2.0 / w_in) ** 0.5).astype(jnp.bfloat16)
        p['p_g'] = jnp.ones((1, w_out), jnp.float32); p['p_b'] = jnp.zeros((1, w_out), jnp.float32)
    return p


# ---------------------------------- stage forward ---------------------------------- #

def any_stage_forward(x_nchw, stage_params):
    # AnyStage.forward: sequentially apply all blocks (each block = one fused pallas_call).
    x = jnp.transpose(x_nchw, (0, 2, 3, 1))   # NCHW -> NHWC (channels on lanes)
    for p in stage_params:
        x = _block_forward(x, p)
    return jnp.transpose(x, (0, 3, 1, 2))     # NHWC -> NCHW


# ---------------------------------------- main ---------------------------------------- #

if __name__ == "__main__":
    key = jax.random.PRNGKey(0)
    k_x, k_p = jax.random.split(key)

    # AnyStage(w_in=8, w_out=16, stride=2, d=2, block_fun=ResBottleneckBlock, bm=1.0, gw=8, se_r=0.25)
    w_in, w_out, stride, d, bm, gw, se_r = 8, 16, 2, 2, 1.0, 8, 0.25

    pkeys = jax.random.split(k_p, d)
    stage_params = []
    for i in range(d):
        b_stride = stride if i == 0 else 1
        b_w_in = w_in if i == 0 else w_out
        stage_params.append(_init_block(pkeys[i], b_w_in, w_out, b_stride, bm, gw, se_r))

    # Input in PyTorch NCHW convention.
    x = jax.random.normal(k_x, (2, w_in, 16, 16), jnp.float32)

    fwd = jax.jit(lambda xx: any_stage_forward(xx, stage_params))
    y = fwd(x)
    jax.block_until_ready(y)
    assert y.shape == (2, w_out, 8, 8), y.shape
    assert jnp.all(jnp.isfinite(y))
    print("KERNEL_OK")
</pallas_src>

<mosaic_0001>
module attributes {stable_mosaic.version = 11 : i64} {
  func.func @kernel(%arg0: memref<8x9x16x8xf32, #tpu.memory_space<vmem>>, %arg1: memref<1152x1xf32, #tpu.memory_space<vmem>>, %arg2: memref<8x16xbf16, #tpu.memory_space<vmem>>, %arg3: memref<1x16xf32, #tpu.memory_space<vmem>>, %arg4: memref<1x16xf32, #tpu.memory_space<vmem>>, %arg5: memref<9x16x16xbf16, #tpu.memory_space<vmem>>, %arg6: memref<1x16xf32, #tpu.memory_space<vmem>>, %arg7: memref<1x16xf32, #tpu.memory_space<vmem>>, %arg8: memref<16x2xbf16, #tpu.memory_space<vmem>>, %arg9: memref<1x2xf32, #tpu.memory_space<vmem>>, %arg10: memref<2x16xbf16, #tpu.memory_space<vmem>>, %arg11: memref<1x16xf32, #tpu.memory_space<vmem>>, %arg12: memref<16x16xbf16, #tpu.memory_space<vmem>>, %arg13: memref<1x16xf32, #tpu.memory_space<vmem>>, %arg14: memref<1x16xf32, #tpu.memory_space<vmem>>, %arg15: memref<8x16xbf16, #tpu.memory_space<vmem>>, %arg16: memref<1x16xf32, #tpu.memory_space<vmem>>, %arg17: memref<1x16xf32, #tpu.memory_space<vmem>>, %arg18: memref<2x8x8x16xf32, #tpu.memory_space<vmem>>, %arg19: memref<8x9x16x16xf32, #tpu.memory_space<vmem>>) attributes {dimension_semantics = [], scalar_prefetch = 0 : i64, scratch_operands = 1 : i64, tpu.core_type = #tpu.core_type<tc>} {
    %c0 = arith.constant 0 : index
    %c0_0 = arith.constant 0 : index
    %c0_1 = arith.constant 0 : index
    %c0_2 = arith.constant 0 : index
    %0 = vector.load %arg0[%c0, %c0_0, %c0_1, %c0_2] : memref<8x9x16x8xf32, #tpu.memory_space<vmem>>, vector<8x9x16x8xf32>
    %1 = vector.shape_cast %0 : vector<8x9x16x8xf32> to vector<1152x8xf32>
    %2 = arith.truncf %1 : vector<1152x8xf32> to vector<1152x8xbf16>
    %c0_3 = arith.constant 0 : index
    %c0_4 = arith.constant 0 : index
    %3 = vector.load %arg2[%c0_3, %c0_4] : memref<8x16xbf16, #tpu.memory_space<vmem>>, vector<8x16xbf16>
    %cst = arith.constant dense<0.000000e+00> : vector<1152x16xf32>
    %4 = tpu.matmul %2, %3, %cst {dimension_numbers = #tpu.dot_dimension_numbers<[1], [0], [0], [1], [0, 0, 1, 1], [], []>} : vector<1152x8xbf16>, vector<8x16xbf16>, vector<1152x16xf32> -> vector<1152x16xf32>
    %c0_5 = arith.constant 0 : index
    %c0_6 = arith.constant 0 : index
    %5 = vector.load %arg3[%c0_5, %c0_6] : memref<1x16xf32, #tpu.memory_space<vmem>>, vector<1x16xf32>
    %c0_7 = arith.constant 0 : index
    %c0_8 = arith.constant 0 : index
    %6 = vector.load %arg4[%c0_7, %c0_8] : memref<1x16xf32, #tpu.memory_space<vmem>>, vector<1x16xf32>
    %cst_9 = arith.constant dense<0.000000e+00> : vector<16xf32>
    %7 = vector.multi_reduction <add>, %4, %cst_9 [0] : vector<1152x16xf32> to vector<16xf32>
    %8 = vector.shape_cast %7 : vector<16xf32> to vector<1x16xf32>
    %cst_10 = arith.constant 0.001953125 : f32
    %9 = vector.broadcast %cst_10 : f32 to vector<1x16xf32>
    %10 = arith.mulf %8, %9 : vector<1x16xf32>
    %11 = arith.mulf %4, %4 : vector<1152x16xf32>
    %cst_11 = arith.constant dense<0.000000e+00> : vector<16xf32>
    %12 = vector.multi_reduction <add>, %11, %cst_11 [0] : vector<1152x16xf32> to vector<16xf32>
    %13 = vector.shape_cast %12 : vector<16xf32> to vector<1x16xf32>
    %cst_12 = arith.constant 0.001953125 : f32
    %14 = vector.broadcast %cst_12 : f32 to vector<1x16xf32>
    %15 = arith.mulf %13, %14 : vector<1x16xf32>
    %16 = arith.mulf %10, %10 : vector<1x16xf32>
    %17 = arith.subf %15, %16 : vector<1x16xf32>
    %18 = vector.broadcast %10 : vector<1x16xf32> to vector<1152x16xf32>
    %19 = arith.subf %4, %18 : vector<1152x16xf32>
    %cst_13 = arith.constant 9.99999974E-6 : f32
    %20 = vector.broadcast %cst_13 : f32 to vector<1x16xf32>
    %21 = arith.addf %17, %20 : vector<1x16xf32>
    %22 = math.rsqrt %21 : vector<1x16xf32>
    %23 = vector.broadcast %22 : vector<1x16xf32> to vector<1152x16xf32>
    %24 = arith.mulf %19, %23 : vector<1152x16xf32>
    %25 = vector.broadcast %5 : vector<1x16xf32> to vector<1152x16xf32>
    %26 = arith.mulf %24, %25 : vector<1152x16xf32>
    %27 = vector.broadcast %6 : vector<1x16xf32> to vector<1152x16xf32>
    %28 = arith.addf %26, %27 : vector<1152x16xf32>
    %cst_14 = arith.constant 0.000000e+00 : f32
    %29 = vector.broadcast %cst_14 : f32 to vector<1152x16xf32>
    %30 = arith.maximumf %28, %29 : vector<1152x16xf32>
    %c0_15 = arith.constant 0 : index
    %c0_16 = arith.constant 0 : index
    %31 = vector.load %arg1[%c0_15, %c0_16] : memref<1152x1xf32, #tpu.memory_space<vmem>>, vector<1152x1xf32>
    %32 = vector.broadcast %31 : vector<1152x1xf32> to vector<1152x16xf32>
    %33 = arith.mulf %30, %32 : vector<1152x16xf32>
    %34 = vector.shape_cast %33 : vector<1152x16xf32> to vector<8x9x16x16xf32>
    %c0_17 = arith.constant 0 : index
    %c0_18 = arith.constant 0 : index
    %c0_19 = arith.constant 0 : index
    %c0_20 = arith.constant 0 : index
    %35 = vector.load %arg19[%c0_17, %c0_18, %c0_19, %c0_20] : memref<8x9x16x16xf32, #tpu.memory_space<vmem>>, vector<8x9x16x16xf32>
    tpu.vector_store %arg19[%c0_17, %c0_18, %c0_19, %c0_20], %34 {strides = array<i32>} : memref<8x9x16x16xf32, #tpu.memory_space<vmem>>, vector<8x9x16x16xf32>,
    %cst_21 = arith.constant 0.000000e+00 : f32
    %36 = vector.broadcast %cst_21 : f32 to vector<128x16xf32>
    %c0_22 = arith.constant 0 : index
    %c0_23 = arith.constant 0 : index
    %c0_24 = arith.constant 0 : index
    %c0_25 = arith.constant 0 : index
    %37 = vector.load %arg19[%c0_22, %c0_23, %c0_24, %c0_25] : memref<8x9x16x16xf32, #tpu.memory_space<vmem>>, vector<2x8x8x16xf32>
    %38 = vector.shape_cast %37 : vector<2x8x8x16xf32> to vector<128x16xf32>
    %39 = arith.truncf %38 : vector<128x16xf32> to vector<128x16xbf16>
    %c0_26 = arith.constant 0 : index
    %c0_27 = arith.constant 0 : index
    %c0_28 = arith.constant 0 : index
    %40 = vector.load %arg5[%c0_26, %c0_27, %c0_28] : memref<9x16x16xbf16, #tpu.memory_space<vmem>>, vector<1x16x16xbf16>
    %41 = vector.shape_cast %40 : vector<1x16x16xbf16> to vector<16x16xbf16>
    %cst_29 = arith.constant dense<0.000000e+00> : vector<128x16xf32>
    %42 = tpu.matmul %39, %41, %cst_29 {dimension_numbers = #tpu.dot_dimension_numbers<[1], [0], [0], [1], [0, 0, 1, 1], [], []>} : vector<128x16xbf16>, vector<16x16xbf16>, vector<128x16xf32> -> vector<128x16xf32>
    %43 = arith.addf %36, %42 : vector<128x16xf32>
    %c2 = arith.constant 2 : index
    %c0_30 = arith.constant 0 : index
    %c0_31 = arith.constant 0 : index
    %c0_32 = arith.constant 0 : index
    %44 = vector.load %arg19[%c2, %c0_30, %c0_31, %c0_32] : memref<8x9x16x16xf32, #tpu.memory_space<vmem>>, vector<2x8x8x16xf32>
    %45 = vector.shape_cast %44 : vector<2x8x8x16xf32> to vector<128x16xf32>
    %46 = arith.truncf %45 : vector<128x16xf32> to vector<128x16xbf16>
    %c1 = arith.constant 1 : index
    %c0_33 = arith.constant 0 : index
    %c0_34 = arith.constant 0 : index
    %47 = vector.load %arg5[%c1, %c0_33, %c0_34] : memref<9x16x16xbf16, #tpu.memory_space<vmem>>, vector<1x16x16xbf16>
    %48 = vector.shape_cast %47 : vector<1x16x16xbf16> to vector<16x16xbf16>
    %cst_35 = arith.constant dense<0.000000e+00> : vector<128x16xf32>
    %49 = tpu.matmul %46, %48, %cst_35 {dimension_numbers = #tpu.dot_dimension_numbers<[1], [0], [0], [1], [0, 0, 1, 1], [], []>} : vector<128x16xbf16>, vector<16x16xbf16>, vector<128x16xf32> -> vector<128x16xf32>
    %50 = arith.addf %43, %49 : vector<128x16xf32>
    %c0_36 = arith.constant 0 : index
    %c0_37 = arith.constant 0 : index
    %c1_38 = arith.constant 1 : index
    %c0_39 = arith.constant 0 : index
    %51 = vector.load %arg19[%c0_36, %c0_37, %c1_38, %c0_39] : memref<8x9x16x16xf32, #tpu.memory_space<vmem>>, vector<2x8x8x16xf32>
    %52 = vector.shape_cast %51 : vector<2x8x8x16xf32> to vector<128x16xf32>
    %53 = arith.truncf %52 : vector<128x16xf32> to vector<128x16xbf16>
    %c2_40 = arith.constant 2 : index
    %c0_41 = arith.constant 0 : index
    %c0_42 = arith.constant 0 : index
    %54 = vector.load %arg5[%c2_40, %c0_41, %c0_42] : memref<9x16x16xbf16, #tpu.memory_space<vmem>>, vector<1x16x16xbf16>
    %55 = vector.shape_cast %54 : vector<1x16x16xbf16> to vector<16x16xbf16>
    %cst_43 = arith.constant dense<0.000000e+00> : vector<128x16xf32>
    %56 = tpu.matmul %53, %55, %cst_43 {dimension_numbers = #tpu.dot_dimension_numbers<[1], [0], [0], [1], [0, 0, 1, 1], [], []>} : vector<128x16xbf16>, vector<16x16xbf16>, vector<128x16xf32> -> vector<128x16xf32>
    %57 = arith.addf %50, %56 : vector<128x16xf32>
    %c4 = arith.constant 4 : index
    %c0_44 = arith.constant 0 : index
    %c0_45 = arith.constant 0 : index
    %c0_46 = arith.constant 0 : index
    %58 = vector.load %arg19[%c4, %c0_44, %c0_45, %c0_46] : memref<8x9x16x16xf32, #tpu.memory_space<vmem>>, vector<2x8x8x16xf32>
    %59 = vector.shape_cast %58 : vector<2x8x8x16xf32> to vector<128x16xf32>
    %60 = arith.truncf %59 : vector<128x16xf32> to vector<128x16xbf16>
    %c3 = arith.constant 3 : index
    %c0_47 = arith.constant 0 : index
    %c0_48 = arith.constant 0 : index
    %61 = vector.load %arg5[%c3, %c0_47, %c0_48] : memref<9x16x16xbf16, #tpu.memory_space<vmem>>, vector<1x16x16xbf16>
    %62 = vector.shape_cast %61 : vector<1x16x16xbf16> to vector<16x16xbf16>
    %cst_49 = arith.constant dense<0.000000e+00> : vector<128x16xf32>
    %63 = tpu.matmul %60, %62, %cst_49 {dimension_numbers = #tpu.dot_dimension_numbers<[1], [0], [0], [1], [0, 0, 1, 1], [], []>} : vector<128x16xbf16>, vector<16x16xbf16>, vector<128x16xf32> -> vector<128x16xf32>
    %64 = arith.addf %57, %63 : vector<128x16xf32>
    %c6 = arith.constant 6 : index
    %c0_50 = arith.constant 0 : index
    %c0_51 = arith.constant 0 : index
    %c0_52 = arith.constant 0 : index
    %65 = vector.load %arg19[%c6, %c0_50, %c0_51, %c0_52] : memref<8x9x16x16xf32, #tpu.memory_space<vmem>>, vector<2x8x8x16xf32>
    %66 = vector.shape_cast %65 : vector<2x8x8x16xf32> to vector<128x16xf32>
    %67 = arith.truncf %66 : vector<128x16xf32> to vector<128x16xbf16>
    %c4_53 = arith.constant 4 : index
    %c0_54 = arith.constant 0 : index
    %c0_55 = arith.constant 0 : index
    %68 = vector.load %arg5[%c4_53, %c0_54, %c0_55] : memref<9x16x16xbf16, #tpu.memory_space<vmem>>, vector<1x16x16xbf16>
    %69 = vector.shape_cast %68 : vector<1x16x16xbf16> to vector<16x16xbf16>
    %cst_56 = arith.constant dense<0.000000e+00> : vector<128x16xf32>
    %70 = tpu.matmul %67, %69, %cst_56 {dimension_numbers = #tpu.dot_dimension_numbers<[1], [0], [0], [1], [0, 0, 1, 1], [], []>} : vector<128x16xbf16>, vector<16x16xbf16>, vector<128x16xf32> -> vector<128x16xf32>
    %71 = arith.addf %64, %70 : vector<128x16xf32>
    %c4_57 = arith.constant 4 : index
    %c0_58 = arith.constant 0 : index
    %c1_59 = arith.constant 1 : index
    %c0_60 = arith.constant 0 : index
    %72 = vector.load %arg19[%c4_57, %c0_58, %c1_59, %c0_60] : memref<8x9x16x16xf32, #tpu.memory_space<vmem>>, vector<2x8x8x16xf32>
    %73 = vector.shape_cast %72 : vector<2x8x8x16xf32> to vector<128x16xf32>
    %74 = arith.truncf %73 : vector<128x16xf32> to vector<128x16xbf16>
    %c5 = arith.constant 5 : index
    %c0_61 = arith.constant 0 : index
    %c0_62 = arith.constant 0 : index
    %75 = vector.load %arg5[%c5, %c0_61, %c0_62] : memref<9x16x16xbf16, #tpu.memory_space<vmem>>, vector<1x16x16xbf16>
    %76 = vector.shape_cast %75 : vector<1x16x16xbf16> to vector<16x16xbf16>
    %cst_63 = arith.constant dense<0.000000e+00> : vector<128x16xf32>
    %77 = tpu.matmul %74, %76, %cst_63 {dimension_numbers = #tpu.dot_dimension_numbers<[1], [0], [0], [1], [0, 0, 1, 1], [], []>} : vector<128x16xbf16>, vector<16x16xbf16>, vector<128x16xf32> -> vector<128x16xf32>
    %78 = arith.addf %71, %77 : vector<128x16xf32>
    %c0_64 = arith.constant 0 : index
    %c1_65 = arith.constant 1 : index
    %c0_66 = arith.constant 0 : index
    %c0_67 = arith.constant 0 : index
    %79 = vector.load %arg19[%c0_64, %c1_65, %c0_66, %c0_67] : memref<8x9x16x16xf32, #tpu.memory_space<vmem>>, vector<2x8x8x16xf32>
    %80 = vector.shape_cast %79 : vector<2x8x8x16xf32> to vector<128x16xf32>
    %81 = arith.truncf %80 : vector<128x16xf32> to vector<128x16xbf16>
    %c6_68 = arith.constant 6 : index
    %c0_69 = arith.constant 0 : index
    %c0_70 = arith.constant 0 : index
    %82 = vector.load %arg5[%c6_68, %c0_69, %c0_70] : memref<9x16x16xbf16, #tpu.memory_space<vmem>>, vector<1x16x16xbf16>
    %83 = vector.shape_cast %82 : vector<1x16x16xbf16> to vector<16x16xbf16>
    %cst_71 = arith.constant dense<0.000000e+00> : vector<128x16xf32>
    %84 = tpu.matmul %81, %83, %cst_71 {dimension_numbers = #tpu.dot_dimension_numbers<[1], [0], [0], [1], [0, 0, 1, 1], [], []>} : vector<128x16xbf16>, vector<16x16xbf16>, vector<128x16xf32> -> vector<128x16xf32>
    %85 = arith.addf %78, %84 : vector<128x16xf32>
    %c2_72 = arith.constant 2 : index
    %c1_73 = arith.constant 1 : index
    %c0_74 = arith.constant 0 : index
    %c0_75 = arith.constant 0 : index
    %86 = vector.load %arg19[%c2_72, %c1_73, %c0_74, %c0_75] : memref<8x9x16x16xf32, #tpu.memory_space<vmem>>, vector<2x8x8x16xf32>
    %87 = vector.shape_cast %86 : vector<2x8x8x16xf32> to vector<128x16xf32>
    %88 = arith.truncf %87 : vector<128x16xf32> to vector<128x16xbf16>
    %c7 = arith.constant 7 : index
    %c0_76 = arith.constant 0 : index
    %c0_77 = arith.constant 0 : index
    %89 = vector.load %arg5[%c7, %c0_76, %c0_77] : memref<9x16x16xbf16, #tpu.memory_space<vmem>>, vector<1x16x16xbf16>
    %90 = vector.shape_cast %89 : vector<1x16x16xbf16> to vector<16x16xbf16>
    %cst_78 = arith.constant dense<0.000000e+00> : vector<128x16xf32>
    %91 = tpu.matmul %88, %90, %cst_78 {dimension_numbers = #tpu.dot_dimension_numbers<[1], [0], [0], [1], [0, 0, 1, 1], [], []>} : vector<128x16xbf16>, vector<16x16xbf16>, vector<128x16xf32> -> vector<128x16xf32>
    %92 = arith.addf %85, %91 : vector<128x16xf32>
    %c0_79 = arith.constant 0 : index
    %c1_80 = arith.constant 1 : index
    %c1_81 = arith.constant 1 : index
    %c0_82 = arith.constant 0 : index
    %93 = vector.load %arg19[%c0_79, %c1_80, %c1_81, %c0_82] : memref<8x9x16x16xf32, #tpu.memory_space<vmem>>, vector<2x8x8x16xf32>
    %94 = vector.shape_cast %93 : vector<2x8x8x16xf32> to vector<128x16xf32>
    %95 = arith.truncf %94 : vector<128x16xf32> to vector<128x16xbf16>
    %c8 = arith.constant 8 : index
    %c0_83 = arith.constant 0 : index
    %c0_84 = arith.constant 0 : index
    %96 = vector.load %arg5[%c8, %c0_83, %c0_84] : memref<9x16x16xbf16, #tpu.memory_space<vmem>>, vector<1x16x16xbf16>
    %97 = vector.shape_cast %96 : vector<1x16x16xbf16> to vector<16x16xbf16>
    %cst_85 = arith.constant dense<0.000000e+00> : vector<128x16xf32>
    %98 = tpu.matmul %95, %97, %cst_85 {dimension_numbers = #tpu.dot_dimension_numbers<[1], [0], [0], [1], [0, 0, 1, 1], [], []>} : vector<128x16xbf16>, vector<16x16xbf16>, vector<128x16xf32> -> vector<128x16xf32>
    %99 = arith.addf %92, %98 : vector<128x16xf32>
    %c0_86 = arith.constant 0 : index
    %c0_87 = arith.constant 0 : index
    %100 = vector.load %arg6[%c0_86, %c0_87] : memref<1x16xf32, #tpu.memory_space<vmem>>, vector<1x16xf32>
    %c0_88 = arith.constant 0 : index
    %c0_89 = arith.constant 0 : index
    %101 = vector.load %arg7[%c0_88, %c0_89] : memref<1x16xf32, #tpu.memory_space<vmem>>, vector<1x16xf32>
    %cst_90 = arith.constant dense<0.000000e+00> : vector<16xf32>
    %102 = vector.multi_reduction <add>, %99, %cst_90 [0] : vector<128x16xf32> to vector<16xf32>
    %103 = vector.shape_cast %102 : vector<16xf32> to vector<1x16xf32>
    %cst_91 = arith.constant 1.280000e+02 : f32
    %104 = vector.broadcast %cst_91 : f32 to vector<1x16xf32>
    %105 = arith.divf %103, %104 : vector<1x16xf32>
    %106 = vector.broadcast %105 : vector<1x16xf32> to vector<128x16xf32>
    %107 = arith.subf %99, %106 : vector<128x16xf32>
    %108 = arith.mulf %107, %107 : vector<128x16xf32>
    %cst_92 = arith.constant dense<0.000000e+00> : vector<16xf32>
    %109 = vector.multi_reduction <add>, %108, %cst_92 [0] : vector<128x16xf32> to vector<16xf32>
    %110 = vector.shape_cast %109 : vector<16xf32> to vector<1x16xf32>
    %cst_93 = arith.constant 1.280000e+02 : f32
    %111 = vector.broadcast %cst_93 : f32 to vector<1x16xf32>
    %112 = arith.divf %110, %111 : vector<1x16xf32>
    %113 = vector.broadcast %105 : vector<1x16xf32> to vector<128x16xf32>
    %114 = arith.subf %99, %113 : vector<128x16xf32>
    %cst_94 = arith.constant 9.99999974E-6 : f32
    %115 = vector.broadcast %cst_94 : f32 to vector<1x16xf32>
    %116 = arith.addf %112, %115 : vector<1x16xf32>
    %117 = math.rsqrt %116 : vector<1x16xf32>
    %118 = vector.broadcast %117 : vector<1x16xf32> to vector<128x16xf32>
    %119 = arith.mulf %114, %118 : vector<128x16xf32>
    %120 = vector.broadcast %100 : vector<1x16xf32> to vector<128x16xf32>
    %121 = arith.mulf %119, %120 : vector<128x16xf32>
    %122 = vector.broadcast %101 : vector<1x16xf32> to vector<128x16xf32>
    %123 = arith.addf %121, %122 : vector<128x16xf32>
    %cst_95 = arith.constant 0.000000e+00 : f32
    %124 = vector.broadcast %cst_95 : f32 to vector<128x16xf32>
    %125 = arith.maximumf %123, %124 : vector<128x16xf32>
    %126 = vector.shape_cast %125 : vector<128x16xf32> to vector<2x64x16xf32>
    %cst_96 = arith.constant dense<0.000000e+00> : vector<2x16xf32>
    %127 = vector.multi_reduction <add>, %126, %cst_96 [1] : vector<2x64x16xf32> to vector<2x16xf32>
    %cst_97 = arith.constant 6.400000e+01 : f32
    %128 = vector.broadcast %cst_97 : f32 to vector<2x16xf32>
    %129 = arith.divf %127, %128 : vector<2x16xf32>
    %130 = arith.truncf %129 : vector<2x16xf32> to vector<2x16xbf16>
    %c0_98 = arith.constant 0 : index
    %c0_99 = arith.constant 0 : index
    %131 = vector.load %arg8[%c0_98, %c0_99] : memref<16x2xbf16, #tpu.memory_space<vmem>>, vector<16x2xbf16>
    %cst_100 = arith.constant dense<0.000000e+00> : vector<2x2xf32>
    %132 = tpu.matmul %130, %131, %cst_100 {dimension_numbers = #tpu.dot_dimension_numbers<[1], [0], [0], [1], [0, 0, 1, 1], [], []>} : vector<2x16xbf16>, vector<16x2xbf16>, vector<2x2xf32> -> vector<2x2xf32>
    %c0_101 = arith.constant 0 : index
    %c0_102 = arith.constant 0 : index
    %133 = vector.load %arg9[%c0_101, %c0_102] : memref<1x2xf32, #tpu.memory_space<vmem>>, vector<1x2xf32>
    %134 = vector.broadcast %133 : vector<1x2xf32> to vector<2x2xf32>
    %135 = arith.addf %132, %134 : vector<2x2xf32>
    %cst_103 = arith.constant 0.000000e+00 : f32
    %136 = vector.broadcast %cst_103 : f32 to vector<2x2xf32>
    %137 = arith.maximumf %135, %136 : vector<2x2xf32>
    %138 = arith.truncf %137 : vector<2x2xf32> to vector<2x2xbf16>
    %c0_104 = arith.constant 0 : index
    %c0_105 = arith.constant 0 : index
    %139 = vector.load %arg10[%c0_104, %c0_105] : memref<2x16xbf16, #tpu.memory_space<vmem>>, vector<2x16xbf16>
    %cst_106 = arith.constant dense<0.000000e+00> : vector<2x16xf32>
    %140 = tpu.matmul %138, %139, %cst_106 {dimension_numbers = #tpu.dot_dimension_numbers<[1], [0], [0], [1], [0, 0, 1, 1], [], []>} : vector<2x2xbf16>, vector<2x16xbf16>, vector<2x16xf32> -> vector<2x16xf32>
    %c0_107 = arith.constant 0 : index
    %c0_108 = arith.constant 0 : index
    %141 = vector.load %arg11[%c0_107, %c0_108] : memref<1x16xf32, #tpu.memory_space<vmem>>, vector<1x16xf32>
    %142 = vector.broadcast %141 : vector<1x16xf32> to vector<2x16xf32>
    %143 = arith.addf %140, %142 : vector<2x16xf32>
    %144 = arith.negf %143 : vector<2x16xf32>
    %145 = math.exp %144 : vector<2x16xf32>
    %cst_109 = arith.constant 1.000000e+00 : f32
    %146 = vector.broadcast %cst_109 : f32 to vector<2x16xf32>
    %147 = arith.addf %146, %145 : vector<2x16xf32>
    %148 = arith.divf %146, %147 : vector<2x16xf32>
    %149 = vector.shape_cast %148 : vector<2x16xf32> to vector<2x1x16xf32>
    %150 = vector.broadcast %149 : vector<2x1x16xf32> to vector<2x64x16xf32>
    %151 = arith.mulf %126, %150 : vector<2x64x16xf32>
    %152 = vector.shape_cast %151 : vector<2x64x16xf32> to vector<128x16xf32>
    %c6_110 = arith.constant 6 : index
    %c0_111 = arith.constant 0 : index
    %c0_112 = arith.constant 0 : index
    %c0_113 = arith.constant 0 : index
    %153 = vector.load %arg0[%c6_110, %c0_111, %c0_112, %c0_113] : memref<8x9x16x8xf32, #tpu.memory_space<vmem>>, vector<2x8x8x8xf32>
    %154 = vector.shape_cast %153 : vector<2x8x8x8xf32> to vector<128x8xf32>
    %155 = arith.truncf %154 : vector<128x8xf32> to vector<128x8xbf16>
    %c0_114 = arith.constant 0 : index
    %c0_115 = arith.constant 0 : index
    %156 = vector.load %arg15[%c0_114, %c0_115] : memref<8x16xbf16, #tpu.memory_space<vmem>>, vector<8x16xbf16>
    %cst_116 = arith.constant dense<0.000000e+00> : vector<128x16xf32>
    %157 = tpu.matmul %155, %156, %cst_116 {dimension_numbers = #tpu.dot_dimension_numbers<[1], [0], [0], [1], [0, 0, 1, 1], [], []>} : vector<128x8xbf16>, vector<8x16xbf16>, vector<128x16xf32> -> vector<128x16xf32>
    %c0_117 = arith.constant 0 : index
    %c0_118 = arith.constant 0 : index
    %158 = vector.load %arg16[%c0_117, %c0_118] : memref<1x16xf32, #tpu.memory_space<vmem>>, vector<1x16xf32>
    %c0_119 = arith.constant 0 : index
    %c0_120 = arith.constant 0 : index
    %159 = vector.load %arg17[%c0_119, %c0_120] : memref<1x16xf32, #tpu.memory_space<vmem>>, vector<1x16xf32>
    %cst_121 = arith.constant dense<0.000000e+00> : vector<16xf32>
    %160 = vector.multi_reduction <add>, %157, %cst_121 [0] : vector<128x16xf32> to vector<16xf32>
    %161 = vector.shape_cast %160 : vector<16xf32> to vector<1x16xf32>
    %cst_122 = arith.constant 1.280000e+02 : f32
    %162 = vector.broadcast %cst_122 : f32 to vector<1x16xf32>
    %163 = arith.divf %161, %162 : vector<1x16xf32>
    %164 = vector.broadcast %163 : vector<1x16xf32> to vector<128x16xf32>
    %165 = arith.subf %157, %164 : vector<128x16xf32>
    %166 = arith.mulf %165, %165 : vector<128x16xf32>
    %cst_123 = arith.constant dense<0.000000e+00> : vector<16xf32>
    %167 = vector.multi_reduction <add>, %166, %cst_123 [0] : vector<128x16xf32> to vector<16xf32>
    %168 = vector.shape_cast %167 : vector<16xf32> to vector<1x16xf32>
    %cst_124 = arith.constant 1.280000e+02 : f32
    %169 = vector.broadcast %cst_124 : f32 to vector<1x16xf32>
    %170 = arith.divf %168, %169 : vector<1x16xf32>
    %171 = vector.broadcast %163 : vector<1x16xf32> to vector<128x16xf32>
    %172 = arith.subf %157, %171 : vector<128x16xf32>
    %cst_125 = arith.constant 9.99999974E-6 : f32
    %173 = vector.broadcast %cst_125 : f32 to vector<1x16xf32>
    %174 = arith.addf %170, %173 : vector<1x16xf32>
    %175 = math.rsqrt %174 : vector<1x16xf32>
    %176 = vector.broadcast %175 : vector<1x16xf32> to vector<128x16xf32>
    %177 = arith.mulf %172, %176 : vector<128x16xf32>
    %178 = vector.broadcast %158 : vector<1x16xf32> to vector<128x16xf32>
    %179 = arith.mulf %177, %178 : vector<128x16xf32>
    %180 = vector.broadcast %159 : vector<1x16xf32> to vector<128x16xf32>
    %181 = arith.addf %179, %180 : vector<128x16xf32>
    %182 = arith.truncf %152 : vector<128x16xf32> to vector<128x16xbf16>
    %c0_126 = arith.constant 0 : index
    %c0_127 = arith.constant 0 : index
    %183 = vector.load %arg12[%c0_126, %c0_127] : memref<16x16xbf16, #tpu.memory_space<vmem>>, vector<16x16xbf16>
    %cst_128 = arith.constant dense<0.000000e+00> : vector<128x16xf32>
    %184 = tpu.matmul %182, %183, %cst_128 {dimension_numbers = #tpu.dot_dimension_numbers<[1], [0], [0], [1], [0, 0, 1, 1], [], []>} : vector<128x16xbf16>, vector<16x16xbf16>, vector<128x16xf32> -> vector<128x16xf32>
    %c0_129 = arith.constant 0 : index
    %c0_130 = arith.constant 0 : index
    %185 = vector.load %arg13[%c0_129, %c0_130] : memref<1x16xf32, #tpu.memory_space<vmem>>, vector<1x16xf32>
    %c0_131 = arith.constant 0 : index
    %c0_132 = arith.constant 0 : index
    %186 = vector.load %arg14[%c0_131, %c0_132] : memref<1x16xf32, #tpu.memory_space<vmem>>, vector<1x16xf32>
    %cst_133 = arith.constant dense<0.000000e+00> : vector<16xf32>
    %187 = vector.multi_reduction <add>, %184, %cst_133 [0] : vector<128x16xf32> to vector<16xf32>
    %188 = vector.shape_cast %187 : vector<16xf32> to vector<1x16xf32>
    %cst_134 = arith.constant 1.280000e+02 : f32
    %189 = vector.broadcast %cst_134 : f32 to vector<1x16xf32>
    %190 = arith.divf %188, %189 : vector<1x16xf32>
    %191 = vector.broadcast %190 : vector<1x16xf32> to vector<128x16xf32>
    %192 = arith.subf %184, %191 : vector<128x16xf32>
    %193 = arith.mulf %192, %192 : vector<128x16xf32>
    %cst_135 = arith.constant dense<0.000000e+00> : vector<16xf32>
    %194 = vector.multi_reduction <add>, %193, %cst_135 [0] : vector<128x16xf32> to vector<16xf32>
    %195 = vector.shape_cast %194 : vector<16xf32> to vector<1x16xf32>
    %cst_136 = arith.constant 1.280000e+02 : f32
    %196 = vector.broadcast %cst_136 : f32 to vector<1x16xf32>
    %197 = arith.divf %195, %196 : vector<1x16xf32>
    %198 = vector.broadcast %190 : vector<1x16xf32> to vector<128x16xf32>
    %199 = arith.subf %184, %198 : vector<128x16xf32>
    %cst_137 = arith.constant 9.99999974E-6 : f32
    %200 = vector.broadcast %cst_137 : f32 to vector<1x16xf32>
    %201 = arith.addf %197, %200 : vector<1x16xf32>
    %202 = math.rsqrt %201 : vector<1x16xf32>
    %203 = vector.broadcast %202 : vector<1x16xf32> to vector<128x16xf32>
    %204 = arith.mulf %199, %203 : vector<128x16xf32>
    %205 = vector.broadcast %185 : vector<1x16xf32> to vector<128x16xf32>
    %206 = arith.mulf %204, %205 : vector<128x16xf32>
    %207 = vector.broadcast %186 : vector<1x16xf32> to vector<128x16xf32>
    %208 = arith.addf %206, %207 : vector<128x16xf32>
    %209 = arith.addf %208, %181 : vector<128x16xf32>
    %cst_138 = arith.constant 0.000000e+00 : f32
    %210 = vector.broadcast %cst_138 : f32 to vector<128x16xf32>
    %211 = arith.maximumf %209, %210 : vector<128x16xf32>
    %212 = vector.shape_cast %211 : vector<128x16xf32> to vector<2x8x8x16xf32>
    %c0_139 = arith.constant 0 : index
    %c0_140 = arith.constant 0 : index
    %c0_141 = arith.constant 0 : index
    %c0_142 = arith.constant 0 : index
    %213 = vector.load %arg18[%c0_139, %c0_140, %c0_141, %c0_142] : memref<2x8x8x16xf32, #tpu.memory_space<vmem>>, vector<2x8x8x16xf32>
    tpu.vector_store %arg18[%c0_139, %c0_140, %c0_141, %c0_142], %212 {strides = array<i32>} : memref<2x8x8x16xf32, #tpu.memory_space<vmem>>, vector<2x8x8x16xf32>,
    return
  }
}

module attributes {stable_mosaic.version = 11 : i64} {
  func.func @kernel(%arg0: memref<2x10x16x16xf32, #tpu.memory_space<vmem>>, %arg1: memref<320x1xf32, #tpu.memory_space<vmem>>, %arg2: memref<16x16xbf16, #tpu.memory_space<vmem>>, %arg3: memref<1x16xf32, #tpu.memory_space<vmem>>, %arg4: memref<1x16xf32, #tpu.memory_space<vmem>>, %arg5: memref<9x16x16xbf16, #tpu.memory_space<vmem>>, %arg6: memref<1x16xf32, #tpu.memory_space<vmem>>, %arg7: memref<1x16xf32, #tpu.memory_space<vmem>>, %arg8: memref<16x4xbf16, #tpu.memory_space<vmem>>, %arg9: memref<1x4xf32, #tpu.memory_space<vmem>>, %arg10: memref<4x16xbf16, #tpu.memory_space<vmem>>, %arg11: memref<1x16xf32, #tpu.memory_space<vmem>>, %arg12: memref<16x16xbf16, #tpu.memory_space<vmem>>, %arg13: memref<1x16xf32, #tpu.memory_space<vmem>>, %arg14: memref<1x16xf32, #tpu.memory_space<vmem>>, %arg15: memref<2x8x8x16xf32, #tpu.memory_space<vmem>>, %arg16: memref<2x10x16x16xf32, #tpu.memory_space<vmem>>) attributes {dimension_semantics = [], scalar_prefetch = 0 : i64, scratch_operands = 1 : i64, tpu.core_type = #tpu.core_type<tc>} {
    %c0 = arith.constant 0 : index
    %c0_0 = arith.constant 0 : index
    %c0_1 = arith.constant 0 : index
    %c0_2 = arith.constant 0 : index
    %0 = vector.load %arg0[%c0, %c0_0, %c0_1, %c0_2] : memref<2x10x16x16xf32, #tpu.memory_space<vmem>>, vector<2x10x16x16xf32>
    %1 = vector.shape_cast %0 : vector<2x10x16x16xf32> to vector<320x16xf32>
    %2 = arith.truncf %1 : vector<320x16xf32> to vector<320x16xbf16>
    %c0_3 = arith.constant 0 : index
    %c0_4 = arith.constant 0 : index
    %3 = vector.load %arg2[%c0_3, %c0_4] : memref<16x16xbf16, #tpu.memory_space<vmem>>, vector<16x16xbf16>
    %cst = arith.constant dense<0.000000e+00> : vector<320x16xf32>
    %4 = tpu.matmul %2, %3, %cst {dimension_numbers = #tpu.dot_dimension_numbers<[1], [0], [0], [1], [0, 0, 1, 1], [], []>} : vector<320x16xbf16>, vector<16x16xbf16>, vector<320x16xf32> -> vector<320x16xf32>
    %c0_5 = arith.constant 0 : index
    %c0_6 = arith.constant 0 : index
    %5 = vector.load %arg3[%c0_5, %c0_6] : memref<1x16xf32, #tpu.memory_space<vmem>>, vector<1x16xf32>
    %c0_7 = arith.constant 0 : index
    %c0_8 = arith.constant 0 : index
    %6 = vector.load %arg4[%c0_7, %c0_8] : memref<1x16xf32, #tpu.memory_space<vmem>>, vector<1x16xf32>
    %cst_9 = arith.constant dense<0.000000e+00> : vector<16xf32>
    %7 = vector.multi_reduction <add>, %4, %cst_9 [0] : vector<320x16xf32> to vector<16xf32>
    %8 = vector.shape_cast %7 : vector<16xf32> to vector<1x16xf32>
    %cst_10 = arith.constant 7.812500e-03 : f32
    %9 = vector.broadcast %cst_10 : f32 to vector<1x16xf32>
    %10 = arith.mulf %8, %9 : vector<1x16xf32>
    %11 = arith.mulf %4, %4 : vector<320x16xf32>
    %cst_11 = arith.constant dense<0.000000e+00> : vector<16xf32>
    %12 = vector.multi_reduction <add>, %11, %cst_11 [0] : vector<320x16xf32> to vector<16xf32>
    %13 = vector.shape_cast %12 : vector<16xf32> to vector<1x16xf32>
    %cst_12 = arith.constant 7.812500e-03 : f32
    %14 = vector.broadcast %cst_12 : f32 to vector<1x16xf32>
    %15 = arith.mulf %13, %14 : vector<1x16xf32>
    %16 = arith.mulf %10, %10 : vector<1x16xf32>
    %17 = arith.subf %15, %16 : vector<1x16xf32>
    %18 = vector.broadcast %10 : vector<1x16xf32> to vector<320x16xf32>
    %19 = arith.subf %4, %18 : vector<320x16xf32>
    %cst_13 = arith.constant 9.99999974E-6 : f32
    %20 = vector.broadcast %cst_13 : f32 to vector<1x16xf32>
    %21 = arith.addf %17, %20 : vector<1x16xf32>
    %22 = math.rsqrt %21 : vector<1x16xf32>
    %23 = vector.broadcast %22 : vector<1x16xf32> to vector<320x16xf32>
    %24 = arith.mulf %19, %23 : vector<320x16xf32>
    %25 = vector.broadcast %5 : vector<1x16xf32> to vector<320x16xf32>
    %26 = arith.mulf %24, %25 : vector<320x16xf32>
    %27 = vector.broadcast %6 : vector<1x16xf32> to vector<320x16xf32>
    %28 = arith.addf %26, %27 : vector<320x16xf32>
    %cst_14 = arith.constant 0.000000e+00 : f32
    %29 = vector.broadcast %cst_14 : f32 to vector<320x16xf32>
    %30 = arith.maximumf %28, %29 : vector<320x16xf32>
    %c0_15 = arith.constant 0 : index
    %c0_16 = arith.constant 0 : index
    %31 = vector.load %arg1[%c0_15, %c0_16] : memref<320x1xf32, #tpu.memory_space<vmem>>, vector<320x1xf32>
    %32 = vector.broadcast %31 : vector<320x1xf32> to vector<320x16xf32>
    %33 = arith.mulf %30, %32 : vector<320x16xf32>
    %34 = vector.shape_cast %33 : vector<320x16xf32> to vector<2x10x16x16xf32>
    %c0_17 = arith.constant 0 : index
    %c0_18 = arith.constant 0 : index
    %c0_19 = arith.constant 0 : index
    %c0_20 = arith.constant 0 : index
    %35 = vector.load %arg16[%c0_17, %c0_18, %c0_19, %c0_20] : memref<2x10x16x16xf32, #tpu.memory_space<vmem>>, vector<2x10x16x16xf32>
    tpu.vector_store %arg16[%c0_17, %c0_18, %c0_19, %c0_20], %34 {strides = array<i32>} : memref<2x10x16x16xf32, #tpu.memory_space<vmem>>, vector<2x10x16x16xf32>,
    %cst_21 = arith.constant 0.000000e+00 : f32
    %36 = vector.broadcast %cst_21 : f32 to vector<128x16xf32>
    %c0_22 = arith.constant 0 : index
    %c0_23 = arith.constant 0 : index
    %c0_24 = arith.constant 0 : index
    %c0_25 = arith.constant 0 : index
    %37 = vector.load %arg16[%c0_22, %c0_23, %c0_24, %c0_25] : memref<2x10x16x16xf32, #tpu.memory_space<vmem>>, vector<2x8x8x16xf32>
    %38 = vector.shape_cast %37 : vector<2x8x8x16xf32> to vector<128x16xf32>
    %39 = arith.truncf %38 : vector<128x16xf32> to vector<128x16xbf16>
    %c0_26 = arith.constant 0 : index
    %c0_27 = arith.constant 0 : index
    %c0_28 = arith.constant 0 : index
    %40 = vector.load %arg5[%c0_26, %c0_27, %c0_28] : memref<9x16x16xbf16, #tpu.memory_space<vmem>>, vector<1x16x16xbf16>
    %41 = vector.shape_cast %40 : vector<1x16x16xbf16> to vector<16x16xbf16>
    %cst_29 = arith.constant dense<0.000000e+00> : vector<128x16xf32>
    %42 = tpu.matmul %39, %41, %cst_29 {dimension_numbers = #tpu.dot_dimension_numbers<[1], [0], [0], [1], [0, 0, 1, 1], [], []>} : vector<128x16xbf16>, vector<16x16xbf16>, vector<128x16xf32> -> vector<128x16xf32>
    %43 = arith.addf %36, %42 : vector<128x16xf32>
    %c0_30 = arith.constant 0 : index
    %c0_31 = arith.constant 0 : index
    %c1 = arith.constant 1 : index
    %c0_32 = arith.constant 0 : index
    %44 = vector.load %arg16[%c0_30, %c0_31, %c1, %c0_32] : memref<2x10x16x16xf32, #tpu.memory_space<vmem>>, vector<2x8x8x16xf32>
    %45 = vector.shape_cast %44 : vector<2x8x8x16xf32> to vector<128x16xf32>
    %46 = arith.truncf %45 : vector<128x16xf32> to vector<128x16xbf16>
    %c1_33 = arith.constant 1 : index
    %c0_34 = arith.constant 0 : index
    %c0_35 = arith.constant 0 : index
    %47 = vector.load %arg5[%c1_33, %c0_34, %c0_35] : memref<9x16x16xbf16, #tpu.memory_space<vmem>>, vector<1x16x16xbf16>
    %48 = vector.shape_cast %47 : vector<1x16x16xbf16> to vector<16x16xbf16>
    %cst_36 = arith.constant dense<0.000000e+00> : vector<128x16xf32>
    %49 = tpu.matmul %46, %48, %cst_36 {dimension_numbers = #tpu.dot_dimension_numbers<[1], [0], [0], [1], [0, 0, 1, 1], [], []>} : vector<128x16xbf16>, vector<16x16xbf16>, vector<128x16xf32> -> vector<128x16xf32>
    %50 = arith.addf %43, %49 : vector<128x16xf32>
    %c0_37 = arith.constant 0 : index
    %c0_38 = arith.constant 0 : index
    %c2 = arith.constant 2 : index
    %c0_39 = arith.constant 0 : index
    %51 = vector.load %arg16[%c0_37, %c0_38, %c2, %c0_39] : memref<2x10x16x16xf32, #tpu.memory_space<vmem>>, vector<2x8x8x16xf32>
    %52 = vector.shape_cast %51 : vector<2x8x8x16xf32> to vector<128x16xf32>
    %53 = arith.truncf %52 : vector<128x16xf32> to vector<128x16xbf16>
    %c2_40 = arith.constant 2 : index
    %c0_41 = arith.constant 0 : index
    %c0_42 = arith.constant 0 : index
    %54 = vector.load %arg5[%c2_40, %c0_41, %c0_42] : memref<9x16x16xbf16, #tpu.memory_space<vmem>>, vector<1x16x16xbf16>
    %55 = vector.shape_cast %54 : vector<1x16x16xbf16> to vector<16x16xbf16>
    %cst_43 = arith.constant dense<0.000000e+00> : vector<128x16xf32>
    %56 = tpu.matmul %53, %55, %cst_43 {dimension_numbers = #tpu.dot_dimension_numbers<[1], [0], [0], [1], [0, 0, 1, 1], [], []>} : vector<128x16xbf16>, vector<16x16xbf16>, vector<128x16xf32> -> vector<128x16xf32>
    %57 = arith.addf %50, %56 : vector<128x16xf32>
    %c0_44 = arith.constant 0 : index
    %c1_45 = arith.constant 1 : index
    %c0_46 = arith.constant 0 : index
    %c0_47 = arith.constant 0 : index
    %58 = vector.load %arg16[%c0_44, %c1_45, %c0_46, %c0_47] : memref<2x10x16x16xf32, #tpu.memory_space<vmem>>, vector<2x8x8x16xf32>
    %59 = vector.shape_cast %58 : vector<2x8x8x16xf32> to vector<128x16xf32>
    %60 = arith.truncf %59 : vector<128x16xf32> to vector<128x16xbf16>
    %c3 = arith.constant 3 : index
    %c0_48 = arith.constant 0 : index
    %c0_49 = arith.constant 0 : index
    %61 = vector.load %arg5[%c3, %c0_48, %c0_49] : memref<9x16x16xbf16, #tpu.memory_space<vmem>>, vector<1x16x16xbf16>
    %62 = vector.shape_cast %61 : vector<1x16x16xbf16> to vector<16x16xbf16>
    %cst_50 = arith.constant dense<0.000000e+00> : vector<128x16xf32>
    %63 = tpu.matmul %60, %62, %cst_50 {dimension_numbers = #tpu.dot_dimension_numbers<[1], [0], [0], [1], [0, 0, 1, 1], [], []>} : vector<128x16xbf16>, vector<16x16xbf16>, vector<128x16xf32> -> vector<128x16xf32>
    %64 = arith.addf %57, %63 : vector<128x16xf32>
    %c0_51 = arith.constant 0 : index
    %c1_52 = arith.constant 1 : index
    %c1_53 = arith.constant 1 : index
    %c0_54 = arith.constant 0 : index
    %65 = vector.load %arg16[%c0_51, %c1_52, %c1_53, %c0_54] : memref<2x10x16x16xf32, #tpu.memory_space<vmem>>, vector<2x8x8x16xf32>
    %66 = vector.shape_cast %65 : vector<2x8x8x16xf32> to vector<128x16xf32>
    %67 = arith.truncf %66 : vector<128x16xf32> to vector<128x16xbf16>
    %c4 = arith.constant 4 : index
    %c0_55 = arith.constant 0 : index
    %c0_56 = arith.constant 0 : index
    %68 = vector.load %arg5[%c4, %c0_55, %c0_56] : memref<9x16x16xbf16, #tpu.memory_space<vmem>>, vector<1x16x16xbf16>
    %69 = vector.shape_cast %68 : vector<1x16x16xbf16> to vector<16x16xbf16>
    %cst_57 = arith.constant dense<0.000000e+00> : vector<128x16xf32>
    %70 = tpu.matmul %67, %69, %cst_57 {dimension_numbers = #tpu.dot_dimension_numbers<[1], [0], [0], [1], [0, 0, 1, 1], [], []>} : vector<128x16xbf16>, vector<16x16xbf16>, vector<128x16xf32> -> vector<128x16xf32>
    %71 = arith.addf %64, %70 : vector<128x16xf32>
    %c0_58 = arith.constant 0 : index
    %c1_59 = arith.constant 1 : index
    %c2_60 = arith.constant 2 : index
    %c0_61 = arith.constant 0 : index
    %72 = vector.load %arg16[%c0_58, %c1_59, %c2_60, %c0_61] : memref<2x10x16x16xf32, #tpu.memory_space<vmem>>, vector<2x8x8x16xf32>
    %73 = vector.shape_cast %72 : vector<2x8x8x16xf32> to vector<128x16xf32>
    %74 = arith.truncf %73 : vector<128x16xf32> to vector<128x16xbf16>
    %c5 = arith.constant 5 : index
    %c0_62 = arith.constant 0 : index
    %c0_63 = arith.constant 0 : index
    %75 = vector.load %arg5[%c5, %c0_62, %c0_63] : memref<9x16x16xbf16, #tpu.memory_space<vmem>>, vector<1x16x16xbf16>
    %76 = vector.shape_cast %75 : vector<1x16x16xbf16> to vector<16x16xbf16>
    %cst_64 = arith.constant dense<0.000000e+00> : vector<128x16xf32>
    %77 = tpu.matmul %74, %76, %cst_64 {dimension_numbers = #tpu.dot_dimension_numbers<[1], [0], [0], [1], [0, 0, 1, 1], [], []>} : vector<128x16xbf16>, vector<16x16xbf16>, vector<128x16xf32> -> vector<128x16xf32>
    %78 = arith.addf %71, %77 : vector<128x16xf32>
    %c0_65 = arith.constant 0 : index
    %c2_66 = arith.constant 2 : index
    %c0_67 = arith.constant 0 : index
    %c0_68 = arith.constant 0 : index
    %79 = vector.load %arg16[%c0_65, %c2_66, %c0_67, %c0_68] : memref<2x10x16x16xf32, #tpu.memory_space<vmem>>, vector<2x8x8x16xf32>
    %80 = vector.shape_cast %79 : vector<2x8x8x16xf32> to vector<128x16xf32>
    %81 = arith.truncf %80 : vector<128x16xf32> to vector<128x16xbf16>
    %c6 = arith.constant 6 : index
    %c0_69 = arith.constant 0 : index
    %c0_70 = arith.constant 0 : index
    %82 = vector.load %arg5[%c6, %c0_69, %c0_70] : memref<9x16x16xbf16, #tpu.memory_space<vmem>>, vector<1x16x16xbf16>
    %83 = vector.shape_cast %82 : vector<1x16x16xbf16> to vector<16x16xbf16>
    %cst_71 = arith.constant dense<0.000000e+00> : vector<128x16xf32>
    %84 = tpu.matmul %81, %83, %cst_71 {dimension_numbers = #tpu.dot_dimension_numbers<[1], [0], [0], [1], [0, 0, 1, 1], [], []>} : vector<128x16xbf16>, vector<16x16xbf16>, vector<128x16xf32> -> vector<128x16xf32>
    %85 = arith.addf %78, %84 : vector<128x16xf32>
    %c0_72 = arith.constant 0 : index
    %c2_73 = arith.constant 2 : index
    %c1_74 = arith.constant 1 : index
    %c0_75 = arith.constant 0 : index
    %86 = vector.load %arg16[%c0_72, %c2_73, %c1_74, %c0_75] : memref<2x10x16x16xf32, #tpu.memory_space<vmem>>, vector<2x8x8x16xf32>
    %87 = vector.shape_cast %86 : vector<2x8x8x16xf32> to vector<128x16xf32>
    %88 = arith.truncf %87 : vector<128x16xf32> to vector<128x16xbf16>
    %c7 = arith.constant 7 : index
    %c0_76 = arith.constant 0 : index
    %c0_77 = arith.constant 0 : index
    %89 = vector.load %arg5[%c7, %c0_76, %c0_77] : memref<9x16x16xbf16, #tpu.memory_space<vmem>>, vector<1x16x16xbf16>
    %90 = vector.shape_cast %89 : vector<1x16x16xbf16> to vector<16x16xbf16>
    %cst_78 = arith.constant dense<0.000000e+00> : vector<128x16xf32>
    %91 = tpu.matmul %88, %90, %cst_78 {dimension_numbers = #tpu.dot_dimension_numbers<[1], [0], [0], [1], [0, 0, 1, 1], [], []>} : vector<128x16xbf16>, vector<16x16xbf16>, vector<128x16xf32> -> vector<128x16xf32>
    %92 = arith.addf %85, %91 : vector<128x16xf32>
    %c0_79 = arith.constant 0 : index
    %c2_80 = arith.constant 2 : index
    %c2_81 = arith.constant 2 : index
    %c0_82 = arith.constant 0 : index
    %93 = vector.load %arg16[%c0_79, %c2_80, %c2_81, %c0_82] : memref<2x10x16x16xf32, #tpu.memory_space<vmem>>, vector<2x8x8x16xf32>
    %94 = vector.shape_cast %93 : vector<2x8x8x16xf32> to vector<128x16xf32>
    %95 = arith.truncf %94 : vector<128x16xf32> to vector<128x16xbf16>
    %c8 = arith.constant 8 : index
    %c0_83 = arith.constant 0 : index
    %c0_84 = arith.constant 0 : index
    %96 = vector.load %arg5[%c8, %c0_83, %c0_84] : memref<9x16x16xbf16, #tpu.memory_space<vmem>>, vector<1x16x16xbf16>
    %97 = vector.shape_cast %96 : vector<1x16x16xbf16> to vector<16x16xbf16>
    %cst_85 = arith.constant dense<0.000000e+00> : vector<128x16xf32>
    %98 = tpu.matmul %95, %97, %cst_85 {dimension_numbers = #tpu.dot_dimension_numbers<[1], [0], [0], [1], [0, 0, 1, 1], [], []>} : vector<128x16xbf16>, vector<16x16xbf16>, vector<128x16xf32> -> vector<128x16xf32>
    %99 = arith.addf %92, %98 : vector<128x16xf32>
    %c0_86 = arith.constant 0 : index
    %c0_87 = arith.constant 0 : index
    %100 = vector.load %arg6[%c0_86, %c0_87] : memref<1x16xf32, #tpu.memory_space<vmem>>, vector<1x16xf32>
    %c0_88 = arith.constant 0 : index
    %c0_89 = arith.constant 0 : index
    %101 = vector.load %arg7[%c0_88, %c0_89] : memref<1x16xf32, #tpu.memory_space<vmem>>, vector<1x16xf32>
    %cst_90 = arith.constant dense<0.000000e+00> : vector<16xf32>
    %102 = vector.multi_reduction <add>, %99, %cst_90 [0] : vector<128x16xf32> to vector<16xf32>
    %103 = vector.shape_cast %102 : vector<16xf32> to vector<1x16xf32>
    %cst_91 = arith.constant 1.280000e+02 : f32
    %104 = vector.broadcast %cst_91 : f32 to vector<1x16xf32>
    %105 = arith.divf %103, %104 : vector<1x16xf32>
    %106 = vector.broadcast %105 : vector<1x16xf32> to vector<128x16xf32>
    %107 = arith.subf %99, %106 : vector<128x16xf32>
    %108 = arith.mulf %107, %107 : vector<128x16xf32>
    %cst_92 = arith.constant dense<0.000000e+00> : vector<16xf32>
    %109 = vector.multi_reduction <add>, %108, %cst_92 [0] : vector<128x16xf32> to vector<16xf32>
    %110 = vector.shape_cast %109 : vector<16xf32> to vector<1x16xf32>
    %cst_93 = arith.constant 1.280000e+02 : f32
    %111 = vector.broadcast %cst_93 : f32 to vector<1x16xf32>
    %112 = arith.divf %110, %111 : vector<1x16xf32>
    %113 = vector.broadcast %105 : vector<1x16xf32> to vector<128x16xf32>
    %114 = arith.subf %99, %113 : vector<128x16xf32>
    %cst_94 = arith.constant 9.99999974E-6 : f32
    %115 = vector.broadcast %cst_94 : f32 to vector<1x16xf32>
    %116 = arith.addf %112, %115 : vector<1x16xf32>
    %117 = math.rsqrt %116 : vector<1x16xf32>
    %118 = vector.broadcast %117 : vector<1x16xf32> to vector<128x16xf32>
    %119 = arith.mulf %114, %118 : vector<128x16xf32>
    %120 = vector.broadcast %100 : vector<1x16xf32> to vector<128x16xf32>
    %121 = arith.mulf %119, %120 : vector<128x16xf32>
    %122 = vector.broadcast %101 : vector<1x16xf32> to vector<128x16xf32>
    %123 = arith.addf %121, %122 : vector<128x16xf32>
    %cst_95 = arith.constant 0.000000e+00 : f32
    %124 = vector.broadcast %cst_95 : f32 to vector<128x16xf32>
    %125 = arith.maximumf %123, %124 : vector<128x16xf32>
    %126 = vector.shape_cast %125 : vector<128x16xf32> to vector<2x64x16xf32>
    %cst_96 = arith.constant dense<0.000000e+00> : vector<2x16xf32>
    %127 = vector.multi_reduction <add>, %126, %cst_96 [1] : vector<2x64x16xf32> to vector<2x16xf32>
    %cst_97 = arith.constant 6.400000e+01 : f32
    %128 = vector.broadcast %cst_97 : f32 to vector<2x16xf32>
    %129 = arith.divf %127, %128 : vector<2x16xf32>
    %130 = arith.truncf %129 : vector<2x16xf32> to vector<2x16xbf16>
    %c0_98 = arith.constant 0 : index
    %c0_99 = arith.constant 0 : index
    %131 = vector.load %arg8[%c0_98, %c0_99] : memref<16x4xbf16, #tpu.memory_space<vmem>>, vector<16x4xbf16>
    %cst_100 = arith.constant dense<0.000000e+00> : vector<2x4xf32>
    %132 = tpu.matmul %130, %131, %cst_100 {dimension_numbers = #tpu.dot_dimension_numbers<[1], [0], [0], [1], [0, 0, 1, 1], [], []>} : vector<2x16xbf16>, vector<16x4xbf16>, vector<2x4xf32> -> vector<2x4xf32>
    %c0_101 = arith.constant 0 : index
    %c0_102 = arith.constant 0 : index
    %133 = vector.load %arg9[%c0_101, %c0_102] : memref<1x4xf32, #tpu.memory_space<vmem>>, vector<1x4xf32>
    %134 = vector.broadcast %133 : vector<1x4xf32> to vector<2x4xf32>
    %135 = arith.addf %132, %134 : vector<2x4xf32>
    %cst_103 = arith.constant 0.000000e+00 : f32
    %136 = vector.broadcast %cst_103 : f32 to vector<2x4xf32>
    %137 = arith.maximumf %135, %136 : vector<2x4xf32>
    %138 = arith.truncf %137 : vector<2x4xf32> to vector<2x4xbf16>
    %c0_104 = arith.constant 0 : index
    %c0_105 = arith.constant 0 : index
    %139 = vector.load %arg10[%c0_104, %c0_105] : memref<4x16xbf16, #tpu.memory_space<vmem>>, vector<4x16xbf16>
    %cst_106 = arith.constant dense<0.000000e+00> : vector<2x16xf32>
    %140 = tpu.matmul %138, %139, %cst_106 {dimension_numbers = #tpu.dot_dimension_numbers<[1], [0], [0], [1], [0, 0, 1, 1], [], []>} : vector<2x4xbf16>, vector<4x16xbf16>, vector<2x16xf32> -> vector<2x16xf32>
    %c0_107 = arith.constant 0 : index
    %c0_108 = arith.constant 0 : index
    %141 = vector.load %arg11[%c0_107, %c0_108] : memref<1x16xf32, #tpu.memory_space<vmem>>, vector<1x16xf32>
    %142 = vector.broadcast %141 : vector<1x16xf32> to vector<2x16xf32>
    %143 = arith.addf %140, %142 : vector<2x16xf32>
    %144 = arith.negf %143 : vector<2x16xf32>
    %145 = math.exp %144 : vector<2x16xf32>
    %cst_109 = arith.constant 1.000000e+00 : f32
    %146 = vector.broadcast %cst_109 : f32 to vector<2x16xf32>
    %147 = arith.addf %146, %145 : vector<2x16xf32>
    %148 = arith.divf %146, %147 : vector<2x16xf32>
    %149 = vector.shape_cast %148 : vector<2x16xf32> to vector<2x1x16xf32>
    %150 = vector.broadcast %149 : vector<2x1x16xf32> to vector<2x64x16xf32>
    %151 = arith.mulf %126, %150 : vector<2x64x16xf32>
    %152 = vector.shape_cast %151 : vector<2x64x16xf32> to vector<128x16xf32>
    %c0_110 = arith.constant 0 : index
    %c1_111 = arith.constant 1 : index
    %c1_112 = arith.constant 1 : index
    %c0_113 = arith.constant 0 : index
    %153 = vector.load %arg0[%c0_110, %c1_111, %c1_112, %c0_113] : memref<2x10x16x16xf32, #tpu.memory_space<vmem>>, vector<2x8x8x16xf32>
    %154 = vector.shape_cast %153 : vector<2x8x8x16xf32> to vector<128x16xf32>
    %155 = arith.truncf %152 : vector<128x16xf32> to vector<128x16xbf16>
    %c0_114 = arith.constant 0 : index
    %c0_115 = arith.constant 0 : index
    %156 = vector.load %arg12[%c0_114, %c0_115] : memref<16x16xbf16, #tpu.memory_space<vmem>>, vector<16x16xbf16>
    %cst_116 = arith.constant dense<0.000000e+00> : vector<128x16xf32>
    %157 = tpu.matmul %155, %156, %cst_116 {dimension_numbers = #tpu.dot_dimension_numbers<[1], [0], [0], [1], [0, 0, 1, 1], [], []>} : vector<128x16xbf16>, vector<16x16xbf16>, vector<128x16xf32> -> vector<128x16xf32>
    %c0_117 = arith.constant 0 : index
    %c0_118 = arith.constant 0 : index
    %158 = vector.load %arg13[%c0_117, %c0_118] : memref<1x16xf32, #tpu.memory_space<vmem>>, vector<1x16xf32>
    %c0_119 = arith.constant 0 : index
    %c0_120 = arith.constant 0 : index
    %159 = vector.load %arg14[%c0_119, %c0_120] : memref<1x16xf32, #tpu.memory_space<vmem>>, vector<1x16xf32>
    %cst_121 = arith.constant dense<0.000000e+00> : vector<16xf32>
    %160 = vector.multi_reduction <add>, %157, %cst_121 [0] : vector<128x16xf32> to vector<16xf32>
    %161 = vector.shape_cast %160 : vector<16xf32> to vector<1x16xf32>
    %cst_122 = arith.constant 1.280000e+02 : f32
    %162 = vector.broadcast %cst_122 : f32 to vector<1x16xf32>
    %163 = arith.divf %161, %162 : vector<1x16xf32>
    %164 = vector.broadcast %163 : vector<1x16xf32> to vector<128x16xf32>
    %165 = arith.subf %157, %164 : vector<128x16xf32>
    %166 = arith.mulf %165, %165 : vector<128x16xf32>
    %cst_123 = arith.constant dense<0.000000e+00> : vector<16xf32>
    %167 = vector.multi_reduction <add>, %166, %cst_123 [0] : vector<128x16xf32> to vector<16xf32>
    %168 = vector.shape_cast %167 : vector<16xf32> to vector<1x16xf32>
    %cst_124 = arith.constant 1.280000e+02 : f32
    %169 = vector.broadcast %cst_124 : f32 to vector<1x16xf32>
    %170 = arith.divf %168, %169 : vector<1x16xf32>
    %171 = vector.broadcast %163 : vector<1x16xf32> to vector<128x16xf32>
    %172 = arith.subf %157, %171 : vector<128x16xf32>
    %cst_125 = arith.constant 9.99999974E-6 : f32
    %173 = vector.broadcast %cst_125 : f32 to vector<1x16xf32>
    %174 = arith.addf %170, %173 : vector<1x16xf32>
    %175 = math.rsqrt %174 : vector<1x16xf32>
    %176 = vector.broadcast %175 : vector<1x16xf32> to vector<128x16xf32>
    %177 = arith.mulf %172, %176 : vector<128x16xf32>
    %178 = vector.broadcast %158 : vector<1x16xf32> to vector<128x16xf32>
    %179 = arith.mulf %177, %178 : vector<128x16xf32>
    %180 = vector.broadcast %159 : vector<1x16xf32> to vector<128x16xf32>
    %181 = arith.addf %179, %180 : vector<128x16xf32>
    %182 = arith.addf %181, %154 : vector<128x16xf32>
    %cst_126 = arith.constant 0.000000e+00 : f32
    %183 = vector.broadcast %cst_126 : f32 to vector<128x16xf32>
    %184 = arith.maximumf %182, %183 : vector<128x16xf32>
    %185 = vector.shape_cast %184 : vector<128x16xf32> to vector<2x8x8x16xf32>
    %c0_127 = arith.constant 0 : index
    %c0_128 = arith.constant 0 : index
    %c0_129 = arith.constant 0 : index
    %c0_130 = arith.constant 0 : index
    %186 = vector.load %arg15[%c0_127, %c0_128, %c0_129, %c0_130] : memref<2x8x8x16xf32, #tpu.memory_space<vmem>>, vector<2x8x8x16xf32>
    tpu.vector_store %arg15[%c0_127, %c0_128, %c0_129, %c0_130], %185 {strides = array<i32>} : memref<2x8x8x16xf32, #tpu.memory_space<vmem>>, vector<2x8x8x16xf32>,
    return
  }
}

</mosaic_0001>

<bundles_post_ra>
// kernel: _lambda_.3
= control target key start
LH: loop header
LB: loop body
LE: loop exit
PB: predicated region body
PF: predicated region fallthrough
CT: control target
= control target key end

     0   :  { %vm120_vm0 = vcmask 130048   ;;  %v3986_v10 = vmov 0   ;;  %s6004_s0 = inlined_call_operand.vmem [shape: f32[2,10,16,16], index: 0, kind: input, shape index: {}]   ;;  %s6005_s1 = inlined_call_operand.vmem [shape: f32[320,1], index: 1, kind: input, shape index: {}]   ;;  %s6006_s2 = inlined_call_operand.vmem [shape: bf16[16,16], index: 2, kind: input, shape index: {}]   ;;  %s6007_s3 = inlined_call_operand.vmem [shape: f32[1,16], index: 3, kind: input, shape index: {}, may-alias: {3,6,13}]   ;;  %s6008_s4 = inlined_call_operand.vmem [shape: f32[1,16], index: 4, kind: input, shape index: {}, may-alias: {4,7,11,14}]   ;;  %s6009_s5 = inlined_call_operand.vmem [shape: bf16[9,16,16], index: 5, kind: input, shape index: {}]   ;;  %s6010_s6 = inlined_call_operand.vmem [shape: f32[1,16], index: 6, kind: input, shape index: {}, may-alias: {3,6,13}]   ;;  %s6011_s7 = inlined_call_operand.vmem [shape: f32[1,16], index: 7, kind: input, shape index: {}, may-alias: {4,7,11,14}]   ;;  %s6012_s8 = inlined_call_operand.vmem [shape: bf16[16,4], index: 8, kind: input, shape index: {}]   ;;  %s6013_s9 = inlined_call_operand.vmem [shape: f32[1,4], index: 9, kind: input, shape index: {}]   ;;  %s6014_s10 = inlined_call_operand.vmem [shape: bf16[4,16], index: 10, kind: input, shape index: {}]   ;;  %s6015_s11 = inlined_call_operand.vmem [shape: f32[1,16], index: 11, kind: input, shape index: {}, may-alias: {4,7,11,14}]   ;;  %s6016_s12 = inlined_call_operand.vmem [shape: bf16[16,16], index: 12, kind: input, shape index: {}]   ;;  %s6017_s13 = inlined_call_operand.vmem [shape: f32[1,16], index: 13, kind: input, shape index: {}, may-alias: {3,6,13}]   ;;  %s6018_s14 = inlined_call_operand.vmem [shape: f32[1,16], index: 14, kind: input, shape index: {}, may-alias: {4,7,11,14}]   ;;  %s6019_s15 = inlined_call_operand.hbm [shape: f32[2,8,8,16], index: 15, kind: output, shape index: {}]  }
   0x1   :  { %v3942_v0 = vld [vmem:[%s6006_s2] sm:$0xff]   ;;  %v53_v2 = vld [vmem:[%s6004_s0 + $0x8] sm:$0xff]  ;;  %v54_v3 = vld [vmem:[%s6004_s0 + $0x10] sm:$0xff]  ;;  %3941 = vset.pattern.permute.xlu1 %v3986_v10  ;;  %3940 = vset.pattern.permute.xlu0 %v3986_v10 }
   0x2   :  { %v52_v1 = vld [vmem:[%s6004_s0] sm:$0xff]  ;;  %3697 = vmatprep.subr.bf16.mxu0 %v3942_v0  ;;  %v55_v5 = vld [vmem:[%s6004_s0 + $0x18] sm:$0xff]  ;;  %v57_v7 = vld [vmem:[%s6004_s0 + $0x28] sm:$0xff]  ;;  %3931 = vmatprep.subr.bf16.mxu1 %v3942_v0 }
   0x3   :  { %v92_v4 = vpack.c.bf16 %v53_v2, %v52_v1  ;;  %v56_v6 = vld [vmem:[%s6004_s0 + $0x20] sm:$0xff]  ;;  %3698 = vmatpush3.bf16.msra.mxu0 %v3942_v0  ;;  %v93_v8 = vpack.c.bf16 %v55_v5, %v54_v3  ;;  %3932 = vmatpush3.bf16.msra.mxu1 %v3942_v0  ;;  %v58_v11 = vld [vmem:[%s6004_s0 + $0x30] sm:$0xff]  ;;  %v59_v12 = vld [vmem:[%s6004_s0 + $0x38] sm:$0xff] }
   0x4   :  { %v94_v9 = vpack.c.bf16 %v57_v7, %v56_v6  ;;  %v60_v13 = vld [vmem:[%s6004_s0 + $0x40] sm:$0xff]  ;;  %v61_v14 = vld [vmem:[%s6004_s0 + $0x48] sm:$0xff]  ;;  %v95_v15 = vpack.c.bf16 %v59_v12, %v58_v11  ;;  %v86_v19 = vld [vmem:[%s6004_s0 + $0x110] sm:$0xff] }
   0x5   :  { %3699 = vmatprep.mubr.msk.bf16.mxu0 %vm120_vm0, %v92_v4  ;;  %v96_v16 = vpack.c.bf16 %v61_v14, %v60_v13  ;;  %v84_v17 = vld [vmem:[%s6004_s0 + $0x100] sm:$0xff]  ;;  %v85_v18 = vld [vmem:[%s6004_s0 + $0x108] sm:$0xff]  ;;  %v87_v20 = vld [vmem:[%s6004_s0 + $0x118] sm:$0xff] }
   0x6   :  { %3700 = vmatmul.mubr.msk.bf16.vlgmr.msra.gmra.mxu0 %vm120_vm0, %v93_v8  ;;  %v108_v21 = vpack.c.bf16 %v85_v18, %v84_v17  ;;  %v109_v22 = vpack.c.bf16 %v87_v20, %v86_v19  ;;  %v88_v23 = vld [vmem:[%s6004_s0 + $0x120] sm:$0xff]  ;;  %v89_v24 = vld [vmem:[%s6004_s0 + $0x128] sm:$0xff]  ;;  %v806_v26 = vld [vmem:[%s6005_s1 + $0x10] sm:$0xff] }
   0x7   :  { %3703 = vmatprep.mubr.msk.bf16.mxu0 %vm120_vm0, %v94_v9  ;;  %v110_v25 = vpack.c.bf16 %v89_v24, %v88_v23  ;;  %v804_v27 = vld [vmem:[%s6005_s1] sm:$0xff]  ;;  %v62_v28 = vld [vmem:[%s6004_s0 + $0x50] sm:$0xff]  ;;  %v63_v29 = vld [vmem:[%s6004_s0 + $0x58] sm:$0xff]  ;;  %856 = vperm.xlu1 %3941, %v806_v26  }
   0x8   :  { %3731 = vmatprep.mubr.msk.bf16.mxu1 %vm120_vm0, %v108_v21  ;;  %v64_v30 = vld [vmem:[%s6004_s0 + $0x60] sm:$0xff]  ;;  %v65_v31 = vld [vmem:[%s6004_s0 + $0x68] sm:$0xff]  ;;  %v90_v32 = vld [vmem:[%s6004_s0 + $0x130] sm:$0xff]  ;;  %846 = vperm.xlu0 %3940, %v804_v27   ;;  %v97_v35 = vpack.c.bf16 %v63_v29, %v62_v28 }
   0x9   :  { %3732 = vmatmul.mubr.msk.bf16.vlgmr.msra.gmra.mxu1 %vm120_vm0, %v109_v22  ;;  %v91_v33 = vld [vmem:[%s6004_s0 + $0x138] sm:$0xff]  ;;  %v805_v36 = vld [vmem:[%s6005_s1 + $0x8] sm:$0xff]  ;;  %v98_v37 = vpack.c.bf16 %v65_v31, %v64_v30  ;;  %v808_v40 = vld [vmem:[%s6005_s1 + $0x20] sm:$0xff] }
   0xa   :  { %3735 = vmatprep.mubr.msk.bf16.mxu1 %vm120_vm0, %v110_v25  ;;  %v807_v34 = vld [vmem:[%s6005_s1 + $0x18] sm:$0xff]  ;;  %v111_v38 = vpack.c.bf16 %v91_v33, %v90_v32  ;;  %v809_v39 = vld [vmem:[%s6005_s1 + $0x28] sm:$0xff]  ;;  %v66_v41 = vld [vmem:[%s6004_s0 + $0x70] sm:$0xff] }
   0xb   :  { %861 = vperm.xlu1 %3941, %v807_v34   ;;  %v67_v42 = vld [vmem:[%s6004_s0 + $0x78] sm:$0xff]  ;;  %v68_v43 = vld [vmem:[%s6004_s0 + $0x80] sm:$0xff]  ;;  %v69_v44 = vld [vmem:[%s6004_s0 + $0x88] sm:$0xff] }
   0xc   :  { %851 = vperm.xlu0 %3940, %v805_v36   ;;  %v811_v45 = vld [vmem:[%s6005_s1 + $0x38] sm:$0xff]  ;;  %v99_v46 = vpack.c.bf16 %v67_v42, %v66_v41  ;;  %v810_v47 = vld [vmem:[%s6005_s1 + $0x30] sm:$0xff]  ;;  %v100_v48 = vpack.c.bf16 %v69_v44, %v68_v43  ;;  %v813_v49 = vld [vmem:[%s6005_s1 + $0x48] sm:$0xff] }
   0xd   :  { %v812_v50 = vld [vmem:[%s6005_s1 + $0x40] sm:$0xff]  ;;  %v70_v51 = vld [vmem:[%s6004_s0 + $0x90] sm:$0xff]  ;;  %v71_v52 = vld [vmem:[%s6004_s0 + $0x98] sm:$0xff] }
   0xe   :  { %3704 = vmatmul.mubr.msk.bf16.gmra.mxu0 %vm120_vm0, %v95_v15  ;;  %v72_v53 = vld [vmem:[%s6004_s0 + $0xa0] sm:$0xff]  ;;  %v73_v54 = vld [vmem:[%s6004_s0 + $0xa8] sm:$0xff]  ;;  %v815_v55 = vld [vmem:[%s6005_s1 + $0x58] sm:$0xff]  ;;  %v101_v57 = vpack.c.bf16 %v71_v52, %v70_v51 }
   0xf   :  { %3707 = vmatprep.mubr.msk.bf16.mxu0 %vm120_vm0, %v96_v16  ;;  %871 = vperm.xlu1 %3941, %v809_v39   ;;  %v814_v56 = vld [vmem:[%s6005_s1 + $0x50] sm:$0xff]  ;;  %v102_v58 = vpack.c.bf16 %v73_v54, %v72_v53 }
  0x10   :  { %866 = vperm.xlu0 %3940, %v808_v40  }
  0x11   :  { %3736 = vmatmul.mubr.msk.bf16.gmra.mxu1 %vm120_vm0, %v111_v38 }
  0x13   :  { %881 = vperm.xlu1 %3941, %v811_v45  }
  0x14   :  { %876 = vperm.xlu0 %3940, %v810_v47  }
  0x16   :  { %3708 = vmatmul.mubr.msk.bf16.gmra.mxu0 %vm120_vm0, %v97_v35 }
  0x17   :  { %3711 = vmatprep.mubr.msk.bf16.mxu0 %vm120_vm0, %v98_v37  ;;  %891 = vperm.xlu1 %3941, %v813_v49  }
  0x18   :  { %886 = vperm.xlu0 %3940, %v812_v50  }
  0x1e   :  { %3712 = vmatmul.mubr.msk.bf16.gmra.mxu0 %vm120_vm0, %v99_v46 }
  0x1f   :  { %3715 = vmatprep.mubr.msk.bf16.mxu0 %vm120_vm0, %v100_v48 }
  0x20   :  { %20 = vsyncpa [#allocation4], 0  ;;  %901 = vperm.xlu1 %3941, %v815_v55   ;;  %896 = vperm.xlu0 %3940, %v814_v56   ;;  %v817_v59 = vld [vmem:[%s6005_s1 + $0x68] sm:$0xff]  ;;  %v816_v60 = vld [vmem:[%s6005_s1 + $0x60] sm:$0xff]  ;;  %vm3988_vm1 = vmmov 0   ;;  %vm2872_vm2 = vcmask 1041409  }
  0x21   :  { %v74_v61 = vld [vmem:[%s6004_s0 + $0xb0] sm:$0xff]  ;;  %v75_v62 = vld [vmem:[%s6004_s0 + $0xb8] sm:$0xff]  ;;  %v76_v63 = vld [vmem:[%s6004_s0 + $0xc0] sm:$0xff]  ;;  %vm2938_vm3 = vcmask 1041408   ;;  %vm2934_vm4 = vcmask 31744   ;;  %s3990_s16 = smov [#allocation3]  }
  0x22   :  { %v77_v0 = vld [vmem:[%s6004_s0 + $0xc8] sm:$0xff]  ;;  %v819_v1 = vld [vmem:[%s6005_s1 + $0x78] sm:$0xff]  ;;  %v103_v2 = vpack.c.bf16 %v75_v62, %v74_v61  ;;  %v818_v3 = vld [vmem:[%s6005_s1 + $0x70] sm:$0xff] }
  0x23   :  { %v104_v4 = vpack.c.bf16 %v77_v0, %v76_v63  ;;  %v825_v5 = vld [vmem:[%s6005_s1 + $0xa8] sm:$0xff]  ;;  %v824_v6 = vld [vmem:[%s6005_s1 + $0xa0] sm:$0xff]  ;;  %v78_v7 = vld [vmem:[%s6004_s0 + $0xd0] sm:$0xff] }
  0x24   :  { %911 = vperm.xlu1 %3941, %v817_v59   ;;  %906 = vperm.xlu0 %3940, %v816_v60   ;;  %v79_v8 = vld [vmem:[%s6004_s0 + $0xd8] sm:$0xff]  ;;  %v80_v9 = vld [vmem:[%s6004_s0 + $0xe0] sm:$0xff]  ;;  %v81_v10 = vld [vmem:[%s6004_s0 + $0xe8] sm:$0xff] }
  0x25   :  { %v827_v11 = vld [vmem:[%s6005_s1 + $0xb8] sm:$0xff]  ;;  %v105_v12 = vpack.c.bf16 %v79_v8, %v78_v7  ;;  %v826_v13 = vld [vmem:[%s6005_s1 + $0xb0] sm:$0xff]  ;;  %v106_v14 = vpack.c.bf16 %v81_v10, %v80_v9  ;;  %v829_v15 = vld [vmem:[%s6005_s1 + $0xc8] sm:$0xff] }
  0x26   :  { %3716 = vmatmul.mubr.msk.bf16.gmra.mxu0 %vm120_vm0, %v101_v57  ;;  %v828_v16 = vld [vmem:[%s6005_s1 + $0xc0] sm:$0xff]  ;;  %v82_v17 = vld [vmem:[%s6004_s0 + $0xf0] sm:$0xff]  ;;  %v83_v18 = vld [vmem:[%s6004_s0 + $0xf8] sm:$0xff] }
  0x27   :  { %3719 = vmatprep.mubr.msk.bf16.mxu0 %vm120_vm0, %v102_v58  ;;  %v831_v19 = vld [vmem:[%s6005_s1 + $0xd8] sm:$0xff]  ;;  %v107_v20 = vpack.c.bf16 %v83_v18, %v82_v17  ;;  %v830_v21 = vld [vmem:[%s6005_s1 + $0xd0] sm:$0xff]  ;;  %v833_v22 = vld [vmem:[%s6005_s1 + $0xe8] sm:$0xff] }
  0x28   :  { %921 = vperm.xlu1 %3941, %v819_v1   ;;  %916 = vperm.xlu0 %3940, %v818_v3   ;;  %v832_v23 = vld [vmem:[%s6005_s1 + $0xe0] sm:$0xff]  ;;  %v835_v24 = vld [vmem:[%s6005_s1 + $0xf8] sm:$0xff]  ;;  %v834_v25 = vld [vmem:[%s6005_s1 + $0xf0] sm:$0xff] }
  0x29   :  { %v837_v26 = vld [vmem:[%s6005_s1 + $0x108] sm:$0xff]  ;;  %v836_v27 = vld [vmem:[%s6005_s1 + $0x100] sm:$0xff]  ;;  %v839_v28 = vld [vmem:[%s6005_s1 + $0x118] sm:$0xff] }
  0x2a   :  { %v838_v29 = vld [vmem:[%s6005_s1 + $0x110] sm:$0xff]  ;;  %v821_v30 = vld [vmem:[%s6005_s1 + $0x88] sm:$0xff]  ;;  %v820_v31 = vld [vmem:[%s6005_s1 + $0x80] sm:$0xff] }
  0x2b   :  { %v841_v32 = vld [vmem:[%s6005_s1 + $0x128] sm:$0xff]  ;;  %v840_v33 = vld [vmem:[%s6005_s1 + $0x120] sm:$0xff]  ;;  %v842_v34 = vld [vmem:[%s6005_s1 + $0x130] sm:$0xff] }
  0x2c   :  { %951 = vperm.xlu1 %3941, %v825_v5   ;;  %946 = vperm.xlu0 %3940, %v824_v6   ;;  %v822_v35 = vld [vmem:[%s6005_s1 + $0x90] sm:$0xff]  ;;  %v843_v36 = vld [vmem:[%s6005_s1 + $0x138] sm:$0xff] }
  0x2d   :  { %v823_v37 = vld [vmem:[%s6005_s1 + $0x98] sm:$0xff] }
  0x2e   :  { %3720 = vmatmul.mubr.msk.bf16.gmra.mxu0 %vm120_vm0, %v103_v2 }
  0x2f   :  { %3723 = vmatprep.mubr.msk.bf16.mxu0 %vm120_vm0, %v104_v4 }
  0x30   :  { %961 = vperm.xlu1 %3941, %v827_v11   ;;  %956 = vperm.xlu0 %3940, %v826_v13  }
  0x34   :  { %971 = vperm.xlu1 %3941, %v829_v15   ;;  %966 = vperm.xlu0 %3940, %v828_v16  }
  0x36   :  { %3724 = vmatmul.mubr.msk.bf16.gmra.mxu0 %vm120_vm0, %v105_v12 }
  0x37   :  { %3727 = vmatprep.mubr.msk.bf16.mxu0 %vm120_vm0, %v106_v14 }
  0x38   :  { %981 = vperm.xlu1 %3941, %v831_v19   ;;  %976 = vperm.xlu0 %3940, %v830_v21  }
  0x3c   :  { %991 = vperm.xlu1 %3941, %v833_v22   ;;  %986 = vperm.xlu0 %3940, %v832_v23  }
  0x3e   :  { %3728 = vmatmul.mubr.msk.bf16.gmra.mxu0 %vm120_vm0, %v107_v20 }
  0x40   :  { %1001 = vperm.xlu1 %3941, %v835_v24   ;;  %996 = vperm.xlu0 %3940, %v834_v25  }
  0x44   :  { %1011 = vperm.xlu1 %3941, %v837_v26   ;;  %1006 = vperm.xlu0 %3940, %v836_v27  }
  0x48   :  { %1021 = vperm.xlu1 %3941, %v839_v28   ;;  %1016 = vperm.xlu0 %3940, %v838_v29  }
  0x4c   :  { %931 = vperm.xlu1 %3941, %v821_v30   ;;  %926 = vperm.xlu0 %3940, %v820_v31  }
  0x50   :  { %1031 = vperm.xlu1 %3941, %v841_v32   ;;  %1026 = vperm.xlu0 %3940, %v840_v33  }
  0x54   :  { %1036 = vperm.xlu1 %3941, %v842_v34   ;;  %936 = vperm.xlu0 %3940, %v822_v35  }
  0x58   :  { %1041 = vperm.xlu1 %3941, %v843_v36   ;;  %941 = vperm.xlu0 %3940, %v823_v37  }
  0xc6   :  { %v4336_v38 = vpop.f32.mrf.mxu0 }
  0xc7   :  { %v464_v43 = vmul.f32 %v4336_v38, %v4336_v38  ;;  %v379_v49 = vsel %vm120_vm0, %v4336_v38, 0.0 }
  0xc8   :  { %v4338_v39 = vpop.f32.mrf.mxu0 }
  0xc9   :  { %v462_v41 = vmul.f32 %v4338_v39, %v4338_v39  ;;  %v376_v44 = vsel %vm120_vm0, %v4338_v39, 0.0  ;;  %v505_v56 = vsel %vm120_vm0, %v464_v43, 0.0 }
  0xca   :  { %v4340_v40 = vpop.f32.mrf.mxu0 }
  0xcb   :  { %v502_v50 = vsel %vm120_vm0, %v462_v41, 0.0  ;;  %v465_v51 = vmul.f32 %v4340_v40, %v4340_v40  ;;  %v381_v57 = vsel %vm120_vm0, %v4340_v40, 0.0 }
  0xcc   :  { %v4344_v42 = vpop.f32.mrf.mxu0 }
  0xcd   :  { %v377_v45 = vsel %vm120_vm0, %v4344_v42, 0.0  ;;  %v463_v46 = vmul.f32 %v4344_v42, %v4344_v42  ;;  %v507_v62 = vsel %vm120_vm0, %v465_v51, 0.0 }
  0xce   :  { %v378_v47 = vadd.f32 %v377_v45, %v376_v44  ;;  %v4354_v48 = vpop.f32.mrf.mxu0 }
  0xcf   :  { %v503_v52 = vsel %vm120_vm0, %v463_v46, 0.0  ;;  %v468_v3 = vmul.f32 %v4354_v48, %v4354_v48  ;;  %v387_v10 = vsel %vm120_vm0, %v4354_v48, 0.0 }
  0xd0   :  { %v380_v53 = vadd.f32 %v379_v49, %v378_v47  ;;  %v504_v54 = vadd.f32 %v503_v52, %v502_v50  ;;  %v4362_v55 = vpop.f32.mrf.mxu0 }
  0xd1   :  { %v466_v58 = vmul.f32 %v4362_v55, %v4362_v55  ;;  %v383_v63 = vsel %vm120_vm0, %v4362_v55, 0.0  ;;  %v513_v16 = vsel %vm120_vm0, %v468_v3, 0.0 }
  0xd2   :  { %v506_v59 = vadd.f32 %v505_v56, %v504_v54  ;;  %v382_v60 = vadd.f32 %v381_v57, %v380_v53  ;;  %v4369_v61 = vpop.f32.mrf.mxu0 }
  0xd3   :  { %v509_v4 = vsel %vm120_vm0, %v466_v58, 0.0  ;;  %v469_v11 = vmul.f32 %v4369_v61, %v4369_v61  ;;  %v389_v17 = vsel %vm120_vm0, %v4369_v61, 0.0 }
  0xd4   :  { %v384_v0 = vadd.f32 %v383_v63, %v382_v60  ;;  %v508_v1 = vadd.f32 %v507_v62, %v506_v59  ;;  %v4374_v2 = vpop.f32.mrf.mxu0 }
  0xd5   :  { %v385_v5 = vsel %vm120_vm0, %v4374_v2, 0.0  ;;  %v467_v6 = vmul.f32 %v4374_v2, %v4374_v2  ;;  %v515_v22 = vsel %vm120_vm0, %v469_v11, 0.0 }
  0xd6   :  { %v510_v7 = vadd.f32 %v509_v4, %v508_v1  ;;  %v386_v8 = vadd.f32 %v385_v5, %v384_v0  ;;  %v4383_v9 = vpop.f32.mrf.mxu0 }
  0xd7   :  { %v511_v12 = vsel %vm120_vm0, %v467_v6, 0.0  ;;  %v472_v27 = vmul.f32 %v4383_v9, %v4383_v9  ;;  %v395_v34 = vsel %vm120_vm0, %v4383_v9, 0.0 }
  0xd8   :  { %v388_v13 = vadd.f32 %v387_v10, %v386_v8  ;;  %v512_v14 = vadd.f32 %v511_v12, %v510_v7  ;;  %v4390_v15 = vpop.f32.mrf.mxu0 }
  0xd9   :  { %v470_v18 = vmul.f32 %v4390_v15, %v4390_v15  ;;  %v391_v23 = vsel %vm120_vm0, %v4390_v15, 0.0  ;;  %v521_v44 = vsel %vm120_vm0, %v472_v27, 0.0 }
  0xda   :  { %v514_v19 = vadd.f32 %v513_v16, %v512_v14  ;;  %v390_v20 = vadd.f32 %v389_v17, %v388_v13  ;;  %v4397_v21 = vpop.f32.mrf.mxu0  ;;  %v4455_v16 = vpop.permute.xlu1 %856 }
  0xdb   :  { %v517_v28 = vsel %vm120_vm0, %v470_v18, 0.0  ;;  %v473_v35 = vmul.f32 %v4397_v21, %v4397_v21  ;;  %v397_v45 = vsel %vm120_vm0, %v4397_v21, 0.0 }
  0xdc   :  { %v392_v24 = vadd.f32 %v391_v23, %v390_v20  ;;  %v516_v25 = vadd.f32 %v515_v22, %v514_v19  ;;  %v4402_v26 = vpop.f32.mrf.mxu0 }
  0xdd   :  { %v393_v29 = vsel %vm120_vm0, %v4402_v26, 0.0  ;;  %v471_v30 = vmul.f32 %v4402_v26, %v4402_v26  ;;  %v523_v51 = vsel %vm120_vm0, %v473_v35, 0.0 }
  0xde   :  { %v518_v31 = vadd.f32 %v517_v28, %v516_v25  ;;  %v394_v32 = vadd.f32 %v393_v29, %v392_v24  ;;  %v4411_v33 = vpop.f32.mrf.mxu0 }
  0xdf   :  { %v519_v36 = vsel %vm120_vm0, %v471_v30, 0.0  ;;  %v476_v57 = vmul.f32 %v4411_v33, %v4411_v33  ;;  %v403_v1 = vsel %vm120_vm0, %v4411_v33, 0.0 }
  0xe0   :  { %v396_v37 = vadd.f32 %v395_v34, %v394_v32  ;;  %v520_v41 = vadd.f32 %v519_v36, %v518_v31  ;;  %v4418_v43 = vpop.f32.mrf.mxu0 }
  0xe1   :  { %v474_v46 = vmul.f32 %v4418_v43, %v4418_v43  ;;  %v399_v52 = vsel %vm120_vm0, %v4418_v43, 0.0  ;;  %v529_v8 = vsel %vm120_vm0, %v476_v57, 0.0 }
  0xe2   :  { %v522_v47 = vadd.f32 %v521_v44, %v520_v41  ;;  %v398_v49 = vadd.f32 %v397_v45, %v396_v37  ;;  %v4425_v50 = vpop.f32.mrf.mxu0  ;;  %v4478_v41 = vpop.permute.xlu1 %861 }
  0xe3   :  { %v525_v58 = vsel %vm120_vm0, %v474_v46, 0.0  ;;  %v477_v3 = vmul.f32 %v4425_v50, %v4425_v50  ;;  %v405_v10 = vsel %vm120_vm0, %v4425_v50, 0.0  ;;  %6022 = vst [vmem:[#allocation6_spill] sm:$0xff] %v4478_v41 }
  0xe4   :  { %v400_v53 = vadd.f32 %v399_v52, %v398_v49  ;;  %v524_v54 = vadd.f32 %v523_v51, %v522_v47  ;;  %v4430_v56 = vpop.f32.mrf.mxu0 }
  0xe5   :  { %v401_v59 = vsel %vm120_vm0, %v4430_v56, 0.0  ;;  %v475_v60 = vmul.f32 %v4430_v56, %v4430_v56  ;;  %v531_v17 = vsel %vm120_vm0, %v477_v3, 0.0 }
  0xe6   :  { %v526_v62 = vadd.f32 %v525_v58, %v524_v54  ;;  %v402_v63 = vadd.f32 %v401_v59, %v400_v53  ;;  %v4439_v0 = vpop.f32.mrf.mxu0  ;;  %v4492_v59 = vpop.f32.mrf.mxu1 }
  0xe7   :  { %v527_v4 = vsel %vm120_vm0, %v475_v60, 0.0  ;;  %v480_v23 = vmul.f32 %v4439_v0, %v4439_v0  ;;  %v411_v31 = vsel %vm120_vm0, %v4439_v0, 0.0  ;;  %v3943_v60 = vld [vmem:[%s6009_s5 + $0x8] sm:$0xff]  }
  0xe8   :  { %v404_v5 = vadd.f32 %v403_v1, %v402_v63  ;;  %v528_v6 = vadd.f32 %v527_v4, %v526_v62  ;;  %v4446_v7 = vpop.f32.mrf.mxu0  ;;  %v3944_v62 = vld [vmem:[%s6009_s5 + $0x18] sm:$0xff]   ;;  %v4503_v63 = vld [vmem:[%s6009_s5] sm:$0xff]   ;;  %v4505_v1 = vpop.permute.xlu0 %846  ;;  %3739 = vmatprep.subr.bf16.mxu1 %v3943_v60 }
  0xe9   :  { %v478_v11 = vmul.f32 %v4446_v7, %v4446_v7  ;;  %v407_v18 = vsel %vm120_vm0, %v4446_v7, 0.0  ;;  %v537_v44 = vsel %vm120_vm0, %v480_v23, 0.0  ;;  %6023 = vst [vmem:[#allocation7_spill] sm:$0xff] %v4503_v63  ;;  %3793 = vmatprep.subr.bf16.mxu0 %v3944_v62  ;;  %3740 = vmatpush3.bf16.msra.mxu1 %v3943_v60 }
  0xea   :  { %v530_v12 = vadd.f32 %v529_v8, %v528_v6  ;;  %v406_v13 = vadd.f32 %v405_v10, %v404_v5  ;;  %v4453_v14 = vpop.f32.mrf.mxu0  ;;  %3794 = vmatpush3.bf16.msra.mxu0 %v3944_v62  ;;  %3757 = vmatprep.subr.bf16.mxu1 %v4503_v63 }
  0xeb   :  { %v533_v24 = vsel %vm120_vm0, %v478_v11, 0.0  ;;  %v481_v32 = vmul.f32 %v4453_v14, %v4453_v14  ;;  %v413_v45 = vsel %vm120_vm0, %v4453_v14, 0.0 }
  0xec   :  { %v408_v19 = vadd.f32 %v407_v18, %v406_v13  ;;  %v532_v20 = vadd.f32 %v531_v17, %v530_v12  ;;  %v4460_v22 = vpop.f32.mrf.mxu0  ;;  %v4516_v12 = vpop.permute.xlu1 %871 }
  0xed   :  { %v409_v25 = vsel %vm120_vm0, %v4460_v22, 0.0  ;;  %v479_v27 = vmul.f32 %v4460_v22, %v4460_v22  ;;  %v539_v52 = vsel %vm120_vm0, %v481_v32, 0.0  ;;  %6024 = vst [vmem:[#allocation8_spill] sm:$0xff] %v4516_v12 }
  0xee   :  { %v534_v28 = vadd.f32 %v533_v24, %v532_v20  ;;  %v410_v29 = vadd.f32 %v409_v25, %v408_v19  ;;  %v4469_v30 = vpop.f32.mrf.mxu0  ;;  %v4525_v24 = vpop.f32.mrf.mxu1 }
  0xef   :  { %v535_v34 = vsel %vm120_vm0, %v479_v27, 0.0  ;;  %v484_v3 = vmul.f32 %v4469_v30, %v4469_v30  ;;  %v419_v13 = vsel %vm120_vm0, %v4469_v30, 0.0 }
  0xf0   :  { %v412_v35 = vadd.f32 %v411_v31, %v410_v29  ;;  %v536_v36 = vadd.f32 %v535_v34, %v534_v28  ;;  %v4476_v37 = vpop.f32.mrf.mxu0  ;;  %v4535_v34 = vpop.permute.xlu0 %851 }
  0xf1   :  { %v482_v46 = vmul.f32 %v4476_v37, %v4476_v37  ;;  %v415_v53 = vsel %vm120_vm0, %v4476_v37, 0.0  ;;  %v545_v25 = vsel %vm120_vm0, %v484_v3, 0.0 }
  0xf2   :  { %v538_v47 = vadd.f32 %v537_v44, %v536_v36  ;;  %v414_v49 = vadd.f32 %v413_v45, %v412_v35  ;;  %v4485_v51 = vpop.f32.mrf.mxu0 }
  0xf3   :  { %v541_v4 = vsel %vm120_vm0, %v482_v46, 0.0  ;;  %v485_v17 = vmul.f32 %v4485_v51, %v4485_v51  ;;  %v421_v27 = vsel %vm120_vm0, %v4485_v51, 0.0 }
  0xf4   :  { %v416_v54 = vadd.f32 %v415_v53, %v414_v49  ;;  %v540_v57 = vadd.f32 %v539_v52, %v538_v47  ;;  %v4490_v58 = vpop.f32.mrf.mxu0  ;;  %v4542_v47 = vpop.f32.mrf.mxu1 }
  0xf5   :  { %v417_v5 = vsel %vm120_vm0, %v4490_v58, 0.0  ;;  %v483_v6 = vmul.f32 %v4490_v58, %v4490_v58  ;;  %v547_v35 = vsel %vm120_vm0, %v485_v17, 0.0  ;;  %v4544_v49 = vpop.permute.xlu1 %881 }
  0xf6   :  { %v542_v8 = vadd.f32 %v541_v4, %v540_v57  ;;  %v418_v10 = vadd.f32 %v417_v5, %v416_v54  ;;  %v4514_v11 = vpop.f32.mrf.mxu0  ;;  %6025 = vst [vmem:[#allocation9_spill] sm:$0xff] %v4544_v49  ;;  %v4562_v17 = vpop.f32.mrf.mxu1 }
  0xf7   :  { %v543_v18 = vsel %vm120_vm0, %v483_v6, 0.0  ;;  %v488_v52 = vmul.f32 %v4514_v11, %v4514_v11  ;;  %v427_v4 = vsel %vm120_vm0, %v4514_v11, 0.0 }
  0xf8   :  { %v420_v19 = vadd.f32 %v419_v13, %v418_v10  ;;  %v544_v20 = vadd.f32 %v543_v18, %v542_v8  ;;  %v4523_v23 = vpop.f32.mrf.mxu0  ;;  %v4564_v18 = vpop.permute.xlu0 %866 }
  0xf9   :  { %v486_v28 = vmul.f32 %v4523_v23, %v4523_v23  ;;  %v423_v36 = vsel %vm120_vm0, %v4523_v23, 0.0  ;;  %6026 = vst [vmem:[#allocation10_spill] sm:$0xff] %v4564_v18 }
  0xfa   :  { %v546_v29 = vadd.f32 %v545_v25, %v544_v20  ;;  %v422_v31 = vadd.f32 %v421_v27, %v420_v19  ;;  %v4533_v32 = vpop.f32.mrf.mxu0  ;;  %v553_v19 = vsel %vm120_vm0, %v488_v52, 0.0 }
  0xfb   :  { %v549_v53 = vsel %vm120_vm0, %v486_v28, 0.0  ;;  %v489_v5 = vmul.f32 %v4533_v32, %v4533_v32  ;;  %v429_v20 = vsel %vm120_vm0, %v4533_v32, 0.0 }
  0xfc   :  { %v424_v44 = vadd.f32 %v423_v36, %v422_v31  ;;  %v548_v45 = vadd.f32 %v547_v35, %v546_v29  ;;  %v4540_v46 = vpop.f32.mrf.mxu0  ;;  %v4573_v31 = vpop.permute.xlu1 %891 }
  0xfd   :  { %v425_v54 = vsel %vm120_vm0, %v4540_v46, 0.0  ;;  %v487_v57 = vmul.f32 %v4540_v46, %v4540_v46  ;;  %6027 = vst [vmem:[#allocation11_spill] sm:$0xff] %v4573_v31  ;;  %v555_v35 = vsel %vm120_vm0, %v489_v5, 0.0 }
  0xfe   :  { %v550_v60 = vadd.f32 %v549_v53, %v548_v45  ;;  %v426_v62 = vadd.f32 %v425_v54, %v424_v44  ;;  %v4553_v3 = vpop.f32.mrf.mxu0  ;;  %v4580_v53 = vpop.f32.mrf.mxu1 }
  0xff   :  { %v551_v6 = vsel %vm120_vm0, %v487_v57, 0.0  ;;  %v492_v54 = vmul.f32 %v4553_v3, %v4553_v3 }
 0x100   :  { %v428_v8 = vadd.f32 %v427_v4, %v426_v62  ;;  %v552_v10 = vadd.f32 %v551_v6, %v550_v60  ;;  %v4560_v13 = vpop.f32.mrf.mxu0  ;;  %v4589_v6 = vpop.permute.xlu0 %876 }
 0x101   :  { %v490_v25 = vmul.f32 %v4560_v13, %v4560_v13  ;;  %v431_v36 = vsel %vm120_vm0, %v4560_v13, 0.0  ;;  %6028 = vst [vmem:[#allocation12_spill] sm:$0xff] %v4589_v6 }
 0x102   :  { %v554_v27 = vadd.f32 %v553_v19, %v552_v10  ;;  %v430_v28 = vadd.f32 %v429_v20, %v428_v8  ;;  %v4571_v29 = vpop.f32.mrf.mxu0  ;;  %v435_v8 = vsel %vm120_vm0, %v4553_v3, 0.0 }
 0x103   :  { %v557_v57 = vsel %vm120_vm0, %v490_v25, 0.0  ;;  %v493_v10 = vmul.f32 %v4571_v29, %v4571_v29 }
 0x104   :  { %v432_v44 = vadd.f32 %v431_v36, %v430_v28  ;;  %v556_v45 = vadd.f32 %v555_v35, %v554_v27  ;;  %v4578_v52 = vpop.f32.mrf.mxu0  ;;  %v4596_v27 = vpop.f32.mrf.mxu1  ;;  %v561_v35 = vsel %vm120_vm0, %v492_v54, 0.0  ;;  %v437_v36 = vsel %vm120_vm0, %v4571_v29, 0.0  ;;  %v4613_v54 = vld [vmem:[%s6009_s5 + $0x28] sm:$0xff]  }
 0x105   :  { %v433_v60 = vsel %vm120_vm0, %v4578_v52, 0.0  ;;  %v491_v62 = vmul.f32 %v4578_v52, %v4578_v52  ;;  %v4598_v28 = vpop.permute.xlu1 %901  ;;  %6030 = vst [vmem:[#allocation14_spill] sm:$0xff] %v4613_v54  ;;  %v4617_v63 = vpop.permute.xlu0 %886  ;;  %3829 = vmatprep.subr.bf16.mxu0 %v4613_v54 }
 0x106   :  { %v558_v4 = vadd.f32 %v557_v57, %v556_v45  ;;  %v434_v5 = vadd.f32 %v433_v60, %v432_v44  ;;  %6029 = vst [vmem:[#allocation13_spill] sm:$0xff] %v4598_v28  ;;  %v494_v44 = vmul.f32 %v4525_v24, %v4525_v24  ;;  %v563_v60 = vsel %vm120_vm0, %v493_v10, 0.0  ;;  %6031 = vst [vmem:[#allocation15_spill] sm:$0xff] %v4617_v63 }
 0x107   :  { %v559_v19 = vsel %vm120_vm0, %v491_v62, 0.0  ;;  %v439_v62 = vsel %vm120_vm0, %v4525_v24, 0.0  ;;  %v496_v10 = vmul.f32 %v4492_v59, %v4492_v59 }
 0x108   :  { %v436_v20 = vadd.f32 %v435_v8, %v434_v5  ;;  %v560_v25 = vadd.f32 %v559_v19, %v558_v4  ;;  %v495_v4 = vmul.f32 %v4562_v17, %v4562_v17  ;;  %v4615_v19 = vpop.f32.mrf.mxu1 }
 0x109   :  { %v4625_v28 = vpop.permute.xlu1 %911  ;;  %v569_v63 = vsel %vm120_vm0, %v496_v10, 0.0  ;;  %v4639_v54 = vpop.permute.xlu0 %896 }
 0x10a   :  { %v562_v45 = vadd.f32 %v561_v35, %v560_v25  ;;  %v438_v57 = vadd.f32 %v437_v36, %v436_v20  ;;  %v565_v20 = vsel %vm120_vm0, %v494_v44, 0.0  ;;  %v441_v25 = vsel %vm120_vm0, %v4562_v17, 0.0  ;;  %6032 = vst [vmem:[#allocation16_spill] sm:$0xff] %v4625_v28  ;;  %v4632_v44 = vpop.f32.mrf.mxu1  ;;  %6033 = vst [vmem:[#allocation17_spill] sm:$0xff] %v4639_v54 }
 0x10b   :  { %v501_v54 = vmul.f32 %v4615_v19, %v4615_v19 }
 0x10c   :  { %v440_v5 = vadd.f32 %v439_v62, %v438_v57  ;;  %v564_v8 = vadd.f32 %v563_v60, %v562_v45  ;;  %v443_v45 = vsel %vm120_vm0, %v4492_v59, 0.0  ;;  %v497_v57 = vmul.f32 %v4542_v47, %v4542_v47 }
 0x10d   :  { %v567_v60 = vsel %vm120_vm0, %v495_v4, 0.0  ;;  %v447_v4 = vsel %vm120_vm0, %v4596_v27, 0.0 }
 0x10e   :  { %v442_v35 = vadd.f32 %v441_v25, %v440_v5  ;;  %v566_v36 = vadd.f32 %v565_v20, %v564_v8  ;;  %v445_v5 = vsel %vm120_vm0, %v4542_v47, 0.0  ;;  %v498_v8 = vmul.f32 %v4596_v27, %v4596_v27 }
 0x10f   :  { %v571_v28 = vsel %vm120_vm0, %v497_v57, 0.0 }
 0x110   :  { %v444_v62 = vadd.f32 %v443_v45, %v442_v35  ;;  %v568_v31 = vadd.f32 %v567_v60, %v566_v36  ;;  %v499_v35 = vmul.f32 %v4632_v44, %v4632_v44  ;;  %v4646_v45 = vpop.permute.xlu1 %921  ;;  %v500_v60 = vmul.f32 %v4580_v53, %v4580_v53 }
 0x111   :  { %6034 = vst [vmem:[#allocation18_spill] sm:$0xff] %v4646_v45 }
 0x112   :  { %v570_v20 = vadd.f32 %v569_v63, %v568_v31  ;;  %v446_v25 = vadd.f32 %v445_v5, %v444_v62  ;;  %v573_v63 = vsel %vm120_vm0, %v498_v8, 0.0  ;;  %v449_v31 = vsel %vm120_vm0, %v4632_v44, 0.0 }
 0x113   :  { %v451_v5 = vsel %vm120_vm0, %v4580_v53, 0.0  ;;  %v577_v45 = vsel %vm120_vm0, %v500_v60, 0.0  ;;  %v453_v8 = vsel %vm120_vm0, %v4615_v19, 0.0 }
 0x114   :  { %v448_v36 = vadd.f32 %v447_v4, %v446_v25  ;;  %v572_v10 = vadd.f32 %v571_v28, %v570_v20  ;;  %v575_v28 = vsel %vm120_vm0, %v499_v35, 0.0  ;;  %v4658_v4 = vpop.permute.xlu0 %906 }
 0x115   :  { %6035 = vst [vmem:[#allocation19_spill] sm:$0xff] %v4658_v4 }
 0x116   :  { %v574_v62 = vadd.f32 %v573_v63, %v572_v10  ;;  %v450_v57 = vadd.f32 %v449_v31, %v448_v36  ;;  %v4663_v36 = vpop.permute.xlu1 %951  ;;  %v579_v63 = vsel %vm120_vm0, %v501_v54, 0.0 }
 0x117   :  { %6036 = vst [vmem:[#allocation20_spill] sm:$0xff] %v4663_v36 }
 0x118   :  { %v452_v20 = vadd.f32 %v451_v5, %v450_v57  ;;  %v576_v25 = vadd.f32 %v575_v28, %v574_v62  ;;  %v4666_v35 = vpop.permute.xlu0 %916 }
 0x119   :  { %6037 = vst [vmem:[#allocation21_spill] sm:$0xff] %v4666_v35 }
 0x11a   :  { %v454_v49 = vadd.f32 %v453_v8, %v452_v20  ;;  %v578_v10 = vadd.f32 %v577_v45, %v576_v25  ;;  %v4668_v5 = vpop.permute.xlu1 %961 }
 0x11b   :  { %6038 = vst [vmem:[#allocation22_spill] sm:$0xff] %v4668_v5 }
 0x11c   :  { %v455_v31 = vrot.slane %v454_v49, 4  ;;  %v580_v6 = vadd.f32 %v579_v63, %v578_v10  ;;  %v4670_v20 = vpop.permute.xlu0 %946 }
 0x11d   :  { %6039 = vst [vmem:[#allocation23_spill] sm:$0xff] %v4670_v20 }
 0x11e   :  { %v456_v12 = vadd.f32 %v455_v31, %v454_v49  ;;  %v581_v18 = vrot.slane %v580_v6, 4  ;;  %v4672_v8 = vpop.permute.xlu1 %971 }
 0x11f   :  { %6040 = vst [vmem:[#allocation24_spill] sm:$0xff] %v4672_v8 }
 0x120   :  { %v457_v62 = vrot.slane %v456_v12, 2  ;;  %v582_v57 = vadd.f32 %v581_v18, %v580_v6  ;;  %v4678_v18 = vpop.permute.xlu0 %956 }
 0x121   :  { %6041 = vst [vmem:[#allocation25_spill] sm:$0xff] %v4678_v18 }
 0x122   :  { %v458_v60 = vadd.f32 %v457_v62, %v456_v12  ;;  %v583_v28 = vrot.slane %v582_v57, 2  ;;  %v4680_v12 = vpop.permute.xlu1 %981 }
 0x123   :  { %6042 = vst [vmem:[#allocation26_spill] sm:$0xff] %v4680_v12 }
 0x124   :  { %v459_v4 = vrot.slane %v458_v60, 1  ;;  %v584_v41 = vadd.f32 %v583_v28, %v582_v57  ;;  %v4682_v62 = vpop.permute.xlu0 %966 }
 0x125   :  { %6043 = vst [vmem:[#allocation27_spill] sm:$0xff] %v4682_v62 }
 0x126   :  { %v460_v45 = vadd.f32 %v459_v4, %v458_v60  ;;  %v585_v25 = vrot.slane %v584_v41, 1  ;;  %v4684_v4 = vpop.permute.xlu1 %991 }
 0x127   :  { %6044 = vst [vmem:[#allocation28_spill] sm:$0xff] %v4684_v4 }
 0x128   :  { %v4674_v54 = vmul.f32 0.0078125, %v460_v45  ;;  %v586_v49 = vadd.f32 %v585_v25, %v584_v41 }
 0x12a   :  { %v587_v10 = vmul.f32 0.0078125, %v586_v49  ;;  %v588_v63 = vmul.f32 %v4674_v54, %v4674_v54  ;;  %v627_v57 = vsub.f32 %v4632_v44, %v4674_v54  ;;  %v590_v41 = vsub.f32 %v4338_v39, %v4674_v54 }
 0x12b   :  { %v591_v60 = vsub.f32 %v4344_v42, %v4674_v54  ;;  %v592_v28 = vsub.f32 %v4336_v38, %v4674_v54  ;;  %v593_v45 = vsub.f32 %v4340_v40, %v4674_v54  ;;  %v594_v25 = vsub.f32 %v4362_v55, %v4674_v54 }
 0x12c   :  { %v589_v6 = vsub.f32 %v587_v10, %v588_v63  ;;  %v595_v49 = vsub.f32 %v4374_v2, %v4674_v54  ;;  %v596_v44 = vsub.f32 %v4354_v48, %v4674_v54  ;;  %v597_v39 = vsub.f32 %v4369_v61, %v4674_v54  ;;  %v4710_v10 = vpop.permute.xlu0 %976  ;;  %v4728_v63 = vpop.permute.xlu1 %1001 }
 0x12d   :  { %v598_v42 = vsub.f32 %v4390_v15, %v4674_v54  ;;  %v599_v38 = vsub.f32 %v4402_v26, %v4674_v54  ;;  %v600_v40 = vsub.f32 %v4383_v9, %v4674_v54  ;;  %6045 = vst [vmem:[#allocation29_spill] sm:$0xff] %v4710_v10  ;;  %v601_v55 = vsub.f32 %v4397_v21, %v4674_v54 }
 0x12e   :  { %v630_v31 = vadd.f32 1e-05, %v589_v6  ;;  %v602_v48 = vsub.f32 %v4418_v43, %v4674_v54  ;;  %v603_v61 = vsub.f32 %v4430_v56, %v4674_v54  ;;  %v604_v2 = vsub.f32 %v4411_v33, %v4674_v54  ;;  %6046 = vst [vmem:[#allocation30_spill] sm:$0xff] %v4728_v63 }
 0x12f   :  { %v605_v15 = vsub.f32 %v4425_v50, %v4674_v54  ;;  %v606_v9 = vsub.f32 %v4446_v7, %v4674_v54  ;;  %v607_v26 = vsub.f32 %v4460_v22, %v4674_v54  ;;  %v608_v21 = vsub.f32 %v4439_v0, %v4674_v54 }
 0x130   :  { %3954 = vrsqrt.f32 %v630_v31  ;;  %v609_v43 = vsub.f32 %v4453_v14, %v4674_v54  ;;  %v610_v33 = vsub.f32 %v4476_v37, %v4674_v54  ;;  %v611_v50 = vsub.f32 %v4490_v58, %v4674_v54 }
 0x131   :  { %v612_v56 = vsub.f32 %v4469_v30, %v4674_v54  ;;  %v613_v7 = vsub.f32 %v4485_v51, %v4674_v54  ;;  %v614_v0 = vsub.f32 %v4523_v23, %v4674_v54  ;;  %v615_v22 = vsub.f32 %v4540_v46, %v4674_v54 }
 0x132   :  { %v616_v14 = vsub.f32 %v4514_v11, %v4674_v54  ;;  %v617_v37 = vsub.f32 %v4533_v32, %v4674_v54  ;;  %v618_v58 = vsub.f32 %v4560_v13, %v4674_v54  ;;  %v619_v30 = vsub.f32 %v4578_v52, %v4674_v54  ;;  %v4765_v13 = vld [vmem:[%s6007_s3] ss:$0 sm:$0xff]  ;;  %v4767_v52 = vpop.permute.xlu0 %986 }
 0x133   :  { %v620_v51 = vsub.f32 %v4553_v3, %v4674_v54  ;;  %v621_v23 = vsub.f32 %v4571_v29, %v4674_v54  ;;  %v622_v46 = vsub.f32 %v4525_v24, %v4674_v54  ;;  %v623_v11 = vsub.f32 %v4562_v17, %v4674_v54  ;;  %6047 = vst [vmem:[#allocation31_spill] sm:$0xff] %v4767_v52  ;;  %v4782_v52 = vld [vmem:[%s6008_s4] ss:$0 sm:$0xff] }
 0x134   :  { %v625_v32 = vsub.f32 %v4542_v47, %v4674_v54  ;;  %v624_v3 = vsub.f32 %v4492_v59, %v4674_v54  ;;  %v626_v24 = vsub.f32 %v4596_v27, %v4674_v54  ;;  %v628_v17 = vsub.f32 %v4580_v53, %v4674_v54  ;;  %v4784_v59 = vpop.permute.xlu1 %1011 }
 0x135   :  { %v629_v47 = vsub.f32 %v4615_v19, %v4674_v54  ;;  %6048 = vst [vmem:[#allocation32_spill] sm:$0xff] %v4784_v59 }
 0x136   :  { %v4788_v35 = vpop.permute.xlu0 %996 }
 0x137   :  { %6049 = vst [vmem:[#allocation33_spill] sm:$0xff] %v4788_v35 }
 0x13d   :  { %v3955_v6 = vpop.eup %3954 }
 0x13e   :  { %v4777_v29 = vmul.f32 %v3955_v6, %v627_v57  ;;  %v667_v31 = vmul.f32 %v3955_v6, %v625_v32  ;;  %v632_v63 = vmul.f32 %v3955_v6, %v590_v41  ;;  %v633_v4 = vmul.f32 %v3955_v6, %v591_v60 }
 0x13f   :  { %v634_v12 = vmul.f32 %v3955_v6, %v592_v28  ;;  %v635_v27 = vmul.f32 %v3955_v6, %v593_v45  ;;  %v636_v10 = vmul.f32 %v3955_v6, %v594_v25  ;;  %v637_v8 = vmul.f32 %v3955_v6, %v595_v49 }
 0x140   :  { %v713_v53 = vmul.f32 %v4765_v13, %v667_v31  ;;  %v638_v62 = vmul.f32 %v3955_v6, %v596_v44  ;;  %v639_v19 = vmul.f32 %v3955_v6, %v597_v39  ;;  %v640_v54 = vmul.f32 %v3955_v6, %v598_v42 }
 0x141   :  { %v641_v57 = vmul.f32 %v3955_v6, %v599_v38  ;;  %v642_v32 = vmul.f32 %v3955_v6, %v600_v40  ;;  %v643_v41 = vmul.f32 %v3955_v6, %v601_v55  ;;  %v644_v60 = vmul.f32 %v3955_v6, %v602_v48  ;;  %v1022_v40 = vpop.permute.xlu1 %1021 }
 0x142   :  { %v759_v5 = vadd.f32 %v4782_v52, %v713_v53  ;;  %v645_v18 = vmul.f32 %v3955_v6, %v603_v61  ;;  %v646_v36 = vmul.f32 %v3955_v6, %v604_v2  ;;  %v647_v20 = vmul.f32 %v3955_v6, %v605_v15 }
 0x143   :  { %v4790_v28 = vmul.f32 %v3955_v6, %v606_v9  ;;  %v649_v45 = vmul.f32 %v3955_v6, %v607_v26  ;;  %v4792_v25 = vmul.f32 %v3955_v6, %v608_v21  ;;  %v4794_v49 = vmul.f32 %v3955_v6, %v609_v43 }
 0x144   :  { %v799_v44 = vmax.f32 %v759_v5, 0.0  ;;  %v652_v39 = vmul.f32 %v3955_v6, %v610_v33  ;;  %v653_v42 = vmul.f32 %v3955_v6, %v611_v50  ;;  %v654_v38 = vmul.f32 %v3955_v6, %v612_v56  ;;  %v4803_v56 = vpop.permute.xlu0 %1006 }
 0x145   :  { %v655_v55 = vmul.f32 %v3955_v6, %v613_v7  ;;  %v656_v48 = vmul.f32 %v3955_v6, %v614_v0  ;;  %v657_v31 = vmul.f32 %v3955_v6, %v615_v22  ;;  %v658_v61 = vmul.f32 %v3955_v6, %v616_v14 }
 0x146   :  { %v1079_v2 = vmul.f32 %v1022_v40, %v799_v44  ;;  %v659_v15 = vmul.f32 %v3955_v6, %v617_v37  ;;  %v660_v53 = vmul.f32 %v3955_v6, %v618_v58  ;;  %v661_v59 = vmul.f32 %v3955_v6, %v619_v30 }
 0x147   :  { %v662_v9 = vmul.f32 %v3955_v6, %v620_v51  ;;  %v663_v35 = vmul.f32 %v3955_v6, %v621_v23  ;;  %v664_v26 = vmul.f32 %v3955_v6, %v622_v46  ;;  %v665_v21 = vmul.f32 %v3955_v6, %v623_v11 }
 0x148   :  { %1119 = vst.msk [vmem:[#allocation2 + $0x118] sm:$0xff] %vm120_vm0, %v1079_v2  ;;  %v666_v43 = vmul.f32 %v3955_v6, %v624_v3  ;;  %v4797_v5 = vmul.f32 %v3955_v6, %v626_v24  ;;  %v4799_v33 = vmul.f32 %v3955_v6, %v628_v17  ;;  %v4801_v50 = vmul.f32 %v3955_v6, %v629_v47 }
 0x149   :  { %v678_v7 = vmul.f32 %v4765_v13, %v632_v63  ;;  %v679_v0 = vmul.f32 %v4765_v13, %v633_v4  ;;  %v680_v22 = vmul.f32 %v4765_v13, %v634_v12  ;;  %v681_v14 = vmul.f32 %v4765_v13, %v635_v27 }
 0x14a   :  { %v712_v37 = vmul.f32 %v4765_v13, %v666_v43  ;;  %v682_v58 = vmul.f32 %v4765_v13, %v636_v10  ;;  %v683_v30 = vmul.f32 %v4765_v13, %v637_v8  ;;  %v684_v51 = vmul.f32 %v4765_v13, %v638_v62 }
 0x14b   :  { %v685_v23 = vmul.f32 %v4765_v13, %v639_v19  ;;  %v686_v46 = vmul.f32 %v4765_v13, %v640_v54  ;;  %v687_v63 = vmul.f32 %v4765_v13, %v641_v57  ;;  %v688_v4 = vmul.f32 %v4765_v13, %v642_v32  ;;  %v1017_v54 = vpop.permute.xlu0 %1016 }
 0x14c   :  { %v758_v12 = vadd.f32 %v4782_v52, %v712_v37  ;;  %v689_v11 = vmul.f32 %v4765_v13, %v643_v41  ;;  %v690_v6 = vmul.f32 %v4765_v13, %v644_v60  ;;  %v691_v10 = vmul.f32 %v4765_v13, %v645_v18 }
 0x14d   :  { %v692_v8 = vmul.f32 %v4765_v13, %v646_v36  ;;  %v693_v62 = vmul.f32 %v4765_v13, %v647_v20  ;;  %v698_v3 = vmul.f32 %v4765_v13, %v652_v39  ;;  %v699_v24 = vmul.f32 %v4765_v13, %v653_v42 }
 0x14e   :  { %v798_v17 = vmax.f32 %v758_v12, 0.0  ;;  %v700_v47 = vmul.f32 %v4765_v13, %v654_v38  ;;  %v701_v27 = vmul.f32 %v4765_v13, %v655_v55  ;;  %v702_v19 = vmul.f32 %v4765_v13, %v656_v48 }
 0x14f   :  { %v703_v57 = vmul.f32 %v4765_v13, %v657_v31  ;;  %v704_v18 = vmul.f32 %v4765_v13, %v658_v61  ;;  %v705_v36 = vmul.f32 %v4765_v13, %v659_v15  ;;  %v706_v20 = vmul.f32 %v4765_v13, %v660_v53 }
 0x150   :  { %v1078_v32 = vmul.f32 %v1017_v54, %v798_v17  ;;  %v707_v41 = vmul.f32 %v4765_v13, %v661_v59  ;;  %v708_v60 = vmul.f32 %v4765_v13, %v662_v9  ;;  %v709_v44 = vmul.f32 %v4765_v13, %v663_v35 }
 0x151   :  { %v710_v39 = vmul.f32 %v4765_v13, %v664_v26  ;;  %v711_v42 = vmul.f32 %v4765_v13, %v665_v21  ;;  %v695_v38 = vmul.f32 %v4765_v13, %v649_v45  ;;  %v4839_v40 = vadd.f32 %v4782_v52, %v678_v7 }
 0x152   :  { %1118 = vst.msk [vmem:[#allocation2 + $0x110] sm:$0xff] %vm120_vm0, %v1078_v32  ;;  %v4843_v55 = vadd.f32 %v4782_v52, %v679_v0  ;;  %v4846_v59 = vadd.f32 %v4782_v52, %v680_v22  ;;  %v4849_v48 = vadd.f32 %v4782_v52, %v681_v14  ;;  %v4852_v35 = vadd.f32 %v4782_v52, %v682_v58  ;;  %v932_v22 = vpop.permute.xlu1 %931 }
 0x153   :  { %v741_v31 = vadd.f32 %v4782_v52, %v695_v38  ;;  %v4856_v45 = vadd.f32 %v4782_v52, %v683_v30  ;;  %v4859_v61 = vadd.f32 %v4782_v52, %v684_v51  ;;  %v4862_v2 = vadd.f32 %v4782_v52, %v685_v23 }
 0x154   :  { %v4865_v15 = vadd.f32 %v4782_v52, %v686_v46  ;;  %v4868_v53 = vadd.f32 %v4782_v52, %v687_v63  ;;  %v4871_v9 = vadd.f32 %v4782_v52, %v688_v4  ;;  %v4874_v26 = vadd.f32 %v4782_v52, %v689_v11 }
 0x155   :  { %v781_v21 = vmax.f32 %v741_v31, 0.0  ;;  %v4877_v43 = vadd.f32 %v4782_v52, %v690_v6  ;;  %v4880_v7 = vadd.f32 %v4782_v52, %v691_v10  ;;  %v4883_v0 = vadd.f32 %v4782_v52, %v692_v8 }
 0x156   :  { %v4886_v14 = vadd.f32 %v4782_v52, %v693_v62  ;;  %v4889_v37 = vadd.f32 %v4782_v52, %v698_v3  ;;  %v4892_v58 = vadd.f32 %v4782_v52, %v699_v24  ;;  %v4895_v30 = vadd.f32 %v4782_v52, %v700_v47 }
 0x157   :  { %v1061_v51 = vmul.f32 %v932_v22, %v781_v21  ;;  %v4898_v23 = vadd.f32 %v4782_v52, %v701_v27  ;;  %v4901_v46 = vadd.f32 %v4782_v52, %v702_v19  ;;  %v4904_v63 = vadd.f32 %v4782_v52, %v703_v57 }
 0x158   :  { %v4907_v4 = vadd.f32 %v4782_v52, %v704_v18  ;;  %v4910_v12 = vadd.f32 %v4782_v52, %v705_v36  ;;  %v4913_v11 = vadd.f32 %v4782_v52, %v706_v20  ;;  %v4916_v6 = vadd.f32 %v4782_v52, %v707_v41 }
 0x159   :  { %1101 = vst.msk [vmem:[#allocation2 + $0x88] sm:$0xff] %vm120_vm0, %v1061_v51  ;;  %v4920_v10 = vadd.f32 %v4782_v52, %v708_v60  ;;  %v4923_v8 = vadd.f32 %v4782_v52, %v709_v44  ;;  %v4926_v62 = vadd.f32 %v4782_v52, %v710_v39  ;;  %v4929_v3 = vadd.f32 %v4782_v52, %v711_v42 }
 0x15a   :  { %v694_v24 = vmul.f32 %v4765_v13, %v4790_v28  ;;  %v764_v17 = vmax.f32 %v4839_v40, 0.0  ;;  %v765_v47 = vmax.f32 %v4843_v55, 0.0  ;;  %v766_v27 = vmax.f32 %v4846_v59, 0.0  ;;  %v927_v59 = vpop.permute.xlu0 %926 }
 0x15b   :  { %v767_v19 = vmax.f32 %v4849_v48, 0.0  ;;  %v768_v54 = vmax.f32 %v4852_v35, 0.0  ;;  %v769_v57 = vmax.f32 %v4856_v45, 0.0  ;;  %v770_v18 = vmax.f32 %v4859_v61, 0.0 }
 0x15c   :  { %v740_v36 = vadd.f32 %v4782_v52, %v694_v24  ;;  %v771_v20 = vmax.f32 %v4862_v2, 0.0  ;;  %v772_v28 = vmax.f32 %v4865_v15, 0.0  ;;  %v773_v32 = vmax.f32 %v4868_v53, 0.0 }
 0x15d   :  { %v774_v41 = vmax.f32 %v4871_v9, 0.0  ;;  %v775_v60 = vmax.f32 %v4874_v26, 0.0  ;;  %v776_v44 = vmax.f32 %v4877_v43, 0.0  ;;  %v777_v39 = vmax.f32 %v4880_v7, 0.0 }
 0x15e   :  { %v780_v42 = vmax.f32 %v740_v36, 0.0  ;;  %v778_v38 = vmax.f32 %v4883_v0, 0.0  ;;  %v779_v40 = vmax.f32 %v4886_v14, 0.0  ;;  %v784_v55 = vmax.f32 %v4889_v37, 0.0 }
 0x15f   :  { %v785_v48 = vmax.f32 %v4892_v58, 0.0  ;;  %v786_v35 = vmax.f32 %v4895_v30, 0.0  ;;  %v787_v31 = vmax.f32 %v4898_v23, 0.0  ;;  %v788_v45 = vmax.f32 %v4901_v46, 0.0  ;;  %v6050_v30 = vld [vmem:[#allocation6_spill] sm:$0xff] }
 0x160   :  { %v1060_v61 = vmul.f32 %v927_v59, %v780_v42  ;;  %v789_v2 = vmax.f32 %v4904_v63, 0.0  ;;  %v790_v15 = vmax.f32 %v4907_v4, 0.0  ;;  %v791_v53 = vmax.f32 %v4910_v12, 0.0  ;;  %v6051_v23 = vld [vmem:[#allocation10_spill] sm:$0xff]  ;;  %v1032_v63 = vpop.permute.xlu1 %1031  ;;  %v6052_v12 = vld [vmem:[#allocation8_spill] sm:$0xff] }
 0x161   :  { %v792_v9 = vmax.f32 %v4913_v11, 0.0  ;;  %v793_v26 = vmax.f32 %v4916_v6, 0.0  ;;  %v794_v21 = vmax.f32 %v4920_v10, 0.0  ;;  %v795_v43 = vmax.f32 %v4923_v8, 0.0  ;;  %v6053_v6 = vld [vmem:[#allocation12_spill] sm:$0xff]  ;;  %v6054_v8 = vld [vmem:[#allocation9_spill] sm:$0xff] }
 0x162   :  { %1100 = vst.msk [vmem:[#allocation2 + $0x80] sm:$0xff] %vm120_vm0, %v1060_v61  ;;  %v796_v7 = vmax.f32 %v4926_v62, 0.0  ;;  %v797_v0 = vmax.f32 %v4929_v3, 0.0  ;;  %v715_v22 = vmul.f32 %v4765_v13, %v4777_v29  ;;  %v1044_v14 = vmul.f32 %v4505_v1, %v764_v17  ;;  %v6055_v1 = vld [vmem:[#allocation15_spill] sm:$0xff]  ;;  %v6058_v17 = vld [vmem:[#allocation13_spill] sm:$0xff]  ;;  %v6064_v59 = vld [vmem:[#allocation20_spill] sm:$0xff] }
 0x163   :  { %v1045_v37 = vmul.f32 %v4535_v34, %v765_v47  ;;  %v1046_v58 = vmul.f32 %v4455_v16, %v766_v27  ;;  %v1047_v51 = vmul.f32 %v6050_v30, %v767_v19  ;;  %v1048_v46 = vmul.f32 %v6051_v23, %v768_v54  ;;  %v6056_v34 = vld [vmem:[#allocation11_spill] sm:$0xff]  ;;  %v6057_v16 = vld [vmem:[#allocation17_spill] sm:$0xff]  ;;  %v4981_v27 = vpop.permute.xlu0 %1026 }
 0x164   :  { %v761_v4 = vadd.f32 %v4782_v52, %v715_v22  ;;  %v1049_v11 = vmul.f32 %v6052_v12, %v769_v57  ;;  %v1050_v10 = vmul.f32 %v6053_v6, %v770_v18  ;;  %v1051_v62 = vmul.f32 %v6054_v8, %v771_v20  ;;  %1084 = vst.msk [vmem:[#allocation2] sm:$0xff] %vm120_vm0, %v1044_v14  ;;  %v6059_v54 = vld [vmem:[#allocation19_spill] sm:$0xff]  ;;  %v6060_v18 = vld [vmem:[#allocation16_spill] sm:$0xff]  ;;  %v6061_v20 = vld [vmem:[#allocation21_spill] sm:$0xff] }
 0x165   :  { %v1052_v29 = vmul.f32 %v6055_v1, %v772_v28  ;;  %v1053_v3 = vmul.f32 %v6056_v34, %v773_v32  ;;  %v1054_v24 = vmul.f32 %v6057_v16, %v774_v41  ;;  %v1055_v47 = vmul.f32 %v6058_v17, %v775_v60  ;;  %1085 = vst.msk [vmem:[#allocation2 + $0x8] sm:$0xff] %vm120_vm0, %v1045_v37  ;;  %v6062_v32 = vld [vmem:[#allocation18_spill] sm:$0xff]  ;;  %v6063_v60 = vld [vmem:[#allocation23_spill] sm:$0xff]  ;;  %v6065_v22 = vld [vmem:[#allocation25_spill] sm:$0xff] }
 0x166   :  { %1086 = vst.msk [vmem:[#allocation2 + $0x10] sm:$0xff] %vm120_vm0, %v1046_v58  ;;  %1087 = vst.msk [vmem:[#allocation2 + $0x18] sm:$0xff] %vm120_vm0, %v1047_v51  ;;  %v801_v19 = vmax.f32 %v761_v4, 0.0  ;;  %v1056_v57 = vmul.f32 %v6059_v54, %v776_v44  ;;  %v1057_v36 = vmul.f32 %v6060_v18, %v777_v39  ;;  %v1058_v28 = vmul.f32 %v6061_v20, %v778_v38  ;;  %v6066_v39 = vld [vmem:[#allocation22_spill] sm:$0xff]  ;;  %v6067_v37 = vld [vmem:[#allocation27_spill] sm:$0xff] }
 0x167   :  { %1088 = vst.msk [vmem:[#allocation2 + $0x20] sm:$0xff] %vm120_vm0, %v1048_v46  ;;  %1089 = vst.msk [vmem:[#allocation2 + $0x28] sm:$0xff] %vm120_vm0, %v1049_v11  ;;  %v1059_v41 = vmul.f32 %v6062_v32, %v779_v40  ;;  %v1064_v42 = vmul.f32 %v6063_v60, %v784_v55  ;;  %v1065_v61 = vmul.f32 %v6064_v59, %v785_v48  ;;  %v6068_v40 = vld [vmem:[#allocation24_spill] sm:$0xff]  ;;  %v6069_v55 = vld [vmem:[#allocation29_spill] sm:$0xff] }
 0x168   :  { %1090 = vst.msk [vmem:[#allocation2 + $0x30] sm:$0xff] %vm120_vm0, %v1050_v10  ;;  %1091 = vst.msk [vmem:[#allocation2 + $0x38] sm:$0xff] %vm120_vm0, %v1051_v62  ;;  %v1066_v14 = vmul.f32 %v6065_v22, %v786_v35  ;;  %v1081_v44 = vmul.f32 %v1032_v63, %v801_v19  ;;  %v1067_v38 = vmul.f32 %v6066_v39, %v787_v31  ;;  %v6070_v35 = vld [vmem:[#allocation26_spill] sm:$0xff]  ;;  %v6071_v23 = vld [vmem:[#allocation31_spill] sm:$0xff] }
 0x169   :  { %1092 = vst.msk [vmem:[#allocation2 + $0x40] sm:$0xff] %vm120_vm0, %v1052_v29  ;;  %1093 = vst.msk [vmem:[#allocation2 + $0x48] sm:$0xff] %vm120_vm0, %v1053_v3  ;;  %v1068_v58 = vmul.f32 %v6067_v37, %v788_v45  ;;  %v1069_v30 = vmul.f32 %v6068_v40, %v789_v2  ;;  %v1070_v48 = vmul.f32 %v6069_v55, %v790_v15  ;;  %v6072_v4 = vld [vmem:[#allocation28_spill] sm:$0xff]  ;;  %v6073_v31 = vld [vmem:[#allocation33_spill] sm:$0xff] }
 0x16a   :  { %1094 = vst.msk [vmem:[#allocation2 + $0x50] sm:$0xff] %vm120_vm0, %v1054_v24  ;;  %1095 = vst.msk [vmem:[#allocation2 + $0x58] sm:$0xff] %vm120_vm0, %v1055_v47  ;;  %v1071_v51 = vmul.f32 %v6070_v35, %v791_v53  ;;  %v1072_v46 = vmul.f32 %v6071_v23, %v792_v9  ;;  %v1073_v63 = vmul.f32 %v6072_v4, %v793_v26  ;;  %v6074_v2 = vld [vmem:[#allocation30_spill] sm:$0xff]  ;;  %v6075_v12 = vld [vmem:[#allocation32_spill] sm:$0xff]  ;;  %v1037_v26 = vpop.permute.xlu1 %1036 }
 0x16b   :  { %1096 = vst.msk [vmem:[#allocation2 + $0x60] sm:$0xff] %vm120_vm0, %v1056_v57  ;;  %1097 = vst.msk [vmem:[#allocation2 + $0x68] sm:$0xff] %vm120_vm0, %v1057_v36  ;;  %v1074_v45 = vmul.f32 %v6073_v31, %v794_v21  ;;  %v1075_v15 = vmul.f32 %v6074_v2, %v795_v43  ;;  %v1076_v53 = vmul.f32 %v4803_v56, %v796_v7  ;;  %v937_v21 = vpop.permute.xlu0 %936  ;;  %v5086_v60 = vld [vmem:[%s6009_s5 + $0x10] sm:$0xff]   ;;  %v6077_v37 = vld [vmem:[#allocation14_spill] sm:$0xff] }
 0x16c   :  { %1098 = vst.msk [vmem:[#allocation2 + $0x70] sm:$0xff] %vm120_vm0, %v1058_v28  ;;  %1099 = vst.msk [vmem:[#allocation2 + $0x78] sm:$0xff] %vm120_vm0, %v1059_v41  ;;  %v1077_v9 = vmul.f32 %v6075_v12, %v797_v0  ;;  %v714_v11 = vmul.f32 %v4765_v13, %v4797_v5  ;;  %v716_v56 = vmul.f32 %v4765_v13, %v4799_v33  ;;  %v1150_v0 = vld [vmem:[#allocation2 + $0x1] sm:$0xff] }
 0x16d   :  { %1104 = vst.msk [vmem:[#allocation2 + $0xa0] sm:$0xff] %vm120_vm0, %v1064_v42  ;;  %1105 = vst.msk [vmem:[#allocation2 + $0xa8] sm:$0xff] %vm120_vm0, %v1065_v61  ;;  %v696_v43 = vmul.f32 %v4765_v13, %v4792_v25  ;;  %v717_v7 = vmul.f32 %v4765_v13, %v4801_v50  ;;  %v697_v5 = vmul.f32 %v4765_v13, %v4794_v49  ;;  %v5041_v33 = vld [vmem:[#allocation2 + $0x11] sm:$0xff] }
 0x16e   :  { %1106 = vst.msk [vmem:[#allocation2 + $0xb0] sm:$0xff] %vm120_vm0, %v1066_v14  ;;  %1121 = vst.msk [vmem:[#allocation2 + $0x128] sm:$0xff] %vm120_vm0, %v1081_v44  ;;  %v5043_v6 = vld [vmem:[#allocation2 + $0x10] sm:$0xff]  ;;  %v760_v25 = vadd.f32 %v4782_v52, %v714_v11  ;;  %v762_v50 = vadd.f32 %v4782_v52, %v716_v56  ;;  %v5049_v62 = vld [vmem:[#allocation2 + $0x20] sm:$0xff]  ;;  %v1166_v49 = vpack.c.bf16 %v5041_v33, %v1150_v0  ;;  %v1042_v36 = vpop.permute.xlu1 %1041 }
 0x16f   :  { %1107 = vst.msk [vmem:[#allocation2 + $0xb8] sm:$0xff] %vm120_vm0, %v1067_v38  ;;  %1108 = vst.msk [vmem:[#allocation2 + $0xc0] sm:$0xff] %vm120_vm0, %v1068_v58  ;;  %v742_v10 = vadd.f32 %v4782_v52, %v696_v43  ;;  %v763_v8 = vadd.f32 %v4782_v52, %v717_v7  ;;  %v5051_v1 = vld [vmem:[#allocation2 + $0x21] sm:$0xff]  ;;  %v5053_v29 = vld [vmem:[#allocation2 + $0x31] sm:$0xff]  ;;  %v743_v13 = vadd.f32 %v4782_v52, %v697_v5  ;;  %v942_v14 = vpop.permute.xlu0 %941 }
 0x170   :  { %1109 = vst.msk [vmem:[#allocation2 + $0xc8] sm:$0xff] %vm120_vm0, %v1069_v30  ;;  %1110 = vst.msk [vmem:[#allocation2 + $0xd0] sm:$0xff] %vm120_vm0, %v1070_v48  ;;  %v1618_v34 = vpack.c.bf16 %v5049_v62, %v5043_v6  ;;  %v5061_v3 = vpack.c.bf16 %v5053_v29, %v5051_v1  ;;  %v5063_v16 = vld [vmem:[#allocation2 + $0x30] sm:$0xff]  ;;  %v5065_v24 = vld [vmem:[#allocation2 + $0x40] sm:$0xff]  ;;  %v800_v47 = vmax.f32 %v760_v25, 0.0  ;;  %v802_v19 = vmax.f32 %v762_v50, 0.0  ;;  %3741 = vmatprep.mubr.msk.bf16.mxu1 %vm120_vm0, %v1166_v49 }
 0x171   :  { %1111 = vst.msk [vmem:[#allocation2 + $0xd8] sm:$0xff] %vm120_vm0, %v1071_v51  ;;  %1112 = vst.msk [vmem:[#allocation2 + $0xe0] sm:$0xff] %vm120_vm0, %v1072_v46  ;;  %v5067_v17 = vld [vmem:[#allocation2 + $0x41] sm:$0xff]  ;;  %v782_v54 = vmax.f32 %v742_v10, 0.0  ;;  %v803_v57 = vmax.f32 %v763_v8, 0.0  ;;  %v5069_v52 = vld [vmem:[#allocation2 + $0x51] sm:$0xff]  ;;  %v1619_v28 = vpack.c.bf16 %v5065_v24, %v5063_v16  ;;  %v1788_v4 = vpack.c.bf16 %v5051_v1, %v5041_v33 }
 0x172   :  { %1113 = vst.msk [vmem:[#allocation2 + $0xe8] sm:$0xff] %vm120_vm0, %v1073_v63  ;;  %1114 = vst.msk [vmem:[#allocation2 + $0xf0] sm:$0xff] %vm120_vm0, %v1074_v45  ;;  %v5071_v18 = vld [vmem:[#allocation2 + $0x50] sm:$0xff]  ;;  %v783_v20 = vmax.f32 %v743_v13, 0.0  ;;  %3795 = vmatprep.mubr.msk.bf16.mxu0 %vm120_vm0, %v1618_v34  ;;  %v5079_v32 = vpack.c.bf16 %v5069_v52, %v5067_v17  ;;  %v5081_v41 = vld [vmem:[#allocation2 + $0x60] sm:$0xff]  ;;  %v1080_v42 = vmul.f32 %v4981_v27, %v800_v47  ;;  %3742 = vmatmul.mubr.msk.bf16.vlgmr.msra.gmra.mxu1 %vm120_vm0, %v5061_v3 }
 0x173   :  { %1115 = vst.msk [vmem:[#allocation2 + $0xf8] sm:$0xff] %vm120_vm0, %v1075_v15  ;;  %1116 = vst.msk [vmem:[#allocation2 + $0x100] sm:$0xff] %vm120_vm0, %v1076_v53  ;;  %v1082_v59 = vmul.f32 %v1037_v26, %v802_v19  ;;  %v1062_v61 = vmul.f32 %v937_v21, %v782_v54  ;;  %v1083_v22 = vmul.f32 %v1042_v36, %v803_v57  ;;  %v5094_v44 = vld [vmem:[%s6009_s5 + $0x38] sm:$0xff]   ;;  %v6076_v38 = vld [vmem:[#allocation7_spill] sm:$0xff]  ;;  %3796 = vmatmul.mubr.msk.bf16.vlgmr.msra.gmra.mxu0 %vm120_vm0, %v1619_v28 }
 0x174   :  { %1117 = vst.msk [vmem:[#allocation2 + $0x108] sm:$0xff] %vm120_vm0, %v1077_v9  ;;  %v1063_v39 = vmul.f32 %v942_v14, %v783_v20  ;;  %3758 = vmatpush3.bf16.msra.mxu1 %v6076_v38  ;;  %v1620_v27 = vpack.c.bf16 %v5081_v41, %v5071_v18  ;;  %1120 = vst.msk [vmem:[#allocation2 + $0x120] sm:$0xff] %vm120_vm0, %v1080_v42  ;;  %3745 = vmatprep.mubr.msk.bf16.mxu1 %vm120_vm0, %v5079_v32  ;;  %v5109_v58 = vld [vmem:[#allocation2 + $0x61] sm:$0xff]  ;;  %v5111_v40 = vld [vmem:[#allocation2 + $0x71] sm:$0xff] }
 0x175   :  { %1122 = vst.msk [vmem:[#allocation2 + $0x130] sm:$0xff] %vm120_vm0, %v1082_v59  ;;  %1102 = vst.msk [vmem:[#allocation2 + $0x90] sm:$0xff] %vm120_vm0, %v1062_v61  ;;  %3830 = vmatpush3.bf16.msra.mxu0 %v6077_v37  ;;  %v5113_v30 = vld [vmem:[#allocation2 + $0x80] sm:$0xff]  ;;  %3775 = vmatprep.subr.bf16.mxu1 %v5086_v60  ;;  %v5116_v55 = vld [vmem:[#allocation2 + $0x70] sm:$0xff]  ;;  %v5127_v46 = vpack.c.bf16 %v5111_v40, %v5109_v58  ;;  %v1789_v53 = vpack.c.bf16 %v5067_v17, %v5053_v29 }
 0x176   :  { %1123 = vst.msk [vmem:[#allocation2 + $0x138] sm:$0xff] %vm120_vm0, %v1083_v22  ;;  %1103 = vst.msk [vmem:[#allocation2 + $0x98] sm:$0xff] %vm120_vm0, %v1063_v39  ;;  %3799 = vmatprep.mubr.msk.bf16.mxu0 %vm120_vm0, %v1620_v27  ;;  %v1158_v48 = vld [vmem:[#allocation2 + $0xa1] sm:$0xff]  ;;  %v5118_v35 = vld [vmem:[#allocation2 + $0xb1] sm:$0xff]  ;;  %3865 = vmatprep.subr.bf16.mxu0 %v5094_v44  ;;  %v1621_v63 = vpack.c.bf16 %v5113_v30, %v5116_v55  ;;  %v1790_v12 = vpack.c.bf16 %v5109_v58, %v5069_v52 }
 0x177   :  { %v5121_v51 = vld [vmem:[#allocation2 + $0xb0] sm:$0xff]  ;;  %v5123_v23 = vld [vmem:[#allocation2 + $0xc0] sm:$0xff]  ;;  %v1170_v31 = vpack.c.bf16 %v5118_v35, %v1158_v48  ;;  %v5198_v39 = vpack.c.bf16 %v5063_v16, %v5049_v62  ;;  %v5207_v27 = vpack.c.bf16 %v5071_v18, %v5065_v24  ;;  %v5219_v18 = vpack.c.bf16 %v5116_v55, %v5081_v41 }
 0x178   :  { %v1622_v45 = vpack.c.bf16 %v5123_v23, %v5121_v51  ;;  %v5138_v2 = vld [vmem:[#allocation2 + $0xc1] sm:$0xff]  ;;  %v5140_v15 = vld [vmem:[#allocation2 + $0xd1] sm:$0xff] }
 0x179   :  { %v5148_v9 = vld [vmem:[#allocation2 + $0xe1] sm:$0xff]  ;;  %v1612_v56 = vld [vmem:[#allocation2 + $0xd0] sm:$0xff]  ;;  %v1792_v43 = vpack.c.bf16 %v5138_v2, %v5118_v35  ;;  %v5167_v50 = vpack.c.bf16 %v5140_v15, %v5138_v2 }
 0x17a   :  { %3746 = vmatmul.mubr.msk.bf16.gmra.mxu1 %vm120_vm0, %v5127_v46  ;;  %v5150_v26 = vld [vmem:[#allocation2 + $0xf1] sm:$0xff]  ;;  %v5155_v21 = vld [vmem:[#allocation2 + $0xe0] sm:$0xff]  ;;  %v1793_v7 = vpack.c.bf16 %v5148_v9, %v5140_v15  ;;  %v5229_v41 = vpack.c.bf16 %v1612_v56, %v5123_v23 }
 0x17b   :  { %3800 = vmatmul.mubr.msk.bf16.gmra.mxu0 %vm120_vm0, %v1621_v63  ;;  %3749 = vmatprep.mubr.msk.bf16.mxu1 %vm120_vm0, %v1170_v31  ;;  %v5152_v11 = vld [vmem:[#allocation2 + $0x101] sm:$0xff]  ;;  %v1614_v0 = vld [vmem:[#allocation2 + $0xf0] sm:$0xff]  ;;  %v1623_v10 = vpack.c.bf16 %v5155_v21, %v1612_v56  ;;  %v5172_v8 = vpack.c.bf16 %v5150_v26, %v5148_v9 }
 0x17c   :  { %3803 = vmatprep.mubr.msk.bf16.mxu0 %vm120_vm0, %v1622_v45  ;;  %v1794_v5 = vpack.c.bf16 %v5152_v11, %v5150_v26  ;;  %v5163_v25 = vld [vmem:[#allocation2 + $0x100] sm:$0xff]  ;;  %v5181_v49 = vld [vmem:[#allocation2 + $0x111] sm:$0xff] }
 0x17d   :  { %v1624_v13 = vpack.c.bf16 %v5163_v25, %v1614_v0  ;;  %v1616_v34 = vld [vmem:[#allocation2 + $0x110] sm:$0xff]  ;;  %v5183_v47 = vld [vmem:[#allocation2 + $0x120] sm:$0xff]  ;;  %v5187_v36 = vpack.c.bf16 %v5181_v49, %v5152_v11 }
 0x17e   :  { %v1124_v19 = vld [vmem:[#allocation2] sm:$0xff]  ;;  %v1942_v54 = vld [vmem:[#allocation2 + $0x12] sm:$0xff]  ;;  %v1625_v20 = vpack.c.bf16 %v5183_v47, %v1616_v34  ;;  %v1147_v56 = vpack.c.bf16 %v1616_v34, %v5163_v25 }
 0x17f   :  { %v1943_v57 = vld [vmem:[#allocation2 + $0x22] sm:$0xff]  ;;  %v1140_v28 = vpack.c.bf16 %v5043_v6, %v1124_v19  ;;  %v1944_v59 = vld [vmem:[#allocation2 + $0x32] sm:$0xff] }
 0x180   :  { %v1958_v42 = vpack.c.bf16 %v1943_v57, %v1942_v54  ;;  %v1945_v61 = vld [vmem:[#allocation2 + $0x42] sm:$0xff]  ;;  %v1946_v22 = vld [vmem:[#allocation2 + $0x52] sm:$0xff] }
 0x181   :  { %v1947_v14 = vld [vmem:[#allocation2 + $0x62] sm:$0xff]  ;;  %v1959_v38 = vpack.c.bf16 %v1945_v61, %v1944_v59  ;;  %v1948_v62 = vld [vmem:[#allocation2 + $0x72] sm:$0xff]  ;;  %v1449_v25 = vpack.c.bf16 %v1946_v22, %v1945_v61 }
 0x182   :  { %3750 = vmatmul.mubr.msk.bf16.gmra.mxu1 %vm120_vm0, %v5167_v50  ;;  %v3949_v6 = vld [vmem:[%s6009_s5 + $0x20] sm:$0xff]   ;;  %v1960_v37 = vpack.c.bf16 %v1947_v14, %v1946_v22  ;;  %v1950_v63 = vld [vmem:[#allocation2 + $0xb2] sm:$0xff] }
 0x183   :  { %3804 = vmatmul.mubr.msk.bf16.gmra.mxu0 %vm120_vm0, %v1623_v10  ;;  %3753 = vmatprep.mubr.msk.bf16.mxu1 %vm120_vm0, %v5172_v8  ;;  %v5215_v16 = vld [vmem:[#allocation2 + $0x82] sm:$0xff]  ;;  %v2298_v22 = vld [vmem:[#allocation2 + $0x131] sm:$0xff] }
 0x184   :  { %3807 = vmatprep.mubr.msk.bf16.mxu0 %vm120_vm0, %v1624_v13  ;;  %v1132_v48 = vld [vmem:[#allocation2 + $0xa0] sm:$0xff]  ;;  %v1954_v13 = vld [vmem:[#allocation2 + $0xf2] sm:$0xff] }
 0x185   :  { %v1951_v24 = vld [vmem:[#allocation2 + $0xc2] sm:$0xff]  ;;  %v1144_v31 = vpack.c.bf16 %v5121_v51, %v1132_v48  ;;  %v5232_v51 = vpack.c.bf16 %v1614_v0, %v5155_v21  ;;  %v2120_v29 = vld [vmem:[#allocation2 + $0x90] sm:$0xff] }
 0x186   :  { %v1962_v45 = vpack.c.bf16 %v1951_v24, %v1950_v63  ;;  %v1953_v10 = vld [vmem:[#allocation2 + $0xe2] sm:$0xff]  ;;  %v2132_v17 = vpack.c.bf16 %v2120_v29, %v5113_v30  ;;  %v2128_v52 = vld [vmem:[#allocation2 + $0x130] sm:$0xff] }
 0x187   :  { %v1955_v19 = vld [vmem:[#allocation2 + $0x102] sm:$0xff]  ;;  %v1453_v61 = vpack.c.bf16 %v1954_v13, %v1953_v10  ;;  %v2136_v58 = vpack.c.bf16 %v2128_v52, %v5183_v47  ;;  %v2468_v35 = vld [vmem:[#allocation2 + $0x132] sm:$0xff] }
 0x188   :  { %v1431_v23 = vld [vmem:[#allocation2 + $0x2] sm:$0xff] }
 0x189   :  { %v1447_v0 = vpack.c.bf16 %v1942_v54, %v1431_v23  ;;  %v2289_v34 = vld [vmem:[#allocation2 + $0x81] sm:$0xff] }
 0x18a   :  { %3754 = vmatmul.mubr.msk.bf16.gmra.mxu1 %vm120_vm0, %v5187_v36  ;;  %v1439_v54 = vld [vmem:[#allocation2 + $0xa2] sm:$0xff]  ;;  %v1791_v33 = vpack.c.bf16 %v2289_v34, %v5111_v40  ;;  %v2460_v40 = vld [vmem:[#allocation2 + $0x92] sm:$0xff] }
 0x18b   :  { %3808 = vmatmul.mubr.msk.bf16.gmra.mxu0 %vm120_vm0, %v1625_v20  ;;  %3759 = vmatprep.mubr.msk.bf16.mxu1 %vm120_vm0, %v1140_v28  ;;  %v1964_v20 = vpack.c.bf16 %v1955_v19, %v1954_v13  ;;  %v1956_v28 = vld [vmem:[#allocation2 + $0x112] sm:$0xff]  ;;  %v1451_v48 = vpack.c.bf16 %v1950_v63, %v1439_v54  ;;  %v2472_v30 = vpack.c.bf16 %v2460_v40, %v5215_v16 }
 0x18c   :  { %3831 = vmatprep.mubr.msk.bf16.mxu0 %vm120_vm0, %v1958_v42  ;;  %v5240_v42 = vld [vmem:[#allocation2 + $0x122] sm:$0xff] }
 0x18d   :  { %v1965_v21 = vpack.c.bf16 %v5240_v42, %v1956_v28 }
 0x192   :  { %3760 = vmatmul.mubr.msk.bf16.vlgmr.msra.gmra.mxu1 %vm120_vm0, %v5198_v39 }
 0x193   :  { %3776 = vmatpush3.bf16.msra.mxu1 %v5086_v60  ;;  %3832 = vmatmul.mubr.msk.bf16.vlgmr.msra.gmra.mxu0 %vm120_vm0, %v1959_v38  ;;  %v1961_v60 = vpack.c.bf16 %v5215_v16, %v1948_v62  ;;  %v1448_v38 = vpack.c.bf16 %v1944_v59, %v1943_v57  ;;  %v1450_v57 = vpack.c.bf16 %v1948_v62, %v1947_v14 }
 0x194   :  { %3763 = vmatprep.mubr.msk.bf16.mxu1 %vm120_vm0, %v5207_v27  ;;  %3835 = vmatprep.mubr.msk.bf16.mxu0 %vm120_vm0, %v1960_v37  ;;  %v3950_v37 = vld [vmem:[%s6009_s5 + $0x30] sm:$0xff]   ;;  %v1454_v14 = vpack.c.bf16 %v1956_v28, %v1955_v19 }
 0x195   :  { %3866 = vmatpush3.bf16.msra.mxu0 %v5094_v44  ;;  %3811 = vmatprep.subr.bf16.mxu1 %v3949_v6  ;;  %v1952_v44 = vld [vmem:[#allocation2 + $0xd2] sm:$0xff] }
 0x196   :  { %v1963_v55 = vpack.c.bf16 %v1953_v10, %v1952_v44 }
 0x19a   :  { %3764 = vmatmul.mubr.msk.bf16.gmra.mxu1 %vm120_vm0, %v5219_v18 }
 0x19b   :  { %3836 = vmatmul.mubr.msk.bf16.gmra.mxu0 %vm120_vm0, %v1961_v60  ;;  %3767 = vmatprep.mubr.msk.bf16.mxu1 %vm120_vm0, %v1144_v31 }
 0x19c   :  { %3839 = vmatprep.mubr.msk.bf16.mxu0 %vm120_vm0, %v1962_v45 }
 0x1a2   :  { %3768 = vmatmul.mubr.msk.bf16.gmra.mxu1 %vm120_vm0, %v5229_v41 }
 0x1a3   :  { %3840 = vmatmul.mubr.msk.bf16.gmra.mxu0 %vm120_vm0, %v1963_v55  ;;  %3771 = vmatprep.mubr.msk.bf16.mxu1 %vm120_vm0, %v5232_v51 }
 0x1a4   :  { %3843 = vmatprep.mubr.msk.bf16.mxu0 %vm120_vm0, %v1964_v20 }
 0x1aa   :  { %3772 = vmatmul.mubr.msk.bf16.gmra.mxu1 %vm120_vm0, %v1147_v56 }
 0x1ab   :  { %3844 = vmatmul.mubr.msk.bf16.gmra.mxu0 %vm120_vm0, %v1965_v21  ;;  %3777 = vmatprep.mubr.msk.bf16.mxu1 %vm120_vm0, %v1447_v0 }
 0x1ac   :  { %3867 = vmatprep.mubr.msk.bf16.mxu0 %vm120_vm0, %v5061_v3  ;;  %v2290_v3 = vld [vmem:[#allocation2 + $0x91] sm:$0xff] }
 0x1ad   :  { %v2302_v59 = vpack.c.bf16 %v2290_v3, %v2289_v34 }
 0x1b2   :  { %3778 = vmatmul.mubr.msk.bf16.vlgmr.msra.gmra.mxu1 %vm120_vm0, %v1448_v38 }
 0x1b3   :  { %3812 = vmatpush3.bf16.msra.mxu1 %v3949_v6  ;;  %3868 = vmatmul.mubr.msk.bf16.vlgmr.msra.gmra.mxu0 %vm120_vm0, %v5079_v32  ;;  %v1452_v32 = vpack.c.bf16 %v1952_v44, %v1951_v24 }
 0x1b4   :  { %3781 = vmatprep.mubr.msk.bf16.mxu1 %vm120_vm0, %v1449_v25  ;;  %3871 = vmatprep.mubr.msk.bf16.mxu0 %vm120_vm0, %v5127_v46  ;;  %v2297_v46 = vld [vmem:[#allocation2 + $0x121] sm:$0xff] }
 0x1b5   :  { %3847 = vmatprep.subr.bf16.mxu1 %v3950_v37  ;;  %v2306_v6 = vpack.c.bf16 %v2298_v22, %v2297_v46  ;;  %v1795_v1 = vpack.c.bf16 %v2297_v46, %v5181_v49 }
 0x1ba   :  { %3782 = vmatmul.mubr.msk.bf16.gmra.mxu1 %vm120_vm0, %v1450_v57 }
 0x1bb   :  { %3872 = vmatmul.mubr.msk.bf16.gmra.mxu0 %vm120_vm0, %v2302_v59  ;;  %3785 = vmatprep.mubr.msk.bf16.mxu1 %vm120_vm0, %v1451_v48 }
 0x1bc   :  { %3875 = vmatprep.mubr.msk.bf16.mxu0 %vm120_vm0, %v5167_v50  ;;  %v3951_v50 = vld [vmem:[%s6009_s5 + $0x40] sm:$0xff]  }
 0x1c2   :  { %3786 = vmatmul.mubr.msk.bf16.gmra.mxu1 %vm120_vm0, %v1452_v32 }
 0x1c3   :  { %3876 = vmatmul.mubr.msk.bf16.gmra.mxu0 %vm120_vm0, %v5172_v8  ;;  %3789 = vmatprep.mubr.msk.bf16.mxu1 %vm120_vm0, %v1453_v61 }
 0x1c4   :  { %3879 = vmatprep.mubr.msk.bf16.mxu0 %vm120_vm0, %v5187_v36 }
 0x1ca   :  { %3790 = vmatmul.mubr.msk.bf16.gmra.mxu1 %vm120_vm0, %v1454_v14 }
 0x1cb   :  { %3880 = vmatmul.mubr.msk.bf16.gmra.mxu0 %vm120_vm0, %v2306_v6  ;;  %3813 = vmatprep.mubr.msk.bf16.mxu1 %vm120_vm0, %v1788_v4  ;;  %v2476_v4 = vpack.c.bf16 %v2468_v35, %v5240_v42 }
 0x1d2   :  { %3814 = vmatmul.mubr.msk.bf16.vlgmr.msra.gmra.mxu1 %vm120_vm0, %v1789_v53 }
 0x1d3   :  { %3848 = vmatpush3.bf16.msra.mxu1 %v3950_v37  ;;  %3817 = vmatprep.mubr.msk.bf16.mxu1 %vm120_vm0, %v1790_v12 }
 0x1d4   :  { %3883 = vmatprep.subr.bf16.mxu1 %v3951_v50 }
 0x1da   :  { %3818 = vmatmul.mubr.msk.bf16.gmra.mxu1 %vm120_vm0, %v1791_v33 }
 0x1db   :  { %3821 = vmatprep.mubr.msk.bf16.mxu1 %vm120_vm0, %v1792_v43 }
 0x1e2   :  { %3822 = vmatmul.mubr.msk.bf16.gmra.mxu1 %vm120_vm0, %v1793_v7 }
 0x1e3   :  { %3825 = vmatprep.mubr.msk.bf16.mxu1 %vm120_vm0, %v1794_v5 }
 0x1ea   :  { %3826 = vmatmul.mubr.msk.bf16.gmra.mxu1 %vm120_vm0, %v1795_v1 }
 0x1eb   :  { %3849 = vmatprep.mubr.msk.bf16.mxu1 %vm120_vm0, %v5198_v39 }
 0x1f2   :  { %3850 = vmatmul.mubr.msk.bf16.vlgmr.msra.gmra.mxu1 %vm120_vm0, %v5207_v27 }
 0x1f3   :  { %3884 = vmatpush3.bf16.msra.mxu1 %v3951_v50  ;;  %3853 = vmatprep.mubr.msk.bf16.mxu1 %vm120_vm0, %v5219_v18 }
 0x1fa   :  { %3854 = vmatmul.mubr.msk.bf16.gmra.mxu1 %vm120_vm0, %v2132_v17 }
 0x1fb   :  { %3857 = vmatprep.mubr.msk.bf16.mxu1 %vm120_vm0, %v5229_v41 }
 0x202   :  { %3858 = vmatmul.mubr.msk.bf16.gmra.mxu1 %vm120_vm0, %v5232_v51 }
 0x203   :  { %3861 = vmatprep.mubr.msk.bf16.mxu1 %vm120_vm0, %v1147_v56 }
 0x20a   :  { %3862 = vmatmul.mubr.msk.bf16.gmra.mxu1 %vm120_vm0, %v2136_v58 }
 0x20b   :  { %3885 = vmatprep.mubr.msk.bf16.mxu1 %vm120_vm0, %v1448_v38 }
 0x212   :  { %3886 = vmatmul.mubr.msk.bf16.vlgmr.msra.gmra.mxu1 %vm120_vm0, %v1449_v25 }
 0x213   :  { %3889 = vmatprep.mubr.msk.bf16.mxu1 %vm120_vm0, %v1450_v57 }
 0x21a   :  { %3890 = vmatmul.mubr.msk.bf16.gmra.mxu1 %vm120_vm0, %v2472_v30 }
 0x21b   :  { %3893 = vmatprep.mubr.msk.bf16.mxu1 %vm120_vm0, %v1452_v32 }
 0x222   :  { %3894 = vmatmul.mubr.msk.bf16.gmra.mxu1 %vm120_vm0, %v1453_v61 }
 0x223   :  { %3897 = vmatprep.mubr.msk.bf16.mxu1 %vm120_vm0, %v1454_v14 }
 0x22a   :  { %3898 = vmatmul.mubr.msk.bf16.gmra.mxu1 %vm120_vm0, %v2476_v4 }
 0x232   :  { %v3743_v2 = vpop.f32.mrf.mxu1 }
 0x233   :  { %v5327_v15 = vpop.f32.mrf.mxu0 }
 0x234   :  { %v1241_v53 = vpop.f32.mrf.mxu1 }
 0x235   :  { %v5329_v12 = vpop.f32.mrf.mxu0 }
 0x236   :  { %v3744_v9 = vpop.f32.mrf.mxu1 }
 0x237   :  { %v5331_v11 = vpop.f32.mrf.mxu0 }
 0x238   :  { %v1244_v26 = vpop.f32.mrf.mxu1 }
 0x239   :  { %v5333_v5 = vpop.f32.mrf.mxu0 }
 0x23a   :  { %v3747_v43 = vpop.f32.mrf.mxu1 }
 0x23b   :  { %v5335_v47 = vpop.f32.mrf.mxu0 }
 0x23c   :  { %v1257_v7 = vpop.f32.mrf.mxu1 }
 0x23d   :  { %v5337_v27 = vpop.f32.mrf.mxu0 }
 0x23e   :  { %v3748_v8 = vpop.f32.mrf.mxu1 }
 0x23f   :  { %v5339_v63 = vpop.f32.mrf.mxu0 }
 0x240   :  { %v1260_v49 = vpop.f32.mrf.mxu1 }
 0x241   :  { %v5341_v60 = vpop.f32.mrf.mxu0 }
 0x242   :  { %v3751_v36 = vpop.f32.mrf.mxu1 }
 0x243   :  { %v5343_v44 = vpop.f32.mrf.mxu0 }
 0x244   :  { %v1273_v39 = vpop.f32.mrf.mxu1 }
 0x245   :  { %v5345_v55 = vpop.f32.mrf.mxu0 }
 0x246   :  { %v3752_v62 = vpop.f32.mrf.mxu1 }
 0x247   :  { %v5347_v23 = vpop.f32.mrf.mxu0 }
 0x248   :  { %v1276_v16 = vpop.f32.mrf.mxu1 }
 0x249   :  { %v5349_v37 = vpop.f32.mrf.mxu0 }
 0x24a   :  { %v3755_v24 = vpop.f32.mrf.mxu1 }
 0x24b   :  { %v3809_v57 = vpop.f32.mrf.mxu0 }
 0x24c   :  { %v1289_v18 = vpop.f32.mrf.mxu1 }
 0x24d   :  { %v5351_v46 = vpop.f32.mrf.mxu0 }
 0x24e   :  { %v3756_v31 = vpop.f32.mrf.mxu1 }
 0x24f   :  { %v5353_v33 = vpop.f32.mrf.mxu0 }
 0x250   :  { %v1292_v45 = vpop.f32.mrf.mxu1  ;;  %6078 = vst [vmem:[#allocation6_spill] sm:$0xff] %v5353_v33 }
 0x251   :  { %v5355_v58 = vpop.f32.mrf.mxu0 }
 0x252   :  { %v3761_v10 = vpop.f32.mrf.mxu1  ;;  %6079 = vst [vmem:[#allocation10_spill] sm:$0xff] %v5355_v58 }
 0x253   :  { %v1377_v13 = vadd.f32 %v3761_v10, %v3743_v2  ;;  %v5357_v2 = vpop.f32.mrf.mxu0 }
 0x254   :  { %v1368_v19 = vpop.f32.mrf.mxu1 }
 0x255   :  { %v1369_v41 = vadd.f32 %v1368_v19, %v1241_v53 }
 0x256   :  { %v3762_v51 = vpop.f32.mrf.mxu1 }
 0x257   :  { %v1380_v20 = vadd.f32 %v3762_v51, %v3744_v9 }
 0x258   :  { %v1371_v28 = vpop.f32.mrf.mxu1 }
 0x259   :  { %v1372_v42 = vadd.f32 %v1371_v28, %v1244_v26 }
 0x25a   :  { %v3765_v56 = vpop.f32.mrf.mxu1 }
 0x25b   :  { %v1393_v21 = vadd.f32 %v3765_v56, %v3747_v43 }
 0x25c   :  { %v1384_v0 = vpop.f32.mrf.mxu1 }
 0x25d   :  { %v1385_v38 = vadd.f32 %v1384_v0, %v1257_v7 }
 0x25e   :  { %v3766_v25 = vpop.f32.mrf.mxu1 }
 0x25f   :  { %v1396_v34 = vadd.f32 %v3766_v25, %v3748_v8  ;;  %v5362_v8 = vpop.f32.mrf.mxu0 }
 0x260   :  { %v1387_v3 = vpop.f32.mrf.mxu1 }
 0x261   :  { %v1388_v54 = vadd.f32 %v1387_v3, %v1260_v49 }
 0x262   :  { %v3769_v59 = vpop.f32.mrf.mxu1 }
 0x263   :  { %v1409_v48 = vadd.f32 %v3769_v59, %v3751_v36 }
 0x264   :  { %v1400_v32 = vpop.f32.mrf.mxu1 }
 0x265   :  { %v1401_v61 = vadd.f32 %v1400_v32, %v1273_v39 }
 0x266   :  { %v3770_v22 = vpop.f32.mrf.mxu1 }
 0x267   :  { %v1412_v14 = vadd.f32 %v3770_v22, %v3752_v62 }
 0x268   :  { %v1403_v6 = vpop.f32.mrf.mxu1 }
 0x269   :  { %v1404_v50 = vadd.f32 %v1403_v6, %v1276_v16  ;;  %v5368_v16 = vpop.f32.mrf.mxu0 }
 0x26a   :  { %v3773_v1 = vpop.f32.mrf.mxu1 }
 0x26b   :  { %v1425_v29 = vadd.f32 %v3773_v1, %v3755_v24 }
 0x26c   :  { %v1416_v17 = vpop.f32.mrf.mxu1 }
 0x26d   :  { %v1417_v52 = vadd.f32 %v1416_v17, %v1289_v18 }
 0x26e   :  { %v3774_v40 = vpop.f32.mrf.mxu1 }
 0x26f   :  { %v1428_v30 = vadd.f32 %v3774_v40, %v3756_v31 }
 0x270   :  { %v1419_v35 = vpop.f32.mrf.mxu1 }
 0x271   :  { %v1420_v4 = vadd.f32 %v1419_v35, %v1292_v45 }
 0x272   :  { %v3779_v53 = vpop.f32.mrf.mxu1 }
 0x273   :  { %v1587_v9 = vadd.f32 %v3779_v53, %v1377_v13  ;;  %v5373_v13 = vpop.f32.mrf.mxu0 }
 0x274   :  { %v1522_v26 = vpop.f32.mrf.mxu1 }
 0x275   :  { %v5359_v43 = vadd.f32 %v1522_v26, %v1369_v41  ;;  %v1758_v7 = vadd.f32 %v5327_v15, %v1587_v9 }
 0x276   :  { %v3780_v49 = vpop.f32.mrf.mxu1 }
 0x277   :  { %v5364_v36 = vadd.f32 %v3780_v49, %v1380_v20  ;;  %v5379_v20 = vpop.f32.mrf.mxu0  ;;  %v1756_v58 = vadd.f32 %v5329_v12, %v5359_v43 }
 0x278   :  { %v1525_v39 = vpop.f32.mrf.mxu1 }
 0x279   :  { %v5366_v62 = vadd.f32 %v1525_v39, %v1372_v42 }
 0x27a   :  { %v3783_v24 = vpop.f32.mrf.mxu1 }
 0x27b   :  { %v1591_v18 = vadd.f32 %v3783_v24, %v1393_v21 }
 0x27c   :  { %v1538_v31 = vpop.f32.mrf.mxu1 }
 0x27d   :  { %v5370_v45 = vadd.f32 %v1538_v31, %v1385_v38  ;;  %v1762_v10 = vadd.f32 %v5335_v47, %v1591_v18  ;;  %v5384_v38 = vpop.f32.mrf.mxu0 }
 0x27e   :  { %v3784_v15 = vpop.f32.mrf.mxu1 }
 0x27f   :  { %v5375_v19 = vadd.f32 %v3784_v15, %v1396_v34  ;;  %v5390_v59 = vpop.f32.mrf.mxu0 }
 0x280   :  { %v1541_v41 = vpop.f32.mrf.mxu1 }
 0x281   :  { %v5377_v51 = vadd.f32 %v1541_v41, %v1388_v54 }
 0x282   :  { %v3787_v28 = vpop.f32.mrf.mxu1 }
 0x283   :  { %v1595_v42 = vadd.f32 %v3787_v28, %v1409_v48 }
 0x284   :  { %v1554_v56 = vpop.f32.mrf.mxu1 }
 0x285   :  { %v5381_v0 = vadd.f32 %v1554_v56, %v1401_v61  ;;  %v1766_v21 = vadd.f32 %v5343_v44, %v1595_v42  ;;  %v5394_v61 = vpop.f32.mrf.mxu0 }
 0x286   :  { %v3788_v47 = vpop.f32.mrf.mxu1 }
 0x287   :  { %v5386_v25 = vadd.f32 %v3788_v47, %v1412_v14  ;;  %v5400_v14 = vpop.f32.mrf.mxu0 }
 0x288   :  { %v1557_v3 = vpop.f32.mrf.mxu1  ;;  %6082 = vst [vmem:[#allocation9_spill] sm:$0xff] %v5400_v14 }
 0x289   :  { %v5388_v34 = vadd.f32 %v1557_v3, %v1404_v50  ;;  %v5402_v9 = vpop.f32.mrf.mxu0 }
 0x28a   :  { %v3791_v54 = vpop.f32.mrf.mxu1 }
 0x28b   :  { %v1599_v32 = vadd.f32 %v3791_v54, %v1425_v29 }
 0x28c   :  { %v1570_v22 = vpop.f32.mrf.mxu1 }
 0x28d   :  { %v5392_v6 = vadd.f32 %v1570_v22, %v1417_v52  ;;  %v1770_v48 = vadd.f32 %v3809_v57, %v1599_v32  ;;  %v5404_v52 = vpop.f32.mrf.mxu0 }
 0x28e   :  { %v3792_v1 = vpop.f32.mrf.mxu1  ;;  %6083 = vst [vmem:[#allocation15_spill] sm:$0xff] %v5404_v52 }
 0x28f   :  { %v5396_v44 = vadd.f32 %v3792_v1, %v1428_v30  ;;  %v5408_v30 = vpop.f32.mrf.mxu0 }
 0x290   :  { %v1573_v17 = vpop.f32.mrf.mxu1  ;;  %6084 = vst [vmem:[#allocation11_spill] sm:$0xff] %v5408_v30 }
 0x291   :  { %6080 = vst [vmem:[#allocation8_spill] sm:$0xff] %v5396_v44  ;;  %v5398_v40 = vadd.f32 %v1573_v17, %v1420_v4  ;;  %v5412_v18 = vpop.f32.mrf.mxu0 }
 0x292   :  { %v3815_v50 = vpop.f32.mrf.mxu1  ;;  %6085 = vst [vmem:[#allocation17_spill] sm:$0xff] %v5412_v18 }
 0x293   :  { %6081 = vst [vmem:[#allocation12_spill] sm:$0xff] %v5398_v40  ;;  %v1928_v35 = vadd.f32 %v3815_v50, %v1758_v7  ;;  %v5418_v41 = vpop.f32.mrf.mxu0 }
 0x294   :  { %v1863_v53 = vpop.f32.mrf.mxu1  ;;  %6087 = vst [vmem:[#allocation19_spill] sm:$0xff] %v5418_v41 }
 0x295   :  { %v1926_v14 = vadd.f32 %v1863_v53, %v1756_v58 }
 0x296   :  { %v3816_v29 = vpop.f32.mrf.mxu1 }
 0x298   :  { %v1866_v26 = vpop.f32.mrf.mxu1 }
 0x29a   :  { %v3819_v57 = vpop.f32.mrf.mxu1 }
 0x29b   :  { %v5406_v49 = vadd.f32 %v3819_v57, %v1762_v10  ;;  %v5424_v10 = vpop.f32.mrf.mxu0 }
 0x29c   :  { %v1879_v39 = vpop.f32.mrf.mxu1  ;;  %6088 = vst [vmem:[#allocation16_spill] sm:$0xff] %v5424_v10 }
 0x29d   :  { %v5430_v54 = vpop.f32.mrf.mxu0 }
 0x29e   :  { %v5410_v24 = vpop.f32.mrf.mxu1  ;;  %6091 = vst [vmem:[#allocation23_spill] sm:$0xff] %v5430_v54 }
 0x29f   :  { %v3869_v22 = vpop.f32.mrf.mxu0 }
 0x2a0   :  { %v1882_v4 = vpop.f32.mrf.mxu1 }
 0x2a1   :  { %v2374_v50 = vpop.f32.mrf.mxu0 }
 0x2a2   :  { %v3823_v31 = vpop.f32.mrf.mxu1 }
 0x2a3   :  { %v5414_v7 = vadd.f32 %v3823_v31, %v1766_v21  ;;  %v3870_v18 = vpop.f32.mrf.mxu0 }
 0x2a4   :  { %v5416_v15 = vpop.f32.mrf.mxu1 }
 0x2a5   :  { %6086 = vst [vmem:[#allocation13_spill] sm:$0xff] %v5414_v7  ;;  %v2377_v33 = vpop.f32.mrf.mxu0  ;;  %v1757_v7 = vadd.f32 %v5333_v5, %v5366_v62  ;;  %v2098_v5 = vadd.f32 %v5357_v2, %v1928_v35 }
 0x2a6   :  { %v5420_v28 = vpop.f32.mrf.mxu1 }
 0x2a8   :  { %v5422_v42 = vpop.f32.mrf.mxu1 }
 0x2aa   :  { %v3827_v56 = vpop.f32.mrf.mxu1 }
 0x2ab   :  { %v5426_v47 = vadd.f32 %v3827_v56, %v1770_v48 }
 0x2ac   :  { %v5428_v3 = vpop.f32.mrf.mxu1 }
 0x2ad   :  { %6089 = vst [vmem:[#allocation21_spill] sm:$0xff] %v5426_v47  ;;  %6090 = vst [vmem:[#allocation18_spill] sm:$0xff] %v5428_v3  ;;  %v5438_v47 = vpop.f32.mrf.mxu0 }
 0x2ae   :  { %v5432_v32 = vpop.f32.mrf.mxu1  ;;  %6094 = vst [vmem:[#allocation22_spill] sm:$0xff] %v5438_v47  ;;  %v1927_v47 = vadd.f32 %v1866_v26, %v1757_v7 }
 0x2af   :  { %6092 = vst [vmem:[#allocation20_spill] sm:$0xff] %v5432_v32 }
 0x2b0   :  { %v5434_v21 = vpop.f32.mrf.mxu1 }
 0x2b1   :  { %6093 = vst [vmem:[#allocation25_spill] sm:$0xff] %v5434_v21  ;;  %v2390_v21 = vpop.f32.mrf.mxu0 }
 0x2b2   :  { %v3851_v1 = vpop.f32.mrf.mxu1 }
 0x2b3   :  { %v5450_v40 = vpop.f32.mrf.mxu0 }
 0x2b4   :  { %v2204_v17 = vpop.f32.mrf.mxu1 }
 0x2b6   :  { %v3852_v57 = vpop.f32.mrf.mxu1 }
 0x2b8   :  { %v2207_v31 = vpop.f32.mrf.mxu1 }
 0x2ba   :  { %v3855_v41 = vpop.f32.mrf.mxu1 }
 0x2bc   :  { %v2220_v10 = vpop.f32.mrf.mxu1 }
 0x2be   :  { %v5436_v48 = vpop.f32.mrf.mxu1 }
 0x2c0   :  { %v2223_v56 = vpop.f32.mrf.mxu1 }
 0x2c2   :  { %v5440_v54 = vpop.f32.mrf.mxu1 }
 0x2c3   :  { %6095 = vst [vmem:[#allocation27_spill] sm:$0xff] %v5440_v54  ;;  %v1759_v54 = vadd.f32 %v5331_v11, %v5364_v36  ;;  %v1761_v36 = vadd.f32 %v5341_v60, %v5377_v51  ;;  %v1764_v60 = vadd.f32 %v5345_v55, %v5381_v0  ;;  %v1765_v55 = vadd.f32 %v5349_v37, %v5388_v34 }
 0x2c4   :  { %v5442_v32 = vpop.f32.mrf.mxu1 }
 0x2c5   :  { %v1929_v43 = vadd.f32 %v3816_v29, %v1759_v54 }
 0x2c6   :  { %v5444_v44 = vpop.f32.mrf.mxu1 }
 0x2c7   :  { %6096 = vst [vmem:[#allocation24_spill] sm:$0xff] %v5444_v44  ;;  %v5460_v44 = vpop.f32.mrf.mxu0 }
 0x2c8   :  { %v5446_v52 = vpop.f32.mrf.mxu1 }
 0x2c9   :  { %6097 = vst [vmem:[#allocation29_spill] sm:$0xff] %v5446_v52  ;;  %v1760_v52 = vadd.f32 %v5337_v27, %v5370_v45  ;;  %v5471_v11 = vpop.f32.mrf.mxu0  ;;  %v2269_v27 = vadd.f32 %v3851_v1, %v2098_v5  ;;  %v2099_v45 = vadd.f32 %v5368_v16, %v1929_v43  ;;  %v1768_v43 = vadd.f32 %v5351_v46, %v5392_v6 }
 0x2ca   :  { %v5452_v30 = vpop.f32.mrf.mxu1 }
 0x2cb   :  { %6098 = vst [vmem:[#allocation26_spill] sm:$0xff] %v5452_v30  ;;  %v2096_v30 = vadd.f32 %v5362_v8, %v1926_v14  ;;  %v1930_v58 = vadd.f32 %v1879_v39, %v1760_v52  ;;  %v1763_v8 = vadd.f32 %v5339_v63, %v5375_v19  ;;  %v1931_v14 = vadd.f32 %v1882_v4, %v1761_v36 }
 0x2cc   :  { %v5456_v3 = vpop.f32.mrf.mxu1  ;;  %v2270_v35 = vadd.f32 %v3852_v57, %v2099_v45  ;;  %v2439_v51 = vadd.f32 %v3869_v22, %v2269_v27  ;;  %v2102_v63 = vadd.f32 %v5379_v20, %v5406_v49  ;;  %v1934_v4 = vadd.f32 %v5416_v15, %v1764_v60  ;;  %v6103_v27 = vld [vmem:[#allocation9_spill] sm:$0xff] }
 0x2cd   :  { %6099 = vst [vmem:[#allocation31_spill] sm:$0xff] %v5456_v3  ;;  %v2267_v62 = vadd.f32 %v2204_v17, %v2096_v30  ;;  %v2097_v3 = vadd.f32 %v5373_v13, %v1927_v47  ;;  %v2100_v52 = vadd.f32 %v5384_v38, %v1930_v58  ;;  %v2406_v13 = vpop.f32.mrf.mxu0  ;;  %v1933_v30 = vadd.f32 %v5410_v24, %v1763_v8  ;;  %v6100_v58 = vld [vmem:[#allocation22_spill] sm:$0xff] }
 0x2ce   :  { %v5464_v12 = vpop.f32.mrf.mxu1  ;;  %v2101_v19 = vadd.f32 %v5394_v61, %v1931_v14  ;;  %v2440_v24 = vadd.f32 %v3870_v18, %v2270_v35  ;;  %v2273_v0 = vadd.f32 %v3855_v41, %v2102_v63  ;;  %v1767_v17 = vadd.f32 %v5347_v23, %v5386_v25  ;;  %v6106_v35 = vld [vmem:[#allocation10_spill] sm:$0xff] }
 0x2cf   :  { %v2268_v29 = vadd.f32 %v2207_v31, %v2097_v3  ;;  %v2437_v39 = vadd.f32 %v2374_v50, %v2267_v62  ;;  %v2271_v7 = vadd.f32 %v2220_v10, %v2100_v52  ;;  %v5492_v1 = vpop.f32.mrf.mxu0  ;;  %v1935_v50 = vadd.f32 %v5422_v42, %v1765_v55  ;;  %v6101_v62 = vld [vmem:[#allocation18_spill] sm:$0xff] }
 0x2d0   :  { %v5467_v53 = vpop.f32.mrf.mxu1  ;;  %v2272_v49 = vadd.f32 %v2223_v56, %v2101_v19  ;;  %v2104_v41 = vadd.f32 %v5402_v9, %v1934_v4  ;;  %v1937_v56 = vadd.f32 %v5420_v28, %v1767_v17  ;;  %v2443_v9 = vadd.f32 %v6100_v58, %v2273_v0  ;;  %v6104_v28 = vld [vmem:[#allocation11_spill] sm:$0xff]  ;;  %v6109_v63 = vld [vmem:[#allocation29_spill] sm:$0xff]  ;;  %v6111_v55 = vld [vmem:[#allocation6_spill] sm:$0xff] }
 0x2d1   :  { %v2438_v3 = vadd.f32 %v2377_v33, %v2268_v29  ;;  %v2103_v33 = vadd.f32 %v5390_v59, %v1933_v30  ;;  %v2441_v20 = vadd.f32 %v2390_v21, %v2271_v7  ;;  %v2409_v31 = vpop.f32.mrf.mxu0  ;;  %v1938_v36 = vadd.f32 %v6101_v62, %v1768_v43  ;;  %v6107_v30 = vld [vmem:[#allocation27_spill] sm:$0xff]  ;;  %v6117_v58 = vld [vmem:[#allocation21_spill] sm:$0xff] }
 0x2d2   :  { %v3887_v26 = vpop.f32.mrf.mxu1  ;;  %v2275_v42 = vadd.f32 %v5442_v32, %v2104_v41  ;;  %v2442_v5 = vadd.f32 %v5460_v44, %v2272_v49  ;;  %v2105_v29 = vadd.f32 %v6104_v28, %v1935_v50  ;;  %v6105_v44 = vld [vmem:[#allocation12_spill] sm:$0xff]  ;;  %v6114_v17 = vld [vmem:[#allocation19_spill] sm:$0xff] }
 0x2d3   :  { %v5488_v54 = vadd.f32 %v3887_v26, %v2439_v51  ;;  %v2274_v59 = vadd.f32 %v5436_v48, %v2103_v33  ;;  %v6102_v26 = vld [vmem:[#allocation13_spill] sm:$0xff]  ;;  %v2108_v50 = vadd.f32 %v6114_v17, %v1938_v36  ;;  %v6115_v41 = vld [vmem:[#allocation20_spill] sm:$0xff]  ;;  %v6119_v62 = vld [vmem:[#allocation23_spill] sm:$0xff] }
 0x2d4   :  { %v2544_v2 = vpop.f32.mrf.mxu1  ;;  %v2106_v45 = vadd.f32 %v6103_v27, %v6102_v26  ;;  %v2276_v19 = vadd.f32 %v6109_v63, %v2105_v29  ;;  %v6112_v33 = vld [vmem:[#allocation25_spill] sm:$0xff]  ;;  %v6116_v43 = vld [vmem:[#allocation31_spill] sm:$0xff] }
 0x2d5   :  { %v5482_v16 = vadd.f32 %v2544_v2, %v2437_v39  ;;  %v2628_v21 = vsel %vm120_vm0, %v5488_v54, 0.0  ;;  %v2444_v14 = vadd.f32 %v5450_v40, %v2274_v59  ;;  %v3881_v2 = vpop.f32.mrf.mxu0  ;;  %v1769_v39 = vadd.f32 %v6106_v35, %v6105_v44  ;;  %v6121_v44 = vld [vmem:[#allocation16_spill] sm:$0xff] }
 0x2d6   :  { %v3888_v47 = vpop.f32.mrf.mxu1  ;;  %v2277_v7 = vadd.f32 %v6107_v30, %v2106_v45  ;;  %v2445_v40 = vadd.f32 %v2406_v13, %v2275_v42 }
 0x2d7   :  { %v2625_v61 = vsel %vm120_vm0, %v5482_v16, 0.0  ;;  %v5499_v15 = vadd.f32 %v3888_v47, %v2440_v24  ;;  %v6108_v47 = vld [vmem:[#allocation15_spill] sm:$0xff]  ;;  %v6110_v24 = vld [vmem:[#allocation8_spill] sm:$0xff]  ;;  %v2422_v59 = vpop.f32.mrf.mxu0 }
 0x2d8   :  { %v2547_v38 = vpop.f32.mrf.mxu1  ;;  %v2107_v60 = vadd.f32 %v6108_v47, %v1937_v56  ;;  %v1771_v0 = vadd.f32 %v6111_v55, %v6110_v24  ;;  %v2447_v42 = vadd.f32 %v5471_v11, %v2277_v7 }
 0x2d9   :  { %v5490_v10 = vadd.f32 %v2547_v38, %v2438_v3  ;;  %v2630_v48 = vsel %vm120_vm0, %v5499_v15, 0.0 }
 0x2da   :  { %v3891_v22 = vpop.f32.mrf.mxu1 }
 0x2db   :  { %v2626_v18 = vsel %vm120_vm0, %v5490_v10, 0.0  ;;  %v5524_v6 = vadd.f32 %v3891_v22, %v2443_v9  ;;  %v1939_v22 = vadd.f32 %v6112_v33, %v1769_v39  ;;  %v6118_v9 = vld [vmem:[#allocation17_spill] sm:$0xff] }
 0x2dc   :  { %v2627_v37 = vadd.f32 %v2626_v18, %v2625_v61  ;;  %v2560_v34 = vpop.f32.mrf.mxu1  ;;  %v6113_v61 = vld [vmem:[#allocation24_spill] sm:$0xff] }
 0x2dd   :  { %v5510_v57 = vadd.f32 %v2560_v34, %v2441_v20  ;;  %v2278_v18 = vadd.f32 %v6113_v61, %v2107_v60  ;;  %v2109_v36 = vadd.f32 %v6119_v62, %v1939_v22 }
 0x2de   :  { %v2629_v23 = vadd.f32 %v2628_v21, %v2627_v37  ;;  %v3892_v25 = vpop.f32.mrf.mxu1  ;;  %v2636_v37 = vsel %vm120_vm0, %v5524_v6, 0.0  ;;  %v1941_v21 = vadd.f32 %v6115_v41, %v1771_v0 }
 0x2df   :  { %v2632_v32 = vsel %vm120_vm0, %v5510_v57, 0.0  ;;  %v5536_v38 = vadd.f32 %v3892_v25, %v2444_v14  ;;  %v2448_v29 = vadd.f32 %v5492_v1, %v2278_v18  ;;  %v2280_v39 = vadd.f32 %v5467_v53, %v2109_v36 }
 0x2e0   :  { %v2631_v8 = vadd.f32 %v2630_v48, %v2629_v23  ;;  %v2563_v46 = vpop.f32.mrf.mxu1  ;;  %v2279_v23 = vadd.f32 %v6116_v43, %v2108_v50  ;;  %v2446_v48 = vadd.f32 %v2409_v31, %v2276_v19  ;;  %v2111_v11 = vadd.f32 %v6121_v44, %v1941_v21 }
 0x2e1   :  { %v5529_v52 = vadd.f32 %v2563_v46, %v2442_v5  ;;  %v2638_v25 = vsel %vm120_vm0, %v5536_v38, 0.0  ;;  %v2110_v5 = vadd.f32 %v6118_v9, %v6117_v58  ;;  %v3882_v46 = vpop.f32.mrf.mxu0 }
 0x2e2   :  { %v2633_v51 = vadd.f32 %v2632_v32, %v2631_v8  ;;  %v3895_v3 = vpop.f32.mrf.mxu1  ;;  %v6120_v32 = vld [vmem:[#allocation26_spill] sm:$0xff]  ;;  %v2449_v47 = vadd.f32 %v2422_v59, %v2279_v23 }
 0x2e3   :  { %v2634_v4 = vsel %vm120_vm0, %v5529_v52, 0.0  ;;  %v2617_v45 = vadd.f32 %v3895_v3, %v2447_v42  ;;  %v2281_v14 = vadd.f32 %v6120_v32, %v2110_v5  ;;  %v2282_v3 = vadd.f32 %v5464_v12, %v2111_v11  ;;  %v2425_v19 = vpop.f32.mrf.mxu0 }
 0x2e4   :  { %v2635_v20 = vadd.f32 %v2634_v4, %v2633_v51  ;;  %v2576_v49 = vpop.f32.mrf.mxu1  ;;  %v2450_v0 = vadd.f32 %v2425_v19, %v2280_v39 }
 0x2e5   :  { %v5547_v34 = vadd.f32 %v2576_v49, %v2445_v40  ;;  %v2644_v1 = vsel %vm120_vm0, %v2617_v45, 0.0  ;;  %v2451_v55 = vadd.f32 %v3881_v2, %v2281_v14  ;;  %v2452_v49 = vadd.f32 %v3882_v46, %v2282_v3  ;;  %v3952_v2 = vld [vmem:[%s6012_s8] sm:$0xff]  }
 0x2e6   :  { %v2637_v13 = vadd.f32 %v2636_v37, %v2635_v20  ;;  %v3896_v56 = vpop.f32.mrf.mxu1 }
 0x2e7   :  { %v2640_v28 = vsel %vm120_vm0, %v5547_v34, 0.0  ;;  %v2618_v30 = vadd.f32 %v3896_v56, %v2448_v29 }
 0x2e8   :  { %v2639_v26 = vadd.f32 %v2638_v25, %v2637_v13  ;;  %v2579_v27 = vpop.f32.mrf.mxu1  ;;  %v3987_v13 = vmov 0.0  }
 0x2e9   :  { %v2616_v8 = vadd.f32 %v2579_v27, %v2446_v48  ;;  %v2646_v24 = vsel %vm120_vm0, %v2618_v30, 0.0  ;;  %3901 = vmatprep.subr.bf16.mxu0 %v3987_v13  ;;  %3903 = vmatprep.mubr.msk.bf16.mxu0 %vm3988_vm1, %v3987_v13 }
 0x2ea   :  { %v2641_v31 = vadd.f32 %v2640_v28, %v2639_v26  ;;  %v3899_v35 = vpop.f32.mrf.mxu1  ;;  %3902 = vmatpush3.bf16.msra.mxu0 %v3952_v2 }
 0x2eb   :  { %v2642_v7 = vsel %vm120_vm0, %v2616_v8, 0.0  ;;  %v2621_v22 = vadd.f32 %v3899_v35, %v2451_v55  ;;  %3907 = vmatprep.subr.bf16.mxu0 %v3987_v13 }
 0x2ec   :  { %v2643_v60 = vadd.f32 %v2642_v7, %v2641_v31  ;;  %v2592_v51 = vpop.f32.mrf.mxu1 }
 0x2ed   :  { %v2619_v63 = vadd.f32 %v2592_v51, %v2449_v47  ;;  %v2652_v37 = vsel %vm120_vm0, %v2621_v22, 0.0 }
 0x2ee   :  { %v2645_v4 = vadd.f32 %v2644_v1, %v2643_v60  ;;  %v3900_v40 = vpop.f32.mrf.mxu1 }
 0x2ef   :  { %v2648_v20 = vsel %vm120_vm0, %v2619_v63, 0.0  ;;  %v2622_v17 = vadd.f32 %v3900_v40, %v2452_v49 }
 0x2f0   :  { %v2647_v33 = vadd.f32 %v2646_v24, %v2645_v4  ;;  %v2595_v53 = vpop.f32.mrf.mxu1 }
 0x2f1   :  { %v2620_v61 = vadd.f32 %v2595_v53, %v2450_v0  ;;  %v2654_v41 = vsel %vm120_vm0, %v2622_v17, 0.0 }
 0x2f2   :  { %v2649_v18 = vadd.f32 %v2648_v20, %v2647_v33 }
 0x2f3   :  { %v2650_v12 = vsel %vm120_vm0, %v2620_v61, 0.0 }
 0x2f4   :  { %v2651_v50 = vadd.f32 %v2650_v12, %v2649_v18 }
 0x2f6   :  { %v2653_v59 = vadd.f32 %v2652_v37, %v2651_v50 }
 0x2f8   :  { %v2655_v21 = vadd.f32 %v2654_v41, %v2653_v59 }
 0x2fa   :  { %v2656_v56 = vrot.slane %v2655_v21, 4 }
 0x2fc   :  { %v2657_v43 = vadd.f32 %v2656_v56, %v2655_v21 }
 0x2fe   :  { %v2658_v23 = vrot.slane %v2657_v43, 2 }
 0x300   :  { %v2659_v25 = vadd.f32 %v2658_v23, %v2657_v43 }
 0x302   :  { %v2660_v42 = vrot.slane %v2659_v25, 1 }
 0x304   :  { %v2661_v48 = vadd.f32 %v2660_v42, %v2659_v25 }
 0x306   :  { %v2663_v58 = vmul.f32 0.0078125, %v2661_v48 }
 0x308   :  { %v5579_v9 = vsub.f32 %v5482_v16, %v2663_v58  ;;  %v5582_v5 = vsub.f32 %v5490_v10, %v2663_v58  ;;  %v5585_v62 = vsub.f32 %v5488_v54, %v2663_v58  ;;  %v5588_v36 = vsub.f32 %v5499_v15, %v2663_v58 }
 0x309   :  { %v5591_v26 = vsub.f32 %v5510_v57, %v2663_v58  ;;  %v5594_v27 = vsub.f32 %v5529_v52, %v2663_v58  ;;  %v5597_v28 = vsub.f32 %v5524_v6, %v2663_v58  ;;  %v5600_v16 = vsub.f32 %v5536_v38, %v2663_v58 }
 0x30a   :  { %v5603_v10 = vsub.f32 %v5547_v34, %v2663_v58  ;;  %v5605_v54 = vsub.f32 %v2616_v8, %v2663_v58  ;;  %v5607_v29 = vsub.f32 %v2617_v45, %v2663_v58  ;;  %v5609_v15 = vsub.f32 %v2618_v30, %v2663_v58 }
 0x30b   :  { %v5611_v57 = vsub.f32 %v2619_v63, %v2663_v58  ;;  %v5613_v46 = vsub.f32 %v2620_v61, %v2663_v58  ;;  %v5615_v52 = vsub.f32 %v2621_v22, %v2663_v58  ;;  %v5617_v6 = vsub.f32 %v2622_v17, %v2663_v58 }
 0x30c   :  { %v2680_v38 = vmul.f32 %v5579_v9, %v5579_v9  ;;  %v2681_v34 = vmul.f32 %v5582_v5, %v5582_v5  ;;  %v2682_v45 = vmul.f32 %v5585_v62, %v5585_v62  ;;  %v2683_v8 = vmul.f32 %v5588_v36, %v5588_v36 }
 0x30d   :  { %v2684_v11 = vmul.f32 %v5591_v26, %v5591_v26  ;;  %v2685_v39 = vmul.f32 %v5594_v27, %v5594_v27  ;;  %v2686_v47 = vmul.f32 %v5597_v28, %v5597_v28  ;;  %v2687_v3 = vmul.f32 %v5600_v16, %v5600_v16 }
 0x30e   :  { %v2696_v32 = vsel %vm120_vm0, %v2680_v38, 0.0  ;;  %v2697_v14 = vsel %vm120_vm0, %v2681_v34, 0.0  ;;  %v2699_v31 = vsel %vm120_vm0, %v2682_v45, 0.0  ;;  %v2701_v30 = vsel %vm120_vm0, %v2683_v8, 0.0 }
 0x30f   :  { %v2698_v44 = vadd.f32 %v2697_v14, %v2696_v32  ;;  %v2703_v60 = vsel %vm120_vm0, %v2684_v11, 0.0  ;;  %v2705_v1 = vsel %vm120_vm0, %v2685_v39, 0.0  ;;  %v2688_v19 = vmul.f32 %v5603_v10, %v5603_v10 }
 0x310   :  { %v2707_v4 = vsel %vm120_vm0, %v2686_v47, 0.0  ;;  %v2689_v24 = vmul.f32 %v5605_v54, %v5605_v54  ;;  %v2709_v55 = vsel %vm120_vm0, %v2687_v3, 0.0  ;;  %v2690_v33 = vmul.f32 %v5607_v29, %v5607_v29 }
 0x311   :  { %v2700_v35 = vadd.f32 %v2699_v31, %v2698_v44  ;;  %v2711_v53 = vsel %vm120_vm0, %v2688_v19, 0.0  ;;  %v2691_v20 = vmul.f32 %v5609_v15, %v5609_v15  ;;  %v2692_v18 = vmul.f32 %v5611_v57, %v5611_v57  ;;  %v3548_v19 = vld [vmem:[%s6011_s7] ss:$0 sm:$0xff] }
 0x312   :  { %v2713_v49 = vsel %vm120_vm0, %v2689_v24, 0.0  ;;  %v2715_v17 = vsel %vm120_vm0, %v2690_v33, 0.0  ;;  %v2693_v50 = vmul.f32 %v5613_v46, %v5613_v46  ;;  %v2694_v41 = vmul.f32 %v5615_v52, %v5615_v52 }
 0x313   :  { %v2702_v7 = vadd.f32 %v2701_v30, %v2700_v35  ;;  %v2717_v37 = vsel %vm120_vm0, %v2691_v20, 0.0  ;;  %v2719_v21 = vsel %vm120_vm0, %v2692_v18, 0.0  ;;  %v2695_v56 = vmul.f32 %v5617_v6, %v5617_v6 }
 0x314   :  { %v2721_v43 = vsel %vm120_vm0, %v2693_v50, 0.0  ;;  %v2723_v25 = vsel %vm120_vm0, %v2694_v41, 0.0 }
 0x315   :  { %v2704_v51 = vadd.f32 %v2703_v60, %v2702_v7  ;;  %v2725_v48 = vsel %vm120_vm0, %v2695_v56, 0.0 }
 0x317   :  { %v2706_v63 = vadd.f32 %v2705_v1, %v2704_v51  ;;  %v3547_v1 = vld [vmem:[%s6010_s6] ss:$0 sm:$0xff] }
 0x319   :  { %v2708_v40 = vadd.f32 %v2707_v4, %v2706_v63 }
 0x31b   :  { %v2710_v0 = vadd.f32 %v2709_v55, %v2708_v40 }
 0x31d   :  { %v2712_v22 = vadd.f32 %v2711_v53, %v2710_v0 }
 0x31f   :  { %v2714_v61 = vadd.f32 %v2713_v49, %v2712_v22 }
 0x321   :  { %v2716_v12 = vadd.f32 %v2715_v17, %v2714_v61 }
 0x323   :  { %v2718_v59 = vadd.f32 %v2717_v37, %v2716_v12 }
 0x325   :  { %v2720_v2 = vadd.f32 %v2719_v21, %v2718_v59 }
 0x327   :  { %v2722_v23 = vadd.f32 %v2721_v43, %v2720_v2 }
 0x329   :  { %v2724_v42 = vadd.f32 %v2723_v25, %v2722_v23 }
 0x32b   :  { %v2726_v58 = vadd.f32 %v2725_v48, %v2724_v42 }
 0x32d   :  { %v2727_v38 = vrot.slane %v2726_v58, 4 }
 0x32f   :  { %v2728_v34 = vadd.f32 %v2727_v38, %v2726_v58 }
 0x331   :  { %v2729_v45 = vrot.slane %v2728_v34, 2 }
 0x333   :  { %v2730_v8 = vadd.f32 %v2729_v45, %v2728_v34 }
 0x335   :  { %v2731_v32 = vrot.slane %v2730_v8, 1 }
 0x337   :  { %v2732_v14 = vadd.f32 %v2731_v32, %v2730_v8 }
 0x339   :  { %v2733_v44 = vmul.f32 0.0078125, %v2732_v14 }
 0x33b   :  { %v2734_v11 = vadd.f32 1e-05, %v2733_v44 }
 0x33d   :  { %3956 = vrsqrt.f32 %v2734_v11 }
 0x34a   :  { %v3957_v31 = vpop.eup %3956 }
 0x34b   :  { %v2736_v35 = vmul.f32 %v3957_v31, %v5579_v9  ;;  %v2737_v39 = vmul.f32 %v3957_v31, %v5582_v5  ;;  %v2738_v30 = vmul.f32 %v3957_v31, %v5585_v62  ;;  %v2739_v7 = vmul.f32 %v3957_v31, %v5588_v36 }
 0x34c   :  { %v2740_v47 = vmul.f32 %v3957_v31, %v5591_v26  ;;  %v2741_v60 = vmul.f32 %v3957_v31, %v5594_v27  ;;  %v2742_v51 = vmul.f32 %v3957_v31, %v5597_v28  ;;  %v2743_v3 = vmul.f32 %v3957_v31, %v5600_v16 }
 0x34d   :  { %v2744_v9 = vmul.f32 %v3957_v31, %v5603_v10  ;;  %v2745_v5 = vmul.f32 %v3957_v31, %v5605_v54  ;;  %v2746_v62 = vmul.f32 %v3957_v31, %v5607_v29  ;;  %v2747_v36 = vmul.f32 %v3957_v31, %v5609_v15 }
 0x34e   :  { %v2748_v26 = vmul.f32 %v3957_v31, %v5611_v57  ;;  %v2749_v27 = vmul.f32 %v3957_v31, %v5613_v46  ;;  %v2750_v28 = vmul.f32 %v3957_v31, %v5615_v52  ;;  %v2751_v16 = vmul.f32 %v3957_v31, %v5617_v6 }
 0x34f   :  { %v2758_v63 = vmul.f32 %v3547_v1, %v2736_v35  ;;  %v2759_v10 = vmul.f32 %v3547_v1, %v2737_v39  ;;  %v2766_v4 = vmul.f32 %v3547_v1, %v2744_v9  ;;  %v2767_v54 = vmul.f32 %v3547_v1, %v2745_v5 }
 0x350   :  { %v2768_v40 = vmul.f32 %v3547_v1, %v2746_v62  ;;  %v2760_v29 = vmul.f32 %v3547_v1, %v2738_v30  ;;  %v2769_v24 = vmul.f32 %v3547_v1, %v2747_v36  ;;  %v2761_v15 = vmul.f32 %v3547_v1, %v2739_v7 }
 0x351   :  { %v2770_v55 = vmul.f32 %v3547_v1, %v2748_v26  ;;  %v5689_v57 = vadd.f32 %v3548_v19, %v2758_v63  ;;  %v5691_v46 = vadd.f32 %v3548_v19, %v2759_v10  ;;  %v5693_v52 = vadd.f32 %v3548_v19, %v2766_v4 }
 0x352   :  { %v5695_v6 = vadd.f32 %v3548_v19, %v2767_v54  ;;  %v5697_v0 = vadd.f32 %v3548_v19, %v2768_v40  ;;  %v2762_v33 = vmul.f32 %v3547_v1, %v2740_v47  ;;  %v2771_v53 = vmul.f32 %v3547_v1, %v2749_v27 }
 0x353   :  { %v2763_v22 = vmul.f32 %v3547_v1, %v2741_v60  ;;  %v2764_v20 = vmul.f32 %v3547_v1, %v2742_v51  ;;  %v5699_v49 = vadd.f32 %v3548_v19, %v2760_v29  ;;  %v5701_v61 = vadd.f32 %v3548_v19, %v2769_v24 }
 0x354   :  { %v2772_v18 = vmul.f32 %v3547_v1, %v2750_v28  ;;  %v5703_v17 = vadd.f32 %v3548_v19, %v2761_v15  ;;  %v5705_v12 = vadd.f32 %v3548_v19, %v2770_v55  ;;  %v2796_v50 = vmax.f32 %v5689_v57, 0.0 }
 0x355   :  { %v2797_v37 = vmax.f32 %v5691_v46, 0.0  ;;  %v2804_v59 = vmax.f32 %v5693_v52, 0.0  ;;  %v2805_v41 = vmax.f32 %v5695_v6, 0.0  ;;  %v2806_v21 = vmax.f32 %v5697_v0, 0.0 }
 0x356   :  { %v2765_v2 = vmul.f32 %v3547_v1, %v2743_v3  ;;  %v2773_v56 = vmul.f32 %v3547_v1, %v2751_v16  ;;  %v5712_v43 = vadd.f32 %v3548_v19, %v2762_v33  ;;  %v5714_v23 = vadd.f32 %v3548_v19, %v2771_v53 }
 0x357   :  { %v2798_v25 = vmax.f32 %v5699_v49, 0.0  ;;  %v2807_v42 = vmax.f32 %v5701_v61, 0.0  ;;  %v2833_v48 = vsel %vm120_vm0, %v2804_v59, 0.0  ;;  %v2834_v58 = vsel %vm120_vm0, %v2805_v41, 0.0 }
 0x358   :  { %v5724_v38 = vadd.f32 %v3548_v19, %v2763_v22  ;;  %v5726_v34 = vadd.f32 %v3548_v19, %v2772_v18  ;;  %v2799_v45 = vmax.f32 %v5703_v17, 0.0  ;;  %v2835_v8 = vadd.f32 %v2834_v58, %v2833_v48 }
 0x359   :  { %v2808_v32 = vmax.f32 %v5705_v12, 0.0  ;;  %v2836_v14 = vsel %vm120_vm0, %v2806_v21, 0.0  ;;  %v2812_v44 = vsel %vm120_vm0, %v2796_v50, 0.0  ;;  %v2813_v11 = vsel %vm120_vm0, %v2797_v37, 0.0 }
 0x35a   :  { %v5739_v31 = vadd.f32 %v3548_v19, %v2764_v20  ;;  %v5741_v35 = vadd.f32 %v3548_v19, %v2773_v56  ;;  %v2837_v39 = vadd.f32 %v2836_v14, %v2835_v8  ;;  %v2814_v30 = vadd.f32 %v2813_v11, %v2812_v44 }
 0x35b   :  { %v2800_v7 = vmax.f32 %v5712_v43, 0.0  ;;  %v2809_v47 = vmax.f32 %v5714_v23, 0.0  ;;  %v2838_v60 = vsel %vm120_vm0, %v2807_v42, 0.0  ;;  %v2815_v51 = vsel %vm120_vm0, %v2798_v25, 0.0 }
 0x35c   :  { %v5751_v3 = vadd.f32 %v3548_v19, %v2765_v2  ;;  %v2839_v1 = vadd.f32 %v2838_v60, %v2837_v39  ;;  %v2816_v9 = vadd.f32 %v2815_v51, %v2814_v30  ;;  %v2801_v5 = vmax.f32 %v5724_v38, 0.0 }
 0x35d   :  { %v2810_v62 = vmax.f32 %v5726_v34, 0.0  ;;  %v2840_v36 = vsel %vm120_vm0, %v2808_v32, 0.0  ;;  %v2817_v26 = vsel %vm120_vm0, %v2799_v45, 0.0  ;;  %v2802_v16 = vmax.f32 %v5739_v31, 0.0 }
 0x35e   :  { %v2841_v27 = vadd.f32 %v2840_v36, %v2839_v1  ;;  %v2818_v28 = vadd.f32 %v2817_v26, %v2816_v9  ;;  %v2811_v63 = vmax.f32 %v5741_v35, 0.0  ;;  %v2842_v19 = vsel %vm120_vm0, %v2809_v47, 0.0 }
 0x35f   :  { %v2819_v10 = vsel %vm120_vm0, %v2800_v7, 0.0  ;;  %v2803_v40 = vmax.f32 %v5751_v3, 0.0  ;;  %v2844_v29 = vsel %vm120_vm0, %v2810_v62, 0.0  ;;  %v2821_v24 = vsel %vm120_vm0, %v2801_v5, 0.0 }
 0x360   :  { %v2843_v4 = vadd.f32 %v2842_v19, %v2841_v27  ;;  %v2820_v54 = vadd.f32 %v2819_v10, %v2818_v28  ;;  %v2846_v33 = vsel %vm120_vm0, %v2811_v63, 0.0  ;;  %v2823_v53 = vsel %vm120_vm0, %v2802_v16, 0.0  ;;  %v2926_v10 = vld [vmem:[%s6014_s10] sm:$0x3] }
 0x361   :  { %v2825_v18 = vsel %vm120_vm0, %v2803_v40, 0.0 }
 0x362   :  { %v2845_v15 = vadd.f32 %v2844_v29, %v2843_v4  ;;  %v2822_v55 = vadd.f32 %v2821_v24, %v2820_v54  ;;  %v2940_v29 = vsel %vm2938_vm3, %v2926_v10, 0  ;;  %v3549_v24 = vld [vmem:[%s6013_s9] ss:$0 sm:$0xff] }
 0x364   :  { %v2847_v22 = vadd.f32 %v2846_v33, %v2845_v15  ;;  %v2824_v20 = vadd.f32 %v2823_v53, %v2822_v55 }
 0x366   :  { %v2848_v2 = vrot.slane %v2847_v22, 4  ;;  %v2826_v56 = vadd.f32 %v2825_v18, %v2824_v20 }
 0x368   :  { %v2849_v48 = vadd.f32 %v2848_v2, %v2847_v22  ;;  %v2827_v58 = vrot.slane %v2826_v56, 4  ;;  %v3953_v2 = vld [vmem:[%s6016_s12] sm:$0xff]  }
 0x36a   :  { %v2850_v8 = vrot.slane %v2849_v48, 2  ;;  %v2828_v14 = vadd.f32 %v2827_v58, %v2826_v56 }
 0x36c   :  { %v2851_v44 = vadd.f32 %v2850_v8, %v2849_v48  ;;  %v2829_v11 = vrot.slane %v2828_v14, 2 }
 0x36e   :  { %v2852_v39 = vrot.slane %v2851_v44, 1  ;;  %v2830_v30 = vadd.f32 %v2829_v11, %v2828_v14 }
 0x370   :  { %v2853_v60 = vadd.f32 %v2852_v39, %v2851_v44  ;;  %v2831_v51 = vrot.slane %v2830_v30, 1 }
 0x372   :  { %v2856_v1 = vmul.f32 0.015625, %v2853_v60  ;;  %v2832_v9 = vadd.f32 %v2831_v51, %v2830_v30  ;;  %v3989_v30 = vmov 1966171168   ;;  %v2992_v51 = vlaneseq }
 0x373   :  { %v2990_v60 = vunpack.c.l.s4 %v3989_v30 }
 0x374   :  { %v2855_v36 = vmul.f32 0.015625, %v2832_v9  ;;  %v2858_v26 = vpack.c.bf16 %v2856_v1, %v2856_v1  ;;  %v2993_v9 = vshrl.u32 %v2992_v51, 7 }
 0x375   :  { %v2991_v1 = vunpack.c.0.s8 %v2990_v60 }
 0x376   :  { %v2857_v27 = vpack.c.bf16 %v2855_v36, %v2855_v36  ;;  %v2871_v28 = vunpack.c.l.b16 %v2858_v26 }
 0x377   :  { %v2994_v36 = vsub.s32 %v2991_v1, %v2993_v9 }
 0x378   :  { %v2870_v19 = vunpack.c.l.b16 %v2857_v27 }
 0x37a   :  { %v2873_v4 = vsel %vm2872_vm2, %v2871_v28, %v2870_v19  ;;  %v3013_v28 = vsub.s32 0, %v2993_v9 }
 0x37b   :  { %v2874_v54 = vpack.c.b16 %v2873_v4, %v2873_v4 }
 0x37d   :  { %3904 = vmatmul.mubr.msk.bf16.vlgmr.msra.gmra.mxu0 %vm120_vm0, %v2874_v54 }
 0x37e   :  { %3908 = vmatpush3.bf16.msra.mxu0 %v2940_v29  ;;  %3909 = vmatprep.mubr.msk.bf16.mxu0 %vm3988_vm1, %v3987_v13  ;;  %v3552_v13 = vld [vmem:[%s6015_s11] ss:$0 sm:$0xff] }
 0x37f   :  { %3913 = vmatprep.subr.bf16.mxu0 %v3953_v2 }
 0x43d   :  { %v2918_v15 = vpop.f32.mrf.mxu0 }
 0x43e   :  { %v2919_v55 = vadd.f32 %v3549_v24, %v2918_v15 }
 0x43f   :  { %v3905_v33 = vpop.f32.mrf.mxu0 }
 0x440   :  { %v2924_v53 = vmax.f32 %v2919_v55, 0.0 }
 0x441   :  { %v2921_v22 = vpop.f32.mrf.mxu0 }
 0x442   :  { %v2925_v20 = vpack.c.bf16 %v2924_v53, %v2924_v53 }
 0x443   :  { %v3906_v18 = vpop.f32.mrf.mxu0 }
 0x444   :  { %3910 = vmatmul.mubr.msk.bf16.vlgmr.msra.gmra.mxu0 %vm2934_vm4, %v2925_v20 }
 0x445   :  { %3914 = vmatpush3.bf16.msra.mxu0 %v3953_v2 }
 0x504   :  { %v2976_v56 = vpop.f32.mrf.mxu0 }
 0x505   :  { %v2977_v48 = vadd.f32 %v3552_v13, %v2976_v56 }
 0x506   :  { %v3911_v58 = vpop.f32.mrf.mxu0 }
 0x507   :  { %v3554_v8 = vmul.f32 -1.442695, %v2977_v48 }
 0x508   :  { %v2979_v14 = vpop.f32.mrf.mxu0 }
 0x509   :  { %3958 = vpow2.f32 %v3554_v8 }
 0x50a   :  { %v3912_v44 = vpop.f32.mrf.mxu0 }
 0x516   :  { %v3959_v11 = vpop.eup %3958 }
 0x517   :  { %v2985_v39 = vadd.f32 1.0, %v3959_v11 }
 0x519   :  { %3960 = vrcp.f32 %v2985_v39 }
 0x526   :  { %v3961_v26 = vpop.eup %3960 }
 0x527   :  { %v2995_v27 = vrot.slane %v3961_v26, %v2994_v36 }
 0x529   :  { %v2996_v19 = vcombine.high %v2995_v27, %v2995_v27  ;;  %v3003_v10 = vrot.slane %v2995_v27, %v2994_v36 }
 0x52b   :  { %v3014_v4 = vrot.slane %v3003_v10, %v3013_v28  ;;  %v3010_v54 = vrot.slane %v2996_v19, %v2994_v36 }
 0x52d   :  { %v3021_v29 = vmul.f32 %v3014_v4, %v2796_v50  ;;  %v3022_v24 = vmul.f32 %v3014_v4, %v2797_v37  ;;  %v3023_v15 = vmul.f32 %v3014_v4, %v2798_v25  ;;  %v3024_v55 = vmul.f32 %v3014_v4, %v2799_v45 }
 0x52e   :  { %v3025_v33 = vmul.f32 %v3014_v4, %v2800_v7  ;;  %v3026_v53 = vmul.f32 %v3014_v4, %v2801_v5  ;;  %v3018_v18 = vrot.slane %v3010_v54, %v3013_v28  ;;  %v3027_v46 = vmul.f32 %v3014_v4, %v2802_v16 }
 0x52f   :  { %v3054_v22 = vpack.c.bf16 %v3022_v24, %v3021_v29  ;;  %v3055_v20 = vpack.c.bf16 %v3024_v55, %v3023_v15  ;;  %v3028_v49 = vmul.f32 %v3014_v4, %v2803_v40 }
 0x530   :  { %v3056_v57 = vpack.c.bf16 %v3026_v53, %v3025_v33  ;;  %v3029_v17 = vmul.f32 %v3018_v18, %v2804_v59  ;;  %v3030_v50 = vmul.f32 %v3018_v18, %v2805_v41  ;;  %v3031_v25 = vmul.f32 %v3018_v18, %v2806_v21 }
 0x531   :  { %3915 = vmatprep.mubr.msk.bf16.mxu0 %vm120_vm0, %v3054_v22  ;;  %v3057_v37 = vpack.c.bf16 %v3028_v49, %v3027_v46  ;;  %v3032_v38 = vmul.f32 %v3018_v18, %v2807_v42  ;;  %v3033_v45 = vmul.f32 %v3018_v18, %v2808_v32  ;;  %v3034_v52 = vmul.f32 %v3018_v18, %v2809_v47 }
 0x532   :  { %3916 = vmatmul.mubr.msk.bf16.vlgmr.msra.gmra.mxu0 %vm120_vm0, %v3055_v20  ;;  %v3058_v43 = vpack.c.bf16 %v3030_v50, %v3029_v17  ;;  %v3035_v41 = vmul.f32 %v3018_v18, %v2810_v62  ;;  %v3036_v0 = vmul.f32 %v3018_v18, %v2811_v63 }
 0x533   :  { %3919 = vmatprep.mubr.msk.bf16.mxu0 %vm120_vm0, %v3056_v57  ;;  %v3059_v6 = vpack.c.bf16 %v3032_v38, %v3031_v25  ;;  %v3060_v59 = vpack.c.bf16 %v3034_v52, %v3033_v45 }
 0x534   :  { %v3061_v61 = vpack.c.bf16 %v3036_v0, %v3035_v41 }
 0x53a   :  { %3920 = vmatmul.mubr.msk.bf16.gmra.mxu0 %vm120_vm0, %v3057_v37 }
 0x53b   :  { %3923 = vmatprep.mubr.msk.bf16.mxu0 %vm120_vm0, %v3058_v43 }
 0x542   :  { %3924 = vmatmul.mubr.msk.bf16.gmra.mxu0 %vm120_vm0, %v3059_v6 }
 0x543   :  { %3927 = vmatprep.mubr.msk.bf16.mxu0 %vm120_vm0, %v3060_v59 }
 0x54a   :  { %3928 = vmatmul.mubr.msk.bf16.gmra.mxu0 %vm120_vm0, %v3061_v61 }
 0x5f2   :  { %v3917_v12 = vpop.f32.mrf.mxu0 }
 0x5f3   :  { %v3196_v3 = vsel %vm120_vm0, %v3917_v12, 0.0 }
 0x5f4   :  { %v3128_v21 = vpop.f32.mrf.mxu0 }
 0x5f5   :  { %v3193_v32 = vsel %vm120_vm0, %v3128_v21, 0.0 }
 0x5f6   :  { %v3918_v42 = vpop.f32.mrf.mxu0 }
 0x5f7   :  { %v3198_v35 = vsel %vm120_vm0, %v3918_v42, 0.0 }
 0x5f8   :  { %v3131_v23 = vpop.f32.mrf.mxu0 }
 0x5f9   :  { %v3194_v31 = vsel %vm120_vm0, %v3131_v23, 0.0 }
 0x5fa   :  { %v3195_v7 = vadd.f32 %v3194_v31, %v3193_v32  ;;  %v3921_v47 = vpop.f32.mrf.mxu0 }
 0x5fb   :  { %v3204_v58 = vsel %vm120_vm0, %v3921_v47, 0.0 }
 0x5fc   :  { %v3197_v34 = vadd.f32 %v3196_v3, %v3195_v7  ;;  %v3144_v5 = vpop.f32.mrf.mxu0 }
 0x5fd   :  { %v3200_v63 = vsel %vm120_vm0, %v3144_v5, 0.0 }
 0x5fe   :  { %v3199_v62 = vadd.f32 %v3198_v35, %v3197_v34  ;;  %v3922_v16 = vpop.f32.mrf.mxu0 }
 0x5ff   :  { %v3206_v44 = vsel %vm120_vm0, %v3922_v16, 0.0 }
 0x600   :  { %v3201_v40 = vadd.f32 %v3200_v63, %v3199_v62  ;;  %v3147_v2 = vpop.f32.mrf.mxu0 }
 0x601   :  { %v3202_v13 = vsel %vm120_vm0, %v3147_v2, 0.0 }
 0x602   :  { %v3203_v56 = vadd.f32 %v3202_v13, %v3201_v40  ;;  %v5846_v48 = vpop.f32.mrf.mxu0 }
 0x603   :  { %v3212_v26 = vsel %vm120_vm0, %v5846_v48, 0.0 }
 0x604   :  { %v3205_v8 = vadd.f32 %v3204_v58, %v3203_v56  ;;  %v3160_v14 = vpop.f32.mrf.mxu0 }
 0x605   :  { %v3208_v30 = vsel %vm120_vm0, %v3160_v14, 0.0 }
 0x606   :  { %v3207_v11 = vadd.f32 %v3206_v44, %v3205_v8  ;;  %v3926_v39 = vpop.f32.mrf.mxu0 }
 0x607   :  { %v3214_v19 = vsel %vm120_vm0, %v3926_v39, 0.0 }
 0x608   :  { %v3209_v60 = vadd.f32 %v3208_v30, %v3207_v11  ;;  %v3163_v51 = vpop.f32.mrf.mxu0 }
 0x609   :  { %v3210_v1 = vsel %vm120_vm0, %v3163_v51, 0.0 }
 0x60a   :  { %v3211_v9 = vadd.f32 %v3210_v1, %v3209_v60  ;;  %v5852_v36 = vpop.f32.mrf.mxu0 }
 0x60b   :  { %v3220_v33 = vsel %vm120_vm0, %v5852_v36, 0.0 }
 0x60c   :  { %v3213_v27 = vadd.f32 %v3212_v26, %v3211_v9  ;;  %v3176_v28 = vpop.f32.mrf.mxu0 }
 0x60d   :  { %v3216_v54 = vsel %vm120_vm0, %v3176_v28, 0.0 }
 0x60e   :  { %v3215_v10 = vadd.f32 %v3214_v19, %v3213_v27  ;;  %v5857_v4 = vpop.f32.mrf.mxu0 }
 0x60f   :  { %v3222_v22 = vsel %vm120_vm0, %v5857_v4, 0.0 }
 0x610   :  { %v3217_v29 = vadd.f32 %v3216_v54, %v3215_v10  ;;  %v3179_v24 = vpop.f32.mrf.mxu0 }
 0x611   :  { %v3218_v15 = vsel %vm120_vm0, %v3179_v24, 0.0 }
 0x612   :  { %v3219_v55 = vadd.f32 %v3218_v15, %v3217_v29 }
 0x614   :  { %v3221_v53 = vadd.f32 %v3220_v33, %v3219_v55 }
 0x616   :  { %v3223_v20 = vadd.f32 %v3222_v22, %v3221_v53 }
 0x618   :  { %v3224_v18 = vrot.slane %v3223_v20, 4 }
 0x61a   :  { %v3225_v57 = vadd.f32 %v3224_v18, %v3223_v20 }
 0x61c   :  { %v3226_v46 = vrot.slane %v3225_v57, 2 }
 0x61e   :  { %v3227_v49 = vadd.f32 %v3226_v46, %v3225_v57 }
 0x620   :  { %v3228_v17 = vrot.slane %v3227_v49, 1 }
 0x622   :  { %v3229_v50 = vadd.f32 %v3228_v17, %v3227_v49 }
 0x624   :  { %v3230_v37 = vmul.f32 0.0078125, %v3229_v50 }
 0x626   :  { %v5865_v43 = vsub.f32 %v3128_v21, %v3230_v37  ;;  %v5867_v25 = vsub.f32 %v3131_v23, %v3230_v37  ;;  %v5869_v38 = vsub.f32 %v3917_v12, %v3230_v37  ;;  %v5871_v45 = vsub.f32 %v3918_v42, %v3230_v37 }
 0x627   :  { %v5877_v59 = vsub.f32 %v3144_v5, %v3230_v37  ;;  %v5881_v0 = vsub.f32 %v3147_v2, %v3230_v37  ;;  %v5887_v23 = vsub.f32 %v3921_v47, %v3230_v37  ;;  %v5892_v3 = vsub.f32 %v3922_v16, %v3230_v37 }
 0x628   :  { %v3247_v52 = vmul.f32 %v5865_v43, %v5865_v43  ;;  %v3248_v6 = vmul.f32 %v5867_v25, %v5867_v25  ;;  %v3249_v41 = vmul.f32 %v5869_v38, %v5869_v38  ;;  %v3250_v61 = vmul.f32 %v5871_v45, %v5871_v45 }
 0x629   :  { %v3251_v32 = vmul.f32 %v5877_v59, %v5877_v59  ;;  %v3252_v34 = vmul.f32 %v5881_v0, %v5881_v0  ;;  %v3239_v62 = vsub.f32 %v3160_v14, %v3230_v37  ;;  %v3253_v63 = vmul.f32 %v5887_v23, %v5887_v23 }
 0x62a   :  { %v3263_v12 = vsel %vm120_vm0, %v3247_v52, 0.0  ;;  %v3264_v21 = vsel %vm120_vm0, %v3248_v6, 0.0  ;;  %v3266_v31 = vsel %vm120_vm0, %v3249_v41, 0.0  ;;  %v3268_v5 = vsel %vm120_vm0, %v3250_v61, 0.0 }
 0x62b   :  { %v3265_v42 = vadd.f32 %v3264_v21, %v3263_v12  ;;  %v3270_v47 = vsel %vm120_vm0, %v3251_v32, 0.0  ;;  %v3240_v2 = vsub.f32 %v3163_v51, %v3230_v37  ;;  %v3254_v13 = vmul.f32 %v5892_v3, %v5892_v3 }
 0x62c   :  { %v3272_v16 = vsel %vm120_vm0, %v3252_v34, 0.0  ;;  %v3241_v58 = vsub.f32 %v5846_v48, %v3230_v37  ;;  %v3255_v8 = vmul.f32 %v3239_v62, %v3239_v62  ;;  %v3274_v44 = vsel %vm120_vm0, %v3253_v63, 0.0 }
 0x62d   :  { %v3267_v7 = vadd.f32 %v3266_v31, %v3265_v42  ;;  %v3242_v14 = vsub.f32 %v3926_v39, %v3230_v37  ;;  %v3256_v30 = vmul.f32 %v3240_v2, %v3240_v2  ;;  %v3276_v60 = vsel %vm120_vm0, %v3254_v13, 0.0 }
 0x62e   :  { %v3243_v9 = vsub.f32 %v3176_v28, %v3230_v37  ;;  %v3257_v26 = vmul.f32 %v3241_v58, %v3241_v58  ;;  %v3278_v51 = vsel %vm120_vm0, %v3255_v8, 0.0  ;;  %v3244_v19 = vsub.f32 %v3179_v24, %v3230_v37 }
 0x62f   :  { %v3269_v35 = vadd.f32 %v3268_v5, %v3267_v7  ;;  %v3258_v10 = vmul.f32 %v3242_v14, %v3242_v14  ;;  %v3280_v54 = vsel %vm120_vm0, %v3256_v30, 0.0  ;;  %v3245_v48 = vsub.f32 %v5852_v36, %v3230_v37 }
 0x630   :  { %v3259_v15 = vmul.f32 %v3243_v9, %v3243_v9  ;;  %v3282_v55 = vsel %vm120_vm0, %v3257_v26, 0.0  ;;  %v3246_v33 = vsub.f32 %v5857_v4, %v3230_v37  ;;  %v3260_v53 = vmul.f32 %v3244_v19, %v3244_v19 }
 0x631   :  { %v3271_v40 = vadd.f32 %v3270_v47, %v3269_v35  ;;  %v3284_v28 = vsel %vm120_vm0, %v3258_v10, 0.0  ;;  %v3261_v20 = vmul.f32 %v3245_v48, %v3245_v48  ;;  %v3580_v35 = vld [vmem:[%s6017_s13] ss:$0 sm:$0xff] }
 0x632   :  { %v3286_v18 = vsel %vm120_vm0, %v3259_v15, 0.0  ;;  %v3262_v57 = vmul.f32 %v3246_v33, %v3246_v33  ;;  %v3288_v46 = vsel %vm120_vm0, %v3260_v53, 0.0  ;;  %v3559_v53 = vld [vmem:[%s6004_s0 + $0x51] sm:$0xff] }
 0x633   :  { %v3273_v56 = vadd.f32 %v3272_v16, %v3271_v40  ;;  %v3290_v36 = vsel %vm120_vm0, %v3261_v20, 0.0 }
 0x634   :  { %v3292_v50 = vsel %vm120_vm0, %v3262_v57, 0.0 }
 0x635   :  { %v3275_v11 = vadd.f32 %v3274_v44, %v3273_v56 }
 0x637   :  { %v3277_v1 = vadd.f32 %v3276_v60, %v3275_v11 }
 0x639   :  { %v3279_v27 = vadd.f32 %v3278_v51, %v3277_v1 }
 0x63b   :  { %v3281_v29 = vadd.f32 %v3280_v54, %v3279_v27  ;;  %v3556_v54 = vld [vmem:[%s6004_s0 + $0x21] sm:$0xff] }
 0x63d   :  { %v3283_v39 = vadd.f32 %v3282_v55, %v3281_v29  ;;  %v3557_v29 = vld [vmem:[%s6004_s0 + $0x31] sm:$0xff] }
 0x63f   :  { %v3285_v22 = vadd.f32 %v3284_v28, %v3283_v39  ;;  %v3560_v28 = vld [vmem:[%s6004_s0 + $0x61] sm:$0xff] }
 0x641   :  { %v3287_v24 = vadd.f32 %v3286_v18, %v3285_v22  ;;  %v3561_v22 = vld [vmem:[%s6004_s0 + $0x71] sm:$0xff] }
 0x643   :  { %v3289_v49 = vadd.f32 %v3288_v46, %v3287_v24  ;;  %v3562_v46 = vld [vmem:[%s6004_s0 + $0x81] sm:$0xff] }
 0x645   :  { %v3291_v17 = vadd.f32 %v3290_v36, %v3289_v49  ;;  %v3563_v49 = vld [vmem:[%s6004_s0 + $0xb1] sm:$0xff]  ;;  %v3564_v36 = vld [vmem:[%s6004_s0 + $0xc1] sm:$0xff] }
 0x647   :  { %v3293_v52 = vadd.f32 %v3292_v50, %v3291_v17 }
 0x649   :  { %v3294_v6 = vrot.slane %v3293_v52, 4 }
 0x64b   :  { %v3295_v4 = vadd.f32 %v3294_v6, %v3293_v52 }
 0x64d   :  { %v3296_v37 = vrot.slane %v3295_v4, 2 }
 0x64f   :  { %v3297_v41 = vadd.f32 %v3296_v37, %v3295_v4  ;;  %v3565_v4 = vld [vmem:[%s6004_s0 + $0xd1] sm:$0xff]  ;;  %v3566_v37 = vld [vmem:[%s6004_s0 + $0xe1] sm:$0xff] }
 0x651   :  { %v3298_v61 = vrot.slane %v3297_v41, 1 }
 0x653   :  { %v3299_v12 = vadd.f32 %v3298_v61, %v3297_v41  ;;  %v3567_v41 = vld [vmem:[%s6004_s0 + $0xf1] sm:$0xff] }
 0x655   :  { %v3300_v21 = vmul.f32 0.0078125, %v3299_v12 }
 0x657   :  { %v3301_v42 = vadd.f32 1e-05, %v3300_v21 }
 0x659   :  { %3962 = vrsqrt.f32 %v3301_v42 }
 0x666   :  { %v3963_v32 = vpop.eup %3962 }
 0x667   :  { %v3303_v31 = vmul.f32 %v3963_v32, %v5865_v43  ;;  %v3304_v7 = vmul.f32 %v3963_v32, %v5867_v25  ;;  %v3305_v34 = vmul.f32 %v3963_v32, %v5869_v38  ;;  %v3306_v5 = vmul.f32 %v3963_v32, %v5871_v45 }
 0x668   :  { %v3307_v63 = vmul.f32 %v3963_v32, %v5877_v59  ;;  %v3308_v47 = vmul.f32 %v3963_v32, %v5881_v0  ;;  %v3309_v40 = vmul.f32 %v3963_v32, %v5887_v23  ;;  %v3310_v13 = vmul.f32 %v3963_v32, %v5892_v3  ;;  %v3581_v59 = vld [vmem:[%s6018_s14] ss:$0 sm:$0xff]  ;;  %s3416_s14 = sshll.u32 %s3990_s16, 4  ;;  %s5982_s14 = int_to_ptr.vmem [resolvable:$true] %s3416_s14 }
 0x669   :  { %v3311_v16 = vmul.f32 %v3963_v32, %v3239_v62  ;;  %v3312_v43 = vmul.f32 %v3963_v32, %v3240_v2  ;;  %v3313_v56 = vmul.f32 %v3963_v32, %v3241_v58  ;;  %v3314_v25 = vmul.f32 %v3963_v32, %v3242_v14  ;;  %p3969_p1 = scmp.lt.s32.totalorder %s5982_s14, %s5982_s14 }
 0x66a   :  { %v3315_v8 = vmul.f32 %v3963_v32, %v3243_v9  ;;  %v3316_v38 = vmul.f32 %v3963_v32, %v3244_v19  ;;  %v3317_v44 = vmul.f32 %v3963_v32, %v3245_v48  ;;  %v3318_v45 = vmul.f32 %v3963_v32, %v3246_v33  ;;  %v3555_v9 = vld [vmem:[%s6004_s0 + $0x11] sm:$0xff]  ;;  %v3558_v48 = vld [vmem:[%s6004_s0 + $0x41] sm:$0xff] }
 0x66b   :  { %v3325_v11 = vmul.f32 %v3580_v35, %v3303_v31  ;;  %v3326_v30 = vmul.f32 %v3580_v35, %v3304_v7  ;;  %v3327_v60 = vmul.f32 %v3580_v35, %v3305_v34  ;;  %v3328_v1 = vmul.f32 %v3580_v35, %v3306_v5  ;;  %v3568_v32 = vld [vmem:[%s6004_s0 + $0x101] sm:$0xff]  ;;  %v3569_v31 = vld [vmem:[%s6004_s0 + $0x111] sm:$0xff] }
 0x66c   :  { %v3329_v0 = vmul.f32 %v3580_v35, %v3307_v63  ;;  %v3330_v23 = vmul.f32 %v3580_v35, %v3308_v47  ;;  %v3331_v26 = vmul.f32 %v3580_v35, %v3309_v40  ;;  %v3332_v3 = vmul.f32 %v3580_v35, %v3310_v13  ;;  %v3570_v7 = vld [vmem:[%s6004_s0 + $0x121] sm:$0xff]  ;;  %s3964_s0 = scalar_lea.vmem %s5982_s14, 2048 }
 0x66d   :  { %v3333_v62 = vmul.f32 %v3580_v35, %v3311_v16  ;;  %v3334_v2 = vmul.f32 %v3580_v35, %v3312_v43  ;;  %v3335_v58 = vmul.f32 %v3580_v35, %v3313_v56  ;;  %v3336_v14 = vmul.f32 %v3580_v35, %v3314_v25  ;;  %p3965_p0 = scmp.ne.s32.totalorder %s5982_s14, %s3964_s0  ;;  %p3970_p2 = scmp.lt.s32.totalorder %s3964_s0, %s3964_s0 }
 0x66e   :  { %v3337_v51 = vmul.f32 %v3580_v35, %v3315_v8  ;;  %v3338_v27 = vmul.f32 %v3580_v35, %v3316_v38  ;;  %v3339_v19 = vmul.f32 %v3580_v35, %v3317_v44  ;;  %v3340_v10 = vmul.f32 %v3580_v35, %v3318_v45 }
 0x66f   :  { %v3347_v15 = vadd.f32 %v3581_v59, %v3325_v11  ;;  %v3348_v55 = vadd.f32 %v3581_v59, %v3326_v30  ;;  %v3349_v39 = vadd.f32 %v3581_v59, %v3327_v60  ;;  %v3350_v33 = vadd.f32 %v3581_v59, %v3328_v1  ;;  %p3971_p3 = por %p3970_p2, %p3969_p1 }
 0x670   :  { %v3351_v20 = vadd.f32 %v3581_v59, %v3329_v0  ;;  %v3352_v18 = vadd.f32 %v3581_v59, %v3330_v23  ;;  %v3353_v24 = vadd.f32 %v3581_v59, %v3331_v26  ;;  %v3354_v57 = vadd.f32 %v3581_v59, %v3332_v3 }
 0x671   :  { %v3355_v17 = vadd.f32 %v3581_v59, %v3333_v62  ;;  %v3356_v50 = vadd.f32 %v3581_v59, %v3334_v2  ;;  %v3357_v52 = vadd.f32 %v3581_v59, %v3335_v58  ;;  %v3358_v6 = vadd.f32 %v3581_v59, %v3336_v14  ;;  %p3972_p4 = pnand %p3971_p3, %p3965_p0 }
 0x672   :  { %v3359_v61 = vadd.f32 %v3581_v59, %v3337_v51  ;;  %v3360_v12 = vadd.f32 %v3581_v59, %v3338_v27  ;;  %v3361_v21 = vadd.f32 %v3581_v59, %v3339_v19  ;;  %v3362_v42 = vadd.f32 %v3581_v59, %v3340_v10 }
 0x673   :  { %v3363_v34 = vadd.f32 %v3555_v9, %v3347_v15  ;;  %v3364_v5 = vadd.f32 %v3556_v54, %v3348_v55  ;;  %v3365_v35 = vadd.f32 %v3557_v29, %v3349_v39  ;;  %v3366_v63 = vadd.f32 %v3558_v48, %v3350_v33 }
 0x674   :  { %v3367_v47 = vadd.f32 %v3559_v53, %v3351_v20  ;;  %v3368_v40 = vadd.f32 %v3560_v28, %v3352_v18  ;;  %v3369_v13 = vadd.f32 %v3561_v22, %v3353_v24  ;;  %v3370_v16 = vadd.f32 %v3562_v46, %v3354_v57 }
 0x675   :  { %v3371_v43 = vadd.f32 %v3563_v49, %v3355_v17  ;;  %v3372_v56 = vadd.f32 %v3564_v36, %v3356_v50  ;;  %v3373_v25 = vadd.f32 %v3565_v4, %v3357_v52  ;;  %v3374_v8 = vadd.f32 %v3566_v37, %v3358_v6 }
 0x676   :  { %v3375_v38 = vadd.f32 %v3567_v41, %v3359_v61  ;;  %v3376_v44 = vadd.f32 %v3568_v32, %v3360_v12  ;;  %v3377_v45 = vadd.f32 %v3569_v31, %v3361_v21  ;;  %v3378_v11 = vadd.f32 %v3570_v7, %v3362_v42 }
 0x677   :  { %v3379_v30 = vmax.f32 %v3363_v34, 0.0  ;;  %v3380_v60 = vmax.f32 %v3364_v5, 0.0  ;;  %v3381_v1 = vmax.f32 %v3365_v35, 0.0  ;;  %v3382_v59 = vmax.f32 %v3366_v63, 0.0 }
 0x678   :  { %v3383_v0 = vmax.f32 %v3367_v47, 0.0  ;;  %v3384_v23 = vmax.f32 %v3368_v40, 0.0  ;;  %v3385_v26 = vmax.f32 %v3369_v13, 0.0  ;;  %v3386_v3 = vmax.f32 %v3370_v16, 0.0 }
 0x679   :  { %v3387_v62 = vmax.f32 %v3371_v43, 0.0  ;;  %v3388_v2 = vmax.f32 %v3372_v56, 0.0  ;;  %v3389_v58 = vmax.f32 %v3373_v25, 0.0  ;;  %v3390_v14 = vmax.f32 %v3374_v8, 0.0  ;;  %3395 = vst.msk [vmem:[#allocation3] sm:$0xff] %vm120_vm0, %v3379_v30  ;;  %3396 = vst.msk [vmem:[#allocation3 + $0x8] sm:$0xff] %vm120_vm0, %v3380_v60 }
 0x67a   :  { %3397 = vst.msk [vmem:[#allocation3 + $0x10] sm:$0xff] %vm120_vm0, %v3381_v1  ;;  %3398 = vst.msk [vmem:[#allocation3 + $0x18] sm:$0xff] %vm120_vm0, %v3382_v59  ;;  %v3391_v9 = vmax.f32 %v3375_v38, 0.0  ;;  %v3392_v51 = vmax.f32 %v3376_v44, 0.0  ;;  %v3393_v27 = vmax.f32 %v3377_v45, 0.0  ;;  %v3394_v19 = vmax.f32 %v3378_v11, 0.0 }
 0x67b   :  { %3399 = vst.msk [vmem:[#allocation3 + $0x20] sm:$0xff] %vm120_vm0, %v3383_v0  ;;  %3400 = vst.msk [vmem:[#allocation3 + $0x28] sm:$0xff] %vm120_vm0, %v3384_v23 }
 0x67c   :  { %3401 = vst.msk [vmem:[#allocation3 + $0x30] sm:$0xff] %vm120_vm0, %v3385_v26  ;;  %3402 = vst.msk [vmem:[#allocation3 + $0x38] sm:$0xff] %vm120_vm0, %v3386_v3 }
 0x67d   :  { %3403 = vst.msk [vmem:[#allocation3 + $0x40] sm:$0xff] %vm120_vm0, %v3387_v62  ;;  %3404 = vst.msk [vmem:[#allocation3 + $0x48] sm:$0xff] %vm120_vm0, %v3388_v2 }
 0x67e   :  { %3405 = vst.msk [vmem:[#allocation3 + $0x50] sm:$0xff] %vm120_vm0, %v3389_v58  ;;  %3406 = vst.msk [vmem:[#allocation3 + $0x58] sm:$0xff] %vm120_vm0, %v3390_v14 }
 0x67f   :  { %3407 = vst.msk [vmem:[#allocation3 + $0x60] sm:$0xff] %vm120_vm0, %v3391_v9  ;;  %3408 = vst.msk [vmem:[#allocation3 + $0x68] sm:$0xff] %vm120_vm0, %v3392_v51 }
 0x680   :  { %3409 = vst.msk [vmem:[#allocation3 + $0x70] sm:$0xff] %vm120_vm0, %v3393_v27  ;;  %3410 = vst.msk [vmem:[#allocation3 + $0x78] sm:$0xff] %vm120_vm0, %v3394_v19 }
 0x681   :  { %3975 = shalt.err (!%p3972_p4)
}
 0x682   :  { %s3991_s17 = smov 128   ;;  %s3992_s18 = smov 8  }
 0x683   :  { %3422 = dma.vmem_to_hbm [thread:$0]  %s5982_s14, 2048, %s6019_s15, [#allocation4], %s3991_s17, %s3991_s17, %s3992_s18  }
 0x684   :  { %3984 = dma.done.wait [#allocation4], 2048  }
 0x685   :  { %3985 = vsyncadd [#allocation4], 4294965248 }
 0x686   :  { %3426 = vsyncpa [#allocation4], 1 }

// kernel: _lambda_.2
= control target key start
LH: loop header
LB: loop body
LE: loop exit
PB: predicated region body
PF: predicated region fallthrough
CT: control target
= control target key end

     0   :  { %vm494_vm0 = vcmask 1043456   ;;  %vm277_vm1 = vcmask 64512   ;;  %v7111_v3 = vmov 0   ;;  %vm1109_vm2 = vcmask 130048   ;;  %s12546_s2 = inlined_call_operand.vmem [shape: bf16[8,16], index: 2, kind: input, shape index: {}]   ;;  %s12547_s0 = inlined_call_operand.vmem [shape: f32[8,9,16,8], index: 0, kind: input, shape index: {}]   ;;  %s12548_s1 = inlined_call_operand.vmem [shape: f32[1152,1], index: 1, kind: input, shape index: {}]   ;;  %s12549_s3 = inlined_call_operand.vmem [shape: f32[1,16], index: 3, kind: input, shape index: {}, may-alias: {3,6,13,16}]   ;;  %s12550_s4 = inlined_call_operand.vmem [shape: f32[1,16], index: 4, kind: input, shape index: {}, may-alias: {4,7,11,14,17}]   ;;  %s12551_s5 = inlined_call_operand.vmem [shape: bf16[9,16,16], index: 5, kind: input, shape index: {}]   ;;  %s12552_s8 = inlined_call_operand.vmem [shape: bf16[16,2], index: 8, kind: input, shape index: {}]   ;;  %s12553_s10 = inlined_call_operand.vmem [shape: bf16[2,16], index: 10, kind: input, shape index: {}]   ;;  %s12554_s6 = inlined_call_operand.vmem [shape: f32[1,16], index: 6, kind: input, shape index: {}, may-alias: {3,6,13,16}]   ;;  %s12555_s7 = inlined_call_operand.vmem [shape: f32[1,16], index: 7, kind: input, shape index: {}, may-alias: {4,7,11,14,17}]   ;;  %s12556_s15 = inlined_call_operand.vmem [shape: bf16[8,16], index: 15, kind: input, shape index: {}]   ;;  %s12557_s9 = inlined_call_operand.vmem [shape: f32[1,2], index: 9, kind: input, shape index: {}]   ;;  %s12558_s12 = inlined_call_operand.vmem [shape: bf16[16,16], index: 12, kind: input, shape index: {}]   ;;  %s12559_s11 = inlined_call_operand.vmem [shape: f32[1,16], index: 11, kind: input, shape index: {}, may-alias: {4,7,11,14,17}]   ;;  %s12560_s16 = inlined_call_operand.vmem [shape: f32[1,16], index: 16, kind: input, shape index: {}, may-alias: {3,6,13,16}]   ;;  %s12561_s17 = inlined_call_operand.vmem [shape: f32[1,16], index: 17, kind: input, shape index: {}, may-alias: {4,7,11,14,17}]   ;;  %s12562_s13 = inlined_call_operand.vmem [shape: f32[1,16], index: 13, kind: input, shape index: {}, may-alias: {3,6,13,16}]   ;;  %s12563_s14 = inlined_call_operand.vmem [shape: f32[1,16], index: 14, kind: input, shape index: {}, may-alias: {4,7,11,14,17}]   ;;  %s12564_s18 = inlined_call_operand.vmem [shape: f32[2,8,8,16], index: 18, kind: output, shape index: {}]  }
   0x1   :  { %12759 = sst [smem:[#allocation173_spill]] %s12546_s2  ;;  %7083 = vset.pattern.permute.xlu0 %v7111_v3  ;;  %7084 = vset.pattern.permute.xlu1 %v7111_v3  ;;  %vm7113_vm3 = vmmov 0   ;;  %vm5547_vm4 = vcmask 1040384   ;;  %vm5481_vm5 = vcmask 1041409   ;;  %vm5543_vm6 = vcmask 15360  }
   0x2   :  { %12760 = sst [smem:[#allocation174_spill]] %s12547_s0 }
   0x3   :  { %12761 = sst [smem:[#allocation175_spill]] %s12548_s1 }
   0x4   :  { %s12762_s29 = sld [smem:[#allocation173_spill]] }
   0x5   :  { %s12763_s19 = sld [smem:[#allocation174_spill]] }
   0x6   :  { %s12764_s0 = sld [smem:[#allocation175_spill]] }
   0xa   :  { %v276_v0 = vld [vmem:[%s12762_s29] sm:$0xf] }
   0xb   :  { %v60_v1 = vld [vmem:[%s12763_s19] sm:$0xff]  ;;  %v61_v2 = vld [vmem:[%s12763_s19 + $0x8] sm:$0xff]  ;;  %7077 = vmatprep.subr.msk.bf16.mxu0 %vm494_vm0, %v276_v0  ;;  %v496_v4 = vsel %vm494_vm0, %v276_v0, 0  ;;  %v62_v6 = vld [vmem:[%s12763_s19 + $0x10] sm:$0xff] }
   0xc   :  { %v204_v5 = vpack.c.bf16 %v61_v2, %v60_v1  ;;  %v63_v7 = vld [vmem:[%s12763_s19 + $0x18] sm:$0xff]  ;;  %v64_v8 = vld [vmem:[%s12763_s19 + $0x20] sm:$0xff]  ;;  %6722 = vmatpush3.bf16.msra.mxu0 %v496_v4  ;;  %v65_v10 = vld [vmem:[%s12763_s19 + $0x28] sm:$0xff] }
   0xd   :  { %v205_v9 = vpack.c.bf16 %v63_v7, %v62_v6  ;;  %v206_v11 = vpack.c.bf16 %v65_v10, %v64_v8  ;;  %v66_v12 = vld [vmem:[%s12763_s19 + $0x30] sm:$0xff]  ;;  %v67_v13 = vld [vmem:[%s12763_s19 + $0x38] sm:$0xff]  ;;  %v68_v14 = vld [vmem:[%s12763_s19 + $0x40] sm:$0xff] }
   0xe   :  { %6723 = vmatprep.mubr.msk.bf16.mxu0 %vm277_vm1, %v204_v5  ;;  %v69_v15 = vld [vmem:[%s12763_s19 + $0x48] sm:$0xff]  ;;  %v207_v16 = vpack.c.bf16 %v67_v13, %v66_v12  ;;  %v70_v18 = vld [vmem:[%s12763_s19 + $0x50] sm:$0xff]  ;;  %v71_v19 = vld [vmem:[%s12763_s19 + $0x58] sm:$0xff] }
   0xf   :  { %6724 = vmatmul.mubr.msk.bf16.vlgmr.msra.gmra.mxu0 %vm277_vm1, %v205_v9  ;;  %v208_v17 = vpack.c.bf16 %v69_v15, %v68_v14  ;;  %v72_v20 = vld [vmem:[%s12763_s19 + $0x60] sm:$0xff]  ;;  %v73_v21 = vld [vmem:[%s12763_s19 + $0x68] sm:$0xff]  ;;  %v209_v22 = vpack.c.bf16 %v71_v19, %v70_v18  ;;  %v74_v26 = vld [vmem:[%s12763_s19 + $0x70] sm:$0xff] }
  0x10   :  { %6727 = vmatprep.mubr.msk.bf16.mxu0 %vm277_vm1, %v206_v11  ;;  %v210_v23 = vpack.c.bf16 %v73_v21, %v72_v20  ;;  %v2614_v24 = vld [vmem:[%s12764_s0 + $0x120] sm:$0xff]  ;;  %v75_v27 = vld [vmem:[%s12763_s19 + $0x78] sm:$0xff]  ;;  %v2616_v28 = vld [vmem:[%s12764_s0 + $0x130] sm:$0xff] }
  0x11   :  { %v2618_v25 = vld [vmem:[%s12764_s0 + $0x140] sm:$0xff]  ;;  %2904 = vperm.xlu0 %7083, %v2614_v24   ;;  %v77_v30 = vld [vmem:[%s12763_s19 + $0x88] sm:$0xff]  ;;  %v2620_v31 = vld [vmem:[%s12764_s0 + $0x150] sm:$0xff]  ;;  %v211_v32 = vpack.c.bf16 %v75_v27, %v74_v26 }
  0x12   :  { %2924 = vperm.xlu1 %7084, %v2618_v25   ;;  %v76_v29 = vld [vmem:[%s12763_s19 + $0x80] sm:$0xff]  ;;  %v2624_v35 = vld [vmem:[%s12764_s0 + $0x170] sm:$0xff]  ;;  %v79_v37 = vld [vmem:[%s12763_s19 + $0x98] sm:$0xff] }
  0x13   :  { %v212_v33 = vpack.c.bf16 %v77_v30, %v76_v29  ;;  %v2622_v34 = vld [vmem:[%s12764_s0 + $0x160] sm:$0xff]  ;;  %v78_v36 = vld [vmem:[%s12763_s19 + $0x90] sm:$0xff]  ;;  %v81_v40 = vld [vmem:[%s12763_s19 + $0xa8] sm:$0xff] }
  0x14   :  { %v2626_v38 = vld [vmem:[%s12764_s0 + $0x180] sm:$0xff]  ;;  %v2628_v41 = vld [vmem:[%s12764_s0 + $0x190] sm:$0xff]  ;;  %v213_v42 = vpack.c.bf16 %v79_v37, %v78_v36  ;;  %v83_v47 = vld [vmem:[%s12763_s19 + $0xb8] sm:$0xff] }
  0x15   :  { %2914 = vperm.xlu0 %7083, %v2616_v28   ;;  %v80_v39 = vld [vmem:[%s12763_s19 + $0xa0] sm:$0xff]  ;;  %v2632_v44 = vld [vmem:[%s12764_s0 + $0x1b0] sm:$0xff]  ;;  %v85_v50 = vld [vmem:[%s12763_s19 + $0xc8] sm:$0xff] }
  0x16   :  { %2934 = vperm.xlu1 %7084, %v2620_v31   ;;  %v214_v43 = vpack.c.bf16 %v81_v40, %v80_v39  ;;  %v2634_v45 = vld [vmem:[%s12764_s0 + $0x1c0] sm:$0xff]  ;;  %v82_v46 = vld [vmem:[%s12763_s19 + $0xb0] sm:$0xff]  ;;  %v87_v57 = vld [vmem:[%s12763_s19 + $0xd8] sm:$0xff] }
  0x17   :  { %6728 = vmatmul.mubr.msk.bf16.gmra.mxu0 %vm277_vm1, %v207_v16  ;;  %v2636_v48 = vld [vmem:[%s12764_s0 + $0x1d0] sm:$0xff]  ;;  %v84_v49 = vld [vmem:[%s12763_s19 + $0xc0] sm:$0xff]  ;;  %v215_v52 = vpack.c.bf16 %v83_v47, %v82_v46  ;;  %v89_v60 = vld [vmem:[%s12763_s19 + $0xe8] sm:$0xff] }
  0x18   :  { %6731 = vmatprep.mubr.msk.bf16.mxu0 %vm277_vm1, %v208_v17  ;;  %v2638_v51 = vld [vmem:[%s12764_s0 + $0x1e0] sm:$0xff]  ;;  %v216_v53 = vpack.c.bf16 %v85_v50, %v84_v49  ;;  %v2640_v54 = vld [vmem:[%s12764_s0 + $0x1f0] sm:$0xff]  ;;  %v91_v3 = vld [vmem:[%s12763_s19 + $0xf8] sm:$0xff] }
  0x19   :  { %2944 = vperm.xlu0 %7083, %v2622_v34   ;;  %v2642_v55 = vld [vmem:[%s12764_s0 + $0x200] sm:$0xff]  ;;  %v86_v56 = vld [vmem:[%s12763_s19 + $0xd0] sm:$0xff]  ;;  %v93_v6 = vld [vmem:[%s12763_s19 + $0x108] sm:$0xff] }
  0x1a   :  { %2954 = vperm.xlu1 %7084, %v2624_v35   ;;  %v2644_v58 = vld [vmem:[%s12764_s0 + $0x210] sm:$0xff]  ;;  %v88_v59 = vld [vmem:[%s12763_s19 + $0xe0] sm:$0xff]  ;;  %v217_v62 = vpack.c.bf16 %v87_v57, %v86_v56  ;;  %v95_v13 = vld [vmem:[%s12763_s19 + $0x118] sm:$0xff] }
  0x1b   :  { %v2646_v61 = vld [vmem:[%s12764_s0 + $0x220] sm:$0xff]  ;;  %v218_v63 = vpack.c.bf16 %v89_v60, %v88_v59  ;;  %v2580_v1 = vld [vmem:[%s12764_s0 + $0x10] sm:$0xff]  ;;  %v97_v16 = vld [vmem:[%s12763_s19 + $0x128] sm:$0xff] }
  0x1c   :  { %v2578_v0 = vld [vmem:[%s12764_s0] sm:$0xff]  ;;  %v90_v2 = vld [vmem:[%s12763_s19 + $0xf0] sm:$0xff]  ;;  %v101_v26 = vld [vmem:[%s12763_s19 + $0x148] sm:$0xff] }
  0x1d   :  { %2964 = vperm.xlu0 %7083, %v2626_v38   ;;  %v2582_v4 = vld [vmem:[%s12764_s0 + $0x20] sm:$0xff]  ;;  %v2584_v7 = vld [vmem:[%s12764_s0 + $0x30] sm:$0xff]  ;;  %v219_v8 = vpack.c.bf16 %v91_v3, %v90_v2  ;;  %v105_v36 = vld [vmem:[%s12763_s19 + $0x168] sm:$0xff] }
  0x1e   :  { %2974 = vperm.xlu1 %7084, %v2628_v41   ;;  %v92_v5 = vld [vmem:[%s12763_s19 + $0x100] sm:$0xff]  ;;  %v2588_v11 = vld [vmem:[%s12764_s0 + $0x50] sm:$0xff]  ;;  %v2579_v40 = vld [vmem:[%s12764_s0 + $0x8] sm:$0xff] }
  0x1f   :  { %6732 = vmatmul.mubr.msk.bf16.gmra.mxu0 %vm277_vm1, %v209_v22  ;;  %v220_v9 = vpack.c.bf16 %v93_v6, %v92_v5  ;;  %v2586_v10 = vld [vmem:[%s12764_s0 + $0x40] sm:$0xff]  ;;  %v94_v12 = vld [vmem:[%s12763_s19 + $0x110] sm:$0xff]  ;;  %v2581_v41 = vld [vmem:[%s12764_s0 + $0x18] sm:$0xff] }
  0x20   :  { %6735 = vmatprep.mubr.msk.bf16.mxu0 %vm277_vm1, %v210_v23  ;;  %v2590_v14 = vld [vmem:[%s12764_s0 + $0x60] sm:$0xff]  ;;  %v2592_v17 = vld [vmem:[%s12764_s0 + $0x70] sm:$0xff]  ;;  %v221_v18 = vpack.c.bf16 %v95_v13, %v94_v12  ;;  %v99_v23 = vld [vmem:[%s12763_s19 + $0x138] sm:$0xff] }
  0x21   :  { %2994 = vperm.xlu0 %7083, %v2632_v44   ;;  %v96_v15 = vld [vmem:[%s12763_s19 + $0x120] sm:$0xff]  ;;  %v2596_v20 = vld [vmem:[%s12764_s0 + $0x90] sm:$0xff]  ;;  %v2583_v44 = vld [vmem:[%s12764_s0 + $0x28] sm:$0xff] }
  0x22   :  { %3004 = vperm.xlu1 %7084, %v2634_v45   ;;  %v222_v19 = vpack.c.bf16 %v97_v16, %v96_v15  ;;  %v2598_v21 = vld [vmem:[%s12764_s0 + $0xa0] sm:$0xff]  ;;  %v98_v22 = vld [vmem:[%s12763_s19 + $0x130] sm:$0xff]  ;;  %v109_v46 = vld [vmem:[%s12763_s19 + $0x188] sm:$0xff] }
  0x23   :  { %v2600_v24 = vld [vmem:[%s12764_s0 + $0xb0] sm:$0xff]  ;;  %v100_v25 = vld [vmem:[%s12763_s19 + $0x140] sm:$0xff]  ;;  %v223_v28 = vpack.c.bf16 %v99_v23, %v98_v22  ;;  %v2585_v47 = vld [vmem:[%s12764_s0 + $0x38] sm:$0xff] }
  0x24   :  { %v2602_v27 = vld [vmem:[%s12764_s0 + $0xc0] sm:$0xff]  ;;  %v224_v29 = vpack.c.bf16 %v101_v26, %v100_v25  ;;  %v2604_v30 = vld [vmem:[%s12764_s0 + $0xd0] sm:$0xff]  ;;  %v2587_v50 = vld [vmem:[%s12764_s0 + $0x48] sm:$0xff] }
  0x25   :  { %3014 = vperm.xlu0 %7083, %v2636_v48   ;;  %v2606_v31 = vld [vmem:[%s12764_s0 + $0xe0] sm:$0xff]  ;;  %v2608_v34 = vld [vmem:[%s12764_s0 + $0xf0] sm:$0xff]  ;;  %v113_v56 = vld [vmem:[%s12763_s19 + $0x1a8] sm:$0xff] }
  0x26   :  { %3024 = vperm.xlu1 %7084, %v2638_v51   ;;  %v104_v35 = vld [vmem:[%s12763_s19 + $0x160] sm:$0xff]  ;;  %v2589_v51 = vld [vmem:[%s12764_s0 + $0x58] sm:$0xff]  ;;  %v117_v2 = vld [vmem:[%s12763_s19 + $0x1c8] sm:$0xff] }
  0x27   :  { %6736 = vmatmul.mubr.msk.bf16.gmra.mxu0 %vm277_vm1, %v211_v32  ;;  %v102_v32 = vld [vmem:[%s12763_s19 + $0x150] sm:$0xff]  ;;  %v2610_v37 = vld [vmem:[%s12764_s0 + $0x100] sm:$0xff]  ;;  %v226_v39 = vpack.c.bf16 %v105_v36, %v104_v35  ;;  %v2593_v57 = vld [vmem:[%s12764_s0 + $0x78] sm:$0xff] }
  0x28   :  { %6739 = vmatprep.mubr.msk.bf16.mxu0 %vm277_vm1, %v212_v33  ;;  %v103_v33 = vld [vmem:[%s12763_s19 + $0x158] sm:$0xff]  ;;  %v108_v45 = vld [vmem:[%s12763_s19 + $0x180] sm:$0xff]  ;;  %v2603_v3 = vld [vmem:[%s12764_s0 + $0xc8] sm:$0xff] }
  0x29   :  { %3034 = vperm.xlu0 %7083, %v2640_v54   ;;  %v225_v38 = vpack.c.bf16 %v103_v33, %v102_v32  ;;  %v228_v49 = vpack.c.bf16 %v109_v46, %v108_v45  ;;  %v2591_v54 = vld [vmem:[%s12764_s0 + $0x68] sm:$0xff]  ;;  %v2597_v60 = vld [vmem:[%s12764_s0 + $0x98] sm:$0xff]  ;;  %v2650_v16 = vld [vmem:[%s12764_s0 + $0x240] sm:$0xff] }
  0x2a   :  { %3044 = vperm.xlu1 %7084, %v2642_v55   ;;  %v112_v55 = vld [vmem:[%s12763_s19 + $0x1a0] sm:$0xff]  ;;  %v2605_v6 = vld [vmem:[%s12764_s0 + $0xd8] sm:$0xff]  ;;  %v121_v12 = vld [vmem:[%s12763_s19 + $0x1e8] sm:$0xff] }
  0x2b   :  { %v230_v59 = vpack.c.bf16 %v113_v56, %v112_v55  ;;  %v2611_v13 = vld [vmem:[%s12764_s0 + $0x108] sm:$0xff]  ;;  %v2656_v23 = vld [vmem:[%s12764_s0 + $0x270] sm:$0xff]  ;;  %v2658_v26 = vld [vmem:[%s12764_s0 + $0x280] sm:$0xff] }
  0x2c   :  { %v125_v22 = vld [vmem:[%s12763_s19 + $0x208] sm:$0xff]  ;;  %v2664_v33 = vld [vmem:[%s12764_s0 + $0x2b0] sm:$0xff]  ;;  %v2686_v56 = vld [vmem:[%s12764_s0 + $0x360] sm:$0xff] }
  0x2d   :  { %3054 = vperm.xlu0 %7083, %v2644_v58   ;;  %v129_v32 = vld [vmem:[%s12763_s19 + $0x228] sm:$0xff]  ;;  %v2668_v36 = vld [vmem:[%s12764_s0 + $0x2d0] sm:$0xff] }
  0x2e   :  { %3064 = vperm.xlu1 %7084, %v2646_v61   ;;  %v2599_v61 = vld [vmem:[%s12764_s0 + $0xa8] sm:$0xff]  ;;  %v2676_v46 = vld [vmem:[%s12764_s0 + $0x310] sm:$0xff] }
  0x2f   :  { %6740 = vmatmul.mubr.msk.bf16.gmra.mxu0 %vm277_vm1, %v213_v42  ;;  %v106_v42 = vld [vmem:[%s12763_s19 + $0x170] sm:$0xff] }
  0x30   :  { %6743 = vmatprep.mubr.msk.bf16.mxu0 %vm277_vm1, %v214_v43  ;;  %v107_v43 = vld [vmem:[%s12763_s19 + $0x178] sm:$0xff] }
  0x31   :  { %2724 = vperm.xlu0 %7083, %v2578_v0   ;;  %v227_v48 = vpack.c.bf16 %v107_v43, %v106_v42  ;;  %v2601_v0 = vld [vmem:[%s12764_s0 + $0xb8] sm:$0xff]  ;;  %v133_v42 = vld [vmem:[%s12763_s19 + $0x248] sm:$0xff]  ;;  %v2674_v43 = vld [vmem:[%s12764_s0 + $0x300] sm:$0xff] }
  0x32   :  { %2734 = vperm.xlu1 %7084, %v2580_v1   ;;  %v116_v1 = vld [vmem:[%s12763_s19 + $0x1c0] sm:$0xff] }
  0x33   :  { %v232_v5 = vpack.c.bf16 %v117_v2, %v116_v1  ;;  %v2694_v2 = vld [vmem:[%s12764_s0 + $0x3a0] sm:$0xff] }
  0x35   :  { %2744 = vperm.xlu0 %7083, %v2582_v4  }
  0x36   :  { %2754 = vperm.xlu1 %7084, %v2584_v7   ;;  %v2607_v7 = vld [vmem:[%s12764_s0 + $0xe8] sm:$0xff] }
  0x37   :  { %6744 = vmatmul.mubr.msk.bf16.gmra.mxu0 %vm277_vm1, %v215_v52  ;;  %v110_v52 = vld [vmem:[%s12763_s19 + $0x190] sm:$0xff] }
  0x38   :  { %6747 = vmatprep.mubr.msk.bf16.mxu0 %vm277_vm1, %v216_v53  ;;  %v111_v53 = vld [vmem:[%s12763_s19 + $0x198] sm:$0xff] }
  0x39   :  { %2764 = vperm.xlu0 %7083, %v2586_v10   ;;  %v229_v58 = vpack.c.bf16 %v111_v53, %v110_v52  ;;  %v2609_v10 = vld [vmem:[%s12764_s0 + $0xf8] sm:$0xff]  ;;  %v137_v52 = vld [vmem:[%s12763_s19 + $0x268] sm:$0xff]  ;;  %v2682_v53 = vld [vmem:[%s12764_s0 + $0x340] sm:$0xff] }
  0x3a   :  { %2774 = vperm.xlu1 %7084, %v2588_v11   ;;  %v120_v11 = vld [vmem:[%s12763_s19 + $0x1e0] sm:$0xff] }
  0x3b   :  { %v234_v15 = vpack.c.bf16 %v121_v12, %v120_v11  ;;  %v2704_v12 = vld [vmem:[%s12764_s0 + $0x3f0] sm:$0xff] }
  0x3d   :  { %2784 = vperm.xlu0 %7083, %v2590_v14  }
  0x3e   :  { %2794 = vperm.xlu1 %7084, %v2592_v17   ;;  %v2652_v17 = vld [vmem:[%s12764_s0 + $0x250] sm:$0xff] }
  0x3f   :  { %6748 = vmatmul.mubr.msk.bf16.gmra.mxu0 %vm277_vm1, %v217_v62  ;;  %v114_v62 = vld [vmem:[%s12763_s19 + $0x1b0] sm:$0xff] }
  0x40   :  { %6751 = vmatprep.mubr.msk.bf16.mxu0 %vm277_vm1, %v218_v63  ;;  %v115_v63 = vld [vmem:[%s12763_s19 + $0x1b8] sm:$0xff] }
  0x41   :  { %2814 = vperm.xlu0 %7083, %v2596_v20   ;;  %v231_v4 = vpack.c.bf16 %v115_v63, %v114_v62  ;;  %v2654_v20 = vld [vmem:[%s12764_s0 + $0x260] sm:$0xff]  ;;  %v141_v62 = vld [vmem:[%s12763_s19 + $0x288] sm:$0xff]  ;;  %v2692_v63 = vld [vmem:[%s12764_s0 + $0x390] sm:$0xff] }
  0x42   :  { %2824 = vperm.xlu1 %7084, %v2598_v21   ;;  %v124_v21 = vld [vmem:[%s12763_s19 + $0x200] sm:$0xff] }
  0x43   :  { %v236_v25 = vpack.c.bf16 %v125_v22, %v124_v21  ;;  %v2712_v22 = vld [vmem:[%s12764_s0 + $0x430] sm:$0xff] }
  0x45   :  { %2834 = vperm.xlu0 %7083, %v2600_v24  }
  0x46   :  { %2844 = vperm.xlu1 %7084, %v2602_v27   ;;  %v2660_v27 = vld [vmem:[%s12764_s0 + $0x290] sm:$0xff] }
  0x47   :  { %6752 = vmatmul.mubr.msk.bf16.gmra.mxu0 %vm277_vm1, %v219_v8  ;;  %v118_v8 = vld [vmem:[%s12763_s19 + $0x1d0] sm:$0xff] }
  0x48   :  { %6755 = vmatprep.mubr.msk.bf16.mxu0 %vm277_vm1, %v220_v9  ;;  %v119_v9 = vld [vmem:[%s12763_s19 + $0x1d8] sm:$0xff] }
  0x49   :  { %2854 = vperm.xlu0 %7083, %v2604_v30   ;;  %v233_v14 = vpack.c.bf16 %v119_v9, %v118_v8  ;;  %v2662_v30 = vld [vmem:[%s12764_s0 + $0x2a0] sm:$0xff]  ;;  %v145_v8 = vld [vmem:[%s12763_s19 + $0x2a8] sm:$0xff]  ;;  %v2700_v9 = vld [vmem:[%s12764_s0 + $0x3d0] sm:$0xff] }
  0x4a   :  { %2864 = vperm.xlu1 %7084, %v2606_v31   ;;  %v128_v31 = vld [vmem:[%s12763_s19 + $0x220] sm:$0xff] }
  0x4b   :  { %v238_v35 = vpack.c.bf16 %v129_v32, %v128_v31  ;;  %v2718_v31 = vld [vmem:[%s12764_s0 + $0x460] sm:$0xff] }
  0x4d   :  { %2874 = vperm.xlu0 %7083, %v2608_v34  }
  0x4e   :  { %2884 = vperm.xlu1 %7084, %v2610_v37   ;;  %v2670_v37 = vld [vmem:[%s12764_s0 + $0x2e0] sm:$0xff] }
  0x4f   :  { %6756 = vmatmul.mubr.msk.bf16.gmra.mxu0 %vm277_vm1, %v221_v18  ;;  %v122_v18 = vld [vmem:[%s12763_s19 + $0x1f0] sm:$0xff] }
  0x50   :  { %6759 = vmatprep.mubr.msk.bf16.mxu0 %vm277_vm1, %v222_v19  ;;  %v123_v19 = vld [vmem:[%s12763_s19 + $0x1f8] sm:$0xff] }
  0x51   :  { %2729 = vperm.xlu0 %7083, %v2579_v40   ;;  %v235_v24 = vpack.c.bf16 %v123_v19, %v122_v18  ;;  %v2672_v40 = vld [vmem:[%s12764_s0 + $0x2f0] sm:$0xff]  ;;  %v149_v18 = vld [vmem:[%s12763_s19 + $0x2c8] sm:$0xff]  ;;  %v2710_v19 = vld [vmem:[%s12764_s0 + $0x420] sm:$0xff] }
  0x52   :  { %2739 = vperm.xlu1 %7084, %v2581_v41   ;;  %v132_v41 = vld [vmem:[%s12763_s19 + $0x240] sm:$0xff] }
  0x53   :  { %v240_v45 = vpack.c.bf16 %v133_v42, %v132_v41  ;;  %v156_v41 = vld [vmem:[%s12763_s19 + $0x300] sm:$0xff]  ;;  %v157_v42 = vld [vmem:[%s12763_s19 + $0x308] sm:$0xff] }
  0x55   :  { %2749 = vperm.xlu0 %7083, %v2583_v44  }
  0x56   :  { %2759 = vperm.xlu1 %7084, %v2585_v47   ;;  %v2678_v47 = vld [vmem:[%s12764_s0 + $0x320] sm:$0xff] }
  0x57   :  { %6760 = vmatmul.mubr.msk.bf16.gmra.mxu0 %vm277_vm1, %v223_v28  ;;  %v126_v28 = vld [vmem:[%s12763_s19 + $0x210] sm:$0xff] }
  0x58   :  { %6763 = vmatprep.mubr.msk.bf16.mxu0 %vm277_vm1, %v224_v29  ;;  %v127_v29 = vld [vmem:[%s12763_s19 + $0x218] sm:$0xff] }
  0x59   :  { %2769 = vperm.xlu0 %7083, %v2587_v50   ;;  %v237_v34 = vpack.c.bf16 %v127_v29, %v126_v28  ;;  %v2680_v50 = vld [vmem:[%s12764_s0 + $0x330] sm:$0xff]  ;;  %v152_v29 = vld [vmem:[%s12763_s19 + $0x2e0] sm:$0xff] }
  0x5a   :  { %2779 = vperm.xlu1 %7084, %v2589_v51   ;;  %v136_v51 = vld [vmem:[%s12763_s19 + $0x260] sm:$0xff]  ;;  %v2716_v28 = vld [vmem:[%s12764_s0 + $0x450] sm:$0xff] }
  0x5b   :  { %v242_v55 = vpack.c.bf16 %v137_v52, %v136_v51  ;;  %v159_v51 = vld [vmem:[%s12763_s19 + $0x318] sm:$0xff]  ;;  %v2663_v52 = vld [vmem:[%s12764_s0 + $0x2a8] sm:$0xff] }
  0x5d   :  { %2789 = vperm.xlu0 %7083, %v2591_v54  }
  0x5e   :  { %2799 = vperm.xlu1 %7084, %v2593_v57   ;;  %v2688_v57 = vld [vmem:[%s12764_s0 + $0x370] sm:$0xff] }
  0x5f   :  { %6764 = vmatmul.mubr.msk.bf16.gmra.mxu0 %vm277_vm1, %v225_v38  ;;  %v130_v38 = vld [vmem:[%s12763_s19 + $0x230] sm:$0xff] }
  0x60   :  { %6767 = vmatprep.mubr.msk.bf16.mxu0 %vm277_vm1, %v226_v39  ;;  %v131_v39 = vld [vmem:[%s12763_s19 + $0x238] sm:$0xff] }
  0x61   :  { %2819 = vperm.xlu0 %7083, %v2597_v60   ;;  %v239_v44 = vpack.c.bf16 %v131_v39, %v130_v38  ;;  %v2690_v60 = vld [vmem:[%s12764_s0 + $0x380] sm:$0xff]  ;;  %v154_v38 = vld [vmem:[%s12763_s19 + $0x2f0] sm:$0xff]  ;;  %v155_v39 = vld [vmem:[%s12763_s19 + $0x2f8] sm:$0xff] }
  0x62   :  { %2829 = vperm.xlu1 %7084, %v2599_v61   ;;  %v140_v61 = vld [vmem:[%s12763_s19 + $0x280] sm:$0xff] }
  0x63   :  { %v244_v1 = vpack.c.bf16 %v141_v62, %v140_v61  ;;  %v2671_v61 = vld [vmem:[%s12764_s0 + $0x2e8] sm:$0xff] }
  0x65   :  { %2839 = vperm.xlu0 %7083, %v2601_v0  }
  0x66   :  { %2849 = vperm.xlu1 %7084, %v2603_v3   ;;  %v2696_v3 = vld [vmem:[%s12764_s0 + $0x3b0] sm:$0xff] }
  0x67   :  { %6768 = vmatmul.mubr.msk.bf16.gmra.mxu0 %vm277_vm1, %v227_v48  ;;  %v134_v48 = vld [vmem:[%s12763_s19 + $0x250] sm:$0xff] }
  0x68   :  { %6771 = vmatprep.mubr.msk.bf16.mxu0 %vm277_vm1, %v228_v49  ;;  %v135_v49 = vld [vmem:[%s12763_s19 + $0x258] sm:$0xff] }
  0x69   :  { %2859 = vperm.xlu0 %7083, %v2605_v6   ;;  %v241_v54 = vpack.c.bf16 %v135_v49, %v134_v48  ;;  %v2698_v6 = vld [vmem:[%s12764_s0 + $0x3c0] sm:$0xff]  ;;  %v2659_v48 = vld [vmem:[%s12764_s0 + $0x288] sm:$0xff]  ;;  %v2661_v49 = vld [vmem:[%s12764_s0 + $0x298] sm:$0xff] }
  0x6a   :  { %2869 = vperm.xlu1 %7084, %v2607_v7   ;;  %v144_v7 = vld [vmem:[%s12763_s19 + $0x2a0] sm:$0xff] }
  0x6b   :  { %v246_v11 = vpack.c.bf16 %v145_v8, %v144_v7  ;;  %v2675_v7 = vld [vmem:[%s12764_s0 + $0x308] sm:$0xff] }
  0x6d   :  { %2879 = vperm.xlu0 %7083, %v2609_v10  }
  0x6e   :  { %2889 = vperm.xlu1 %7084, %v2611_v13   ;;  %v2706_v13 = vld [vmem:[%s12764_s0 + $0x400] sm:$0xff] }
  0x6f   :  { %6772 = vmatmul.mubr.msk.bf16.gmra.mxu0 %vm277_vm1, %v229_v58  ;;  %v138_v58 = vld [vmem:[%s12763_s19 + $0x270] sm:$0xff] }
  0x70   :  { %6775 = vmatprep.mubr.msk.bf16.mxu0 %vm277_vm1, %v230_v59  ;;  %v139_v59 = vld [vmem:[%s12763_s19 + $0x278] sm:$0xff] }
  0x71   :  { %3084 = vperm.xlu0 %7083, %v2650_v16   ;;  %v243_v0 = vpack.c.bf16 %v139_v59, %v138_v58  ;;  %v2708_v16 = vld [vmem:[%s12764_s0 + $0x410] sm:$0xff] }
  0x72   :  { %3094 = vperm.xlu1 %7084, %v2652_v17   ;;  %v148_v17 = vld [vmem:[%s12763_s19 + $0x2c0] sm:$0xff] }
  0x73   :  { %v248_v21 = vpack.c.bf16 %v149_v18, %v148_v17 }
  0x75   :  { %3104 = vperm.xlu0 %7083, %v2654_v20  }
  0x76   :  { %3114 = vperm.xlu1 %7084, %v2656_v23   ;;  %v2714_v23 = vld [vmem:[%s12764_s0 + $0x440] sm:$0xff] }
  0x77   :  { %6776 = vmatmul.mubr.msk.bf16.gmra.mxu0 %vm277_vm1, %v231_v4  ;;  %v142_v4 = vld [vmem:[%s12763_s19 + $0x290] sm:$0xff] }
  0x78   :  { %6779 = vmatprep.mubr.msk.bf16.mxu0 %vm277_vm1, %v232_v5  ;;  %v143_v5 = vld [vmem:[%s12763_s19 + $0x298] sm:$0xff] }
  0x79   :  { %3124 = vperm.xlu0 %7083, %v2658_v26   ;;  %v245_v10 = vpack.c.bf16 %v143_v5, %v142_v4  ;;  %v151_v26 = vld [vmem:[%s12763_s19 + $0x2d8] sm:$0xff]  ;;  %v164_v5 = vld [vmem:[%s12763_s19 + $0x340] sm:$0xff] }
  0x7a   :  { %3134 = vperm.xlu1 %7084, %v2660_v27  }
  0x7d   :  { %3144 = vperm.xlu0 %7083, %v2662_v30   ;;  %v153_v30 = vld [vmem:[%s12763_s19 + $0x2e8] sm:$0xff] }
  0x7e   :  { %3154 = vperm.xlu1 %7084, %v2664_v33   ;;  %v250_v33 = vpack.c.bf16 %v153_v30, %v152_v29  ;;  %v166_v29 = vld [vmem:[%s12763_s19 + $0x350] sm:$0xff]  ;;  %v167_v30 = vld [vmem:[%s12763_s19 + $0x358] sm:$0xff] }
  0x7f   :  { %6780 = vmatmul.mubr.msk.bf16.gmra.mxu0 %vm277_vm1, %v233_v14  ;;  %v146_v14 = vld [vmem:[%s12763_s19 + $0x2b0] sm:$0xff] }
  0x80   :  { %6783 = vmatprep.mubr.msk.bf16.mxu0 %vm277_vm1, %v234_v15  ;;  %v147_v15 = vld [vmem:[%s12763_s19 + $0x2b8] sm:$0xff] }
  0x81   :  { %3174 = vperm.xlu0 %7083, %v2668_v36   ;;  %v247_v20 = vpack.c.bf16 %v147_v15, %v146_v14  ;;  %v2653_v36 = vld [vmem:[%s12764_s0 + $0x258] sm:$0xff]  ;;  %v2679_v15 = vld [vmem:[%s12764_s0 + $0x328] sm:$0xff] }
  0x82   :  { %3184 = vperm.xlu1 %7084, %v2670_v37  }
  0x85   :  { %3194 = vperm.xlu0 %7083, %v2672_v40   ;;  %v2655_v40 = vld [vmem:[%s12764_s0 + $0x268] sm:$0xff] }
  0x86   :  { %3204 = vperm.xlu1 %7084, %v2674_v43   ;;  %v2657_v43 = vld [vmem:[%s12764_s0 + $0x278] sm:$0xff] }
  0x87   :  { %6784 = vmatmul.mubr.msk.bf16.gmra.mxu0 %vm277_vm1, %v235_v24 }
  0x88   :  { %6787 = vmatprep.mubr.msk.bf16.mxu0 %vm277_vm1, %v236_v25  ;;  %v150_v25 = vld [vmem:[%s12763_s19 + $0x2d0] sm:$0xff] }
  0x89   :  { %3214 = vperm.xlu0 %7083, %v2676_v46   ;;  %v249_v32 = vpack.c.bf16 %v151_v26, %v150_v25  ;;  %v252_v46 = vpack.c.bf16 %v157_v42, %v156_v41 }
  0x8a   :  { %3224 = vperm.xlu1 %7084, %v2678_v47  }
  0x8c   :  { %v7763_v24 = vpop.permute.xlu0 %2904 }
  0x8d   :  { %3234 = vperm.xlu0 %7083, %v2680_v50   ;;  %12765 = vst [vmem:[#allocation3_spill] sm:$0xff] %v7763_v24  ;;  %v7772_v27 = vpop.permute.xlu1 %2924  ;;  %v158_v50 = vld [vmem:[%s12763_s19 + $0x310] sm:$0xff] }
  0x8e   :  { %3244 = vperm.xlu1 %7084, %v2682_v53   ;;  %12766 = vst [vmem:[#allocation4_spill] sm:$0xff] %v7772_v27  ;;  %v160_v53 = vld [vmem:[%s12763_s19 + $0x320] sm:$0xff]  ;;  %v253_v58 = vpack.c.bf16 %v159_v51, %v158_v50 }
  0x8f   :  { %6788 = vmatmul.mubr.msk.bf16.gmra.mxu0 %vm277_vm1, %v237_v34  ;;  %v2651_v34 = vld [vmem:[%s12764_s0 + $0x248] sm:$0xff] }
  0x90   :  { %6791 = vmatprep.mubr.msk.bf16.mxu0 %vm277_vm1, %v238_v35  ;;  %v7789_v35 = vpop.permute.xlu0 %2914 }
  0x91   :  { %3264 = vperm.xlu0 %7083, %v2686_v56   ;;  %12767 = vst [vmem:[#allocation5_spill] sm:$0xff] %v7789_v35  ;;  %v7794_v37 = vpop.permute.xlu1 %2934  ;;  %v2665_v56 = vld [vmem:[%s12764_s0 + $0x2b8] sm:$0xff] }
  0x92   :  { %3274 = vperm.xlu1 %7084, %v2688_v57   ;;  %12768 = vst [vmem:[#allocation6_spill] sm:$0xff] %v7794_v37 }
  0x95   :  { %3284 = vperm.xlu0 %7083, %v2690_v60   ;;  %v7818_v47 = vpop.permute.xlu1 %2954  ;;  %v2669_v60 = vld [vmem:[%s12764_s0 + $0x2d8] sm:$0xff] }
  0x96   :  { %3294 = vperm.xlu1 %7084, %v2692_v63   ;;  %12770 = vst [vmem:[#allocation8_spill] sm:$0xff] %v7818_v47 }
  0x97   :  { %6792 = vmatmul.mubr.msk.bf16.gmra.mxu0 %vm277_vm1, %v239_v44  ;;  %v251_v44 = vpack.c.bf16 %v155_v39, %v154_v38  ;;  %v169_v38 = vld [vmem:[%s12763_s19 + $0x368] sm:$0xff] }
  0x98   :  { %6795 = vmatprep.mubr.msk.bf16.mxu0 %vm277_vm1, %v240_v45  ;;  %v7816_v45 = vpop.permute.xlu0 %2944  ;;  %v2683_v39 = vld [vmem:[%s12764_s0 + $0x348] sm:$0xff] }
  0x99   :  { %3304 = vperm.xlu0 %7083, %v2694_v2   ;;  %12769 = vst [vmem:[#allocation7_spill] sm:$0xff] %v7816_v45  ;;  %v7848_v57 = vpop.permute.xlu1 %2974 }
  0x9a   :  { %3314 = vperm.xlu1 %7084, %v2696_v3   ;;  %12772 = vst [vmem:[#allocation10_spill] sm:$0xff] %v7848_v57  ;;  %v2673_v3 = vld [vmem:[%s12764_s0 + $0x2f8] sm:$0xff] }
  0x9d   :  { %3324 = vperm.xlu0 %7083, %v2698_v6   ;;  %v7868_v2 = vpop.permute.xlu1 %3004  ;;  %v165_v6 = vld [vmem:[%s12763_s19 + $0x348] sm:$0xff] }
  0x9e   :  { %3334 = vperm.xlu1 %7084, %v2700_v9   ;;  %12774 = vst [vmem:[#allocation12_spill] sm:$0xff] %v7868_v2 }
  0x9f   :  { %6796 = vmatmul.mubr.msk.bf16.gmra.mxu0 %vm277_vm1, %v241_v54  ;;  %v161_v54 = vld [vmem:[%s12763_s19 + $0x328] sm:$0xff] }
  0xa0   :  { %6799 = vmatprep.mubr.msk.bf16.mxu0 %vm277_vm1, %v242_v55  ;;  %v7843_v55 = vpop.permute.xlu0 %2964  ;;  %v254_v59 = vpack.c.bf16 %v161_v54, %v160_v53  ;;  %v2594_v54 = vld [vmem:[%s12764_s0 + $0x80] sm:$0xff] }
  0xa1   :  { %3354 = vperm.xlu0 %7083, %v2704_v12   ;;  %12771 = vst [vmem:[#allocation9_spill] sm:$0xff] %v7843_v55  ;;  %v2677_v12 = vld [vmem:[%s12764_s0 + $0x318] sm:$0xff] }
  0xa2   :  { %3364 = vperm.xlu1 %7084, %v2706_v13  }
  0xa4   :  { %v7859_v63 = vpop.permute.xlu0 %2994 }
  0xa5   :  { %3374 = vperm.xlu0 %7083, %v2708_v16   ;;  %12773 = vst [vmem:[#allocation11_spill] sm:$0xff] %v7859_v63 }
  0xa6   :  { %3384 = vperm.xlu1 %7084, %v2710_v19  }
  0xa7   :  { %6800 = vmatmul.mubr.msk.bf16.gmra.mxu0 %vm277_vm1, %v243_v0  ;;  %v162_v0 = vld [vmem:[%s12763_s19 + $0x330] sm:$0xff] }
  0xa8   :  { %6803 = vmatprep.mubr.msk.bf16.mxu0 %vm277_vm1, %v244_v1  ;;  %v163_v1 = vld [vmem:[%s12763_s19 + $0x338] sm:$0xff]  ;;  %v7893_v14 = vpop.permute.xlu0 %3014 }
  0xa9   :  { %3394 = vperm.xlu0 %7083, %v2712_v22   ;;  %v255_v9 = vpack.c.bf16 %v163_v1, %v162_v0  ;;  %12775 = vst [vmem:[#allocation13_spill] sm:$0xff] %v7893_v14 }
  0xaa   :  { %3404 = vperm.xlu1 %7084, %v2714_v23  }
  0xad   :  { %3414 = vperm.xlu0 %7083, %v2716_v28  }
  0xae   :  { %3424 = vperm.xlu1 %7084, %v2718_v31   ;;  %v2681_v31 = vld [vmem:[%s12764_s0 + $0x338] sm:$0xff] }
  0xaf   :  { %6804 = vmatmul.mubr.msk.bf16.gmra.mxu0 %vm277_vm1, %v245_v10 }
  0xb0   :  { %6807 = vmatprep.mubr.msk.bf16.mxu0 %vm277_vm1, %v246_v11  ;;  %v256_v11 = vpack.c.bf16 %v165_v6, %v164_v5 }
  0xb1   :  { %3089 = vperm.xlu0 %7083, %v2651_v34  }
  0xb2   :  { %3099 = vperm.xlu1 %7084, %v2653_v36   ;;  %v168_v36 = vld [vmem:[%s12763_s19 + $0x360] sm:$0xff] }
  0xb5   :  { %3109 = vperm.xlu0 %7083, %v2655_v40  }
  0xb6   :  { %3119 = vperm.xlu1 %7084, %v2657_v43  }
  0xb7   :  { %6808 = vmatmul.mubr.msk.bf16.gmra.mxu0 %vm277_vm1, %v247_v20  ;;  %v7906_v20 = vpop.permute.xlu1 %3024 }
  0xb8   :  { %6811 = vmatprep.mubr.msk.bf16.mxu0 %vm277_vm1, %v248_v21  ;;  %12776 = vst [vmem:[#allocation14_spill] sm:$0xff] %v7906_v20 }
  0xb9   :  { %3129 = vperm.xlu0 %7083, %v2659_v48   ;;  %v257_v48 = vpack.c.bf16 %v167_v30, %v166_v29 }
  0xba   :  { %3139 = vperm.xlu1 %7084, %v2661_v49   ;;  %v7945_v49 = vpop.permute.xlu0 %3034 }
  0xbb   :  { %12777 = vst [vmem:[#allocation15_spill] sm:$0xff] %v7945_v49  ;;  %v7950_v53 = vpop.permute.xlu1 %3044 }
  0xbc   :  { %12778 = vst [vmem:[#allocation16_spill] sm:$0xff] %v7950_v53 }
  0xbd   :  { %3149 = vperm.xlu0 %7083, %v2663_v52   ;;  %v258_v52 = vpack.c.bf16 %v169_v38, %v168_v36 }
  0xbe   :  { %3159 = vperm.xlu1 %7084, %v2665_v56  }
  0xbf   :  { %6812 = vmatmul.mubr.msk.bf16.gmra.mxu0 %vm277_vm1, %v249_v32 }
  0xc0   :  { %6815 = vmatprep.mubr.msk.bf16.mxu0 %vm277_vm1, %v250_v33 }
  0xc1   :  { %3179 = vperm.xlu0 %7083, %v2669_v60   ;;  %v2612_v60 = vld [vmem:[%s12764_s0 + $0x110] sm:$0xff] }
  0xc2   :  { %3189 = vperm.xlu1 %7084, %v2671_v61  }
  0xc5   :  { %3199 = vperm.xlu0 %7083, %v2673_v3  }
  0xc6   :  { %3209 = vperm.xlu1 %7084, %v2675_v7  }
  0xc7   :  { %6816 = vmatmul.mubr.msk.bf16.gmra.mxu0 %vm277_vm1, %v251_v44 }
  0xc8   :  { %6819 = vmatprep.mubr.msk.bf16.mxu0 %vm277_vm1, %v252_v46 }
  0xc9   :  { %3219 = vperm.xlu0 %7083, %v2677_v12   ;;  %v170_v12 = vld [vmem:[%s12763_s19 + $0x370] sm:$0xff] }
  0xca   :  { %3229 = vperm.xlu1 %7084, %v2679_v15   ;;  %v171_v15 = vld [vmem:[%s12763_s19 + $0x378] sm:$0xff] }
  0xcb   :  { %v259_v38 = vpack.c.bf16 %v171_v15, %v170_v12 }
  0xcd   :  { %3239 = vperm.xlu0 %7083, %v2681_v31   ;;  %v8003_v31 = vpop.permute.xlu1 %3064 }
  0xce   :  { %3249 = vperm.xlu1 %7084, %v2683_v39   ;;  %12780 = vst [vmem:[#allocation18_spill] sm:$0xff] %v8003_v31 }
  0xcf   :  { %v7856_v62 = vpop.f32.mrf.mxu0  ;;  %6820 = vmatmul.mubr.msk.bf16.gmra.mxu0 %vm277_vm1, %v253_v58 }
  0xd0   :  { %6823 = vmatprep.mubr.msk.bf16.mxu0 %vm277_vm1, %v254_v59  ;;  %v1406_v16 = vmul.f32 %v7856_v62, %v7856_v62  ;;  %v1113_v23 = vsel %vm1109_vm2, %v7856_v62, 0.0 }
  0xd1   :  { %v7873_v4 = vpop.f32.mrf.mxu0  ;;  %2804 = vperm.xlu0 %7083, %v2594_v54  }
  0xd2   :  { %v1404_v10 = vmul.f32 %v7873_v4, %v7873_v4  ;;  %v1110_v17 = vsel %vm1109_vm2, %v7873_v4, 0.0  ;;  %v1551_v40 = vsel %vm1109_vm2, %v1406_v16, 0.0  ;;  %2894 = vperm.xlu1 %7084, %v2612_v60   ;;  %v2630_v16 = vld [vmem:[%s12764_s0 + $0x1a0] sm:$0xff] }
  0xd3   :  { %v7884_v8 = vpop.f32.mrf.mxu0 }
  0xd4   :  { %v1548_v25 = vsel %vm1109_vm2, %v1404_v10, 0.0  ;;  %v1407_v26 = vmul.f32 %v7884_v8, %v7884_v8  ;;  %v1115_v41 = vsel %vm1109_vm2, %v7884_v8, 0.0 }
  0xd5   :  { %v7891_v13 = vpop.f32.mrf.mxu0  ;;  %2984 = vperm.xlu0 %7083, %v2630_v16  }
  0xd6   :  { %v1111_v18 = vsel %vm1109_vm2, %v7891_v13, 0.0  ;;  %v1405_v19 = vmul.f32 %v7891_v13, %v7891_v13  ;;  %v1553_v50 = vsel %vm1109_vm2, %v1407_v26, 0.0  ;;  %v2648_v26 = vld [vmem:[%s12764_s0 + $0x230] sm:$0xff] }
  0xd7   :  { %v1112_v21 = vadd.f32 %v1111_v18, %v1110_v17  ;;  %v7908_v22 = vpop.f32.mrf.mxu0  ;;  %6824 = vmatmul.mubr.msk.bf16.gmra.mxu0 %vm277_vm1, %v255_v9  ;;  %3074 = vperm.xlu1 %7084, %v2648_v26  }
  0xd8   :  { %v1549_v28 = vsel %vm1109_vm2, %v1405_v19, 0.0  ;;  %6827 = vmatprep.mubr.msk.bf16.mxu0 %vm277_vm1, %v256_v11  ;;  %v1410_v61 = vmul.f32 %v7908_v22, %v7908_v22  ;;  %v1121_v9 = vsel %vm1109_vm2, %v7908_v22, 0.0 }
  0xd9   :  { %v1114_v32 = vadd.f32 %v1113_v23, %v1112_v21  ;;  %v1550_v33 = vadd.f32 %v1549_v28, %v1548_v25  ;;  %v7927_v34 = vpop.f32.mrf.mxu0  ;;  %v172_v21 = vld [vmem:[%s12763_s19 + $0x380] sm:$0xff]  ;;  %v173_v23 = vld [vmem:[%s12763_s19 + $0x388] sm:$0xff]  ;;  %v7993_v25 = vpop.permute.xlu0 %3054 }
  0xda   :  { %v1408_v42 = vmul.f32 %v7927_v34, %v7927_v34  ;;  %v1117_v51 = vsel %vm1109_vm2, %v7927_v34, 0.0  ;;  %12779 = vst [vmem:[#allocation17_spill] sm:$0xff] %v7993_v25  ;;  %v1559_v28 = vsel %vm1109_vm2, %v1410_v61, 0.0  ;;  %v2635_v25 = vld [vmem:[%s12764_s0 + $0x1c8] sm:$0xff] }
  0xdb   :  { %v1116_v43 = vadd.f32 %v1115_v41, %v1114_v32  ;;  %v1552_v44 = vadd.f32 %v1551_v40, %v1550_v33  ;;  %v7943_v46 = vpop.f32.mrf.mxu0  ;;  %v260_v41 = vpack.c.bf16 %v173_v23, %v172_v21  ;;  %v2617_v21 = vld [vmem:[%s12764_s0 + $0x138] sm:$0xff] }
  0xdc   :  { %v1555_v0 = vsel %vm1109_vm2, %v1408_v42, 0.0  ;;  %v1411_v10 = vmul.f32 %v7943_v46, %v7943_v46  ;;  %v1123_v29 = vsel %vm1109_vm2, %v7943_v46, 0.0  ;;  %v2595_v42 = vld [vmem:[%s12764_s0 + $0x88] sm:$0xff] }
  0xdd   :  { %v1554_v56 = vadd.f32 %v1553_v50, %v1552_v44  ;;  %v1118_v58 = vadd.f32 %v1117_v51, %v1116_v43  ;;  %v7955_v59 = vpop.f32.mrf.mxu0  ;;  %v2613_v50 = vld [vmem:[%s12764_s0 + $0x118] sm:$0xff]  ;;  %2809 = vperm.xlu0 %7083, %v2595_v42  }
  0xde   :  { %v1119_v1 = vsel %vm1109_vm2, %v7955_v59, 0.0  ;;  %v1409_v3 = vmul.f32 %v7955_v59, %v7955_v59  ;;  %v1561_v39 = vsel %vm1109_vm2, %v1411_v10, 0.0  ;;  %v8042_v10 = vpop.permute.xlu1 %2734  ;;  %2899 = vperm.xlu1 %7084, %v2613_v50  }
  0xdf   :  { %v1556_v5 = vadd.f32 %v1555_v0, %v1554_v56  ;;  %v1120_v6 = vadd.f32 %v1119_v1, %v1118_v58  ;;  %v7967_v7 = vpop.f32.mrf.mxu0  ;;  %6828 = vmatmul.mubr.msk.bf16.gmra.mxu0 %vm277_vm1, %v257_v48  ;;  %v8028_v0 = vpop.permute.xlu0 %2724  ;;  %12782 = vst [vmem:[#allocation20_spill] sm:$0xff] %v8042_v10 }
  0xe0   :  { %v1557_v11 = vsel %vm1109_vm2, %v1409_v3, 0.0  ;;  %6831 = vmatprep.mubr.msk.bf16.mxu0 %vm277_vm1, %v258_v52  ;;  %v1414_v51 = vmul.f32 %v7967_v7, %v7967_v7  ;;  %12781 = vst [vmem:[#allocation19_spill] sm:$0xff] %v8028_v0  ;;  %v1129_v1 = vsel %vm1109_vm2, %v7967_v7, 0.0 }
  0xe1   :  { %v1122_v17 = vadd.f32 %v1121_v9, %v1120_v6  ;;  %v1558_v18 = vadd.f32 %v1557_v11, %v1556_v5  ;;  %v7985_v19 = vpop.f32.mrf.mxu0  ;;  %v174_v6 = vld [vmem:[%s12763_s19 + $0x390] sm:$0xff]  ;;  %v175_v9 = vld [vmem:[%s12763_s19 + $0x398] sm:$0xff]  ;;  %v2615_v11 = vld [vmem:[%s12764_s0 + $0x128] sm:$0xff] }
  0xe2   :  { %v1412_v30 = vmul.f32 %v7985_v19, %v7985_v19  ;;  %v1125_v40 = vsel %vm1109_vm2, %v7985_v19, 0.0  ;;  %v1567_v23 = vsel %vm1109_vm2, %v1414_v51, 0.0  ;;  %2909 = vperm.xlu0 %7083, %v2615_v11   ;;  %2919 = vperm.xlu1 %7084, %v2617_v21   ;;  %v2621_v51 = vld [vmem:[%s12764_s0 + $0x158] sm:$0xff] }
  0xe3   :  { %v1124_v32 = vadd.f32 %v1123_v29, %v1122_v17  ;;  %v1560_v33 = vadd.f32 %v1559_v28, %v1558_v18  ;;  %v8005_v36 = vpop.f32.mrf.mxu0  ;;  %v176_v17 = vld [vmem:[%s12763_s19 + $0x3a0] sm:$0xff]  ;;  %v177_v18 = vld [vmem:[%s12763_s19 + $0x3a8] sm:$0xff]  ;;  %v8073_v50 = vpop.permute.xlu0 %2744 }
  0xe4   :  { %v1563_v52 = vsel %vm1109_vm2, %v1412_v30, 0.0  ;;  %v1415_v3 = vmul.f32 %v8005_v36, %v8005_v36  ;;  %v1131_v26 = vsel %vm1109_vm2, %v8005_v36, 0.0  ;;  %12783 = vst [vmem:[#allocation21_spill] sm:$0xff] %v8073_v50 }
  0xe5   :  { %v1562_v43 = vadd.f32 %v1561_v39, %v1560_v33  ;;  %v1126_v44 = vadd.f32 %v1125_v40, %v1124_v32  ;;  %v8013_v48 = vpop.f32.mrf.mxu0  ;;  %v261_v33 = vpack.c.bf16 %v175_v9, %v174_v6  ;;  %v262_v40 = vpack.c.bf16 %v177_v18, %v176_v17  ;;  %v2623_v17 = vld [vmem:[%s12764_s0 + $0x168] sm:$0xff] }
  0xe6   :  { %v1127_v54 = vsel %vm1109_vm2, %v8013_v48, 0.0  ;;  %v1413_v56 = vmul.f32 %v8013_v48, %v8013_v48  ;;  %2939 = vperm.xlu1 %7084, %v2621_v51  }
  0xe7   :  { %v1564_v58 = vadd.f32 %v1563_v52, %v1562_v43  ;;  %v1128_v60 = vadd.f32 %v1127_v54, %v1126_v44  ;;  %v8025_v61 = vpop.f32.mrf.mxu0  ;;  %6832 = vmatmul.mubr.msk.bf16.gmra.mxu0 %vm277_vm1, %v259_v38  ;;  %v1569_v38 = vsel %vm1109_vm2, %v1415_v3, 0.0 }
  0xe8   :  { %v1565_v5 = vsel %vm1109_vm2, %v1413_v56, 0.0  ;;  %6835 = vmatprep.mubr.msk.bf16.mxu0 %vm277_vm1, %v260_v41  ;;  %v2619_v41 = vld [vmem:[%s12764_s0 + $0x148] sm:$0xff]  ;;  %v1418_v52 = vmul.f32 %v8025_v61, %v8025_v61  ;;  %v1137_v6 = vsel %vm1109_vm2, %v8025_v61, 0.0 }
  0xe9   :  { %v1130_v12 = vadd.f32 %v1129_v1, %v1128_v60  ;;  %v1566_v15 = vadd.f32 %v1565_v5, %v1564_v58  ;;  %v8047_v16 = vpop.f32.mrf.mxu0  ;;  %v8085_v60 = vpop.permute.xlu1 %2754  ;;  %2929 = vperm.xlu0 %7083, %v2619_v41  }
  0xea   :  { %v1416_v28 = vmul.f32 %v8047_v16, %v8047_v16  ;;  %v1133_v39 = vsel %vm1109_vm2, %v8047_v16, 0.0  ;;  %12784 = vst [vmem:[#allocation22_spill] sm:$0xff] %v8085_v60 }
  0xeb   :  { %v1132_v29 = vadd.f32 %v1131_v26, %v1130_v12  ;;  %v1568_v30 = vadd.f32 %v1567_v23, %v1566_v15  ;;  %v8063_v32 = vpop.f32.mrf.mxu0  ;;  %v178_v12 = vld [vmem:[%s12763_s19 + $0x3b0] sm:$0xff]  ;;  %v179_v15 = vld [vmem:[%s12763_s19 + $0x3b8] sm:$0xff]  ;;  %v180_v26 = vld [vmem:[%s12763_s19 + $0x3c0] sm:$0xff] }
  0xec   :  { %v1571_v54 = vsel %vm1109_vm2, %v1416_v28, 0.0  ;;  %v1419_v9 = vmul.f32 %v8063_v32, %v8063_v32  ;;  %v181_v28 = vld [vmem:[%s12763_s19 + $0x3c8] sm:$0xff] }
  0xed   :  { %v1570_v42 = vadd.f32 %v1569_v38, %v1568_v30  ;;  %v1134_v43 = vadd.f32 %v1133_v39, %v1132_v29  ;;  %v8071_v44 = vpop.f32.mrf.mxu0  ;;  %v2625_v29 = vld [vmem:[%s12764_s0 + $0x178] sm:$0xff]  ;;  %v1575_v30 = vsel %vm1109_vm2, %v1418_v52, 0.0  ;;  %2949 = vperm.xlu0 %7083, %v2623_v17   ;;  %v264_v52 = vpack.c.bf16 %v181_v28, %v180_v26 }
  0xee   :  { %v1135_v56 = vsel %vm1109_vm2, %v8071_v44, 0.0  ;;  %v1417_v58 = vmul.f32 %v8071_v44, %v8071_v44  ;;  %v1577_v51 = vsel %vm1109_vm2, %v1419_v9, 0.0  ;;  %2959 = vperm.xlu1 %7084, %v2625_v29  }
  0xef   :  { %v1572_v1 = vadd.f32 %v1571_v54, %v1570_v42  ;;  %v1136_v3 = vadd.f32 %v1135_v56, %v1134_v43  ;;  %v8087_v5 = vpop.f32.mrf.mxu0  ;;  %6836 = vmatmul.mubr.msk.bf16.gmra.mxu0 %vm277_vm1, %v261_v33  ;;  %v1139_v33 = vsel %vm1109_vm2, %v8063_v32, 0.0  ;;  %v263_v42 = vpack.c.bf16 %v179_v15, %v178_v12  ;;  %v8123_v43 = vpop.permute.xlu0 %2764 }
  0xf0   :  { %v1573_v11 = vsel %vm1109_vm2, %v1417_v58, 0.0  ;;  %6839 = vmatprep.mubr.msk.bf16.mxu0 %vm277_vm1, %v262_v40  ;;  %12785 = vst [vmem:[#allocation23_spill] sm:$0xff] %v8123_v43  ;;  %v8128_v56 = vpop.permute.xlu1 %2774  ;;  %v2627_v58 = vld [vmem:[%s12764_s0 + $0x188] sm:$0xff]  ;;  %v1422_v9 = vmul.f32 %v8087_v5, %v8087_v5  ;;  %v1145_v28 = vsel %vm1109_vm2, %v8087_v5, 0.0 }
  0xf1   :  { %v1138_v18 = vadd.f32 %v1137_v6, %v1136_v3  ;;  %v1574_v21 = vadd.f32 %v1573_v11, %v1572_v1  ;;  %v8105_v23 = vpop.f32.mrf.mxu0  ;;  %12786 = vst [vmem:[#allocation24_spill] sm:$0xff] %v8128_v56  ;;  %v2629_v11 = vld [vmem:[%s12764_s0 + $0x198] sm:$0xff]  ;;  %2969 = vperm.xlu0 %7083, %v2627_v58  }
  0xf2   :  { %v1420_v38 = vmul.f32 %v8105_v23, %v8105_v23  ;;  %v1141_v54 = vsel %vm1109_vm2, %v8105_v23, 0.0  ;;  %2979 = vperm.xlu1 %7084, %v2629_v11  }
  0xf3   :  { %v1140_v39 = vadd.f32 %v1139_v33, %v1138_v18  ;;  %v1576_v40 = vadd.f32 %v1575_v30, %v1574_v21  ;;  %v8121_v41 = vpop.f32.mrf.mxu0  ;;  %v182_v33 = vld [vmem:[%s12763_s19 + $0x3d0] sm:$0xff]  ;;  %v8171_v58 = vpop.permute.xlu0 %2784 }
  0xf4   :  { %v1579_v12 = vsel %vm1109_vm2, %v1420_v38, 0.0  ;;  %v1423_v29 = vmul.f32 %v8121_v41, %v8121_v41  ;;  %v183_v38 = vld [vmem:[%s12763_s19 + $0x3d8] sm:$0xff]  ;;  %12787 = vst [vmem:[#allocation25_spill] sm:$0xff] %v8171_v58  ;;  %v1147_v11 = vsel %vm1109_vm2, %v8121_v41, 0.0 }
  0xf5   :  { %v1578_v1 = vadd.f32 %v1577_v51, %v1576_v40  ;;  %v1142_v3 = vadd.f32 %v1141_v54, %v1140_v39  ;;  %v8133_v6 = vpop.f32.mrf.mxu0  ;;  %v2631_v39 = vld [vmem:[%s12764_s0 + $0x1a8] sm:$0xff]  ;;  %v184_v54 = vld [vmem:[%s12763_s19 + $0x3e0] sm:$0xff] }
  0xf6   :  { %v1143_v15 = vsel %vm1109_vm2, %v8133_v6, 0.0  ;;  %v1421_v17 = vmul.f32 %v8133_v6, %v8133_v6  ;;  %2989 = vperm.xlu0 %7083, %v2631_v39  }
  0xf7   :  { %v1580_v18 = vadd.f32 %v1579_v12, %v1578_v1  ;;  %v1144_v21 = vadd.f32 %v1143_v15, %v1142_v3  ;;  %v8145_v26 = vpop.f32.mrf.mxu0  ;;  %6840 = vmatmul.mubr.msk.bf16.gmra.mxu0 %vm277_vm1, %v263_v42  ;;  %v2633_v1 = vld [vmem:[%s12764_s0 + $0x1b8] sm:$0xff]  ;;  %v1583_v3 = vsel %vm1109_vm2, %v1422_v9, 0.0  ;;  %v8181_v15 = vpop.permute.xlu1 %2794 }
  0xf8   :  { %v1581_v30 = vsel %vm1109_vm2, %v1421_v17, 0.0  ;;  %6843 = vmatprep.mubr.msk.bf16.mxu0 %vm277_vm1, %v264_v52  ;;  %v185_v52 = vld [vmem:[%s12763_s19 + $0x3e8] sm:$0xff]  ;;  %12788 = vst [vmem:[#allocation26_spill] sm:$0xff] %v8181_v15  ;;  %2999 = vperm.xlu1 %7084, %v2633_v1   ;;  %v1153_v1 = vsel %vm1109_vm2, %v8145_v26, 0.0 }
  0xf9   :  { %v1146_v40 = vadd.f32 %v1145_v28, %v1144_v21  ;;  %v1582_v42 = vadd.f32 %v1581_v30, %v1580_v18  ;;  %v8163_v51 = vpop.f32.mrf.mxu0  ;;  %v265_v28 = vpack.c.bf16 %v183_v38, %v182_v33  ;;  %v1585_v30 = vsel %vm1109_vm2, %v1423_v29, 0.0  ;;  %v2637_v33 = vld [vmem:[%s12764_s0 + $0x1d8] sm:$0xff] }
  0xfa   :  { %v1424_v12 = vmul.f32 %v8163_v51, %v8163_v51  ;;  %v1149_v31 = vsel %vm1109_vm2, %v8163_v51, 0.0  ;;  %v266_v9 = vpack.c.bf16 %v185_v52, %v184_v54  ;;  %v1426_v29 = vmul.f32 %v8145_v26, %v8145_v26  ;;  %v8206_v52 = vpop.permute.xlu0 %2814  ;;  %3009 = vperm.xlu0 %7083, %v2635_v25   ;;  %v2639_v25 = vld [vmem:[%s12764_s0 + $0x1e8] sm:$0xff] }
  0xfb   :  { %v1148_v17 = vadd.f32 %v1147_v11, %v1146_v40  ;;  %v1584_v18 = vadd.f32 %v1583_v3, %v1582_v42  ;;  %v8183_v21 = vpop.f32.mrf.mxu0  ;;  %12789 = vst [vmem:[#allocation27_spill] sm:$0xff] %v8206_v52 }
  0xfc   :  { %v1587_v38 = vsel %vm1109_vm2, %v1424_v12, 0.0  ;;  %v1427_v3 = vmul.f32 %v8183_v21, %v8183_v21  ;;  %v8220_v12 = vpop.permute.xlu1 %2824  ;;  %3019 = vperm.xlu1 %7084, %v2637_v33   ;;  %v2641_v33 = vld [vmem:[%s12764_s0 + $0x1f8] sm:$0xff] }
  0xfd   :  { %v1586_v53 = vadd.f32 %v1585_v30, %v1584_v18  ;;  %v1150_v49 = vadd.f32 %v1149_v31, %v1148_v17  ;;  %v8191_v20 = vpop.f32.mrf.mxu0  ;;  %12790 = vst [vmem:[#allocation28_spill] sm:$0xff] %v8220_v12  ;;  %v188_v30 = vld [vmem:[%s12763_s19 + $0x400] sm:$0xff]  ;;  %v2687_v12 = vld [vmem:[%s12764_s0 + $0x368] sm:$0xff] }
  0xfe   :  { %v1151_v39 = vsel %vm1109_vm2, %v8191_v20, 0.0  ;;  %v1425_v40 = vmul.f32 %v8191_v20, %v8191_v20  ;;  %3029 = vperm.xlu0 %7083, %v2639_v25   ;;  %v1593_v14 = vsel %vm1109_vm2, %v1427_v3, 0.0 }
  0xff   :  { %v1588_v42 = vadd.f32 %v1587_v38, %v1586_v53  ;;  %v1152_v54 = vadd.f32 %v1151_v39, %v1150_v49  ;;  %v8203_v31 = vpop.f32.mrf.mxu0  ;;  %6844 = vmatmul.mubr.msk.bf16.gmra.mxu0 %vm277_vm1, %v265_v28  ;;  %v186_v49 = vld [vmem:[%s12763_s19 + $0x3f0] sm:$0xff]  ;;  %v187_v53 = vld [vmem:[%s12763_s19 + $0x3f8] sm:$0xff]  ;;  %v1591_v38 = vsel %vm1109_vm2, %v1426_v29, 0.0  ;;  %v1155_v39 = vsel %vm1109_vm2, %v8183_v21, 0.0  ;;  %v2643_v29 = vld [vmem:[%s12764_s0 + $0x208] sm:$0xff] }
 0x100   :  { %v1589_v11 = vsel %vm1109_vm2, %v1425_v40, 0.0  ;;  %6847 = vmatprep.mubr.msk.bf16.mxu0 %vm277_vm1, %v266_v9  ;;  %v189_v9 = vld [vmem:[%s12763_s19 + $0x408] sm:$0xff]  ;;  %3039 = vperm.xlu1 %7084, %v2641_v33   ;;  %v1430_v3 = vmul.f32 %v8203_v31, %v8203_v31  ;;  %v1161_v33 = vsel %vm1109_vm2, %v8203_v31, 0.0 }
 0x101   :  { %v1154_v17 = vadd.f32 %v1153_v1, %v1152_v54  ;;  %v1590_v18 = vadd.f32 %v1589_v11, %v1588_v42  ;;  %v8225_v28 = vpop.f32.mrf.mxu0  ;;  %v267_v11 = vpack.c.bf16 %v187_v53, %v186_v49  ;;  %v268_v63 = vpack.c.bf16 %v189_v9, %v188_v30  ;;  %v2645_v49 = vld [vmem:[%s12764_s0 + $0x218] sm:$0xff] }
 0x102   :  { %v1428_v40 = vmul.f32 %v8225_v28, %v8225_v28  ;;  %v1157_v2 = vsel %vm1109_vm2, %v8225_v28, 0.0  ;;  %3049 = vperm.xlu0 %7083, %v2643_v29   ;;  %v193_v29 = vld [vmem:[%s12763_s19 + $0x428] sm:$0xff] }
 0x103   :  { %v1156_v42 = vadd.f32 %v1155_v39, %v1154_v17  ;;  %v1592_v54 = vadd.f32 %v1591_v38, %v1590_v18  ;;  %v8241_v1 = vpop.f32.mrf.mxu0  ;;  %v8251_v17 = vpop.permute.xlu0 %2834 }
 0x104   :  { %12791 = vst [vmem:[#allocation29_spill] sm:$0xff] %v8251_v17  ;;  %v1595_v53 = vsel %vm1109_vm2, %v1428_v40, 0.0  ;;  %v1431_v38 = vmul.f32 %v8241_v1, %v8241_v1  ;;  %3059 = vperm.xlu1 %7084, %v2645_v49   ;;  %v2647_v40 = vld [vmem:[%s12764_s0 + $0x228] sm:$0xff]  ;;  %v2649_v49 = vld [vmem:[%s12764_s0 + $0x238] sm:$0xff] }
 0x105   :  { %v1594_v57 = vadd.f32 %v1593_v14, %v1592_v54  ;;  %v1158_v55 = vadd.f32 %v1157_v2, %v1156_v42  ;;  %v8249_v47 = vpop.f32.mrf.mxu0  ;;  %v8263_v2 = vpop.permute.xlu1 %2844 }
 0x106   :  { %v1159_v25 = vsel %vm1109_vm2, %v8249_v47, 0.0  ;;  %v1429_v14 = vmul.f32 %v8249_v47, %v8249_v47  ;;  %12792 = vst [vmem:[#allocation30_spill] sm:$0xff] %v8263_v2  ;;  %3069 = vperm.xlu0 %7083, %v2647_v40   ;;  %v1601_v37 = vsel %vm1109_vm2, %v1431_v38, 0.0 }
 0x107   :  { %v1596_v18 = vadd.f32 %v1595_v53, %v1594_v57  ;;  %v1160_v30 = vadd.f32 %v1159_v25, %v1158_v55  ;;  %v8265_v9 = vpop.f32.mrf.mxu0  ;;  %6848 = vmatmul.mubr.msk.bf16.gmra.mxu0 %vm277_vm1, %v267_v11  ;;  %v190_v57 = vld [vmem:[%s12763_s19 + $0x410] sm:$0xff]  ;;  %v191_v55 = vld [vmem:[%s12763_s19 + $0x418] sm:$0xff]  ;;  %v1599_v53 = vsel %vm1109_vm2, %v1430_v3, 0.0  ;;  %v1163_v25 = vsel %vm1109_vm2, %v8241_v1, 0.0  ;;  %v8301_v45 = vpop.permute.xlu0 %2854 }
 0x108   :  { %v1597_v39 = vsel %vm1109_vm2, %v1429_v14, 0.0  ;;  %6851 = vmatprep.mubr.msk.bf16.mxu0 %vm277_vm1, %v268_v63  ;;  %v192_v63 = vld [vmem:[%s12763_s19 + $0x420] sm:$0xff]  ;;  %12793 = vst [vmem:[#allocation31_spill] sm:$0xff] %v8301_v45  ;;  %3079 = vperm.xlu1 %7084, %v2649_v49   ;;  %v1434_v38 = vmul.f32 %v8265_v9, %v8265_v9  ;;  %v1169_v49 = vsel %vm1109_vm2, %v8265_v9, 0.0 }
 0x109   :  { %v1162_v42 = vadd.f32 %v1161_v33, %v1160_v30  ;;  %v1598_v54 = vadd.f32 %v1597_v39, %v1596_v18  ;;  %v8283_v11 = vpop.f32.mrf.mxu0  ;;  %v269_v39 = vpack.c.bf16 %v191_v55, %v190_v57  ;;  %v270_v3 = vpack.c.bf16 %v193_v29, %v192_v63  ;;  %v8306_v35 = vpop.permute.xlu1 %2864  ;;  %v2667_v57 = vld [vmem:[%s12764_s0 + $0x2c8] sm:$0xff] }
 0x10a   :  { %v1432_v14 = vmul.f32 %v8283_v11, %v8283_v11  ;;  %v1165_v27 = vsel %vm1109_vm2, %v8283_v11, 0.0  ;;  %12794 = vst [vmem:[#allocation32_spill] sm:$0xff] %v8306_v35  ;;  %v1607_v24 = vsel %vm1109_vm2, %v1434_v38, 0.0 }
 0x10b   :  { %v1164_v18 = vadd.f32 %v1163_v25, %v1162_v42  ;;  %v1600_v30 = vadd.f32 %v1599_v53, %v1598_v54  ;;  %v8299_v33 = vpop.f32.mrf.mxu0  ;;  %v2666_v42 = vld [vmem:[%s12764_s0 + $0x2c0] sm:$0xff] }
 0x10c   :  { %v1603_v55 = vsel %vm1109_vm2, %v1432_v14, 0.0  ;;  %3164 = vperm.xlu0 %7083, %v2666_v42   ;;  %3169 = vperm.xlu1 %7084, %v2667_v57   ;;  %v2685_v57 = vld [vmem:[%s12764_s0 + $0x358] sm:$0xff] }
 0x10d   :  { %v1602_v54 = vadd.f32 %v1601_v37, %v1600_v30  ;;  %v1166_v53 = vadd.f32 %v1165_v27, %v1164_v18  ;;  %v8311_v25 = vpop.f32.mrf.mxu0  ;;  %v1435_v18 = vmul.f32 %v8299_v33, %v8299_v33  ;;  %v194_v30 = vld [vmem:[%s12763_s19 + $0x430] sm:$0xff] }
 0x10e   :  { %v1167_v40 = vsel %vm1109_vm2, %v8311_v25, 0.0  ;;  %v1433_v63 = vmul.f32 %v8311_v25, %v8311_v25 }
 0x10f   :  { %v1604_v29 = vadd.f32 %v1603_v55, %v1602_v54  ;;  %v1168_v37 = vadd.f32 %v1167_v40, %v1166_v53  ;;  %v8323_v27 = vpop.f32.mrf.mxu0  ;;  %6852 = vmatmul.mubr.msk.bf16.gmra.mxu0 %vm277_vm1, %v269_v39  ;;  %v195_v54 = vld [vmem:[%s12763_s19 + $0x438] sm:$0xff]  ;;  %v2684_v39 = vld [vmem:[%s12764_s0 + $0x350] sm:$0xff]  ;;  %v197_v40 = vld [vmem:[%s12763_s19 + $0x448] sm:$0xff] }
 0x110   :  { %v1605_v14 = vsel %vm1109_vm2, %v1433_v63, 0.0  ;;  %6855 = vmatprep.mubr.msk.bf16.mxu0 %vm277_vm1, %v270_v3  ;;  %v196_v3 = vld [vmem:[%s12763_s19 + $0x440] sm:$0xff]  ;;  %v8349_v63 = vpop.permute.xlu0 %2874  ;;  %v271_v2 = vpack.c.bf16 %v195_v54, %v194_v30  ;;  %3254 = vperm.xlu0 %7083, %v2684_v39  }
 0x111   :  { %v1170_v42 = vadd.f32 %v1169_v49, %v1168_v37  ;;  %v1606_v53 = vadd.f32 %v1605_v14, %v1604_v29  ;;  %v8341_v55 = vpop.f32.mrf.mxu0  ;;  %12795 = vst [vmem:[#allocation33_spill] sm:$0xff] %v8349_v63  ;;  %v1171_v29 = vsel %vm1109_vm2, %v8299_v33, 0.0  ;;  %v8359_v49 = vpop.permute.xlu1 %2884  ;;  %v1609_v63 = vsel %vm1109_vm2, %v1435_v18, 0.0  ;;  %3259 = vperm.xlu1 %7084, %v2685_v57  }
 0x112   :  { %v1436_v37 = vmul.f32 %v8341_v55, %v8341_v55  ;;  %12796 = vst [vmem:[#allocation34_spill] sm:$0xff] %v8359_v49  ;;  %v1173_v17 = vsel %vm1109_vm2, %v8341_v55, 0.0  ;;  %v272_v38 = vpack.c.bf16 %v197_v40, %v196_v3  ;;  %v1438_v18 = vmul.f32 %v8323_v27, %v8323_v27 }
 0x113   :  { %v1172_v14 = vadd.f32 %v1171_v29, %v1170_v42  ;;  %v1608_v35 = vadd.f32 %v1607_v24, %v1606_v53  ;;  %v8361_v45 = vpop.f32.mrf.mxu0  ;;  %v2689_v24 = vld [vmem:[%s12764_s0 + $0x378] sm:$0xff]  ;;  %v1177_v3 = vsel %vm1109_vm2, %v8323_v27, 0.0 }
 0x114   :  { %v1611_v30 = vsel %vm1109_vm2, %v1436_v37, 0.0  ;;  %v8384_v53 = vpop.permute.xlu0 %2729  ;;  %3269 = vperm.xlu0 %7083, %v2687_v12   ;;  %v1439_v40 = vmul.f32 %v8361_v45, %v8361_v45  ;;  %v2691_v12 = vld [vmem:[%s12764_s0 + $0x388] sm:$0xff] }
 0x115   :  { %v1610_v52 = vadd.f32 %v1609_v63, %v1608_v35  ;;  %v1174_v15 = vadd.f32 %v1173_v17, %v1172_v14  ;;  %v8369_v49 = vpop.f32.mrf.mxu0  ;;  %12797 = vst [vmem:[#allocation35_spill] sm:$0xff] %v8384_v53  ;;  %3279 = vperm.xlu1 %7084, %v2689_v24   ;;  %v200_v14 = vld [vmem:[%s12763_s19 + $0x460] sm:$0xff]  ;;  %v2693_v24 = vld [vmem:[%s12764_s0 + $0x398] sm:$0xff] }
 0x116   :  { %v1175_v54 = vsel %vm1109_vm2, %v8369_v49, 0.0  ;;  %v1437_v39 = vmul.f32 %v8369_v49, %v8369_v49  ;;  %v1617_v58 = vsel %vm1109_vm2, %v1439_v40, 0.0 }
 0x117   :  { %v1612_v42 = vadd.f32 %v1611_v30, %v1610_v52  ;;  %v1176_v35 = vadd.f32 %v1175_v54, %v1174_v15  ;;  %v8381_v17 = vpop.f32.mrf.mxu0  ;;  %6856 = vmatmul.mubr.msk.bf16.gmra.mxu0 %vm277_vm1, %v271_v2  ;;  %v198_v15 = vld [vmem:[%s12763_s19 + $0x450] sm:$0xff]  ;;  %v199_v52 = vld [vmem:[%s12763_s19 + $0x458] sm:$0xff]  ;;  %v8398_v2 = vpop.permute.xlu1 %2739  ;;  %v1615_v30 = vsel %vm1109_vm2, %v1438_v18, 0.0  ;;  %v1179_v54 = vsel %vm1109_vm2, %v8361_v45, 0.0  ;;  %v2695_v18 = vld [vmem:[%s12764_s0 + $0x3a8] sm:$0xff] }
 0x118   :  { %v1613_v63 = vsel %vm1109_vm2, %v1437_v39, 0.0  ;;  %6859 = vmatprep.mubr.msk.bf16.mxu0 %vm277_vm1, %v272_v38  ;;  %12798 = vst [vmem:[#allocation36_spill] sm:$0xff] %v8398_v2  ;;  %v201_v38 = vld [vmem:[%s12763_s19 + $0x468] sm:$0xff]  ;;  %3289 = vperm.xlu0 %7083, %v2691_v12   ;;  %v8425_v10 = vpop.permute.xlu0 %2749  ;;  %v1442_v40 = vmul.f32 %v8381_v17, %v8381_v17 }
 0x119   :  { %v1178_v57 = vadd.f32 %v1177_v3, %v1176_v35  ;;  %v1614_v29 = vadd.f32 %v1613_v63, %v1612_v42  ;;  %v8403_v37 = vpop.f32.mrf.mxu0  ;;  %v273_v63 = vpack.c.bf16 %v199_v52, %v198_v15  ;;  %v274_v43 = vpack.c.bf16 %v201_v38, %v200_v14  ;;  %3299 = vperm.xlu1 %7084, %v2693_v24   ;;  %v2697_v15 = vld [vmem:[%s12764_s0 + $0x3b8] sm:$0xff] }
 0x11a   :  { %v1440_v39 = vmul.f32 %v8403_v37, %v8403_v37  ;;  %v1181_v56 = vsel %vm1109_vm2, %v8403_v37, 0.0  ;;  %12799 = vst [vmem:[#allocation37_spill] sm:$0xff] %v8425_v10  ;;  %v1185_v38 = vsel %vm1109_vm2, %v8381_v17, 0.0 }
 0x11b   :  { %v1180_v42 = vadd.f32 %v1179_v54, %v1178_v57  ;;  %v1616_v35 = vadd.f32 %v1615_v30, %v1614_v29  ;;  %v6762_v3 = vpop.f32.mrf.mxu0  ;;  %v8434_v29 = vpop.permute.xlu1 %2759 }
 0x11c   :  { %v1619_v52 = vsel %vm1109_vm2, %v1440_v39, 0.0  ;;  %12800 = vst [vmem:[#allocation38_spill] sm:$0xff] %v8434_v29  ;;  %3309 = vperm.xlu0 %7083, %v2695_v18   ;;  %v1443_v24 = vmul.f32 %v6762_v3, %v6762_v3  ;;  %v8461_v29 = vpop.permute.xlu0 %2769 }
 0x11d   :  { %v1618_v60 = vadd.f32 %v1617_v58, %v1616_v35  ;;  %v1182_v50 = vadd.f32 %v1181_v56, %v1180_v42  ;;  %v679_v2 = vpop.f32.mrf.mxu0  ;;  %3319 = vperm.xlu1 %7084, %v2697_v15   ;;  %v1623_v35 = vsel %vm1109_vm2, %v1442_v40, 0.0  ;;  %12801 = vst [vmem:[#allocation39_spill] sm:$0xff] %v8461_v29 }
 0x11e   :  { %v1183_v12 = vsel %vm1109_vm2, %v679_v2, 0.0  ;;  %v1441_v57 = vmul.f32 %v679_v2, %v679_v2  ;;  %v202_v2 = vld [vmem:[%s12763_s19 + $0x470] sm:$0xff] }
 0x11f   :  { %v1620_v14 = vadd.f32 %v1619_v52, %v1618_v60  ;;  %v1184_v58 = vadd.f32 %v1183_v12, %v1182_v50  ;;  %v8436_v56 = vpop.f32.mrf.mxu0  ;;  %6860 = vmatmul.mubr.msk.bf16.gmra.mxu0 %vm277_vm1, %v273_v63  ;;  %v203_v50 = vld [vmem:[%s12763_s19 + $0x478] sm:$0xff]  ;;  %v2699_v60 = vld [vmem:[%s12764_s0 + $0x3c8] sm:$0xff]  ;;  %v1187_v63 = vsel %vm1109_vm2, %v6762_v3, 0.0  ;;  %v2702_v3 = vld [vmem:[%s12764_s0 + $0x3e0] sm:$0xff] }
 0x120   :  { %v1621_v30 = vsel %vm1109_vm2, %v1441_v57, 0.0  ;;  %6863 = vmatprep.mubr.msk.bf16.mxu0 %vm277_vm1, %v274_v43  ;;  %v2701_v43 = vld [vmem:[%s12764_s0 + $0x3d8] sm:$0xff]  ;;  %v275_v57 = vpack.c.bf16 %v203_v50, %v202_v2  ;;  %3329 = vperm.xlu0 %7083, %v2699_v60   ;;  %v2703_v2 = vld [vmem:[%s12764_s0 + $0x3e8] sm:$0xff] }
 0x121   :  { %v1186_v54 = vadd.f32 %v1185_v38, %v1184_v58  ;;  %v1622_v39 = vadd.f32 %v1621_v30, %v1620_v14  ;;  %v8452_v42 = vpop.f32.mrf.mxu0  ;;  %v1625_v14 = vsel %vm1109_vm2, %v1443_v24, 0.0  ;;  %v8466_v38 = vpop.permute.xlu1 %2779  ;;  %3339 = vperm.xlu1 %7084, %v2701_v43   ;;  %v1446_v24 = vmul.f32 %v8436_v56, %v8436_v56 }
 0x122   :  { %v1444_v18 = vmul.f32 %v8452_v42, %v8452_v42  ;;  %v1189_v58 = vsel %vm1109_vm2, %v8452_v42, 0.0  ;;  %12802 = vst [vmem:[#allocation40_spill] sm:$0xff] %v8466_v38 }
 0x123   :  { %v1188_v15 = vadd.f32 %v1187_v63, %v1186_v54  ;;  %v1624_v52 = vadd.f32 %v1623_v35, %v1622_v39  ;;  %v6766_v12 = vpop.f32.mrf.mxu0 }
 0x124   :  { %v1627_v50 = vsel %vm1109_vm2, %v1444_v18, 0.0  ;;  %3344 = vperm.xlu0 %7083, %v2702_v3   ;;  %v2705_v18 = vld [vmem:[%s12764_s0 + $0x3f8] sm:$0xff]  ;;  %v1631_v3 = vsel %vm1109_vm2, %v1446_v24, 0.0 }
 0x125   :  { %v1626_v40 = vadd.f32 %v1625_v14, %v1624_v52  ;;  %v1190_v30 = vadd.f32 %v1189_v58, %v1188_v15  ;;  %v695_v54 = vpop.f32.mrf.mxu0  ;;  %v1193_v15 = vsel %vm1109_vm2, %v8436_v56, 0.0  ;;  %v1447_v52 = vmul.f32 %v6766_v12, %v6766_v12  ;;  %3349 = vperm.xlu1 %7084, %v2703_v2   ;;  %v2709_v24 = vld [vmem:[%s12764_s0 + $0x418] sm:$0xff] }
 0x126   :  { %v1191_v60 = vsel %vm1109_vm2, %v695_v54, 0.0  ;;  %v1445_v39 = vmul.f32 %v695_v54, %v695_v54 }
 0x127   :  { %v1628_v43 = vadd.f32 %v1627_v50, %v1626_v40  ;;  %v1192_v35 = vadd.f32 %v1191_v60, %v1190_v30  ;;  %v8478_v63 = vpop.f32.mrf.mxu0  ;;  %6864 = vmatmul.mubr.msk.bf16.gmra.mxu0 %vm277_vm1, %v275_v57  ;;  %v8489_v30 = vpop.permute.xlu0 %2789  ;;  %v2707_v57 = vld [vmem:[%s12764_s0 + $0x408] sm:$0xff]  ;;  %v1195_v50 = vsel %vm1109_vm2, %v6766_v12, 0.0 }
 0x128   :  { %12803 = vst [vmem:[#allocation41_spill] sm:$0xff] %v8478_v63  ;;  %v1629_v14 = vsel %vm1109_vm2, %v1445_v39, 0.0  ;;  %12805 = vst [vmem:[#allocation43_spill] sm:$0xff] %v8489_v30  ;;  %v8498_v60 = vpop.permute.xlu1 %2799  ;;  %3359 = vperm.xlu0 %7083, %v2705_v18   ;;  %v1450_v18 = vmul.f32 %v8478_v63, %v8478_v63 }
 0x129   :  { %v1194_v58 = vadd.f32 %v1193_v15, %v1192_v35  ;;  %v1630_v54 = vadd.f32 %v1629_v14, %v1628_v43  ;;  %v8487_v40 = vpop.f32.mrf.mxu0  ;;  %12806 = vst [vmem:[#allocation44_spill] sm:$0xff] %v8498_v60  ;;  %v1633_v15 = vsel %vm1109_vm2, %v1447_v52, 0.0  ;;  %3369 = vperm.xlu1 %7084, %v2707_v57  }
 0x12a   :  { %12804 = vst [vmem:[#allocation42_spill] sm:$0xff] %v8487_v40  ;;  %v1448_v2 = vmul.f32 %v8487_v40, %v8487_v40  ;;  %v1197_v14 = vsel %vm1109_vm2, %v8487_v40, 0.0 }
 0x12b   :  { %v1196_v39 = vadd.f32 %v1195_v50, %v1194_v58  ;;  %v1632_v35 = vadd.f32 %v1631_v3, %v1630_v54  ;;  %v6770_v43 = vpop.f32.mrf.mxu0  ;;  %v2711_v58 = vld [vmem:[%s12764_s0 + $0x428] sm:$0xff]  ;;  %v8515_v29 = vpop.permute.xlu0 %2819 }
 0x12c   :  { %v1635_v52 = vsel %vm1109_vm2, %v1448_v2, 0.0  ;;  %12808 = vst [vmem:[#allocation46_spill] sm:$0xff] %v8515_v29  ;;  %3379 = vperm.xlu0 %7083, %v2709_v24   ;;  %v2715_v24 = vld [vmem:[%s12764_s0 + $0x448] sm:$0xff] }
 0x12d   :  { %v1634_v12 = vadd.f32 %v1633_v15, %v1632_v35  ;;  %v1198_v30 = vadd.f32 %v1197_v14, %v1196_v39  ;;  %v711_v38 = vpop.f32.mrf.mxu0  ;;  %v1201_v39 = vsel %vm1109_vm2, %v8478_v63, 0.0  ;;  %v1451_v35 = vmul.f32 %v6770_v43, %v6770_v43  ;;  %v8520_v14 = vpop.permute.xlu1 %2829  ;;  %3389 = vperm.xlu1 %7084, %v2711_v58  }
 0x12e   :  { %v1199_v54 = vsel %vm1109_vm2, %v711_v38, 0.0  ;;  %v1449_v3 = vmul.f32 %v711_v38, %v711_v38  ;;  %12809 = vst [vmem:[#allocation47_spill] sm:$0xff] %v8520_v14  ;;  %v2713_v38 = vld [vmem:[%s12764_s0 + $0x438] sm:$0xff] }
 0x12f   :  { %v1636_v57 = vadd.f32 %v1635_v52, %v1634_v12  ;;  %v1200_v50 = vadd.f32 %v1199_v54, %v1198_v30  ;;  %v8513_v60 = vpop.f32.mrf.mxu0  ;;  %v1639_v52 = vsel %vm1109_vm2, %v1450_v18, 0.0  ;;  %v1203_v54 = vsel %vm1109_vm2, %v6770_v43, 0.0  ;;  %v8540_v10 = vpop.permute.xlu0 %2839 }
 0x130   :  { %12807 = vst [vmem:[#allocation45_spill] sm:$0xff] %v8513_v60  ;;  %v1637_v15 = vsel %vm1109_vm2, %v1449_v3, 0.0  ;;  %3399 = vperm.xlu0 %7083, %v2713_v38   ;;  %12811 = vst [vmem:[#allocation49_spill] sm:$0xff] %v8540_v10 }
 0x131   :  { %v1202_v2 = vadd.f32 %v1201_v39, %v1200_v50  ;;  %v1638_v30 = vadd.f32 %v1637_v15, %v1636_v57  ;;  %v8525_v12 = vpop.f32.mrf.mxu0  ;;  %v1641_v50 = vsel %vm1109_vm2, %v1451_v35, 0.0  ;;  %3409 = vperm.xlu1 %7084, %v2715_v24   ;;  %v2717_v39 = vld [vmem:[%s12764_s0 + $0x458] sm:$0xff]  ;;  %v1454_v35 = vmul.f32 %v8513_v60, %v8513_v60 }
 0x132   :  { %12810 = vst [vmem:[#allocation48_spill] sm:$0xff] %v8525_v12  ;;  %v1452_v3 = vmul.f32 %v8525_v12, %v8525_v12  ;;  %v1205_v57 = vsel %vm1109_vm2, %v8525_v12, 0.0 }
 0x133   :  { %v1204_v58 = vadd.f32 %v1203_v54, %v1202_v2  ;;  %v1640_v14 = vadd.f32 %v1639_v52, %v1638_v30  ;;  %v6774_v29 = vpop.f32.mrf.mxu0  ;;  %v2719_v2 = vld [vmem:[%s12764_s0 + $0x468] sm:$0xff]  ;;  %v8549_v52 = vpop.permute.xlu1 %2849 }
 0x134   :  { %v1643_v38 = vsel %vm1109_vm2, %v1452_v3, 0.0  ;;  %12812 = vst [vmem:[#allocation50_spill] sm:$0xff] %v8549_v52  ;;  %3419 = vperm.xlu0 %7083, %v2717_v39   ;;  %v2720_v3 = vld [vmem:[%s12764_s0 + $0x470] sm:$0xff]  ;;  %v1647_v39 = vsel %vm1109_vm2, %v1454_v35, 0.0  ;;  %v8568_v52 = vpop.permute.xlu0 %2859 }
 0x135   :  { %v1642_v18 = vadd.f32 %v1641_v50, %v1640_v14  ;;  %v1206_v15 = vadd.f32 %v1205_v57, %v1204_v58  ;;  %v727_v43 = vpop.f32.mrf.mxu0  ;;  %v1209_v50 = vsel %vm1109_vm2, %v8513_v60, 0.0  ;;  %v1455_v57 = vmul.f32 %v6774_v29, %v6774_v29  ;;  %3429 = vperm.xlu1 %7084, %v2719_v2   ;;  %12815 = vst [vmem:[#allocation53_spill] sm:$0xff] %v8568_v52 }
 0x136   :  { %v1207_v30 = vsel %vm1109_vm2, %v727_v43, 0.0  ;;  %v1453_v24 = vmul.f32 %v727_v43, %v727_v43 }
 0x137   :  { %v1644_v54 = vadd.f32 %v1643_v38, %v1642_v18  ;;  %v1208_v14 = vadd.f32 %v1207_v30, %v1206_v15  ;;  %v8551_v58 = vpop.f32.mrf.mxu0  ;;  %v2721_v18 = vld [vmem:[%s12764_s0 + $0x478] sm:$0xff]  ;;  %v1211_v15 = vsel %vm1109_vm2, %v6774_v29, 0.0 }
 0x138   :  { %12813 = vst [vmem:[#allocation51_spill] sm:$0xff] %v8551_v58  ;;  %v1645_v10 = vsel %vm1109_vm2, %v1453_v24, 0.0  ;;  %3434 = vperm.xlu0 %7083, %v2720_v3   ;;  %v1458_v60 = vmul.f32 %v8551_v58, %v8551_v58  ;;  %v1217_v52 = vsel %vm1109_vm2, %v8551_v58, 0.0 }
 0x139   :  { %v1210_v53 = vadd.f32 %v1209_v50, %v1208_v14  ;;  %v1646_v43 = vadd.f32 %v1645_v10, %v1644_v54  ;;  %v8559_v0 = vpop.f32.mrf.mxu0  ;;  %v1649_v10 = vsel %vm1109_vm2, %v1455_v57, 0.0  ;;  %v8573_v14 = vpop.permute.xlu1 %2869  ;;  %3439 = vperm.xlu1 %7084, %v2721_v18  }
 0x13a   :  { %12814 = vst [vmem:[#allocation52_spill] sm:$0xff] %v8559_v0  ;;  %v1456_v38 = vmul.f32 %v8559_v0, %v8559_v0  ;;  %v1213_v54 = vsel %vm1109_vm2, %v8559_v0, 0.0  ;;  %12816 = vst [vmem:[#allocation54_spill] sm:$0xff] %v8573_v14 }
 0x13b   :  { %v1212_v2 = vadd.f32 %v1211_v15, %v1210_v53  ;;  %v1648_v30 = vadd.f32 %v1647_v39, %v1646_v43  ;;  %v6778_v24 = vpop.f32.mrf.mxu0 }
 0x13c   :  { %v1651_v53 = vsel %vm1109_vm2, %v1456_v38, 0.0  ;;  %v1459_v14 = vmul.f32 %v6778_v24, %v6778_v24  ;;  %v1219_v38 = vsel %vm1109_vm2, %v6778_v24, 0.0 }
 0x13d   :  { %v1650_v35 = vadd.f32 %v1649_v10, %v1648_v30  ;;  %v1214_v50 = vadd.f32 %v1213_v54, %v1212_v2  ;;  %v743_v29 = vpop.f32.mrf.mxu0  ;;  %v1655_v54 = vsel %vm1109_vm2, %v1458_v60, 0.0 }
 0x13e   :  { %v1215_v43 = vsel %vm1109_vm2, %v743_v29, 0.0  ;;  %v1457_v39 = vmul.f32 %v743_v29, %v743_v29 }
 0x13f   :  { %v1652_v3 = vadd.f32 %v1651_v53, %v1650_v35  ;;  %v1216_v15 = vadd.f32 %v1215_v43, %v1214_v50  ;;  %v8579_v57 = vpop.f32.mrf.mxu0  ;;  %v1657_v43 = vsel %vm1109_vm2, %v1459_v14, 0.0 }
 0x140   :  { %12817 = vst [vmem:[#allocation55_spill] sm:$0xff] %v8579_v57  ;;  %v1653_v18 = vsel %vm1109_vm2, %v1457_v39, 0.0  ;;  %v1225_v14 = vsel %vm1109_vm2, %v8579_v57, 0.0 }
 0x141   :  { %v1218_v2 = vadd.f32 %v1217_v52, %v1216_v15  ;;  %v1654_v30 = vadd.f32 %v1653_v18, %v1652_v3  ;;  %v8584_v10 = vpop.f32.mrf.mxu0  ;;  %v1462_v15 = vmul.f32 %v8579_v57, %v8579_v57 }
 0x142   :  { %12818 = vst [vmem:[#allocation56_spill] sm:$0xff] %v8584_v10  ;;  %v1460_v35 = vmul.f32 %v8584_v10, %v8584_v10  ;;  %v1221_v58 = vsel %vm1109_vm2, %v8584_v10, 0.0 }
 0x143   :  { %v1220_v50 = vadd.f32 %v1219_v38, %v1218_v2  ;;  %v1656_v29 = vadd.f32 %v1655_v54, %v1654_v30  ;;  %v6782_v53 = vpop.f32.mrf.mxu0 }
 0x144   :  { %v1659_v60 = vsel %vm1109_vm2, %v1460_v35, 0.0  ;;  %v1463_v54 = vmul.f32 %v6782_v53, %v6782_v53  ;;  %v1227_v35 = vsel %vm1109_vm2, %v6782_v53, 0.0 }
 0x145   :  { %v1658_v39 = vadd.f32 %v1657_v43, %v1656_v29  ;;  %v1222_v52 = vadd.f32 %v1221_v58, %v1220_v50  ;;  %v759_v3 = vpop.f32.mrf.mxu0  ;;  %v1663_v43 = vsel %vm1109_vm2, %v1462_v15, 0.0 }
 0x146   :  { %v1223_v24 = vsel %vm1109_vm2, %v759_v3, 0.0  ;;  %v1461_v18 = vmul.f32 %v759_v3, %v759_v3 }
 0x147   :  { %v1660_v0 = vadd.f32 %v1659_v60, %v1658_v39  ;;  %v1224_v2 = vadd.f32 %v1223_v24, %v1222_v52  ;;  %v8597_v30 = vpop.f32.mrf.mxu0  ;;  %v1665_v24 = vsel %vm1109_vm2, %v1463_v54, 0.0 }
 0x148   :  { %12819 = vst [vmem:[#allocation57_spill] sm:$0xff] %v8597_v30  ;;  %v1661_v38 = vsel %vm1109_vm2, %v1461_v18, 0.0  ;;  %v1233_v54 = vsel %vm1109_vm2, %v8597_v30, 0.0 }
 0x149   :  { %v1226_v58 = vadd.f32 %v1225_v14, %v1224_v2  ;;  %v1662_v50 = vadd.f32 %v1661_v38, %v1660_v0  ;;  %v8602_v29 = vpop.f32.mrf.mxu0  ;;  %v1466_v14 = vmul.f32 %v8597_v30, %v8597_v30 }
 0x14a   :  { %12820 = vst [vmem:[#allocation58_spill] sm:$0xff] %v8602_v29  ;;  %v1464_v39 = vmul.f32 %v8602_v29, %v8602_v29  ;;  %v1229_v57 = vsel %vm1109_vm2, %v8602_v29, 0.0 }
 0x14b   :  { %v1228_v52 = vadd.f32 %v1227_v35, %v1226_v58  ;;  %v1664_v3 = vadd.f32 %v1663_v43, %v1662_v50  ;;  %v6786_v60 = vpop.f32.mrf.mxu0 }
 0x14c   :  { %v1667_v15 = vsel %vm1109_vm2, %v1464_v39, 0.0  ;;  %v1467_v43 = vmul.f32 %v6786_v60, %v6786_v60  ;;  %v1671_v39 = vsel %vm1109_vm2, %v1466_v14, 0.0 }
 0x14d   :  { %v1666_v18 = vadd.f32 %v1665_v24, %v1664_v3  ;;  %v1230_v2 = vadd.f32 %v1229_v57, %v1228_v52  ;;  %v775_v0 = vpop.f32.mrf.mxu0  ;;  %v8622_v24 = vpop.permute.xlu0 %2879 }
 0x14e   :  { %v1231_v53 = vsel %vm1109_vm2, %v775_v0, 0.0  ;;  %v1465_v38 = vmul.f32 %v775_v0, %v775_v0  ;;  %12823 = vst [vmem:[#allocation61_spill] sm:$0xff] %v8622_v24  ;;  %v1235_v0 = vsel %vm1109_vm2, %v6786_v60, 0.0  ;;  %v1673_v30 = vsel %vm1109_vm2, %v1467_v43, 0.0 }
 0x14f   :  { %v1668_v10 = vadd.f32 %v1667_v15, %v1666_v18  ;;  %v1232_v58 = vadd.f32 %v1231_v53, %v1230_v2  ;;  %v8615_v50 = vpop.f32.mrf.mxu0 }
 0x150   :  { %12821 = vst [vmem:[#allocation59_spill] sm:$0xff] %v8615_v50  ;;  %v1669_v35 = vsel %vm1109_vm2, %v1465_v38, 0.0  ;;  %v1241_v43 = vsel %vm1109_vm2, %v8615_v50, 0.0 }
 0x151   :  { %v1234_v57 = vadd.f32 %v1233_v54, %v1232_v58  ;;  %v1670_v52 = vadd.f32 %v1669_v35, %v1668_v10  ;;  %v8620_v3 = vpop.f32.mrf.mxu0  ;;  %v1470_v35 = vmul.f32 %v8615_v50, %v8615_v50 }
 0x152   :  { %12822 = vst [vmem:[#allocation60_spill] sm:$0xff] %v8620_v3  ;;  %v1468_v18 = vmul.f32 %v8620_v3, %v8620_v3  ;;  %v1237_v38 = vsel %vm1109_vm2, %v8620_v3, 0.0 }
 0x153   :  { %v1236_v2 = vadd.f32 %v1235_v0, %v1234_v57  ;;  %v1672_v15 = vadd.f32 %v1671_v39, %v1670_v52  ;;  %v6790_v53 = vpop.f32.mrf.mxu0  ;;  %v8637_v39 = vpop.permute.xlu0 %3084 }
 0x154   :  { %v1675_v14 = vsel %vm1109_vm2, %v1468_v18, 0.0  ;;  %12825 = vst [vmem:[#allocation63_spill] sm:$0xff] %v8637_v39  ;;  %v1679_v18 = vsel %vm1109_vm2, %v1470_v35, 0.0 }
 0x155   :  { %v1674_v10 = vadd.f32 %v1673_v30, %v1672_v15  ;;  %v1238_v58 = vadd.f32 %v1237_v38, %v1236_v2  ;;  %v791_v54 = vpop.f32.mrf.mxu0  ;;  %v1471_v30 = vmul.f32 %v6790_v53, %v6790_v53 }
 0x156   :  { %v1239_v60 = vsel %vm1109_vm2, %v791_v54, 0.0  ;;  %v1469_v24 = vmul.f32 %v791_v54, %v791_v54  ;;  %v1243_v54 = vsel %vm1109_vm2, %v6790_v53, 0.0 }
 0x157   :  { %v1676_v29 = vadd.f32 %v1675_v14, %v1674_v10  ;;  %v1240_v57 = vadd.f32 %v1239_v60, %v1238_v58  ;;  %v8635_v52 = vpop.f32.mrf.mxu0  ;;  %v1681_v39 = vsel %vm1109_vm2, %v1471_v30, 0.0 }
 0x158   :  { %12824 = vst [vmem:[#allocation62_spill] sm:$0xff] %v8635_v52  ;;  %v1677_v0 = vsel %vm1109_vm2, %v1469_v24, 0.0  ;;  %v1474_v35 = vmul.f32 %v8635_v52, %v8635_v52  ;;  %v1249_v30 = vsel %vm1109_vm2, %v8635_v52, 0.0 }
 0x159   :  { %v1242_v2 = vadd.f32 %v1241_v43, %v1240_v57  ;;  %v1678_v15 = vadd.f32 %v1677_v0, %v1676_v29  ;;  %v8642_v38 = vpop.f32.mrf.mxu0  ;;  %v8651_v43 = vpop.permute.xlu0 %3104 }
 0x15a   :  { %12826 = vst [vmem:[#allocation64_spill] sm:$0xff] %v8642_v38  ;;  %v1472_v10 = vmul.f32 %v8642_v38, %v8642_v38  ;;  %v1245_v50 = vsel %vm1109_vm2, %v8642_v38, 0.0  ;;  %12827 = vst [vmem:[#allocation65_spill] sm:$0xff] %v8651_v43  ;;  %v1687_v38 = vsel %vm1109_vm2, %v1474_v35, 0.0 }
 0x15b   :  { %v1244_v58 = vadd.f32 %v1243_v54, %v1242_v2  ;;  %v1680_v14 = vadd.f32 %v1679_v18, %v1678_v15  ;;  %v6794_v60 = vpop.f32.mrf.mxu0 }
 0x15c   :  { %v1683_v53 = vsel %vm1109_vm2, %v1472_v10, 0.0  ;;  %v1251_v10 = vsel %vm1109_vm2, %v6794_v60, 0.0 }
 0x15d   :  { %v1682_v24 = vadd.f32 %v1681_v39, %v1680_v14  ;;  %v1246_v57 = vadd.f32 %v1245_v50, %v1244_v58  ;;  %v807_v29 = vpop.f32.mrf.mxu0  ;;  %v1475_v39 = vmul.f32 %v6794_v60, %v6794_v60 }
 0x15e   :  { %v1247_v0 = vsel %vm1109_vm2, %v807_v29, 0.0  ;;  %v1473_v2 = vmul.f32 %v807_v29, %v807_v29 }
 0x15f   :  { %v1684_v15 = vadd.f32 %v1683_v53, %v1682_v24  ;;  %v1248_v18 = vadd.f32 %v1247_v0, %v1246_v57  ;;  %v8657_v54 = vpop.f32.mrf.mxu0  ;;  %v8670_v0 = vpop.permute.xlu0 %3124  ;;  %v1689_v52 = vsel %vm1109_vm2, %v1475_v39, 0.0 }
 0x160   :  { %12828 = vst [vmem:[#allocation66_spill] sm:$0xff] %v8657_v54  ;;  %v1685_v50 = vsel %vm1109_vm2, %v1473_v2, 0.0  ;;  %12831 = vst [vmem:[#allocation69_spill] sm:$0xff] %v8670_v0  ;;  %v1478_v60 = vmul.f32 %v8657_v54, %v8657_v54 }
 0x161   :  { %v1250_v58 = vadd.f32 %v1249_v30, %v1248_v18  ;;  %v1686_v14 = vadd.f32 %v1685_v50, %v1684_v15  ;;  %v8662_v43 = vpop.f32.mrf.mxu0 }
 0x162   :  { %12829 = vst [vmem:[#allocation67_spill] sm:$0xff] %v8662_v43  ;;  %v1476_v24 = vmul.f32 %v8662_v43, %v8662_v43  ;;  %v1253_v2 = vsel %vm1109_vm2, %v8662_v43, 0.0 }
 0x163   :  { %v1252_v57 = vadd.f32 %v1251_v10, %v1250_v58  ;;  %v1688_v29 = vadd.f32 %v1687_v38, %v1686_v14  ;;  %v8668_v53 = vpop.f32.mrf.mxu0  ;;  %v8693_v0 = vpop.permute.xlu0 %3144 }
 0x164   :  { %12830 = vst [vmem:[#allocation68_spill] sm:$0xff] %v8668_v53  ;;  %v1691_v35 = vsel %vm1109_vm2, %v1476_v24, 0.0  ;;  %v1479_v10 = vmul.f32 %v8668_v53, %v8668_v53  ;;  %12835 = vst [vmem:[#allocation73_spill] sm:$0xff] %v8693_v0 }
 0x165   :  { %v1690_v15 = vadd.f32 %v1689_v52, %v1688_v29  ;;  %v1254_v18 = vadd.f32 %v1253_v2, %v1252_v57  ;;  %v8675_v30 = vpop.f32.mrf.mxu0  ;;  %v1257_v52 = vsel %vm1109_vm2, %v8657_v54, 0.0 }
 0x166   :  { %12832 = vst [vmem:[#allocation70_spill] sm:$0xff] %v8675_v30  ;;  %v1255_v38 = vsel %vm1109_vm2, %v8675_v30, 0.0  ;;  %v1477_v50 = vmul.f32 %v8675_v30, %v8675_v30  ;;  %v1695_v30 = vsel %vm1109_vm2, %v1478_v60, 0.0 }
 0x167   :  { %v1692_v58 = vadd.f32 %v1691_v35, %v1690_v15  ;;  %v1256_v39 = vadd.f32 %v1255_v38, %v1254_v18  ;;  %v8684_v14 = vpop.f32.mrf.mxu0  ;;  %v1259_v15 = vsel %vm1109_vm2, %v8668_v53, 0.0 }
 0x168   :  { %12833 = vst [vmem:[#allocation71_spill] sm:$0xff] %v8684_v14  ;;  %v1693_v57 = vsel %vm1109_vm2, %v1477_v50, 0.0  ;;  %v1697_v50 = vsel %vm1109_vm2, %v1479_v10, 0.0  ;;  %v1482_v60 = vmul.f32 %v8684_v14, %v8684_v14 }
 0x169   :  { %v1258_v29 = vadd.f32 %v1257_v52, %v1256_v39  ;;  %v1694_v24 = vadd.f32 %v1693_v57, %v1692_v58  ;;  %v8691_v2 = vpop.f32.mrf.mxu0 }
 0x16a   :  { %12834 = vst [vmem:[#allocation72_spill] sm:$0xff] %v8691_v2  ;;  %v1480_v18 = vmul.f32 %v8691_v2, %v8691_v2  ;;  %v1261_v58 = vsel %vm1109_vm2, %v8691_v2, 0.0 }
 0x16b   :  { %v1260_v35 = vadd.f32 %v1259_v15, %v1258_v29  ;;  %v1696_v38 = vadd.f32 %v1695_v30, %v1694_v24  ;;  %v8700_v54 = vpop.f32.mrf.mxu0  ;;  %v8714_v15 = vpop.permute.xlu0 %3174 }
 0x16c   :  { %12836 = vst [vmem:[#allocation74_spill] sm:$0xff] %v8700_v54  ;;  %v1699_v0 = vsel %vm1109_vm2, %v1480_v18, 0.0  ;;  %12838 = vst [vmem:[#allocation76_spill] sm:$0xff] %v8714_v15 }
 0x16d   :  { %v1698_v39 = vadd.f32 %v1697_v50, %v1696_v38  ;;  %v1262_v52 = vadd.f32 %v1261_v58, %v1260_v35  ;;  %v8705_v57 = vpop.f32.mrf.mxu0  ;;  %v1265_v35 = vsel %vm1109_vm2, %v8684_v14, 0.0  ;;  %v1483_v38 = vmul.f32 %v8700_v54, %v8700_v54  ;;  %v8732_v14 = vpop.permute.xlu1 %2889 }
 0x16e   :  { %12837 = vst [vmem:[#allocation75_spill] sm:$0xff] %v8705_v57  ;;  %v1263_v29 = vsel %vm1109_vm2, %v8705_v57, 0.0  ;;  %v1481_v30 = vmul.f32 %v8705_v57, %v8705_v57  ;;  %v1703_v57 = vsel %vm1109_vm2, %v1482_v60, 0.0  ;;  %12842 = vst [vmem:[#allocation80_spill] sm:$0xff] %v8732_v14 }
 0x16f   :  { %v1700_v24 = vadd.f32 %v1699_v0, %v1698_v39  ;;  %v1264_v10 = vadd.f32 %v1263_v29, %v1262_v52  ;;  %v8716_v2 = vpop.f32.mrf.mxu0  ;;  %v1267_v0 = vsel %vm1109_vm2, %v8700_v54, 0.0  ;;  %v8737_v60 = vpop.permute.xlu0 %3194 }
 0x170   :  { %12839 = vst [vmem:[#allocation77_spill] sm:$0xff] %v8716_v2  ;;  %v1701_v18 = vsel %vm1109_vm2, %v1481_v30, 0.0  ;;  %v1705_v30 = vsel %vm1109_vm2, %v1483_v38, 0.0  ;;  %12843 = vst [vmem:[#allocation81_spill] sm:$0xff] %v8737_v60  ;;  %v1486_v54 = vmul.f32 %v8716_v2, %v8716_v2 }
 0x171   :  { %v1266_v50 = vadd.f32 %v1265_v35, %v1264_v10  ;;  %v1702_v58 = vadd.f32 %v1701_v18, %v1700_v24  ;;  %v8723_v53 = vpop.f32.mrf.mxu0 }
 0x172   :  { %12840 = vst [vmem:[#allocation78_spill] sm:$0xff] %v8723_v53  ;;  %v1484_v39 = vmul.f32 %v8723_v53, %v8723_v53  ;;  %v1269_v24 = vsel %vm1109_vm2, %v8723_v53, 0.0  ;;  %v8757_v53 = vpop.permute.xlu1 %3094 }
 0x173   :  { %v1268_v52 = vadd.f32 %v1267_v0, %v1266_v50  ;;  %v1704_v29 = vadd.f32 %v1703_v57, %v1702_v58  ;;  %v8730_v15 = vpop.f32.mrf.mxu0  ;;  %12847 = vst [vmem:[#allocation85_spill] sm:$0xff] %v8757_v53 }
 0x174   :  { %12841 = vst [vmem:[#allocation79_spill] sm:$0xff] %v8730_v15  ;;  %v1707_v57 = vsel %vm1109_vm2, %v1484_v39, 0.0 }
 0x175   :  { %v1706_v10 = vadd.f32 %v1705_v30, %v1704_v29  ;;  %v1270_v35 = vadd.f32 %v1269_v24, %v1268_v52  ;;  %v8739_v18 = vpop.f32.mrf.mxu0  ;;  %v1273_v52 = vsel %vm1109_vm2, %v8716_v2, 0.0  ;;  %v1487_v29 = vmul.f32 %v8730_v15, %v8730_v15 }
 0x176   :  { %12844 = vst [vmem:[#allocation82_spill] sm:$0xff] %v8739_v18  ;;  %v1271_v50 = vsel %vm1109_vm2, %v8739_v18, 0.0  ;;  %v1485_v38 = vmul.f32 %v8739_v18, %v8739_v18  ;;  %v1711_v18 = vsel %vm1109_vm2, %v1486_v54, 0.0 }
 0x177   :  { %v1708_v58 = vadd.f32 %v1707_v57, %v1706_v10  ;;  %v1272_v0 = vadd.f32 %v1271_v50, %v1270_v35  ;;  %v8748_v14 = vpop.f32.mrf.mxu0  ;;  %v1275_v10 = vsel %vm1109_vm2, %v8730_v15, 0.0  ;;  %v8764_v50 = vpop.permute.xlu0 %3214 }
 0x178   :  { %12845 = vst [vmem:[#allocation83_spill] sm:$0xff] %v8748_v14  ;;  %v1709_v30 = vsel %vm1109_vm2, %v1485_v38, 0.0  ;;  %12848 = vst [vmem:[#allocation86_spill] sm:$0xff] %v8764_v50  ;;  %v1713_v38 = vsel %vm1109_vm2, %v1487_v29, 0.0  ;;  %v8782_v50 = vpop.permute.xlu1 %3114 }
 0x179   :  { %v1274_v24 = vadd.f32 %v1273_v52, %v1272_v0  ;;  %v1710_v39 = vadd.f32 %v1709_v30, %v1708_v58  ;;  %v8755_v60 = vpop.f32.mrf.mxu0  ;;  %v1490_v30 = vmul.f32 %v8748_v14, %v8748_v14  ;;  %12852 = vst [vmem:[#allocation90_spill] sm:$0xff] %v8782_v50 }
 0x17a   :  { %12846 = vst [vmem:[#allocation84_spill] sm:$0xff] %v8755_v60  ;;  %v1488_v35 = vmul.f32 %v8755_v60, %v8755_v60  ;;  %v1277_v58 = vsel %vm1109_vm2, %v8755_v60, 0.0 }
 0x17b   :  { %v1712_v57 = vadd.f32 %v1711_v18, %v1710_v39  ;;  %v1276_v2 = vadd.f32 %v1275_v10, %v1274_v24  ;;  %v8766_v43 = vpop.f32.mrf.mxu0 }
 0x17c   :  { %12849 = vst [vmem:[#allocation87_spill] sm:$0xff] %v8766_v43  ;;  %v1715_v53 = vsel %vm1109_vm2, %v1488_v35, 0.0 }
 0x17d   :  { %v1278_v0 = vadd.f32 %v1277_v58, %v1276_v2  ;;  %v1714_v52 = vadd.f32 %v1713_v38, %v1712_v57  ;;  %v8771_v54 = vpop.f32.mrf.mxu0  ;;  %v1281_v2 = vsel %vm1109_vm2, %v8748_v14, 0.0  ;;  %v1491_v57 = vmul.f32 %v8766_v43, %v8766_v43  ;;  %v8789_v38 = vpop.permute.xlu0 %3234 }
 0x17e   :  { %12850 = vst [vmem:[#allocation88_spill] sm:$0xff] %v8771_v54  ;;  %v1279_v18 = vsel %vm1109_vm2, %v8771_v54, 0.0  ;;  %v1489_v24 = vmul.f32 %v8771_v54, %v8771_v54  ;;  %12853 = vst [vmem:[#allocation91_spill] sm:$0xff] %v8789_v38 }
 0x17f   :  { %v1716_v39 = vadd.f32 %v1715_v53, %v1714_v52  ;;  %v1280_v29 = vadd.f32 %v1279_v18, %v1278_v0  ;;  %v8780_v10 = vpop.f32.mrf.mxu0  ;;  %v1719_v53 = vsel %vm1109_vm2, %v1490_v30, 0.0  ;;  %v1283_v0 = vsel %vm1109_vm2, %v8766_v43, 0.0 }
 0x180   :  { %12851 = vst [vmem:[#allocation89_spill] sm:$0xff] %v8780_v10  ;;  %v1717_v35 = vsel %vm1109_vm2, %v1489_v24, 0.0  ;;  %v1721_v14 = vsel %vm1109_vm2, %v1491_v57, 0.0  ;;  %v1494_v30 = vmul.f32 %v8780_v10, %v8780_v10 }
 0x181   :  { %v1282_v58 = vadd.f32 %v1281_v2, %v1280_v29  ;;  %v1718_v60 = vadd.f32 %v1717_v35, %v1716_v39  ;;  %v884_v15 = vpop.f32.mrf.mxu0  ;;  %v8798_v29 = vpop.permute.xlu1 %3134 }
 0x182   :  { %v1492_v52 = vmul.f32 %v884_v15, %v884_v15  ;;  %v1285_v3 = vsel %vm1109_vm2, %v884_v15, 0.0  ;;  %12855 = vst [vmem:[#allocation93_spill] sm:$0xff] %v8798_v29  ;;  %v8804_v35 = vpop.permute.xlu0 %3264 }
 0x183   :  { %v1720_v18 = vadd.f32 %v1719_v53, %v1718_v60  ;;  %v1284_v50 = vadd.f32 %v1283_v0, %v1282_v58  ;;  %v8794_v54 = vpop.f32.mrf.mxu0  ;;  %12856 = vst [vmem:[#allocation94_spill] sm:$0xff] %v8804_v35 }
 0x184   :  { %12854 = vst [vmem:[#allocation92_spill] sm:$0xff] %v8794_v54  ;;  %v1723_v39 = vsel %vm1109_vm2, %v1492_v52, 0.0 }
 0x185   :  { %v1286_v24 = vadd.f32 %v1285_v3, %v1284_v50  ;;  %v1722_v12 = vadd.f32 %v1721_v14, %v1720_v18  ;;  %v887_v38 = vpop.f32.mrf.mxu0  ;;  %v1289_v3 = vsel %vm1109_vm2, %v8780_v10, 0.0  ;;  %v1495_v14 = vmul.f32 %v8794_v54, %v8794_v54  ;;  %v8822_v35 = vpop.permute.xlu1 %3154 }
 0x186   :  { %v1287_v2 = vsel %vm1109_vm2, %v887_v38, 0.0  ;;  %v1493_v60 = vmul.f32 %v887_v38, %v887_v38  ;;  %v1727_v38 = vsel %vm1109_vm2, %v1494_v30, 0.0  ;;  %12860 = vst [vmem:[#allocation98_spill] sm:$0xff] %v8822_v35 }
 0x187   :  { %v1724_v58 = vadd.f32 %v1723_v39, %v1722_v12  ;;  %v1288_v53 = vadd.f32 %v1287_v2, %v1286_v24  ;;  %v8806_v57 = vpop.f32.mrf.mxu0  ;;  %v1291_v12 = vsel %vm1109_vm2, %v8794_v54, 0.0 }
 0x188   :  { %12857 = vst [vmem:[#allocation95_spill] sm:$0xff] %v8806_v57  ;;  %v1725_v15 = vsel %vm1109_vm2, %v1493_v60, 0.0  ;;  %v1729_v60 = vsel %vm1109_vm2, %v1495_v14, 0.0  ;;  %v1498_v29 = vmul.f32 %v8806_v57, %v8806_v57 }
 0x189   :  { %v1290_v50 = vadd.f32 %v1289_v3, %v1288_v53  ;;  %v1726_v0 = vadd.f32 %v1725_v15, %v1724_v58  ;;  %v8813_v52 = vpop.f32.mrf.mxu0  ;;  %v8827_v53 = vpop.permute.xlu0 %3284 }
 0x18a   :  { %12858 = vst [vmem:[#allocation96_spill] sm:$0xff] %v8813_v52  ;;  %v1496_v18 = vmul.f32 %v8813_v52, %v8813_v52  ;;  %v1293_v58 = vsel %vm1109_vm2, %v8813_v52, 0.0  ;;  %12861 = vst [vmem:[#allocation99_spill] sm:$0xff] %v8827_v53  ;;  %v8847_v52 = vpop.permute.xlu1 %3184 }
 0x18b   :  { %v1728_v24 = vadd.f32 %v1727_v38, %v1726_v0  ;;  %v1292_v39 = vadd.f32 %v1291_v12, %v1290_v50  ;;  %v8820_v2 = vpop.f32.mrf.mxu0  ;;  %12865 = vst [vmem:[#allocation103_spill] sm:$0xff] %v8847_v52 }
 0x18c   :  { %12859 = vst [vmem:[#allocation97_spill] sm:$0xff] %v8820_v2  ;;  %v1731_v50 = vsel %vm1109_vm2, %v1496_v18, 0.0 }
 0x18d   :  { %v1294_v30 = vadd.f32 %v1293_v58, %v1292_v39  ;;  %v1730_v3 = vadd.f32 %v1729_v60, %v1728_v24  ;;  %v8829_v15 = vpop.f32.mrf.mxu0  ;;  %v1297_v24 = vsel %vm1109_vm2, %v8806_v57, 0.0  ;;  %v1499_v39 = vmul.f32 %v8820_v2, %v8820_v2 }
 0x18e   :  { %12862 = vst [vmem:[#allocation100_spill] sm:$0xff] %v8829_v15  ;;  %v1295_v0 = vsel %vm1109_vm2, %v8829_v15, 0.0  ;;  %v1497_v14 = vmul.f32 %v8829_v15, %v8829_v15  ;;  %v1735_v15 = vsel %vm1109_vm2, %v1498_v29, 0.0 }
 0x18f   :  { %v1732_v38 = vadd.f32 %v1731_v50, %v1730_v3  ;;  %v1296_v12 = vadd.f32 %v1295_v0, %v1294_v30  ;;  %v8838_v35 = vpop.f32.mrf.mxu0  ;;  %v1299_v30 = vsel %vm1109_vm2, %v8820_v2, 0.0  ;;  %v8854_v50 = vpop.permute.xlu0 %3304 }
 0x190   :  { %12863 = vst [vmem:[#allocation101_spill] sm:$0xff] %v8838_v35  ;;  %v1733_v60 = vsel %vm1109_vm2, %v1497_v14, 0.0  ;;  %12866 = vst [vmem:[#allocation104_spill] sm:$0xff] %v8854_v50  ;;  %v1737_v14 = vsel %vm1109_vm2, %v1499_v39, 0.0  ;;  %v8872_v50 = vpop.permute.xlu1 %3204 }
 0x191   :  { %v1298_v58 = vadd.f32 %v1297_v24, %v1296_v12  ;;  %v1734_v18 = vadd.f32 %v1733_v60, %v1732_v38  ;;  %v8845_v53 = vpop.f32.mrf.mxu0  ;;  %v1502_v60 = vmul.f32 %v8838_v35, %v8838_v35  ;;  %12870 = vst [vmem:[#allocation108_spill] sm:$0xff] %v8872_v50 }
 0x192   :  { %12864 = vst [vmem:[#allocation102_spill] sm:$0xff] %v8845_v53  ;;  %v1500_v3 = vmul.f32 %v8845_v53, %v8845_v53  ;;  %v1301_v38 = vsel %vm1109_vm2, %v8845_v53, 0.0 }
 0x193   :  { %v1736_v0 = vadd.f32 %v1735_v15, %v1734_v18  ;;  %v1300_v57 = vadd.f32 %v1299_v30, %v1298_v58  ;;  %v8856_v54 = vpop.f32.mrf.mxu0 }
 0x194   :  { %12867 = vst [vmem:[#allocation105_spill] sm:$0xff] %v8856_v54  ;;  %v1739_v52 = vsel %vm1109_vm2, %v1500_v3, 0.0 }
 0x195   :  { %v1302_v12 = vadd.f32 %v1301_v38, %v1300_v57  ;;  %v1738_v24 = vadd.f32 %v1737_v14, %v1736_v0  ;;  %v8861_v29 = vpop.f32.mrf.mxu0  ;;  %v1305_v57 = vsel %vm1109_vm2, %v8838_v35, 0.0  ;;  %v1503_v0 = vmul.f32 %v8856_v54, %v8856_v54  ;;  %v8879_v14 = vpop.permute.xlu0 %3324 }
 0x196   :  { %12868 = vst [vmem:[#allocation106_spill] sm:$0xff] %v8861_v29  ;;  %v1303_v15 = vsel %vm1109_vm2, %v8861_v29, 0.0  ;;  %v1501_v58 = vmul.f32 %v8861_v29, %v8861_v29  ;;  %12871 = vst [vmem:[#allocation109_spill] sm:$0xff] %v8879_v14 }
 0x197   :  { %v1740_v18 = vadd.f32 %v1739_v52, %v1738_v24  ;;  %v1304_v39 = vadd.f32 %v1303_v15, %v1302_v12  ;;  %v8870_v30 = vpop.f32.mrf.mxu0  ;;  %v1743_v52 = vsel %vm1109_vm2, %v1502_v60, 0.0  ;;  %v1307_v12 = vsel %vm1109_vm2, %v8856_v54, 0.0  ;;  %v8895_v60 = vpop.permute.xlu1 %3224 }
 0x198   :  { %12869 = vst [vmem:[#allocation107_spill] sm:$0xff] %v8870_v30  ;;  %v1741_v3 = vsel %vm1109_vm2, %v1501_v58, 0.0  ;;  %v1745_v58 = vsel %vm1109_vm2, %v1503_v0, 0.0  ;;  %12875 = vst [vmem:[#allocation113_spill] sm:$0xff] %v8895_v60  ;;  %v1506_v14 = vmul.f32 %v8870_v30, %v8870_v30 }
 0x199   :  { %v1306_v38 = vadd.f32 %v1305_v57, %v1304_v39  ;;  %v1742_v53 = vadd.f32 %v1741_v3, %v1740_v18  ;;  %v8881_v2 = vpop.f32.mrf.mxu0 }
 0x19a   :  { %12872 = vst [vmem:[#allocation110_spill] sm:$0xff] %v8881_v2  ;;  %v1504_v24 = vmul.f32 %v8881_v2, %v8881_v2  ;;  %v1309_v39 = vsel %vm1109_vm2, %v8881_v2, 0.0  ;;  %v1751_v29 = vsel %vm1109_vm2, %v1506_v14, 0.0 }
 0x19b   :  { %v1744_v15 = vadd.f32 %v1743_v52, %v1742_v53  ;;  %v1308_v50 = vadd.f32 %v1307_v12, %v1306_v38  ;;  %v8888_v35 = vpop.f32.mrf.mxu0  ;;  %v8904_v38 = vpop.permute.xlu0 %3354 }
 0x19c   :  { %12873 = vst [vmem:[#allocation111_spill] sm:$0xff] %v8888_v35  ;;  %v1747_v54 = vsel %vm1109_vm2, %v1504_v24, 0.0  ;;  %12876 = vst [vmem:[#allocation114_spill] sm:$0xff] %v8904_v38  ;;  %v1315_v38 = vsel %vm1109_vm2, %v8888_v35, 0.0 }
 0x19d   :  { %v1310_v18 = vadd.f32 %v1309_v39, %v1308_v50  ;;  %v1746_v57 = vadd.f32 %v1745_v58, %v1744_v15  ;;  %v8893_v3 = vpop.f32.mrf.mxu0  ;;  %v1313_v15 = vsel %vm1109_vm2, %v8870_v30, 0.0  ;;  %v1507_v58 = vmul.f32 %v8888_v35, %v8888_v35  ;;  %v8918_v30 = vpop.permute.xlu1 %3244 }
 0x19e   :  { %12874 = vst [vmem:[#allocation112_spill] sm:$0xff] %v8893_v3  ;;  %v1311_v53 = vsel %vm1109_vm2, %v8893_v3, 0.0  ;;  %v1505_v0 = vmul.f32 %v8893_v3, %v8893_v3  ;;  %12878 = vst [vmem:[#allocation116_spill] sm:$0xff] %v8918_v30 }
 0x19f   :  { %v1748_v52 = vadd.f32 %v1747_v54, %v1746_v57  ;;  %v1312_v50 = vadd.f32 %v1311_v53, %v1310_v18  ;;  %v6829_v12 = vpop.f32.mrf.mxu0  ;;  %v1753_v3 = vsel %vm1109_vm2, %v1507_v58, 0.0 }
 0x1a0   :  { %v1749_v39 = vsel %vm1109_vm2, %v1505_v0, 0.0  ;;  %v1321_v30 = vsel %vm1109_vm2, %v6829_v12, 0.0 }
 0x1a1   :  { %v1314_v24 = vadd.f32 %v1313_v15, %v1312_v50  ;;  %v1750_v60 = vadd.f32 %v1749_v39, %v1748_v52  ;;  %v8911_v2 = vpop.f32.mrf.mxu0  ;;  %v8923_v52 = vpop.permute.xlu0 %3374  ;;  %v1510_v39 = vmul.f32 %v6829_v12, %v6829_v12 }
 0x1a2   :  { %12877 = vst [vmem:[#allocation115_spill] sm:$0xff] %v8911_v2  ;;  %v1508_v54 = vmul.f32 %v8911_v2, %v8911_v2  ;;  %v1317_v0 = vsel %vm1109_vm2, %v8911_v2, 0.0  ;;  %12879 = vst [vmem:[#allocation117_spill] sm:$0xff] %v8923_v52 }
 0x1a3   :  { %v1752_v18 = vadd.f32 %v1751_v29, %v1750_v60  ;;  %v1316_v57 = vadd.f32 %v1315_v38, %v1314_v24  ;;  %v6830_v53 = vpop.f32.mrf.mxu0  ;;  %v1759_v2 = vsel %vm1109_vm2, %v1510_v39, 0.0 }
 0x1a4   :  { %v1755_v35 = vsel %vm1109_vm2, %v1508_v54, 0.0  ;;  %v1511_v52 = vmul.f32 %v6830_v53, %v6830_v53  ;;  %v8938_v54 = vpop.permute.xlu1 %3274  ;;  %v1323_v10 = vsel %vm1109_vm2, %v6830_v53, 0.0 }
 0x1a5   :  { %v1318_v50 = vadd.f32 %v1317_v0, %v1316_v57  ;;  %v1754_v14 = vadd.f32 %v1753_v3, %v1752_v18  ;;  %v8925_v15 = vpop.f32.mrf.mxu0  ;;  %12883 = vst [vmem:[#allocation121_spill] sm:$0xff] %v8938_v54 }
 0x1a6   :  { %12880 = vst [vmem:[#allocation118_spill] sm:$0xff] %v8925_v15  ;;  %v1319_v29 = vsel %vm1109_vm2, %v8925_v15, 0.0  ;;  %v1509_v60 = vmul.f32 %v8925_v15, %v8925_v15 }
 0x1a7   :  { %v1756_v38 = vadd.f32 %v1755_v35, %v1754_v14  ;;  %v1320_v58 = vadd.f32 %v1319_v29, %v1318_v50  ;;  %v8932_v24 = vpop.f32.mrf.mxu0  ;;  %v8944_v50 = vpop.permute.xlu0 %3394 }
 0x1a8   :  { %12881 = vst [vmem:[#allocation119_spill] sm:$0xff] %v8932_v24  ;;  %v1757_v3 = vsel %vm1109_vm2, %v1509_v60, 0.0  ;;  %12884 = vst [vmem:[#allocation122_spill] sm:$0xff] %v8944_v50  ;;  %v1761_v60 = vsel %vm1109_vm2, %v1511_v52, 0.0  ;;  %v1514_v39 = vmul.f32 %v8932_v24, %v8932_v24  ;;  %v1329_v52 = vsel %vm1109_vm2, %v8932_v24, 0.0 }
 0x1a9   :  { %v1322_v18 = vadd.f32 %v1321_v30, %v1320_v58  ;;  %v1758_v57 = vadd.f32 %v1757_v3, %v1756_v38  ;;  %v8936_v0 = vpop.f32.mrf.mxu0 }
 0x1aa   :  { %12882 = vst [vmem:[#allocation120_spill] sm:$0xff] %v8936_v0  ;;  %v1512_v35 = vmul.f32 %v8936_v0, %v8936_v0  ;;  %v1325_v30 = vsel %vm1109_vm2, %v8936_v0, 0.0 }
 0x1ab   :  { %v1760_v14 = vadd.f32 %v1759_v2, %v1758_v57  ;;  %v1324_v12 = vadd.f32 %v1323_v10, %v1322_v18  ;;  %v6834_v29 = vpop.f32.mrf.mxu0  ;;  %v8955_v18 = vpop.permute.xlu1 %3294 }
 0x1ac   :  { %v1763_v53 = vsel %vm1109_vm2, %v1512_v35, 0.0  ;;  %12886 = vst [vmem:[#allocation124_spill] sm:$0xff] %v8955_v18  ;;  %v1515_v57 = vmul.f32 %v6834_v29, %v6834_v29 }
 0x1ad   :  { %v1326_v38 = vadd.f32 %v1325_v30, %v1324_v12  ;;  %v1762_v58 = vadd.f32 %v1761_v60, %v1760_v14  ;;  %v967_v3 = vpop.f32.mrf.mxu0  ;;  %v8960_v12 = vpop.permute.xlu0 %3414 }
 0x1ae   :  { %v1327_v54 = vsel %vm1109_vm2, %v967_v3, 0.0  ;;  %v1513_v15 = vmul.f32 %v967_v3, %v967_v3  ;;  %12887 = vst [vmem:[#allocation125_spill] sm:$0xff] %v8960_v12  ;;  %v1767_v3 = vsel %vm1109_vm2, %v1514_v39, 0.0  ;;  %v1769_v24 = vsel %vm1109_vm2, %v1515_v57, 0.0 }
 0x1af   :  { %v1764_v50 = vadd.f32 %v1763_v53, %v1762_v58  ;;  %v1328_v2 = vadd.f32 %v1327_v54, %v1326_v38  ;;  %v8953_v10 = vpop.f32.mrf.mxu0  ;;  %v1331_v54 = vsel %vm1109_vm2, %v6834_v29, 0.0 }
 0x1b0   :  { %12885 = vst [vmem:[#allocation123_spill] sm:$0xff] %v8953_v10  ;;  %v1765_v14 = vsel %vm1109_vm2, %v1513_v15, 0.0  ;;  %v1518_v39 = vmul.f32 %v8953_v10, %v8953_v10 }
 0x1b1   :  { %v1330_v60 = vadd.f32 %v1329_v52, %v1328_v2  ;;  %v1766_v30 = vadd.f32 %v1765_v14, %v1764_v50  ;;  %v8962_v35 = vpop.f32.mrf.mxu0  ;;  %v8971_v52 = vpop.permute.xlu1 %3314 }
 0x1b2   :  { %12888 = vst [vmem:[#allocation126_spill] sm:$0xff] %v8962_v35  ;;  %v1516_v38 = vmul.f32 %v8962_v35, %v8962_v35  ;;  %v1333_v15 = vsel %vm1109_vm2, %v8962_v35, 0.0  ;;  %12889 = vst [vmem:[#allocation127_spill] sm:$0xff] %v8971_v52 }
 0x1b3   :  { %v1768_v58 = vadd.f32 %v1767_v3, %v1766_v30  ;;  %v1332_v53 = vadd.f32 %v1331_v54, %v1330_v60  ;;  %v6838_v18 = vpop.f32.mrf.mxu0  ;;  %v8977_v60 = vpop.permute.xlu0 %3089 }
 0x1b4   :  { %v1771_v29 = vsel %vm1109_vm2, %v1516_v38, 0.0  ;;  %12890 = vst [vmem:[#allocation128_spill] sm:$0xff] %v8977_v60  ;;  %v1775_v38 = vsel %vm1109_vm2, %v1518_v39, 0.0 }
 0x1b5   :  { %v1334_v12 = vadd.f32 %v1333_v15, %v1332_v53  ;;  %v1770_v2 = vadd.f32 %v1769_v24, %v1768_v58  ;;  %v983_v50 = vpop.f32.mrf.mxu0  ;;  %v1337_v24 = vsel %vm1109_vm2, %v8953_v10, 0.0  ;;  %v1519_v58 = vmul.f32 %v6838_v18, %v6838_v18  ;;  %v8990_v60 = vpop.permute.xlu1 %3334 }
 0x1b6   :  { %v1335_v14 = vsel %vm1109_vm2, %v983_v50, 0.0  ;;  %v1517_v30 = vmul.f32 %v983_v50, %v983_v50  ;;  %v1339_v50 = vsel %vm1109_vm2, %v6838_v18, 0.0  ;;  %12893 = vst [vmem:[#allocation131_spill] sm:$0xff] %v8990_v60 }
 0x1b7   :  { %v1772_v3 = vadd.f32 %v1771_v29, %v1770_v2  ;;  %v1336_v57 = vadd.f32 %v1335_v14, %v1334_v12  ;;  %v8979_v54 = vpop.f32.mrf.mxu0  ;;  %v1777_v10 = vsel %vm1109_vm2, %v1519_v58, 0.0 }
 0x1b8   :  { %12891 = vst [vmem:[#allocation129_spill] sm:$0xff] %v8979_v54  ;;  %v1773_v53 = vsel %vm1109_vm2, %v1517_v30, 0.0  ;;  %v1522_v18 = vmul.f32 %v8979_v54, %v8979_v54  ;;  %v1345_v58 = vsel %vm1109_vm2, %v8979_v54, 0.0 }
 0x1b9   :  { %v1338_v15 = vadd.f32 %v1337_v24, %v1336_v57  ;;  %v1774_v52 = vadd.f32 %v1773_v53, %v1772_v3  ;;  %v8984_v35 = vpop.f32.mrf.mxu0  ;;  %v8995_v3 = vpop.permute.xlu0 %3109 }
 0x1ba   :  { %12892 = vst [vmem:[#allocation130_spill] sm:$0xff] %v8984_v35  ;;  %v1520_v2 = vmul.f32 %v8984_v35, %v8984_v35  ;;  %v1341_v30 = vsel %vm1109_vm2, %v8984_v35, 0.0  ;;  %12894 = vst [vmem:[#allocation132_spill] sm:$0xff] %v8995_v3  ;;  %v9008_v3 = vpop.permute.xlu1 %3364 }
 0x1bb   :  { %v1776_v12 = vadd.f32 %v1775_v38, %v1774_v52  ;;  %v1340_v29 = vadd.f32 %v1339_v50, %v1338_v15  ;;  %v6842_v14 = vpop.f32.mrf.mxu0  ;;  %12897 = vst [vmem:[#allocation135_spill] sm:$0xff] %v9008_v3 }
 0x1bc   :  { %v1779_v53 = vsel %vm1109_vm2, %v1520_v2, 0.0  ;;  %v1523_v35 = vmul.f32 %v6842_v14, %v6842_v14  ;;  %v1783_v2 = vsel %vm1109_vm2, %v1522_v18, 0.0 }
 0x1bd   :  { %v1342_v57 = vadd.f32 %v1341_v30, %v1340_v29  ;;  %v1778_v24 = vadd.f32 %v1777_v10, %v1776_v12  ;;  %v999_v39 = vpop.f32.mrf.mxu0 }
 0x1be   :  { %v1343_v52 = vsel %vm1109_vm2, %v999_v39, 0.0  ;;  %v1521_v15 = vmul.f32 %v999_v39, %v999_v39  ;;  %v1347_v39 = vsel %vm1109_vm2, %v6842_v14, 0.0 }
 0x1bf   :  { %v1780_v38 = vadd.f32 %v1779_v53, %v1778_v24  ;;  %v1344_v50 = vadd.f32 %v1343_v52, %v1342_v57  ;;  %v9001_v60 = vpop.f32.mrf.mxu0  ;;  %v9014_v24 = vpop.permute.xlu0 %3129 }
 0x1c0   :  { %12895 = vst [vmem:[#allocation133_spill] sm:$0xff] %v9001_v60  ;;  %v1781_v29 = vsel %vm1109_vm2, %v1521_v15, 0.0  ;;  %12898 = vst [vmem:[#allocation136_spill] sm:$0xff] %v9014_v24  ;;  %v1785_v15 = vsel %vm1109_vm2, %v1523_v35, 0.0  ;;  %v1526_v18 = vmul.f32 %v9001_v60, %v9001_v60  ;;  %v1353_v35 = vsel %vm1109_vm2, %v9001_v60, 0.0 }
 0x1c1   :  { %v1346_v10 = vadd.f32 %v1345_v58, %v1344_v50  ;;  %v1782_v12 = vadd.f32 %v1781_v29, %v1780_v38  ;;  %v9006_v30 = vpop.f32.mrf.mxu0 }
 0x1c2   :  { %12896 = vst [vmem:[#allocation134_spill] sm:$0xff] %v9006_v30  ;;  %v1524_v57 = vmul.f32 %v9006_v30, %v9006_v30  ;;  %v1349_v38 = vsel %vm1109_vm2, %v9006_v30, 0.0  ;;  %v1791_v30 = vsel %vm1109_vm2, %v1526_v18, 0.0 }
 0x1c3   :  { %v1784_v53 = vadd.f32 %v1783_v2, %v1782_v12  ;;  %v1348_v52 = vadd.f32 %v1347_v39, %v1346_v10  ;;  %v6846_v54 = vpop.f32.mrf.mxu0  ;;  %v9025_v2 = vpop.permute.xlu1 %3384 }
 0x1c4   :  { %v1787_v14 = vsel %vm1109_vm2, %v1524_v57, 0.0  ;;  %12899 = vst [vmem:[#allocation137_spill] sm:$0xff] %v9025_v2  ;;  %v1527_v39 = vmul.f32 %v6846_v54, %v6846_v54 }
 0x1c5   :  { %v1350_v50 = vadd.f32 %v1349_v38, %v1348_v52  ;;  %v1786_v58 = vadd.f32 %v1785_v15, %v1784_v53  ;;  %v1015_v29 = vpop.f32.mrf.mxu0  ;;  %v9030_v52 = vpop.permute.xlu0 %3149 }
 0x1c6   :  { %v1351_v3 = vsel %vm1109_vm2, %v1015_v29, 0.0  ;;  %v1525_v0 = vmul.f32 %v1015_v29, %v1015_v29  ;;  %12900 = vst [vmem:[#allocation138_spill] sm:$0xff] %v9030_v52  ;;  %v1793_v2 = vsel %vm1109_vm2, %v1527_v39, 0.0 }
 0x1c7   :  { %v1788_v24 = vadd.f32 %v1787_v14, %v1786_v58  ;;  %v1352_v12 = vadd.f32 %v1351_v3, %v1350_v50  ;;  %v9023_v10 = vpop.f32.mrf.mxu0  ;;  %v1355_v58 = vsel %vm1109_vm2, %v6846_v54, 0.0  ;;  %v9036_v40 = vpop.permute.xlu1 %3404 }
 0x1c8   :  { %v1789_v53 = vsel %vm1109_vm2, %v1525_v0, 0.0  ;;  %12901 = vst [vmem:[#allocation139_spill] sm:$0xff] %v9036_v40 }
 0x1c9   :  { %v1354_v15 = vadd.f32 %v1353_v35, %v1352_v12  ;;  %v1790_v38 = vadd.f32 %v1789_v53, %v1788_v24  ;;  %v1028_v57 = vpop.f32.mrf.mxu0  ;;  %v1530_v24 = vmul.f32 %v9023_v10, %v9023_v10 }
 0x1ca   :  { %v1528_v3 = vmul.f32 %v1028_v57, %v1028_v57  ;;  %v1357_v60 = vsel %vm1109_vm2, %v1028_v57, 0.0 }
 0x1cb   :  { %v1792_v50 = vadd.f32 %v1791_v30, %v1790_v38  ;;  %v1356_v29 = vadd.f32 %v1355_v58, %v1354_v15  ;;  %v6850_v14 = vpop.f32.mrf.mxu0  ;;  %v9042_v30 = vpop.permute.xlu0 %3179 }
 0x1cc   :  { %v1795_v18 = vsel %vm1109_vm2, %v1528_v3, 0.0  ;;  %12902 = vst [vmem:[#allocation140_spill] sm:$0xff] %v9042_v30  ;;  %v1799_v3 = vsel %vm1109_vm2, %v1530_v24, 0.0 }
 0x1cd   :  { %v1358_v43 = vadd.f32 %v1357_v60, %v1356_v29  ;;  %v1794_v63 = vadd.f32 %v1793_v2, %v1792_v50  ;;  %v1031_v0 = vpop.f32.mrf.mxu0  ;;  %v1361_v60 = vsel %vm1109_vm2, %v9023_v10, 0.0  ;;  %v1531_v2 = vmul.f32 %v6850_v14, %v6850_v14 }
 0x1ce   :  { %v1359_v54 = vsel %vm1109_vm2, %v1031_v0, 0.0  ;;  %v1529_v12 = vmul.f32 %v1031_v0, %v1031_v0  ;;  %v1363_v50 = vsel %vm1109_vm2, %v6850_v14, 0.0 }
 0x1cf   :  { %v1796_v35 = vadd.f32 %v1795_v18, %v1794_v63  ;;  %v1360_v53 = vadd.f32 %v1359_v54, %v1358_v43  ;;  %v9044_v39 = vpop.f32.mrf.mxu0  ;;  %v9055_v18 = vpop.permute.xlu1 %3424  ;;  %v1801_v54 = vsel %vm1109_vm2, %v1531_v2, 0.0 }
 0x1d0   :  { %12903 = vst [vmem:[#allocation141_spill] sm:$0xff] %v9044_v39  ;;  %v1797_v15 = vsel %vm1109_vm2, %v1529_v12, 0.0  ;;  %12905 = vst [vmem:[#allocation143_spill] sm:$0xff] %v9055_v18  ;;  %v1534_v14 = vmul.f32 %v9044_v39, %v9044_v39  ;;  %v1369_v2 = vsel %vm1109_vm2, %v9044_v39, 0.0 }
 0x1d1   :  { %v1362_v38 = vadd.f32 %v1361_v60, %v1360_v53  ;;  %v1798_v57 = vadd.f32 %v1797_v15, %v1796_v35  ;;  %v9049_v58 = vpop.f32.mrf.mxu0  ;;  %v9060_v35 = vpop.permute.xlu0 %3199 }
 0x1d2   :  { %12904 = vst [vmem:[#allocation142_spill] sm:$0xff] %v9049_v58  ;;  %v1532_v63 = vmul.f32 %v9049_v58, %v9049_v58  ;;  %v1365_v12 = vsel %vm1109_vm2, %v9049_v58, 0.0  ;;  %12906 = vst [vmem:[#allocation144_spill] sm:$0xff] %v9060_v35 }
 0x1d3   :  { %v1800_v43 = vadd.f32 %v1799_v3, %v1798_v57  ;;  %v1364_v29 = vadd.f32 %v1363_v50, %v1362_v38  ;;  %v6854_v0 = vpop.f32.mrf.mxu0  ;;  %v9073_v35 = vpop.permute.xlu1 %3099 }
 0x1d4   :  { %v1803_v15 = vsel %vm1109_vm2, %v1532_v63, 0.0  ;;  %v1535_v40 = vmul.f32 %v6854_v0, %v6854_v0  ;;  %12909 = vst [vmem:[#allocation147_spill] sm:$0xff] %v9073_v35  ;;  %v1807_v63 = vsel %vm1109_vm2, %v1534_v14, 0.0 }
 0x1d5   :  { %v1366_v53 = vadd.f32 %v1365_v12, %v1364_v29  ;;  %v1802_v60 = vadd.f32 %v1801_v54, %v1800_v43  ;;  %v1047_v24 = vpop.f32.mrf.mxu0 }
 0x1d6   :  { %v1367_v38 = vsel %vm1109_vm2, %v1047_v24, 0.0  ;;  %v1533_v57 = vmul.f32 %v1047_v24, %v1047_v24  ;;  %v1371_v24 = vsel %vm1109_vm2, %v6854_v0, 0.0 }
 0x1d7   :  { %v1804_v3 = vadd.f32 %v1803_v15, %v1802_v60  ;;  %v1368_v50 = vadd.f32 %v1367_v38, %v1366_v53  ;;  %v9066_v18 = vpop.f32.mrf.mxu0  ;;  %v9079_v60 = vpop.permute.xlu0 %3219 }
 0x1d8   :  { %12907 = vst [vmem:[#allocation145_spill] sm:$0xff] %v9066_v18  ;;  %v1805_v29 = vsel %vm1109_vm2, %v1533_v57, 0.0  ;;  %12910 = vst [vmem:[#allocation148_spill] sm:$0xff] %v9079_v60  ;;  %v1809_v57 = vsel %vm1109_vm2, %v1535_v40, 0.0  ;;  %v1538_v14 = vmul.f32 %v9066_v18, %v9066_v18  ;;  %v1377_v40 = vsel %vm1109_vm2, %v9066_v18, 0.0 }
 0x1d9   :  { %v1370_v43 = vadd.f32 %v1369_v2, %v1368_v50  ;;  %v1806_v54 = vadd.f32 %v1805_v29, %v1804_v3  ;;  %v9071_v12 = vpop.f32.mrf.mxu0 }
 0x1da   :  { %12908 = vst [vmem:[#allocation146_spill] sm:$0xff] %v9071_v12  ;;  %v1536_v53 = vmul.f32 %v9071_v12, %v9071_v12  ;;  %v1373_v3 = vsel %vm1109_vm2, %v9071_v12, 0.0 }
 0x1db   :  { %v1808_v15 = vadd.f32 %v1807_v63, %v1806_v54  ;;  %v1372_v38 = vadd.f32 %v1371_v24, %v1370_v43  ;;  %v6858_v30 = vpop.f32.mrf.mxu0  ;;  %v9090_v63 = vpop.permute.xlu1 %3119 }
 0x1dc   :  { %v1811_v0 = vsel %vm1109_vm2, %v1536_v53, 0.0  ;;  %12912 = vst [vmem:[#allocation150_spill] sm:$0xff] %v9090_v63  ;;  %v1539_v24 = vmul.f32 %v6858_v30, %v6858_v30 }
 0x1dd   :  { %v1374_v50 = vadd.f32 %v1373_v3, %v1372_v38  ;;  %v1810_v2 = vadd.f32 %v1809_v57, %v1808_v15  ;;  %v1063_v29 = vpop.f32.mrf.mxu0  ;;  %v9095_v38 = vpop.permute.xlu0 %3239 }
 0x1de   :  { %v1375_v52 = vsel %vm1109_vm2, %v1063_v29, 0.0  ;;  %v1537_v35 = vmul.f32 %v1063_v29, %v1063_v29  ;;  %12913 = vst [vmem:[#allocation151_spill] sm:$0xff] %v9095_v38  ;;  %v1815_v29 = vsel %vm1109_vm2, %v1538_v14, 0.0  ;;  %v1817_v18 = vsel %vm1109_vm2, %v1539_v24, 0.0 }
 0x1df   :  { %v1812_v60 = vadd.f32 %v1811_v0, %v1810_v2  ;;  %v1376_v54 = vadd.f32 %v1375_v52, %v1374_v50  ;;  %v9088_v43 = vpop.f32.mrf.mxu0  ;;  %v1379_v52 = vsel %vm1109_vm2, %v6858_v30, 0.0 }
 0x1e0   :  { %12911 = vst [vmem:[#allocation149_spill] sm:$0xff] %v9088_v43  ;;  %v1813_v15 = vsel %vm1109_vm2, %v1537_v35, 0.0  ;;  %v1542_v14 = vmul.f32 %v9088_v43, %v9088_v43 }
 0x1e1   :  { %v1378_v57 = vadd.f32 %v1377_v40, %v1376_v54  ;;  %v1814_v3 = vadd.f32 %v1813_v15, %v1812_v60  ;;  %v9097_v53 = vpop.f32.mrf.mxu0  ;;  %v9106_v40 = vpop.permute.xlu1 %3139 }
 0x1e2   :  { %12914 = vst [vmem:[#allocation152_spill] sm:$0xff] %v9097_v53  ;;  %v1540_v50 = vmul.f32 %v9097_v53, %v9097_v53  ;;  %v1381_v35 = vsel %vm1109_vm2, %v9097_v53, 0.0  ;;  %12915 = vst [vmem:[#allocation153_spill] sm:$0xff] %v9106_v40 }
 0x1e3   :  { %v1816_v2 = vadd.f32 %v1815_v29, %v1814_v3  ;;  %v1380_v0 = vadd.f32 %v1379_v52, %v1378_v57  ;;  %v6862_v63 = vpop.f32.mrf.mxu0  ;;  %v9112_v57 = vpop.permute.xlu0 %2804 }
 0x1e4   :  { %v1819_v30 = vsel %vm1109_vm2, %v1540_v50, 0.0  ;;  %12916 = vst [vmem:[#allocation154_spill] sm:$0xff] %v9112_v57  ;;  %v1823_v50 = vsel %vm1109_vm2, %v1542_v14, 0.0  ;;  %v1387_v12 = vsel %vm1109_vm2, %v6862_v63, 0.0 }
 0x1e5   :  { %v1382_v38 = vadd.f32 %v1381_v35, %v1380_v0  ;;  %v1818_v54 = vadd.f32 %v1817_v18, %v1816_v2  ;;  %v1079_v60 = vpop.f32.mrf.mxu0  ;;  %v1385_v0 = vsel %vm1109_vm2, %v9088_v43, 0.0  ;;  %v1543_v18 = vmul.f32 %v6862_v63, %v6862_v63 }
 0x1e6   :  { %v1383_v15 = vsel %vm1109_vm2, %v1079_v60, 0.0  ;;  %v1541_v3 = vmul.f32 %v1079_v60, %v1079_v60 }
 0x1e7   :  { %v1820_v29 = vadd.f32 %v1819_v30, %v1818_v54  ;;  %v1384_v24 = vadd.f32 %v1383_v15, %v1382_v38  ;;  %v6865_v52 = vpop.f32.mrf.mxu0  ;;  %v9123_v15 = vpop.permute.xlu1 %3159  ;;  %v1825_v57 = vsel %vm1109_vm2, %v1543_v18, 0.0 }
 0x1e8   :  { %v1821_v2 = vsel %vm1109_vm2, %v1541_v3, 0.0  ;;  %12918 = vst [vmem:[#allocation156_spill] sm:$0xff] %v9123_v15 }
 0x1e9   :  { %v1386_v35 = vadd.f32 %v1385_v0, %v1384_v24  ;;  %v1822_v40 = vadd.f32 %v1821_v2, %v1820_v29  ;;  %v9117_v53 = vpop.f32.mrf.mxu0  ;;  %v9128_v29 = vpop.permute.xlu0 %2984  ;;  %v1546_v2 = vmul.f32 %v6865_v52, %v6865_v52 }
 0x1ea   :  { %12917 = vst [vmem:[#allocation155_spill] sm:$0xff] %v9117_v53  ;;  %v1544_v60 = vmul.f32 %v9117_v53, %v9117_v53  ;;  %v1389_v3 = vsel %vm1109_vm2, %v9117_v53, 0.0  ;;  %12919 = vst [vmem:[#allocation157_spill] sm:$0xff] %v9128_v29 }
 0x1eb   :  { %v1824_v54 = vadd.f32 %v1823_v50, %v1822_v40  ;;  %v1388_v38 = vadd.f32 %v1387_v12, %v1386_v35  ;;  %v6866_v30 = vpop.f32.mrf.mxu0  ;;  %v1393_v50 = vsel %vm1109_vm2, %v6865_v52, 0.0  ;;  %v9134_v58 = vpop.permute.xlu1 %3189 }
 0x1ec   :  { %v1827_v63 = vsel %vm1109_vm2, %v1544_v60, 0.0  ;;  %v1547_v15 = vmul.f32 %v6866_v30, %v6866_v30  ;;  %12920 = vst [vmem:[#allocation158_spill] sm:$0xff] %v9134_v58 }
 0x1ed   :  { %v1390_v24 = vadd.f32 %v1389_v3, %v1388_v38  ;;  %v1826_v0 = vadd.f32 %v1825_v57, %v1824_v54  ;;  %v1095_v14 = vpop.f32.mrf.mxu0  ;;  %v1831_v57 = vsel %vm1109_vm2, %v1546_v2, 0.0  ;;  %v1395_v54 = vsel %vm1109_vm2, %v6866_v30, 0.0  ;;  %v9138_v38 = vpop.permute.xlu0 %2809 }
 0x1ee   :  { %v1391_v43 = vsel %vm1109_vm2, %v1095_v14, 0.0  ;;  %v1545_v40 = vmul.f32 %v1095_v14, %v1095_v14  ;;  %12921 = vst [vmem:[#allocation159_spill] sm:$0xff] %v9138_v38 }
 0x1ef   :  { %v1828_v12 = vadd.f32 %v1827_v63, %v1826_v0  ;;  %v1392_v35 = vadd.f32 %v1391_v43, %v1390_v24  ;;  %v1833_v0 = vsel %vm1109_vm2, %v1547_v15, 0.0  ;;  %v9141_v63 = vpop.permute.xlu1 %3209 }
 0x1f0   :  { %v1829_v18 = vsel %vm1109_vm2, %v1545_v40, 0.0  ;;  %12922 = vst [vmem:[#allocation160_spill] sm:$0xff] %v9141_v63 }
 0x1f1   :  { %v1394_v39 = vadd.f32 %v1393_v50, %v1392_v35  ;;  %v1830_v53 = vadd.f32 %v1829_v18, %v1828_v12  ;;  %v2910_v40 = vpop.permute.xlu0 %2909  ;;  %v12989_v38 = vld [vmem:[#allocation155_spill] sm:$0xff] }
 0x1f3   :  { %v1396_v60 = vadd.f32 %v1395_v54, %v1394_v39  ;;  %v1832_v3 = vadd.f32 %v1831_v57, %v1830_v53  ;;  %v9143_v30 = vpop.permute.xlu1 %3229 }
 0x1f4   :  { %12923 = vst [vmem:[#allocation161_spill] sm:$0xff] %v9143_v30 }
 0x1f5   :  { %v1397_v43 = vrot.slane %v1396_v60, 4  ;;  %v1834_v24 = vadd.f32 %v1833_v0, %v1832_v3  ;;  %v2930_v29 = vpop.permute.xlu0 %2929  ;;  %v12988_v3 = vld [vmem:[#allocation149_spill] sm:$0xff] }
 0x1f7   :  { %v1398_v52 = vadd.f32 %v1397_v43, %v1396_v60  ;;  %v1835_v14 = vrot.slane %v1834_v24, 4  ;;  %v9151_v0 = vpop.permute.xlu1 %3249  ;;  %v9377_v43 = vld [vmem:[%s12550_s4] ss:$0 sm:$0xff] }
 0x1f8   :  { %12924 = vst [vmem:[#allocation162_spill] sm:$0xff] %v9151_v0 }
 0x1f9   :  { %v1399_v12 = vrot.slane %v1398_v52, 2  ;;  %v1836_v35 = vadd.f32 %v1835_v14, %v1834_v24  ;;  %v12981_v24 = vld [vmem:[#allocation133_spill] sm:$0xff] }
 0x1fb   :  { %v1400_v50 = vadd.f32 %v1399_v12, %v1398_v52  ;;  %v1837_v18 = vrot.slane %v1836_v35, 2  ;;  %v2950_v52 = vpop.permute.xlu0 %2949 }
 0x1fc   :  { %v9195_v52 = vpop.permute.xlu1 %2894 }
 0x1fd   :  { %v1401_v2 = vrot.slane %v1400_v50, 1  ;;  %v1838_v58 = vadd.f32 %v1837_v18, %v1836_v35  ;;  %12925 = vst [vmem:[#allocation163_spill] sm:$0xff] %v9195_v52  ;;  %v12929_v35 = vld [vmem:[#allocation48_spill] sm:$0xff] }
 0x1ff   :  { %v1402_v39 = vadd.f32 %v1401_v2, %v1400_v50  ;;  %v1839_v53 = vrot.slane %v1838_v58, 1  ;;  %v12930_v2 = vld [vmem:[#allocation45_spill] sm:$0xff] }
 0x200   :  { %v9235_v50 = vpop.permute.xlu1 %3074  ;;  %12991 = vst [vmem:[#allocation45_spill] sm:$0xff] %v9377_v43 }
 0x201   :  { %v9145_v57 = vmul.f32 0.001953125, %v1402_v39  ;;  %v1840_v15 = vadd.f32 %v1839_v53, %v1838_v58  ;;  %v12980_v58 = vld [vmem:[#allocation134_spill] sm:$0xff] }
 0x203   :  { %v1841_v54 = vmul.f32 0.001953125, %v1840_v15  ;;  %v1842_v60 = vmul.f32 %v9145_v57, %v9145_v57  ;;  %v9362_v15 = vld [vmem:[%s12549_s3] ss:$0 sm:$0xff]  ;;  %v13010_v43 = vsub.f32 %v8121_v41, %v9145_v57 }
 0x204   :  { %v9263_v29 = vpop.permute.xlu1 %2899  ;;  %12987 = vst [vmem:[#allocation48_spill] sm:$0xff] %v9362_v15  ;;  %v12992_v15 = vsub.f32 %v7891_v13, %v9145_v57 }
 0x205   :  { %v1843_v14 = vsub.f32 %v1841_v54, %v1842_v60  ;;  %v12926_v54 = vld [vmem:[#allocation42_spill] sm:$0xff]  ;;  %v12928_v60 = vld [vmem:[#allocation41_spill] sm:$0xff] }
 0x206   :  { %12927 = vst [vmem:[#allocation42_spill] sm:$0xff] %v9235_v50  ;;  %12940 = vst [vmem:[#allocation41_spill] sm:$0xff] %v9263_v29  ;;  %v12975_v29 = vld [vmem:[#allocation119_spill] sm:$0xff]  ;;  %v12985_v50 = vld [vmem:[#allocation145_spill] sm:$0xff] }
 0x207   :  { %v1988_v53 = vadd.f32 1e-05, %v1843_v14  ;;  %v2970_v14 = vpop.permute.xlu0 %2969 }
 0x208   :  { %v12932_v14 = vld [vmem:[#allocation51_spill] sm:$0xff]  ;;  %v2920_v18 = vpop.permute.xlu1 %2919 }
 0x209   :  { %7096 = vrsqrt.f32 %v1988_v53  ;;  %v12931_v53 = vld [vmem:[#allocation52_spill] sm:$0xff] }
 0x20b   :  { %v2990_v12 = vpop.permute.xlu0 %2989 }
 0x20c   :  { %v12990_v12 = vsub.f32 %v7873_v4, %v9145_v57 }
 0x20f   :  { %v3010_v30 = vpop.permute.xlu0 %3009 }
 0x210   :  { %v2940_v30 = vpop.permute.xlu1 %2939 }
 0x211   :  { %v12984_v30 = vld [vmem:[#allocation146_spill] sm:$0xff] }
 0x213   :  { %v3030_v63 = vpop.permute.xlu0 %3029 }
 0x214   :  { %v2960_v39 = vpop.permute.xlu1 %2959 }
 0x215   :  { %v12993_v39 = vsub.f32 %v7856_v62, %v9145_v57 }
 0x216   :  { %v9261_v52 = vpop.eup %7096 }
 0x217   :  { %v3050_v18 = vpop.permute.xlu0 %3049  ;;  %v9372_v40 = vmul.f32 %v9261_v52, %v12990_v12  ;;  %v9383_v0 = vmul.f32 %v9261_v52, %v12992_v15  ;;  %v9389_v4 = vmul.f32 %v9261_v52, %v12993_v39  ;;  %v12994_v12 = vsub.f32 %v7884_v8, %v9145_v57 }
 0x218   :  { %v12996_v15 = vsub.f32 %v7955_v59, %v9145_v57  ;;  %v12997_v39 = vsub.f32 %v7908_v22, %v9145_v57 }
 0x219   :  { %v9395_v63 = vmul.f32 %v9261_v52, %v12994_v12  ;;  %v12998_v12 = vsub.f32 %v7943_v46, %v9145_v57 }
 0x21a   :  { %v9407_v62 = vmul.f32 %v9261_v52, %v12996_v15  ;;  %v9413_v8 = vmul.f32 %v9261_v52, %v12997_v39  ;;  %v13000_v15 = vsub.f32 %v8013_v48, %v9145_v57  ;;  %v13001_v39 = vsub.f32 %v7967_v7, %v9145_v57 }
 0x21b   :  { %v3070_v18 = vpop.permute.xlu0 %3069 }
 0x21c   :  { %v12995_v18 = vsub.f32 %v7927_v34, %v9145_v57  ;;  %v9419_v34 = vmul.f32 %v9261_v52, %v12998_v12  ;;  %v9431_v22 = vmul.f32 %v9261_v52, %v13000_v15  ;;  %v9437_v46 = vmul.f32 %v9261_v52, %v13001_v39 }
 0x21d   :  { %v13002_v12 = vsub.f32 %v8005_v36, %v9145_v57  ;;  %v13004_v15 = vsub.f32 %v8071_v44, %v9145_v57  ;;  %v13005_v39 = vsub.f32 %v8025_v61, %v9145_v57 }
 0x21e   :  { %v9401_v13 = vmul.f32 %v9261_v52, %v12995_v18  ;;  %v12999_v18 = vsub.f32 %v7985_v19, %v9145_v57 }
 0x21f   :  { %v9443_v19 = vmul.f32 %v9261_v52, %v13002_v12  ;;  %v9455_v7 = vmul.f32 %v9261_v52, %v13004_v15  ;;  %v9461_v36 = vmul.f32 %v9261_v52, %v13005_v39  ;;  %v13006_v12 = vsub.f32 %v8063_v32, %v9145_v57 }
 0x220   :  { %v9425_v59 = vmul.f32 %v9261_v52, %v12999_v18  ;;  %v13003_v18 = vsub.f32 %v8047_v16, %v9145_v57  ;;  %v13008_v15 = vsub.f32 %v8133_v6, %v9145_v57  ;;  %v13009_v39 = vsub.f32 %v8087_v5, %v9145_v57 }
 0x221   :  { %v9467_v16 = vmul.f32 %v9261_v52, %v13006_v12  ;;  %v2980_v12 = vpop.permute.xlu1 %2979 }
 0x222   :  { %v9449_v48 = vmul.f32 %v9261_v52, %v13003_v18  ;;  %v13007_v18 = vsub.f32 %v8105_v23, %v9145_v57  ;;  %v9479_v61 = vmul.f32 %v9261_v52, %v13008_v15  ;;  %v9485_v32 = vmul.f32 %v9261_v52, %v13009_v39  ;;  %v3165_v39 = vpop.permute.xlu0 %3164 }
 0x223   :  { %v9491_v23 = vmul.f32 %v9261_v52, %v13010_v43  ;;  %v13012_v15 = vsub.f32 %v8191_v20, %v9145_v57  ;;  %v13013_v12 = vsub.f32 %v8145_v26, %v9145_v57  ;;  %v13014_v43 = vsub.f32 %v8183_v21, %v9145_v57 }
 0x224   :  { %v9473_v44 = vmul.f32 %v9261_v52, %v13007_v18  ;;  %v13011_v18 = vsub.f32 %v8163_v51, %v9145_v57  ;;  %v13017_v39 = vsub.f32 %v8203_v31, %v9145_v57 }
 0x225   :  { %v9503_v5 = vmul.f32 %v9261_v52, %v13012_v15  ;;  %v9509_v41 = vmul.f32 %v9261_v52, %v13013_v12  ;;  %v9515_v51 = vmul.f32 %v9261_v52, %v13014_v43  ;;  %v13016_v15 = vsub.f32 %v8249_v47, %v9145_v57 }
 0x226   :  { %v9497_v6 = vmul.f32 %v9261_v52, %v13011_v18  ;;  %v13015_v18 = vsub.f32 %v8225_v28, %v9145_v57  ;;  %v9533_v21 = vmul.f32 %v9261_v52, %v13017_v39  ;;  %v13018_v12 = vsub.f32 %v8241_v1, %v9145_v57 }
 0x227   :  { %v9527_v26 = vmul.f32 %v9261_v52, %v13016_v15  ;;  %v13019_v43 = vsub.f32 %v8283_v11, %v9145_v57  ;;  %v13021_v15 = vsub.f32 %v8265_v9, %v9145_v57  ;;  %v13022_v39 = vsub.f32 %v8299_v33, %v9145_v57 }
 0x228   :  { %v9521_v20 = vmul.f32 %v9261_v52, %v13015_v18  ;;  %v9539_v28 = vmul.f32 %v9261_v52, %v13018_v12  ;;  %v13020_v18 = vsub.f32 %v8311_v25, %v9145_v57  ;;  %v13023_v12 = vsub.f32 %v8341_v55, %v9145_v57 }
 0x229   :  { %v9545_v47 = vmul.f32 %v9261_v52, %v13019_v43  ;;  %v9557_v1 = vmul.f32 %v9261_v52, %v13021_v15  ;;  %v9563_v11 = vmul.f32 %v9261_v52, %v13022_v39  ;;  %v13024_v43 = vsub.f32 %v8369_v49, %v9145_v57 }
 0x22a   :  { %v9551_v31 = vmul.f32 %v9261_v52, %v13020_v18  ;;  %v9569_v25 = vmul.f32 %v9261_v52, %v13023_v12  ;;  %v13025_v18 = vsub.f32 %v8323_v27, %v9145_v57  ;;  %v13026_v15 = vsub.f32 %v8361_v45, %v9145_v57 }
 0x22b   :  { %v9575_v9 = vmul.f32 %v9261_v52, %v13024_v43  ;;  %v13027_v39 = vsub.f32 %v8403_v37, %v9145_v57  ;;  %v13028_v12 = vsub.f32 %v8381_v17, %v9145_v57  ;;  %v13029_v43 = vsub.f32 %v8452_v42, %v9145_v57 }
 0x22c   :  { %v9581_v33 = vmul.f32 %v9261_v52, %v13025_v18  ;;  %v9587_v55 = vmul.f32 %v9261_v52, %v13026_v15  ;;  %v3000_v18 = vpop.permute.xlu1 %2999  ;;  %v13030_v15 = vsub.f32 %v8436_v56, %v9145_v57 }
 0x22d   :  { %v9593_v49 = vmul.f32 %v9261_v52, %v13027_v39  ;;  %v9599_v27 = vmul.f32 %v9261_v52, %v13028_v12  ;;  %v9605_v45 = vmul.f32 %v9261_v52, %v13029_v43  ;;  %v13031_v39 = vsub.f32 %v12926_v54, %v9145_v57 }
 0x22e   :  { %v9611_v37 = vmul.f32 %v9261_v52, %v13030_v15  ;;  %v13032_v12 = vsub.f32 %v12928_v60, %v9145_v57  ;;  %v13033_v43 = vsub.f32 %v12929_v35, %v9145_v57  ;;  %v13035_v18 = vsub.f32 %v12930_v2, %v9145_v57 }
 0x22f   :  { %v9617_v17 = vmul.f32 %v9261_v52, %v13031_v39  ;;  %v13037_v15 = vsub.f32 %v12931_v53, %v9145_v57  ;;  %v13039_v39 = vsub.f32 %v12932_v14, %v9145_v57 }
 0x230   :  { %v9623_v42 = vmul.f32 %v9261_v52, %v13032_v12  ;;  %v9629_v56 = vmul.f32 %v9261_v52, %v13033_v43  ;;  %v9635_v54 = vmul.f32 %v9261_v52, %v13035_v18  ;;  %v13041_v12 = vld [vmem:[#allocation56_spill] sm:$0xff]  ;;  %v13044_v18 = vld [vmem:[#allocation55_spill] sm:$0xff] }
 0x231   :  { %v9641_v60 = vmul.f32 %v9261_v52, %v13037_v15  ;;  %v9647_v35 = vmul.f32 %v9261_v52, %v13039_v39  ;;  %v13042_v43 = vsub.f32 %v13041_v12, %v9145_v57  ;;  %v13047_v15 = vld [vmem:[#allocation58_spill] sm:$0xff]  ;;  %v13050_v39 = vld [vmem:[#allocation57_spill] sm:$0xff] }
 0x232   :  { %13034 = vst [vmem:[#allocation52_spill] sm:$0xff] %v9629_v56  ;;  %13036 = vst [vmem:[#allocation51_spill] sm:$0xff] %v9635_v54  ;;  %v13045_v54 = vsub.f32 %v13044_v18, %v9145_v57 }
 0x233   :  { %13038 = vst [vmem:[#allocation119_spill] sm:$0xff] %v9641_v60  ;;  %13040 = vst [vmem:[#allocation134_spill] sm:$0xff] %v9647_v35  ;;  %v9653_v2 = vmul.f32 %v9261_v52, %v13042_v43  ;;  %v13048_v60 = vsub.f32 %v13047_v15, %v9145_v57  ;;  %v13051_v35 = vsub.f32 %v13050_v39, %v9145_v57  ;;  %v13053_v43 = vld [vmem:[#allocation60_spill] sm:$0xff] }
 0x234   :  { %v9659_v53 = vmul.f32 %v9261_v52, %v13045_v54  ;;  %v3020_v54 = vpop.permute.xlu1 %3019 }
 0x235   :  { %13043 = vst [vmem:[#allocation133_spill] sm:$0xff] %v9653_v2  ;;  %v9665_v14 = vmul.f32 %v9261_v52, %v13048_v60  ;;  %v9671_v12 = vmul.f32 %v9261_v52, %v13051_v35  ;;  %v13054_v2 = vsub.f32 %v13053_v43, %v9145_v57  ;;  %v13059_v60 = vld [vmem:[#allocation64_spill] sm:$0xff]  ;;  %v13062_v35 = vld [vmem:[#allocation62_spill] sm:$0xff] }
 0x236   :  { %13046 = vst [vmem:[#allocation146_spill] sm:$0xff] %v9659_v53  ;;  %v13056_v53 = vld [vmem:[#allocation59_spill] sm:$0xff] }
 0x237   :  { %13049 = vst [vmem:[#allocation145_spill] sm:$0xff] %v9665_v14  ;;  %13052 = vst [vmem:[#allocation149_spill] sm:$0xff] %v9671_v12  ;;  %v9677_v18 = vmul.f32 %v9261_v52, %v13054_v2  ;;  %v13057_v56 = vsub.f32 %v13056_v53, %v9145_v57  ;;  %v13060_v14 = vsub.f32 %v13059_v60, %v9145_v57  ;;  %v13065_v2 = vld [vmem:[#allocation67_spill] sm:$0xff] }
 0x238   :  { %v13063_v12 = vsub.f32 %v13062_v35, %v9145_v57  ;;  %v13066_v54 = vsub.f32 %v13065_v2, %v9145_v57 }
 0x239   :  { %13055 = vst [vmem:[#allocation155_spill] sm:$0xff] %v9677_v18  ;;  %v9683_v15 = vmul.f32 %v9261_v52, %v13057_v56  ;;  %v9689_v39 = vmul.f32 %v9261_v52, %v13060_v14  ;;  %v13068_v56 = vld [vmem:[#allocation70_spill] sm:$0xff] }
 0x23a   :  { %v9695_v43 = vmul.f32 %v9261_v52, %v13063_v12  ;;  %v9701_v53 = vmul.f32 %v9261_v52, %v13066_v54  ;;  %v13071_v14 = vld [vmem:[#allocation66_spill] sm:$0xff]  ;;  %v13074_v12 = vld [vmem:[#allocation68_spill] sm:$0xff] }
 0x23b   :  { %13058 = vst [vmem:[#allocation56_spill] sm:$0xff] %v9683_v15  ;;  %13061 = vst [vmem:[#allocation55_spill] sm:$0xff] %v9689_v39  ;;  %v13069_v15 = vsub.f32 %v13068_v56, %v9145_v57  ;;  %v13072_v39 = vsub.f32 %v13071_v14, %v9145_v57  ;;  %v13077_v54 = vld [vmem:[#allocation72_spill] sm:$0xff] }
 0x23c   :  { %13064 = vst [vmem:[#allocation58_spill] sm:$0xff] %v9695_v43  ;;  %13067 = vst [vmem:[#allocation57_spill] sm:$0xff] %v9701_v53  ;;  %v13075_v43 = vsub.f32 %v13074_v12, %v9145_v57  ;;  %v13078_v53 = vsub.f32 %v13077_v54, %v9145_v57 }
 0x23d   :  { %v9707_v60 = vmul.f32 %v9261_v52, %v13069_v15  ;;  %v9713_v35 = vmul.f32 %v9261_v52, %v13072_v39  ;;  %v13080_v15 = vld [vmem:[#allocation75_spill] sm:$0xff] }
 0x23e   :  { %v9719_v2 = vmul.f32 %v9261_v52, %v13075_v43  ;;  %v9725_v56 = vmul.f32 %v9261_v52, %v13078_v53  ;;  %v13083_v39 = vld [vmem:[#allocation71_spill] sm:$0xff]  ;;  %v13086_v43 = vld [vmem:[#allocation74_spill] sm:$0xff] }
 0x23f   :  { %13070 = vst [vmem:[#allocation60_spill] sm:$0xff] %v9707_v60  ;;  %13073 = vst [vmem:[#allocation59_spill] sm:$0xff] %v9713_v35  ;;  %v13081_v60 = vsub.f32 %v13080_v15, %v9145_v57  ;;  %v13084_v35 = vsub.f32 %v13083_v39, %v9145_v57  ;;  %v13089_v53 = vld [vmem:[#allocation78_spill] sm:$0xff] }
 0x240   :  { %13076 = vst [vmem:[#allocation64_spill] sm:$0xff] %v9719_v2  ;;  %13079 = vst [vmem:[#allocation62_spill] sm:$0xff] %v9725_v56  ;;  %v13087_v2 = vsub.f32 %v13086_v43, %v9145_v57  ;;  %v13090_v56 = vsub.f32 %v13089_v53, %v9145_v57 }
 0x241   :  { %v9731_v14 = vmul.f32 %v9261_v52, %v13081_v60  ;;  %v9737_v12 = vmul.f32 %v9261_v52, %v13084_v35  ;;  %v13092_v60 = vld [vmem:[#allocation82_spill] sm:$0xff]  ;;  %v13095_v35 = vld [vmem:[#allocation77_spill] sm:$0xff] }
 0x242   :  { %v9743_v54 = vmul.f32 %v9261_v52, %v13087_v2  ;;  %v9749_v15 = vmul.f32 %v9261_v52, %v13090_v56  ;;  %v13098_v2 = vld [vmem:[#allocation79_spill] sm:$0xff]  ;;  %v13101_v56 = vld [vmem:[#allocation84_spill] sm:$0xff] }
 0x243   :  { %13082 = vst [vmem:[#allocation67_spill] sm:$0xff] %v9731_v14  ;;  %13085 = vst [vmem:[#allocation70_spill] sm:$0xff] %v9737_v12  ;;  %v13093_v14 = vsub.f32 %v13092_v60, %v9145_v57  ;;  %v13096_v12 = vsub.f32 %v13095_v35, %v9145_v57 }
 0x244   :  { %13088 = vst [vmem:[#allocation66_spill] sm:$0xff] %v9743_v54  ;;  %13091 = vst [vmem:[#allocation68_spill] sm:$0xff] %v9749_v15  ;;  %v13099_v54 = vsub.f32 %v13098_v2, %v9145_v57  ;;  %v13102_v15 = vsub.f32 %v13101_v56, %v9145_v57 }
 0x245   :  { %v9755_v39 = vmul.f32 %v9261_v52, %v13093_v14  ;;  %v9761_v43 = vmul.f32 %v9261_v52, %v13096_v12  ;;  %v13104_v14 = vld [vmem:[#allocation88_spill] sm:$0xff]  ;;  %v13107_v12 = vld [vmem:[#allocation83_spill] sm:$0xff] }
 0x246   :  { %v9767_v53 = vmul.f32 %v9261_v52, %v13099_v54  ;;  %v9773_v60 = vmul.f32 %v9261_v52, %v13102_v15  ;;  %v13110_v54 = vld [vmem:[#allocation87_spill] sm:$0xff]  ;;  %v3040_v15 = vpop.permute.xlu1 %3039 }
 0x247   :  { %13094 = vst [vmem:[#allocation72_spill] sm:$0xff] %v9755_v39  ;;  %13097 = vst [vmem:[#allocation75_spill] sm:$0xff] %v9761_v43  ;;  %v13105_v39 = vsub.f32 %v13104_v14, %v9145_v57  ;;  %v13108_v43 = vsub.f32 %v13107_v12, %v9145_v57 }
 0x248   :  { %13100 = vst [vmem:[#allocation71_spill] sm:$0xff] %v9767_v53  ;;  %13103 = vst [vmem:[#allocation74_spill] sm:$0xff] %v9773_v60  ;;  %v13111_v53 = vsub.f32 %v13110_v54, %v9145_v57  ;;  %v13112_v60 = vld [vmem:[#allocation89_spill] sm:$0xff] }
 0x249   :  { %v9779_v35 = vmul.f32 %v9261_v52, %v13105_v39  ;;  %v9785_v2 = vmul.f32 %v9261_v52, %v13108_v43  ;;  %v13113_v18 = vsub.f32 %v13112_v60, %v9145_v57  ;;  %v13115_v39 = vld [vmem:[#allocation92_spill] sm:$0xff] }
 0x24a   :  { %v9791_v56 = vmul.f32 %v9261_v52, %v13111_v53  ;;  %v13118_v43 = vld [vmem:[#allocation96_spill] sm:$0xff] }
 0x24b   :  { %13106 = vst [vmem:[#allocation78_spill] sm:$0xff] %v9779_v35  ;;  %13109 = vst [vmem:[#allocation82_spill] sm:$0xff] %v9785_v2  ;;  %v9797_v14 = vmul.f32 %v9261_v52, %v13113_v18  ;;  %v13116_v35 = vsub.f32 %v13115_v39, %v9145_v57  ;;  %v13119_v2 = vsub.f32 %v13118_v43, %v9145_v57  ;;  %v13121_v53 = vld [vmem:[#allocation100_spill] sm:$0xff]  ;;  %v13124_v18 = vld [vmem:[#allocation95_spill] sm:$0xff] }
 0x24c   :  { %v13122_v15 = vsub.f32 %v13121_v53, %v9145_v57 }
 0x24d   :  { %13114 = vst [vmem:[#allocation77_spill] sm:$0xff] %v9797_v14  ;;  %v9803_v12 = vmul.f32 %v9261_v52, %v13116_v35  ;;  %v9809_v54 = vmul.f32 %v9261_v52, %v13119_v2  ;;  %v13125_v14 = vsub.f32 %v13124_v18, %v9145_v57  ;;  %v13127_v35 = vld [vmem:[#allocation97_spill] sm:$0xff]  ;;  %v13130_v2 = vld [vmem:[#allocation102_spill] sm:$0xff] }
 0x24e   :  { %v9815_v60 = vmul.f32 %v9261_v52, %v13122_v15  ;;  %v13133_v15 = vld [vmem:[#allocation106_spill] sm:$0xff] }
 0x24f   :  { %13117 = vst [vmem:[#allocation79_spill] sm:$0xff] %v9803_v12  ;;  %13120 = vst [vmem:[#allocation84_spill] sm:$0xff] %v9809_v54  ;;  %v9821_v39 = vmul.f32 %v9261_v52, %v13125_v14  ;;  %v13128_v12 = vsub.f32 %v13127_v35, %v9145_v57  ;;  %v13131_v54 = vsub.f32 %v13130_v2, %v9145_v57  ;;  %v13136_v14 = vld [vmem:[#allocation101_spill] sm:$0xff] }
 0x250   :  { %13123 = vst [vmem:[#allocation88_spill] sm:$0xff] %v9815_v60  ;;  %v13134_v60 = vsub.f32 %v13133_v15, %v9145_v57 }
 0x251   :  { %13126 = vst [vmem:[#allocation83_spill] sm:$0xff] %v9821_v39  ;;  %v9827_v43 = vmul.f32 %v9261_v52, %v13128_v12  ;;  %v9833_v53 = vmul.f32 %v9261_v52, %v13131_v54  ;;  %v13137_v39 = vsub.f32 %v13136_v14, %v9145_v57  ;;  %v13139_v12 = vld [vmem:[#allocation105_spill] sm:$0xff]  ;;  %v13142_v54 = vld [vmem:[#allocation110_spill] sm:$0xff] }
 0x252   :  { %v9839_v18 = vmul.f32 %v9261_v52, %v13134_v60  ;;  %v13145_v60 = vld [vmem:[#allocation112_spill] sm:$0xff] }
 0x253   :  { %13129 = vst [vmem:[#allocation87_spill] sm:$0xff] %v9827_v43  ;;  %13132 = vst [vmem:[#allocation89_spill] sm:$0xff] %v9833_v53  ;;  %v9845_v35 = vmul.f32 %v9261_v52, %v13137_v39  ;;  %v13140_v43 = vsub.f32 %v13139_v12, %v9145_v57  ;;  %v13143_v53 = vsub.f32 %v13142_v54, %v9145_v57  ;;  %v13148_v39 = vld [vmem:[#allocation107_spill] sm:$0xff] }
 0x254   :  { %13135 = vst [vmem:[#allocation92_spill] sm:$0xff] %v9839_v18  ;;  %v13146_v18 = vsub.f32 %v13145_v60, %v9145_v57 }
 0x255   :  { %13138 = vst [vmem:[#allocation96_spill] sm:$0xff] %v9845_v35  ;;  %v9851_v2 = vmul.f32 %v9261_v52, %v13140_v43  ;;  %v9857_v15 = vmul.f32 %v9261_v52, %v13143_v53  ;;  %v13149_v35 = vsub.f32 %v13148_v39, %v9145_v57  ;;  %v13151_v43 = vld [vmem:[#allocation111_spill] sm:$0xff] }
 0x256   :  { %v9863_v14 = vmul.f32 %v9261_v52, %v13146_v18  ;;  %v13154_v53 = vld [vmem:[#allocation115_spill] sm:$0xff]  ;;  %v13157_v18 = vld [vmem:[#allocation118_spill] sm:$0xff] }
 0x257   :  { %13141 = vst [vmem:[#allocation100_spill] sm:$0xff] %v9851_v2  ;;  %13144 = vst [vmem:[#allocation95_spill] sm:$0xff] %v9857_v15  ;;  %v9869_v12 = vmul.f32 %v9261_v52, %v13149_v35  ;;  %v13152_v2 = vsub.f32 %v13151_v43, %v9145_v57  ;;  %v13155_v15 = vsub.f32 %v13154_v53, %v9145_v57  ;;  %v13160_v35 = vld [vmem:[#allocation120_spill] sm:$0xff] }
 0x258   :  { %13147 = vst [vmem:[#allocation97_spill] sm:$0xff] %v9863_v14  ;;  %v13158_v14 = vsub.f32 %v13157_v18, %v9145_v57 }
 0x259   :  { %13150 = vst [vmem:[#allocation102_spill] sm:$0xff] %v9869_v12  ;;  %v9875_v54 = vmul.f32 %v9261_v52, %v13152_v2  ;;  %v9881_v60 = vmul.f32 %v9261_v52, %v13155_v15  ;;  %v13161_v12 = vsub.f32 %v13160_v35, %v9145_v57  ;;  %v13163_v2 = vsub.f32 %v12975_v29, %v9145_v57  ;;  %v13165_v15 = vld [vmem:[#allocation126_spill] sm:$0xff] }
 0x25a   :  { %v9887_v39 = vmul.f32 %v9261_v52, %v13158_v14  ;;  %v3060_v14 = vpop.permute.xlu1 %3059 }
 0x25b   :  { %13153 = vst [vmem:[#allocation106_spill] sm:$0xff] %v9875_v54  ;;  %13156 = vst [vmem:[#allocation101_spill] sm:$0xff] %v9881_v60  ;;  %v9893_v43 = vmul.f32 %v9261_v52, %v13161_v12  ;;  %v9899_v53 = vmul.f32 %v9261_v52, %v13163_v2  ;;  %v13166_v60 = vsub.f32 %v13165_v15, %v9145_v57  ;;  %v13169_v12 = vld [vmem:[#allocation130_spill] sm:$0xff]  ;;  %v13171_v2 = vld [vmem:[#allocation129_spill] sm:$0xff] }
 0x25c   :  { %13159 = vst [vmem:[#allocation105_spill] sm:$0xff] %v9887_v39  ;;  %v13167_v39 = vld [vmem:[#allocation123_spill] sm:$0xff] }
 0x25d   :  { %13162 = vst [vmem:[#allocation110_spill] sm:$0xff] %v9893_v43  ;;  %13164 = vst [vmem:[#allocation112_spill] sm:$0xff] %v9899_v53  ;;  %v9905_v18 = vmul.f32 %v9261_v52, %v13166_v60  ;;  %v13168_v54 = vsub.f32 %v13167_v39, %v9145_v57  ;;  %v13170_v43 = vsub.f32 %v13169_v12, %v9145_v57 }
 0x25e   :  { %v13172_v53 = vsub.f32 %v13171_v2, %v9145_v57  ;;  %v13173_v60 = vsub.f32 %v12980_v58, %v9145_v57 }
 0x25f   :  { %v9911_v35 = vmul.f32 %v9261_v52, %v13168_v54  ;;  %v9917_v29 = vmul.f32 %v9261_v52, %v13170_v43  ;;  %v13175_v54 = vsub.f32 %v12981_v24, %v9145_v57  ;;  %v13176_v43 = vsub.f32 %v9023_v10, %v9145_v57 }
 0x260   :  { %v9923_v15 = vmul.f32 %v9261_v52, %v13172_v53  ;;  %v9929_v39 = vmul.f32 %v9261_v52, %v13173_v60  ;;  %v13177_v53 = vld [vmem:[#allocation142_spill] sm:$0xff]  ;;  %v13180_v60 = vld [vmem:[#allocation141_spill] sm:$0xff] }
 0x261   :  { %v9935_v14 = vmul.f32 %v9261_v52, %v13175_v54  ;;  %v9941_v12 = vmul.f32 %v9261_v52, %v13176_v43  ;;  %v13178_v2 = vsub.f32 %v13177_v53, %v9145_v57  ;;  %v13183_v54 = vsub.f32 %v12984_v30, %v9145_v57 }
 0x262   :  { %13174 = vst [vmem:[#allocation107_spill] sm:$0xff] %v9929_v39  ;;  %v13181_v39 = vsub.f32 %v13180_v60, %v9145_v57  ;;  %v13184_v43 = vsub.f32 %v12985_v50, %v9145_v57 }
 0x263   :  { %v9947_v58 = vmul.f32 %v9261_v52, %v13178_v2  ;;  %v9959_v10 = vmul.f32 %v9261_v52, %v13183_v54  ;;  %v13186_v2 = vld [vmem:[#allocation152_spill] sm:$0xff]  ;;  %v13189_v54 = vsub.f32 %v12989_v38, %v9145_v57 }
 0x264   :  { %v9953_v24 = vmul.f32 %v9261_v52, %v13181_v39  ;;  %v9965_v53 = vmul.f32 %v9261_v52, %v13184_v43  ;;  %v3080_v39 = vpop.permute.xlu1 %3079  ;;  %v13190_v43 = vld [vmem:[#allocation48_spill] sm:$0xff] }
 0x265   :  { %13179 = vst [vmem:[#allocation111_spill] sm:$0xff] %v9947_v58  ;;  %v13187_v58 = vsub.f32 %v13186_v2, %v9145_v57  ;;  %v9983_v50 = vmul.f32 %v9261_v52, %v13189_v54  ;;  %v10003_v38 = vmul.f32 %v13190_v43, %v9401_v13  ;;  %v10031_v13 = vmul.f32 %v13190_v43, %v9443_v19  ;;  %v13195_v2 = vld [vmem:[#allocation51_spill] sm:$0xff]  ;;  %v13199_v54 = vld [vmem:[#allocation134_spill] sm:$0xff] }
 0x266   :  { %13182 = vst [vmem:[#allocation115_spill] sm:$0xff] %v9953_v24  ;;  %13185 = vst [vmem:[#allocation118_spill] sm:$0xff] %v9965_v53  ;;  %v13188_v24 = vsub.f32 %v12988_v3, %v9145_v57  ;;  %v9987_v53 = vmul.f32 %v13190_v43, %v9372_v40  ;;  %v9995_v3 = vmul.f32 %v13190_v43, %v9389_v4  ;;  %v13197_v39 = vld [vmem:[#allocation119_spill] sm:$0xff] }
 0x267   :  { %v9971_v60 = vmul.f32 %v9261_v52, %v13187_v58  ;;  %v9991_v58 = vmul.f32 %v13190_v43, %v9383_v0  ;;  %v10007_v57 = vmul.f32 %v13190_v43, %v9407_v62  ;;  %v10011_v0 = vmul.f32 %v13190_v43, %v9413_v8 }
 0x268   :  { %v9977_v30 = vmul.f32 %v9261_v52, %v13188_v24  ;;  %v9999_v24 = vmul.f32 %v13190_v43, %v9395_v63  ;;  %v10015_v40 = vmul.f32 %v13190_v43, %v9419_v34  ;;  %v10019_v52 = vmul.f32 %v13190_v43, %v9425_v59 }
 0x269   :  { %v10023_v63 = vmul.f32 %v13190_v43, %v9431_v22  ;;  %v10027_v4 = vmul.f32 %v13190_v43, %v9437_v46  ;;  %v10035_v62 = vmul.f32 %v13190_v43, %v9449_v48  ;;  %v10039_v8 = vmul.f32 %v13190_v43, %v9455_v7  ;;  %v3170_v22 = vpop.permute.xlu1 %3169 }
 0x26a   :  { %v10043_v34 = vmul.f32 %v13190_v43, %v9461_v36  ;;  %v10047_v59 = vmul.f32 %v13190_v43, %v9467_v16  ;;  %v10051_v46 = vmul.f32 %v13190_v43, %v9473_v44  ;;  %v10055_v19 = vmul.f32 %v13190_v43, %v9479_v61  ;;  %v13201_v22 = vld [vmem:[#allocation133_spill] sm:$0xff] }
 0x26b   :  { %v10059_v48 = vmul.f32 %v13190_v43, %v9485_v32  ;;  %v10063_v7 = vmul.f32 %v13190_v43, %v9491_v23  ;;  %v10067_v36 = vmul.f32 %v13190_v43, %v9497_v6  ;;  %v10071_v16 = vmul.f32 %v13190_v43, %v9503_v5 }
 0x26c   :  { %v10075_v44 = vmul.f32 %v13190_v43, %v9509_v41  ;;  %v10079_v61 = vmul.f32 %v13190_v43, %v9515_v51  ;;  %v10083_v32 = vmul.f32 %v13190_v43, %v9521_v20  ;;  %v10087_v23 = vmul.f32 %v13190_v43, %v9527_v26 }
 0x26d   :  { %v10091_v6 = vmul.f32 %v13190_v43, %v9533_v21  ;;  %v10095_v5 = vmul.f32 %v13190_v43, %v9539_v28  ;;  %v10099_v41 = vmul.f32 %v13190_v43, %v9545_v47  ;;  %v10103_v51 = vmul.f32 %v13190_v43, %v9551_v31 }
 0x26e   :  { %v10107_v20 = vmul.f32 %v13190_v43, %v9557_v1  ;;  %v10111_v26 = vmul.f32 %v13190_v43, %v9563_v11  ;;  %v10115_v21 = vmul.f32 %v13190_v43, %v9569_v25  ;;  %v10119_v28 = vmul.f32 %v13190_v43, %v9575_v9 }
 0x26f   :  { %v10123_v47 = vmul.f32 %v13190_v43, %v9581_v33  ;;  %v10127_v31 = vmul.f32 %v13190_v43, %v9587_v55  ;;  %v10131_v1 = vmul.f32 %v13190_v43, %v9593_v49  ;;  %v10135_v11 = vmul.f32 %v13190_v43, %v9599_v27  ;;  %v13193_v49 = vld [vmem:[#allocation52_spill] sm:$0xff] }
 0x270   :  { %v10139_v25 = vmul.f32 %v13190_v43, %v9605_v45  ;;  %v10143_v9 = vmul.f32 %v13190_v43, %v9611_v37  ;;  %v10147_v33 = vmul.f32 %v13190_v43, %v9617_v17  ;;  %v10151_v55 = vmul.f32 %v13190_v43, %v9623_v42 }
 0x271   :  { %v10155_v27 = vmul.f32 %v13190_v43, %v13193_v49  ;;  %v10159_v45 = vmul.f32 %v13190_v43, %v13195_v2  ;;  %v10163_v37 = vmul.f32 %v13190_v43, %v13197_v39  ;;  %v10167_v17 = vmul.f32 %v13190_v43, %v13199_v54 }
 0x272   :  { %13191 = vst [vmem:[#allocation120_spill] sm:$0xff] %v10147_v33  ;;  %13192 = vst [vmem:[#allocation126_spill] sm:$0xff] %v10151_v55  ;;  %v10171_v42 = vmul.f32 %v13190_v43, %v13201_v22  ;;  %v13203_v55 = vld [vmem:[#allocation146_spill] sm:$0xff]  ;;  %v13256_v33 = vld [vmem:[#allocation83_spill] sm:$0xff] }
 0x273   :  { %13194 = vst [vmem:[#allocation123_spill] sm:$0xff] %v10155_v27  ;;  %13196 = vst [vmem:[#allocation130_spill] sm:$0xff] %v10159_v45  ;;  %v10175_v49 = vmul.f32 %v13190_v43, %v13203_v55  ;;  %v13205_v27 = vld [vmem:[#allocation145_spill] sm:$0xff] }
 0x274   :  { %13198 = vst [vmem:[#allocation129_spill] sm:$0xff] %v10163_v37  ;;  %13200 = vst [vmem:[#allocation142_spill] sm:$0xff] %v10167_v17  ;;  %v10179_v2 = vmul.f32 %v13190_v43, %v13205_v27  ;;  %v13207_v45 = vld [vmem:[#allocation149_spill] sm:$0xff]  ;;  %v13209_v37 = vld [vmem:[#allocation155_spill] sm:$0xff] }
 0x275   :  { %13202 = vst [vmem:[#allocation141_spill] sm:$0xff] %v10171_v42  ;;  %13204 = vst [vmem:[#allocation152_spill] sm:$0xff] %v10175_v49  ;;  %v10183_v39 = vmul.f32 %v13190_v43, %v13207_v45  ;;  %v10187_v54 = vmul.f32 %v13190_v43, %v13209_v37  ;;  %v13211_v17 = vld [vmem:[#allocation56_spill] sm:$0xff]  ;;  %v13213_v42 = vld [vmem:[#allocation55_spill] sm:$0xff] }
 0x276   :  { %13206 = vst [vmem:[#allocation48_spill] sm:$0xff] %v10179_v2  ;;  %v10191_v22 = vmul.f32 %v13190_v43, %v13211_v17  ;;  %v10195_v55 = vmul.f32 %v13190_v43, %v13213_v42  ;;  %v13215_v49 = vld [vmem:[#allocation58_spill] sm:$0xff]  ;;  %v13217_v2 = vld [vmem:[#allocation57_spill] sm:$0xff] }
 0x277   :  { %13208 = vst [vmem:[#allocation52_spill] sm:$0xff] %v10183_v39  ;;  %13210 = vst [vmem:[#allocation51_spill] sm:$0xff] %v10187_v54  ;;  %v10199_v27 = vmul.f32 %v13190_v43, %v13215_v49  ;;  %v10203_v45 = vmul.f32 %v13190_v43, %v13217_v2  ;;  %v13219_v39 = vld [vmem:[#allocation60_spill] sm:$0xff]  ;;  %v13221_v54 = vld [vmem:[#allocation59_spill] sm:$0xff] }
 0x278   :  { %13212 = vst [vmem:[#allocation119_spill] sm:$0xff] %v10191_v22  ;;  %13214 = vst [vmem:[#allocation134_spill] sm:$0xff] %v10195_v55  ;;  %v10207_v37 = vmul.f32 %v13190_v43, %v13219_v39  ;;  %v10211_v17 = vmul.f32 %v13190_v43, %v13221_v54  ;;  %v13223_v22 = vld [vmem:[#allocation64_spill] sm:$0xff]  ;;  %v13225_v55 = vld [vmem:[#allocation62_spill] sm:$0xff] }
 0x279   :  { %13216 = vst [vmem:[#allocation133_spill] sm:$0xff] %v10199_v27  ;;  %13218 = vst [vmem:[#allocation146_spill] sm:$0xff] %v10203_v45  ;;  %v10215_v42 = vmul.f32 %v13190_v43, %v13223_v22  ;;  %v10219_v49 = vmul.f32 %v13190_v43, %v13225_v55  ;;  %v13227_v27 = vld [vmem:[#allocation67_spill] sm:$0xff]  ;;  %v13229_v45 = vld [vmem:[#allocation70_spill] sm:$0xff] }
 0x27a   :  { %13220 = vst [vmem:[#allocation145_spill] sm:$0xff] %v10207_v37  ;;  %13222 = vst [vmem:[#allocation149_spill] sm:$0xff] %v10211_v17  ;;  %v10223_v2 = vmul.f32 %v13190_v43, %v13227_v27  ;;  %v10227_v39 = vmul.f32 %v13190_v43, %v13229_v45  ;;  %v13231_v37 = vld [vmem:[#allocation66_spill] sm:$0xff]  ;;  %v13233_v17 = vld [vmem:[#allocation68_spill] sm:$0xff] }
 0x27b   :  { %13224 = vst [vmem:[#allocation155_spill] sm:$0xff] %v10215_v42  ;;  %13226 = vst [vmem:[#allocation56_spill] sm:$0xff] %v10219_v49  ;;  %v10231_v54 = vmul.f32 %v13190_v43, %v13231_v37  ;;  %v10235_v22 = vmul.f32 %v13190_v43, %v13233_v17  ;;  %v13235_v42 = vld [vmem:[#allocation72_spill] sm:$0xff]  ;;  %v13237_v49 = vld [vmem:[#allocation75_spill] sm:$0xff] }
 0x27c   :  { %13228 = vst [vmem:[#allocation55_spill] sm:$0xff] %v10223_v2  ;;  %13230 = vst [vmem:[#allocation58_spill] sm:$0xff] %v10227_v39  ;;  %v10239_v55 = vmul.f32 %v13190_v43, %v13235_v42  ;;  %v10243_v27 = vmul.f32 %v13190_v43, %v13237_v49  ;;  %v7085_v45 = vld [vmem:[%s12551_s5 + $0x8] sm:$0xff]   ;;  %v13239_v39 = vld [vmem:[#allocation71_spill] sm:$0xff] }
 0x27d   :  { %13232 = vst [vmem:[#allocation57_spill] sm:$0xff] %v10231_v54  ;;  %13234 = vst [vmem:[#allocation60_spill] sm:$0xff] %v10235_v22  ;;  %v10250_v37 = vmul.f32 %v13190_v43, %v13239_v39  ;;  %v13241_v54 = vld [vmem:[#allocation74_spill] sm:$0xff]  ;;  %v10269_v39 = vmul.f32 %v13190_v43, %v9791_v56  ;;  %6867 = vmatprep.subr.bf16.mxu1 %v7085_v45  ;;  %v10289_v56 = vmul.f32 %v13190_v43, %v13256_v33 }
 0x27e   :  { %13236 = vst [vmem:[#allocation59_spill] sm:$0xff] %v10239_v55  ;;  %13238 = vst [vmem:[#allocation64_spill] sm:$0xff] %v10243_v27  ;;  %v10254_v17 = vmul.f32 %v13190_v43, %v13241_v54  ;;  %v13243_v22 = vld [vmem:[#allocation78_spill] sm:$0xff]  ;;  %v7086_v27 = vld [vmem:[%s12551_s5] sm:$0xff]   ;;  %6868 = vmatpush3.bf16.msra.mxu1 %v7085_v45 }
 0x27f   :  { %13240 = vst [vmem:[#allocation62_spill] sm:$0xff] %v10250_v37  ;;  %v10258_v42 = vmul.f32 %v13190_v43, %v13243_v22  ;;  %v13245_v55 = vld [vmem:[#allocation82_spill] sm:$0xff]  ;;  %13247 = vst [vmem:[#allocation68_spill] sm:$0xff] %v10269_v39  ;;  %v13248_v37 = vld [vmem:[#allocation77_spill] sm:$0xff]  ;;  %6885 = vmatprep.subr.bf16.mxu1 %v7086_v27 }
 0x280   :  { %13242 = vst [vmem:[#allocation67_spill] sm:$0xff] %v10254_v17  ;;  %v10262_v49 = vmul.f32 %v13190_v43, %v13245_v55  ;;  %v10273_v54 = vmul.f32 %v13190_v43, %v13248_v37  ;;  %v13250_v17 = vld [vmem:[#allocation79_spill] sm:$0xff]  ;;  %13257 = vst [vmem:[#allocation78_spill] sm:$0xff] %v10289_v56  ;;  %v13274_v27 = vld [vmem:[#allocation110_spill] sm:$0xff] }
 0x281   :  { %13244 = vst [vmem:[#allocation70_spill] sm:$0xff] %v10258_v42  ;;  %v10277_v22 = vmul.f32 %v13190_v43, %v13250_v17  ;;  %v13252_v42 = vld [vmem:[#allocation84_spill] sm:$0xff]  ;;  %v13258_v39 = vld [vmem:[#allocation87_spill] sm:$0xff] }
 0x282   :  { %13246 = vst [vmem:[#allocation66_spill] sm:$0xff] %v10262_v49  ;;  %13249 = vst [vmem:[#allocation72_spill] sm:$0xff] %v10273_v54  ;;  %v10281_v55 = vmul.f32 %v13190_v43, %v13252_v42  ;;  %v13254_v49 = vld [vmem:[#allocation88_spill] sm:$0xff]  ;;  %v10293_v37 = vmul.f32 %v13190_v43, %v13258_v39  ;;  %v13259_v54 = vld [vmem:[#allocation89_spill] sm:$0xff] }
 0x283   :  { %13251 = vst [vmem:[#allocation75_spill] sm:$0xff] %v10277_v22  ;;  %v10285_v2 = vmul.f32 %v13190_v43, %v13254_v49  ;;  %v10297_v17 = vmul.f32 %v13190_v43, %v13259_v54  ;;  %v13261_v42 = vld [vmem:[#allocation92_spill] sm:$0xff]  ;;  %v13267_v56 = vld [vmem:[#allocation95_spill] sm:$0xff]  ;;  %v13268_v54 = vld [vmem:[#allocation97_spill] sm:$0xff] }
 0x284   :  { %13253 = vst [vmem:[#allocation71_spill] sm:$0xff] %v10281_v55  ;;  %v10301_v55 = vmul.f32 %v13190_v43, %v13261_v42  ;;  %v13263_v22 = vld [vmem:[#allocation96_spill] sm:$0xff]  ;;  %v10313_v39 = vmul.f32 %v13190_v43, %v13267_v56  ;;  %v10317_v45 = vmul.f32 %v13190_v43, %v13268_v54  ;;  %v10337_v54 = vmul.f32 %v13190_v43, %v13274_v27 }
 0x285   :  { %13255 = vst [vmem:[#allocation74_spill] sm:$0xff] %v10285_v2  ;;  %13260 = vst [vmem:[#allocation82_spill] sm:$0xff] %v10297_v17  ;;  %v10305_v49 = vmul.f32 %v13190_v43, %v13263_v22  ;;  %v13265_v2 = vld [vmem:[#allocation100_spill] sm:$0xff]  ;;  %v13270_v17 = vld [vmem:[#allocation102_spill] sm:$0xff]  ;;  %v10357_v27 = vmul.f32 %v13190_v43, %v9923_v15 }
 0x286   :  { %13262 = vst [vmem:[#allocation77_spill] sm:$0xff] %v10301_v55  ;;  %v10309_v33 = vmul.f32 %v13190_v43, %v13265_v2  ;;  %13269 = vst [vmem:[#allocation88_spill] sm:$0xff] %v10317_v45  ;;  %v10321_v42 = vmul.f32 %v13190_v43, %v13270_v17  ;;  %v13271_v55 = vld [vmem:[#allocation106_spill] sm:$0xff]  ;;  %v13276_v45 = vld [vmem:[#allocation112_spill] sm:$0xff] }
 0x287   :  { %13264 = vst [vmem:[#allocation79_spill] sm:$0xff] %v10305_v49  ;;  %v10325_v22 = vmul.f32 %v13190_v43, %v13271_v55  ;;  %v13272_v49 = vld [vmem:[#allocation101_spill] sm:$0xff]  ;;  %13275 = vst [vmem:[#allocation83_spill] sm:$0xff] %v10337_v54  ;;  %v10341_v17 = vmul.f32 %v13190_v43, %v13276_v45  ;;  %v10345_v55 = vmul.f32 %v13190_v43, %v9905_v18  ;;  %v13279_v54 = vld [vmem:[#allocation107_spill] sm:$0xff] }
 0x288   :  { %13266 = vst [vmem:[#allocation84_spill] sm:$0xff] %v10309_v33  ;;  %v10329_v2 = vmul.f32 %v13190_v43, %v13272_v49  ;;  %v13273_v33 = vld [vmem:[#allocation105_spill] sm:$0xff]  ;;  %v10349_v49 = vmul.f32 %v13190_v43, %v9911_v35  ;;  %v10361_v45 = vmul.f32 %v13190_v43, %v13279_v54  ;;  %v10365_v18 = vmul.f32 %v13190_v43, %v9935_v14 }
 0x289   :  { %v10333_v56 = vmul.f32 %v13190_v43, %v13273_v33  ;;  %v10353_v33 = vmul.f32 %v13190_v43, %v9917_v29  ;;  %v10369_v35 = vmul.f32 %v13190_v43, %v9941_v12  ;;  %v10381_v54 = vmul.f32 %v13190_v43, %v9959_v10 }
 0x28a   :  { %13277 = vst [vmem:[#allocation87_spill] sm:$0xff] %v10349_v49  ;;  %13280 = vst [vmem:[#allocation92_spill] sm:$0xff] %v10361_v45  ;;  %v13281_v49 = vld [vmem:[#allocation111_spill] sm:$0xff]  ;;  %v13284_v45 = vld [vmem:[#allocation118_spill] sm:$0xff]  ;;  %v10389_v12 = vmul.f32 %v13190_v43, %v9971_v60 }
 0x28b   :  { %13278 = vst [vmem:[#allocation89_spill] sm:$0xff] %v10353_v33  ;;  %v10373_v29 = vmul.f32 %v13190_v43, %v13281_v49  ;;  %v13282_v33 = vld [vmem:[#allocation115_spill] sm:$0xff]  ;;  %v10385_v14 = vmul.f32 %v13190_v43, %v13284_v45  ;;  %v10393_v49 = vmul.f32 %v13190_v43, %v9977_v30 }
 0x28c   :  { %v10377_v15 = vmul.f32 %v13190_v43, %v13282_v33  ;;  %v10397_v33 = vmul.f32 %v13190_v43, %v9983_v50 }
 0x28e   :  { %13283 = vst [vmem:[#allocation96_spill] sm:$0xff] %v10377_v15  ;;  %v13285_v15 = vld [vmem:[#allocation45_spill] sm:$0xff] }
 0x28f   :  { %v10401_v10 = vadd.f32 %v13285_v15, %v9987_v53  ;;  %v10405_v45 = vadd.f32 %v13285_v15, %v9991_v58  ;;  %v10409_v60 = vadd.f32 %v13285_v15, %v9995_v3  ;;  %v10413_v30 = vadd.f32 %v13285_v15, %v9999_v24 }
 0x290   :  { %v10417_v50 = vadd.f32 %v13285_v15, %v10003_v38  ;;  %v10421_v53 = vadd.f32 %v13285_v15, %v10007_v57  ;;  %v10425_v43 = vadd.f32 %v13285_v15, %v10011_v0  ;;  %v10429_v58 = vadd.f32 %v13285_v15, %v10015_v40 }
 0x291   :  { %v10433_v3 = vadd.f32 %v13285_v15, %v10019_v52  ;;  %v10437_v24 = vadd.f32 %v13285_v15, %v10023_v63  ;;  %v10441_v38 = vadd.f32 %v13285_v15, %v10027_v4  ;;  %v10445_v57 = vadd.f32 %v13285_v15, %v10031_v13  ;;  %v3255_v4 = vpop.permute.xlu0 %3254 }
 0x292   :  { %v10449_v0 = vadd.f32 %v13285_v15, %v10035_v62  ;;  %v10453_v40 = vadd.f32 %v13285_v15, %v10039_v8  ;;  %v10457_v52 = vadd.f32 %v13285_v15, %v10043_v34  ;;  %v10461_v63 = vadd.f32 %v13285_v15, %v10047_v59  ;;  %v13301_v4 = vld [vmem:[#allocation120_spill] sm:$0xff] }
 0x293   :  { %v10465_v13 = vadd.f32 %v13285_v15, %v10051_v46  ;;  %v10469_v62 = vadd.f32 %v13285_v15, %v10055_v19  ;;  %v10473_v8 = vadd.f32 %v13285_v15, %v10059_v48  ;;  %v10477_v34 = vadd.f32 %v13285_v15, %v10063_v7 }
 0x294   :  { %v10481_v59 = vadd.f32 %v13285_v15, %v10067_v36  ;;  %v10485_v46 = vadd.f32 %v13285_v15, %v10071_v16  ;;  %v10489_v19 = vadd.f32 %v13285_v15, %v10075_v44  ;;  %v10493_v48 = vadd.f32 %v13285_v15, %v10079_v61 }
 0x295   :  { %v10497_v7 = vadd.f32 %v13285_v15, %v10083_v32  ;;  %v10501_v36 = vadd.f32 %v13285_v15, %v10087_v23  ;;  %v10505_v16 = vadd.f32 %v13285_v15, %v10091_v6  ;;  %v10509_v44 = vadd.f32 %v13285_v15, %v10095_v5 }
 0x296   :  { %v10513_v61 = vadd.f32 %v13285_v15, %v10099_v41  ;;  %v10517_v32 = vadd.f32 %v13285_v15, %v10103_v51  ;;  %v10521_v23 = vadd.f32 %v13285_v15, %v10107_v20  ;;  %v10525_v6 = vadd.f32 %v13285_v15, %v10111_v26 }
 0x297   :  { %13286 = vst [vmem:[#allocation100_spill] sm:$0xff] %v10501_v36  ;;  %13287 = vst [vmem:[#allocation95_spill] sm:$0xff] %v10505_v16  ;;  %v10529_v5 = vadd.f32 %v13285_v15, %v10115_v21  ;;  %v10533_v41 = vadd.f32 %v13285_v15, %v10119_v28  ;;  %v10537_v51 = vadd.f32 %v13285_v15, %v10123_v47 }
 0x298   :  { %13288 = vst [vmem:[#allocation97_spill] sm:$0xff] %v10509_v44  ;;  %13289 = vst [vmem:[#allocation102_spill] sm:$0xff] %v10513_v61  ;;  %v10541_v20 = vadd.f32 %v13285_v15, %v10127_v31  ;;  %v10545_v26 = vadd.f32 %v13285_v15, %v10131_v1  ;;  %v10549_v21 = vadd.f32 %v13285_v15, %v10135_v11 }
 0x299   :  { %13290 = vst [vmem:[#allocation106_spill] sm:$0xff] %v10517_v32  ;;  %13291 = vst [vmem:[#allocation101_spill] sm:$0xff] %v10521_v23  ;;  %v10553_v28 = vadd.f32 %v13285_v15, %v10139_v25  ;;  %v10557_v47 = vadd.f32 %v13285_v15, %v10143_v9  ;;  %v10561_v31 = vadd.f32 %v13285_v15, %v13301_v4 }
 0x29a   :  { %13292 = vst [vmem:[#allocation105_spill] sm:$0xff] %v10525_v6  ;;  %13293 = vst [vmem:[#allocation110_spill] sm:$0xff] %v10529_v5  ;;  %v3270_v6 = vpop.permute.xlu0 %3269 }
 0x29b   :  { %13294 = vst [vmem:[#allocation112_spill] sm:$0xff] %v10533_v41  ;;  %13295 = vst [vmem:[#allocation107_spill] sm:$0xff] %v10537_v51  ;;  %v13452_v6 = vmax.f32 %v10409_v60, 0.0  ;;  %v13462_v60 = vmax.f32 %v10429_v58, 0.0  ;;  %v13470_v58 = vmax.f32 %v10445_v57, 0.0  ;;  %v13476_v57 = vmax.f32 %v10457_v52, 0.0 }
 0x29c   :  { %13296 = vst [vmem:[#allocation111_spill] sm:$0xff] %v10541_v20  ;;  %13297 = vst [vmem:[#allocation115_spill] sm:$0xff] %v10545_v26  ;;  %v13303_v20 = vld [vmem:[#allocation126_spill] sm:$0xff]  ;;  %v13305_v26 = vld [vmem:[#allocation123_spill] sm:$0xff]  ;;  %v13482_v52 = vmax.f32 %v10469_v62, 0.0 }
 0x29d   :  { %13298 = vst [vmem:[#allocation118_spill] sm:$0xff] %v10549_v21  ;;  %13299 = vst [vmem:[#allocation45_spill] sm:$0xff] %v10553_v28  ;;  %v10565_v1 = vadd.f32 %v13285_v15, %v13303_v20  ;;  %v10569_v11 = vadd.f32 %v13285_v15, %v13305_v26  ;;  %v13307_v21 = vld [vmem:[#allocation130_spill] sm:$0xff]  ;;  %v13309_v28 = vld [vmem:[#allocation129_spill] sm:$0xff] }
 0x29e   :  { %13300 = vst [vmem:[#allocation164_spill] sm:$0xff] %v10557_v47  ;;  %13302 = vst [vmem:[#allocation120_spill] sm:$0xff] %v10561_v31  ;;  %v10573_v25 = vadd.f32 %v13285_v15, %v13307_v21  ;;  %v10577_v9 = vadd.f32 %v13285_v15, %v13309_v28  ;;  %v13311_v47 = vld [vmem:[#allocation142_spill] sm:$0xff]  ;;  %v13313_v31 = vld [vmem:[#allocation141_spill] sm:$0xff] }
 0x29f   :  { %13304 = vst [vmem:[#allocation126_spill] sm:$0xff] %v10565_v1  ;;  %13306 = vst [vmem:[#allocation123_spill] sm:$0xff] %v10569_v11  ;;  %v10581_v4 = vadd.f32 %v13285_v15, %v13311_v47  ;;  %v10585_v20 = vadd.f32 %v13285_v15, %v13313_v31  ;;  %v13315_v1 = vld [vmem:[#allocation152_spill] sm:$0xff] }
 0x2a0   :  { %13308 = vst [vmem:[#allocation130_spill] sm:$0xff] %v10573_v25  ;;  %13310 = vst [vmem:[#allocation129_spill] sm:$0xff] %v10577_v9  ;;  %v10589_v26 = vadd.f32 %v13285_v15, %v13315_v1  ;;  %v13317_v11 = vld [vmem:[#allocation48_spill] sm:$0xff]  ;;  %v13321_v9 = vld [vmem:[#allocation51_spill] sm:$0xff] }
 0x2a1   :  { %13312 = vst [vmem:[#allocation142_spill] sm:$0xff] %v10581_v4  ;;  %13314 = vst [vmem:[#allocation141_spill] sm:$0xff] %v10585_v20  ;;  %v10593_v21 = vadd.f32 %v13285_v15, %v13317_v11  ;;  %v13319_v25 = vld [vmem:[#allocation52_spill] sm:$0xff]  ;;  %v10601_v47 = vadd.f32 %v13285_v15, %v13321_v9  ;;  %v13323_v4 = vld [vmem:[#allocation119_spill] sm:$0xff] }
 0x2a2   :  { %13316 = vst [vmem:[#allocation152_spill] sm:$0xff] %v10589_v26  ;;  %v10597_v28 = vadd.f32 %v13285_v15, %v13319_v25  ;;  %v10605_v31 = vadd.f32 %v13285_v15, %v13323_v4  ;;  %v13325_v20 = vld [vmem:[#allocation134_spill] sm:$0xff]  ;;  %v13327_v26 = vld [vmem:[#allocation133_spill] sm:$0xff]  ;;  %v13489_v62 = vld [vmem:[#allocation28_spill] sm:$0xff] }
 0x2a3   :  { %13318 = vst [vmem:[#allocation48_spill] sm:$0xff] %v10593_v21  ;;  %13322 = vst [vmem:[#allocation51_spill] sm:$0xff] %v10601_v47  ;;  %v10609_v1 = vadd.f32 %v13285_v15, %v13325_v20  ;;  %v10613_v11 = vadd.f32 %v13285_v15, %v13327_v26  ;;  %v13329_v21 = vld [vmem:[#allocation146_spill] sm:$0xff]  ;;  %v13333_v47 = vld [vmem:[#allocation149_spill] sm:$0xff] }
 0x2a4   :  { %13320 = vst [vmem:[#allocation52_spill] sm:$0xff] %v10597_v28  ;;  %13324 = vst [vmem:[#allocation119_spill] sm:$0xff] %v10605_v31  ;;  %v10617_v25 = vadd.f32 %v13285_v15, %v13329_v21  ;;  %v13331_v28 = vld [vmem:[#allocation145_spill] sm:$0xff]  ;;  %v10625_v4 = vadd.f32 %v13285_v15, %v13333_v47  ;;  %v13335_v31 = vld [vmem:[#allocation155_spill] sm:$0xff] }
 0x2a5   :  { %13326 = vst [vmem:[#allocation134_spill] sm:$0xff] %v10609_v1  ;;  %13328 = vst [vmem:[#allocation133_spill] sm:$0xff] %v10613_v11  ;;  %v10621_v9 = vadd.f32 %v13285_v15, %v13331_v28  ;;  %v10629_v20 = vadd.f32 %v13285_v15, %v13335_v31  ;;  %v13337_v1 = vld [vmem:[#allocation56_spill] sm:$0xff]  ;;  %v13339_v11 = vld [vmem:[#allocation55_spill] sm:$0xff] }
 0x2a6   :  { %13330 = vst [vmem:[#allocation146_spill] sm:$0xff] %v10617_v25  ;;  %13334 = vst [vmem:[#allocation149_spill] sm:$0xff] %v10625_v4  ;;  %v10633_v26 = vadd.f32 %v13285_v15, %v13337_v1  ;;  %v10637_v21 = vadd.f32 %v13285_v15, %v13339_v11  ;;  %v13341_v25 = vld [vmem:[#allocation58_spill] sm:$0xff]  ;;  %v13345_v4 = vld [vmem:[#allocation60_spill] sm:$0xff] }
 0x2a7   :  { %13332 = vst [vmem:[#allocation145_spill] sm:$0xff] %v10621_v9  ;;  %13336 = vst [vmem:[#allocation155_spill] sm:$0xff] %v10629_v20  ;;  %v10641_v28 = vadd.f32 %v13285_v15, %v13341_v25  ;;  %v13343_v9 = vld [vmem:[#allocation57_spill] sm:$0xff]  ;;  %v10649_v31 = vadd.f32 %v13285_v15, %v13345_v4  ;;  %v13347_v20 = vld [vmem:[#allocation59_spill] sm:$0xff] }
 0x2a8   :  { %13338 = vst [vmem:[#allocation56_spill] sm:$0xff] %v10633_v26  ;;  %13340 = vst [vmem:[#allocation55_spill] sm:$0xff] %v10637_v21  ;;  %v10645_v47 = vadd.f32 %v13285_v15, %v13343_v9  ;;  %v10653_v1 = vadd.f32 %v13285_v15, %v13347_v20  ;;  %v13349_v26 = vld [vmem:[#allocation64_spill] sm:$0xff]  ;;  %v13351_v21 = vld [vmem:[#allocation62_spill] sm:$0xff] }
 0x2a9   :  { %13342 = vst [vmem:[#allocation58_spill] sm:$0xff] %v10641_v28  ;;  %13346 = vst [vmem:[#allocation60_spill] sm:$0xff] %v10649_v31  ;;  %v10657_v11 = vadd.f32 %v13285_v15, %v13349_v26  ;;  %v10661_v25 = vadd.f32 %v13285_v15, %v13351_v21  ;;  %v13353_v28 = vld [vmem:[#allocation67_spill] sm:$0xff]  ;;  %v13357_v31 = vld [vmem:[#allocation66_spill] sm:$0xff] }
 0x2aa   :  { %13344 = vst [vmem:[#allocation57_spill] sm:$0xff] %v10645_v47  ;;  %13348 = vst [vmem:[#allocation59_spill] sm:$0xff] %v10653_v1  ;;  %v10665_v9 = vadd.f32 %v13285_v15, %v13353_v28  ;;  %v13355_v47 = vld [vmem:[#allocation70_spill] sm:$0xff]  ;;  %v10673_v20 = vadd.f32 %v13285_v15, %v13357_v31  ;;  %v13359_v1 = vld [vmem:[#allocation68_spill] sm:$0xff] }
 0x2ab   :  { %13350 = vst [vmem:[#allocation64_spill] sm:$0xff] %v10657_v11  ;;  %13352 = vst [vmem:[#allocation62_spill] sm:$0xff] %v10661_v25  ;;  %v10669_v4 = vadd.f32 %v13285_v15, %v13355_v47  ;;  %v10677_v26 = vadd.f32 %v13285_v15, %v13359_v1  ;;  %v13361_v11 = vld [vmem:[#allocation72_spill] sm:$0xff]  ;;  %v13363_v25 = vld [vmem:[#allocation75_spill] sm:$0xff] }
 0x2ac   :  { %13354 = vst [vmem:[#allocation67_spill] sm:$0xff] %v10665_v9  ;;  %13358 = vst [vmem:[#allocation66_spill] sm:$0xff] %v10673_v20  ;;  %v10681_v21 = vadd.f32 %v13285_v15, %v13361_v11  ;;  %v10685_v28 = vadd.f32 %v13285_v15, %v13363_v25  ;;  %v13365_v9 = vld [vmem:[#allocation71_spill] sm:$0xff]  ;;  %v13369_v20 = vld [vmem:[#allocation78_spill] sm:$0xff]  ;;  %v10701_v11 = vadd.f32 %v13285_v15, %v10293_v37 }
 0x2ad   :  { %13356 = vst [vmem:[#allocation70_spill] sm:$0xff] %v10669_v4  ;;  %13360 = vst [vmem:[#allocation68_spill] sm:$0xff] %v10677_v26  ;;  %v10689_v47 = vadd.f32 %v13285_v15, %v13365_v9  ;;  %v13367_v4 = vld [vmem:[#allocation74_spill] sm:$0xff]  ;;  %v10697_v1 = vadd.f32 %v13285_v15, %v13369_v20  ;;  %v10721_v37 = vadd.f32 %v13285_v15, %v10313_v39 }
 0x2ae   :  { %13362 = vst [vmem:[#allocation72_spill] sm:$0xff] %v10681_v21  ;;  %13364 = vst [vmem:[#allocation75_spill] sm:$0xff] %v10685_v28  ;;  %v10693_v31 = vadd.f32 %v13285_v15, %v13367_v4  ;;  %v13371_v21 = vld [vmem:[#allocation82_spill] sm:$0xff]  ;;  %v13372_v28 = vld [vmem:[#allocation77_spill] sm:$0xff]  ;;  %v10741_v39 = vadd.f32 %v13285_v15, %v10333_v56 }
 0x2af   :  { %13366 = vst [vmem:[#allocation71_spill] sm:$0xff] %v10689_v47  ;;  %13370 = vst [vmem:[#allocation78_spill] sm:$0xff] %v10701_v11  ;;  %v10705_v25 = vadd.f32 %v13285_v15, %v13371_v21  ;;  %v10709_v9 = vadd.f32 %v13285_v15, %v13372_v28  ;;  %v13373_v47 = vld [vmem:[#allocation79_spill] sm:$0xff]  ;;  %v13377_v11 = vld [vmem:[#allocation88_spill] sm:$0xff]  ;;  %v10729_v28 = vadd.f32 %v13285_v15, %v10321_v42 }
 0x2b0   :  { %13368 = vst [vmem:[#allocation74_spill] sm:$0xff] %v10693_v31  ;;  %v10713_v4 = vadd.f32 %v13285_v15, %v13373_v47  ;;  %v13374_v31 = vld [vmem:[#allocation84_spill] sm:$0xff]  ;;  %13376 = vst [vmem:[#allocation77_spill] sm:$0xff] %v10721_v37  ;;  %v10725_v21 = vadd.f32 %v13285_v15, %v13377_v11  ;;  %v10733_v47 = vadd.f32 %v13285_v15, %v10325_v22  ;;  %v13381_v37 = vld [vmem:[#allocation83_spill] sm:$0xff] }
 0x2b1   :  { %v10717_v20 = vadd.f32 %v13285_v15, %v13374_v31  ;;  %v10737_v31 = vadd.f32 %v13285_v15, %v10329_v2  ;;  %13380 = vst [vmem:[#allocation88_spill] sm:$0xff] %v10741_v39  ;;  %v10745_v11 = vadd.f32 %v13285_v15, %v13381_v37  ;;  %v10749_v42 = vadd.f32 %v13285_v15, %v10341_v17  ;;  %v13422_v36 = vld [vmem:[#allocation56_spill] sm:$0xff]  ;;  %v13427_v23 = vld [vmem:[#allocation59_spill] sm:$0xff] }
 0x2b2   :  { %13378 = vst [vmem:[#allocation79_spill] sm:$0xff] %v10733_v47  ;;  %v10753_v22 = vadd.f32 %v13285_v15, %v10345_v55  ;;  %v13385_v47 = vld [vmem:[#allocation87_spill] sm:$0xff]  ;;  %v10765_v37 = vadd.f32 %v13285_v15, %v10357_v27  ;;  %v10773_v55 = vadd.f32 %v13285_v15, %v10365_v18  ;;  %v10793_v18 = vadd.f32 %v13285_v15, %v10385_v14  ;;  %v13429_v5 = vld [vmem:[#allocation62_spill] sm:$0xff] }
 0x2b3   :  { %13375 = vst [vmem:[#allocation82_spill] sm:$0xff] %v10717_v20  ;;  %13379 = vst [vmem:[#allocation84_spill] sm:$0xff] %v10737_v31  ;;  %v10757_v2 = vadd.f32 %v13285_v15, %v13385_v47  ;;  %v13387_v31 = vld [vmem:[#allocation89_spill] sm:$0xff]  ;;  %v10777_v47 = vadd.f32 %v13285_v15, %v10369_v35  ;;  %v10797_v35 = vadd.f32 %v13285_v15, %v10389_v12  ;;  %v13430_v41 = vld [vmem:[#allocation67_spill] sm:$0xff]  ;;  %v13448_v14 = vmax.f32 %v10401_v10, 0.0 }
 0x2b4   :  { %13382 = vst [vmem:[#allocation83_spill] sm:$0xff] %v10745_v11  ;;  %13383 = vst [vmem:[#allocation165_spill] sm:$0xff] %v10749_v42  ;;  %v10761_v56 = vadd.f32 %v13285_v15, %v13387_v31  ;;  %v13389_v11 = vld [vmem:[#allocation92_spill] sm:$0xff]  ;;  %v10781_v31 = vadd.f32 %v13285_v15, %v10373_v29  ;;  %v10801_v29 = vadd.f32 %v13285_v15, %v10393_v49  ;;  %v13431_v51 = vld [vmem:[#allocation70_spill] sm:$0xff]  ;;  %v13458_v10 = vmax.f32 %v10421_v53, 0.0 }
 0x2b5   :  { %13384 = vst [vmem:[#allocation166_spill] sm:$0xff] %v10753_v22  ;;  %13386 = vst [vmem:[#allocation87_spill] sm:$0xff] %v10757_v2  ;;  %v10769_v17 = vadd.f32 %v13285_v15, %v13389_v11  ;;  %v10789_v11 = vadd.f32 %v13285_v15, %v10381_v54  ;;  %v13432_v12 = vld [vmem:[#allocation66_spill] sm:$0xff]  ;;  %v13433_v16 = vld [vmem:[#allocation72_spill] sm:$0xff]  ;;  %v13446_v2 = vmov %v10797_v35  ;;  %v13456_v54 = vmax.f32 %v10417_v50, 0.0 }
 0x2b6   :  { %13388 = vst [vmem:[#allocation89_spill] sm:$0xff] %v10761_v56  ;;  %13390 = vst [vmem:[#allocation92_spill] sm:$0xff] %v10773_v55  ;;  %v13392_v56 = vld [vmem:[#allocation96_spill] sm:$0xff]  ;;  %v13434_v44 = vld [vmem:[#allocation75_spill] sm:$0xff]  ;;  %v13466_v50 = vmax.f32 %v10437_v24, 0.0  ;;  %v13474_v24 = vmax.f32 %v10453_v40, 0.0 }
 0x2b7   :  { %13391 = vst [vmem:[#allocation167_spill] sm:$0xff] %v10781_v31  ;;  %v10785_v27 = vadd.f32 %v13285_v15, %v13392_v56  ;;  %13394 = vst [vmem:[#allocation168_spill] sm:$0xff] %v10789_v11  ;;  %v10805_v56 = vadd.f32 %v13285_v15, %v10397_v33  ;;  %v13438_v26 = vld [vmem:[#allocation77_spill] sm:$0xff]  ;;  %v13444_v42 = vmov %v10789_v11  ;;  %v13449_v55 = vld [vmem:[#allocation19_spill] sm:$0xff]  ;;  %v13454_v15 = vmax.f32 %v10413_v30, 0.0 }
 0x2b8   :  { %13395 = vst [vmem:[#allocation169_spill] sm:$0xff] %v10793_v18  ;;  %13396 = vst [vmem:[#allocation170_spill] sm:$0xff] %v10797_v35  ;;  %v3442_v18 = vmul.f32 %v13449_v55, %v13448_v14  ;;  %v13451_v31 = vld [vmem:[#allocation35_spill] sm:$0xff]  ;;  %v13455_v22 = vld [vmem:[#allocation36_spill] sm:$0xff]  ;;  %v13464_v30 = vmax.f32 %v10433_v3, 0.0  ;;  %v13472_v3 = vmax.f32 %v10449_v0, 0.0 }
 0x2b9   :  { %13393 = vst [vmem:[#allocation96_spill] sm:$0xff] %v10785_v27  ;;  %13397 = vst [vmem:[#allocation171_spill] sm:$0xff] %v10801_v29  ;;  %v3260_v27 = vpop.permute.xlu1 %3259  ;;  %v13439_v61 = vld [vmem:[#allocation79_spill] sm:$0xff]  ;;  %v3445_v33 = vmul.f32 %v13455_v22, %v13454_v15  ;;  %v13457_v20 = vld [vmem:[#allocation21_spill] sm:$0xff]  ;;  %v13478_v0 = vmax.f32 %v10461_v63, 0.0  ;;  %v13480_v40 = vmax.f32 %v10465_v13, 0.0 }
 0x2ba   :  { %13398 = vst [vmem:[#allocation172_spill] sm:$0xff] %v10805_v56  ;;  %v13440_v32 = vld [vmem:[#allocation84_spill] sm:$0xff]  ;;  %v13450_v27 = vmax.f32 %v10405_v45, 0.0  ;;  %v3446_v11 = vmul.f32 %v13457_v20, %v13456_v54  ;;  %v13459_v56 = vld [vmem:[#allocation37_spill] sm:$0xff]  ;;  %v13460_v45 = vmax.f32 %v10425_v43, 0.0  ;;  %v13461_v14 = vld [vmem:[#allocation22_spill] sm:$0xff] }
 0x2bb   :  { %v3447_v55 = vmul.f32 %v13459_v56, %v13458_v10  ;;  %3586 = vst.msk [vmem:[#allocation2] sm:$0xff] %vm1109_vm2, %v3442_v18  ;;  %v13467_v53 = vld [vmem:[#allocation39_spill] sm:$0xff]  ;;  %v13468_v43 = vmax.f32 %v10441_v38, 0.0  ;;  %v13469_v56 = vld [vmem:[#allocation24_spill] sm:$0xff]  ;;  %3589 = vst.msk [vmem:[#allocation2 + $0x18] sm:$0xff] %vm1109_vm2, %v3445_v33  ;;  %v13484_v63 = vmax.f32 %v10473_v8, 0.0 }
 0x2bc   :  { %v3443_v35 = vmul.f32 %v13451_v31, %v13450_v27  ;;  %v3448_v31 = vmul.f32 %v13461_v14, %v13460_v45  ;;  %v13463_v27 = vld [vmem:[#allocation38_spill] sm:$0xff]  ;;  %v3451_v20 = vmul.f32 %v13467_v53, %v13466_v50  ;;  %v13471_v15 = vld [vmem:[#allocation40_spill] sm:$0xff]  ;;  %v13473_v45 = vld [vmem:[#allocation25_spill] sm:$0xff]  ;;  %3590 = vst.msk [vmem:[#allocation2 + $0x20] sm:$0xff] %vm1109_vm2, %v3446_v11  ;;  %v3290_v11 = vpop.permute.xlu0 %3289  ;;  %v13488_v13 = vmax.f32 %v10481_v59, 0.0 }
 0x2bd   :  { %v3280_v49 = vpop.permute.xlu1 %3279  ;;  %v3452_v54 = vmul.f32 %v13469_v56, %v13468_v43  ;;  %v3453_v10 = vmul.f32 %v13471_v15, %v13470_v58  ;;  %v3454_v14 = vmul.f32 %v13473_v45, %v13472_v3  ;;  %3591 = vst.msk [vmem:[#allocation2 + $0x28] sm:$0xff] %vm1109_vm2, %v3447_v55  ;;  %v13475_v38 = vld [vmem:[#allocation43_spill] sm:$0xff]  ;;  %v13481_v33 = vld [vmem:[#allocation154_spill] sm:$0xff]  ;;  %v13490_v8 = vmax.f32 %v10485_v46, 0.0  ;;  %v13493_v3 = vld [vmem:[#allocation29_spill] sm:$0xff] }
 0x2be   :  { %v13453_v49 = vld [vmem:[#allocation20_spill] sm:$0xff]  ;;  %3587 = vst.msk [vmem:[#allocation2 + $0x8] sm:$0xff] %vm1109_vm2, %v3443_v35  ;;  %v3455_v18 = vmul.f32 %v13475_v38, %v13474_v24  ;;  %v13477_v35 = vld [vmem:[#allocation26_spill] sm:$0xff]  ;;  %3592 = vst.msk [vmem:[#allocation2 + $0x30] sm:$0xff] %vm1109_vm2, %v3448_v31  ;;  %v3458_v55 = vmul.f32 %v13481_v33, %v13480_v40  ;;  %v13486_v31 = vmax.f32 %v10477_v34, 0.0  ;;  %v13492_v34 = vmax.f32 %v10489_v19, 0.0 }
 0x2bf   :  { %v3444_v29 = vmul.f32 %v13453_v49, %v13452_v6  ;;  %v3449_v6 = vmul.f32 %v13463_v27, %v13462_v60  ;;  %v13465_v49 = vld [vmem:[#allocation23_spill] sm:$0xff]  ;;  %v3456_v60 = vmul.f32 %v13477_v35, %v13476_v57  ;;  %v13479_v27 = vld [vmem:[#allocation44_spill] sm:$0xff]  ;;  %v13487_v56 = vld [vmem:[#allocation46_spill] sm:$0xff]  ;;  %3595 = vst.msk [vmem:[#allocation2 + $0x48] sm:$0xff] %vm1109_vm2, %v3451_v20  ;;  %v13494_v20 = vmax.f32 %v10493_v48, 0.0 }
 0x2c0   :  { %v13443_v39 = vld [vmem:[#allocation96_spill] sm:$0xff]  ;;  %v3450_v22 = vmul.f32 %v13465_v49, %v13464_v30  ;;  %v3457_v30 = vmul.f32 %v13479_v27, %v13478_v0  ;;  %v13483_v49 = vld [vmem:[#allocation159_spill] sm:$0xff]  ;;  %3596 = vst.msk [vmem:[#allocation2 + $0x50] sm:$0xff] %vm1109_vm2, %v3452_v54  ;;  %3597 = vst.msk [vmem:[#allocation2 + $0x58] sm:$0xff] %vm1109_vm2, %v3453_v10  ;;  %v3464_v45 = vmul.f32 %v13493_v3, %v13492_v34  ;;  %v13496_v10 = vmax.f32 %v10497_v7, 0.0 }
 0x2c1   :  { %3588 = vst.msk [vmem:[#allocation2 + $0x10] sm:$0xff] %vm1109_vm2, %v3444_v29  ;;  %3593 = vst.msk [vmem:[#allocation2 + $0x38] sm:$0xff] %vm1109_vm2, %v3449_v6  ;;  %v3300_v29 = vpop.permute.xlu1 %3299  ;;  %v3459_v50 = vmul.f32 %v13483_v49, %v13482_v52  ;;  %v13485_v53 = vld [vmem:[#allocation27_spill] sm:$0xff]  ;;  %v3461_v6 = vmul.f32 %v13487_v56, %v13486_v31  ;;  %v13495_v54 = vld [vmem:[#allocation49_spill] sm:$0xff] }
 0x2c2   :  { %3594 = vst.msk [vmem:[#allocation2 + $0x40] sm:$0xff] %vm1109_vm2, %v3450_v22  ;;  %v3460_v43 = vmul.f32 %v13485_v53, %v13484_v63  ;;  %3598 = vst.msk [vmem:[#allocation2 + $0x60] sm:$0xff] %vm1109_vm2, %v3454_v14  ;;  %v3462_v22 = vmul.f32 %v13489_v62, %v13488_v13  ;;  %v13491_v58 = vld [vmem:[#allocation47_spill] sm:$0xff]  ;;  %v3465_v59 = vmul.f32 %v13495_v54, %v13494_v20  ;;  %v13497_v14 = vld [vmem:[#allocation30_spill] sm:$0xff] }
 0x2c3   :  { %v3463_v15 = vmul.f32 %v13491_v58, %v13490_v8  ;;  %3599 = vst.msk [vmem:[#allocation2 + $0x68] sm:$0xff] %vm1109_vm2, %v3455_v18  ;;  %3600 = vst.msk [vmem:[#allocation2 + $0x70] sm:$0xff] %vm1109_vm2, %v3456_v60  ;;  %v3466_v46 = vmul.f32 %v13497_v14, %v13496_v10  ;;  %v13498_v24 = vld [vmem:[#allocation100_spill] sm:$0xff]  ;;  %v13500_v57 = vld [vmem:[#allocation50_spill] sm:$0xff] }
 0x2c4   :  { %3601 = vst.msk [vmem:[#allocation2 + $0x78] sm:$0xff] %vm1109_vm2, %v3457_v30  ;;  %v13499_v38 = vmax.f32 %v13498_v24, 0.0  ;;  %v13501_v35 = vld [vmem:[#allocation95_spill] sm:$0xff]  ;;  %3602 = vst.msk [vmem:[#allocation2 + $0x80] sm:$0xff] %vm1109_vm2, %v3458_v55  ;;  %v13504_v48 = vld [vmem:[#allocation97_spill] sm:$0xff] }
 0x2c5   :  { %v13502_v0 = vmax.f32 %v13501_v35, 0.0  ;;  %v13503_v27 = vld [vmem:[#allocation31_spill] sm:$0xff]  ;;  %3603 = vst.msk [vmem:[#allocation2 + $0x88] sm:$0xff] %vm1109_vm2, %v3459_v50  ;;  %3604 = vst.msk [vmem:[#allocation2 + $0x90] sm:$0xff] %vm1109_vm2, %v3460_v43  ;;  %v13505_v7 = vmax.f32 %v13504_v48, 0.0  ;;  %v13506_v60 = vld [vmem:[#allocation53_spill] sm:$0xff] }
 0x2c6   :  { %v3467_v19 = vmul.f32 %v13500_v57, %v13499_v38  ;;  %3605 = vst.msk [vmem:[#allocation2 + $0x98] sm:$0xff] %vm1109_vm2, %v3461_v6  ;;  %v13507_v11 = vld [vmem:[#allocation102_spill] sm:$0xff]  ;;  %v13509_v40 = vld [vmem:[#allocation32_spill] sm:$0xff]  ;;  %v13513_v31 = vld [vmem:[#allocation101_spill] sm:$0xff] }
 0x2c7   :  { %v3468_v18 = vmul.f32 %v13503_v27, %v13502_v0  ;;  %v3469_v30 = vmul.f32 %v13506_v60, %v13505_v7  ;;  %v13508_v29 = vmax.f32 %v13507_v11, 0.0  ;;  %v13510_v52 = vld [vmem:[#allocation106_spill] sm:$0xff]  ;;  %v13514_v55 = vmax.f32 %v13513_v31, 0.0  ;;  %v13515_v56 = vld [vmem:[#allocation33_spill] sm:$0xff]  ;;  %3606 = vst.msk [vmem:[#allocation2 + $0xa0] sm:$0xff] %vm1109_vm2, %v3462_v22  ;;  %3607 = vst.msk [vmem:[#allocation2 + $0xa8] sm:$0xff] %vm1109_vm2, %v3463_v15 }
 0x2c8   :  { %v13511_v49 = vmax.f32 %v13510_v52, 0.0  ;;  %v13512_v63 = vld [vmem:[#allocation54_spill] sm:$0xff]  ;;  %3608 = vst.msk [vmem:[#allocation2 + $0xb0] sm:$0xff] %vm1109_vm2, %v3464_v45  ;;  %v13516_v43 = vld [vmem:[#allocation105_spill] sm:$0xff]  ;;  %v13522_v20 = vld [vmem:[#allocation112_spill] sm:$0xff] }
 0x2c9   :  { %v3470_v33 = vmul.f32 %v13509_v40, %v13508_v29  ;;  %v3472_v50 = vmul.f32 %v13515_v56, %v13514_v55  ;;  %v13517_v6 = vmax.f32 %v13516_v43, 0.0  ;;  %v13518_v13 = vld [vmem:[#allocation61_spill] sm:$0xff]  ;;  %v13519_v8 = vld [vmem:[#allocation110_spill] sm:$0xff]  ;;  %v13523_v54 = vmax.f32 %v13522_v20, 0.0  ;;  %v13524_v10 = vld [vmem:[#allocation80_spill] sm:$0xff]  ;;  %3609 = vst.msk [vmem:[#allocation2 + $0xb8] sm:$0xff] %vm1109_vm2, %v3465_v59  ;;  %v3310_v59 = vpop.permute.xlu0 %3309 }
 0x2ca   :  { %v3471_v53 = vmul.f32 %v13512_v63, %v13511_v49  ;;  %v13520_v58 = vmax.f32 %v13519_v8, 0.0  ;;  %v13521_v34 = vld [vmem:[#allocation34_spill] sm:$0xff]  ;;  %v13525_v24 = vld [vmem:[#allocation107_spill] sm:$0xff]  ;;  %3610 = vst.msk [vmem:[#allocation2 + $0xc0] sm:$0xff] %vm1109_vm2, %v3466_v46  ;;  %3611 = vst.msk [vmem:[#allocation2 + $0xc8] sm:$0xff] %vm1109_vm2, %v3467_v19  ;;  %v3320_v46 = vpop.permute.xlu1 %3319 }
 0x2cb   :  { %v3473_v62 = vmul.f32 %v13518_v13, %v13517_v6  ;;  %v3475_v14 = vmul.f32 %v13524_v10, %v13523_v54  ;;  %v13526_v38 = vmax.f32 %v13525_v24, 0.0  ;;  %v13527_v57 = vld [vmem:[#allocation163_spill] sm:$0xff]  ;;  %3612 = vst.msk [vmem:[#allocation2 + $0xd0] sm:$0xff] %vm1109_vm2, %v3468_v18  ;;  %v13530_v35 = vld [vmem:[#allocation41_spill] sm:$0xff]  ;;  %v13534_v11 = vld [vmem:[#allocation118_spill] sm:$0xff] }
 0x2cc   :  { %v3474_v3 = vmul.f32 %v13521_v34, %v13520_v58  ;;  %v13528_v15 = vld [vmem:[#allocation111_spill] sm:$0xff]  ;;  %v13535_v29 = vmax.f32 %v13534_v11, 0.0  ;;  %v13536_v40 = vld [vmem:[#allocation5_spill] sm:$0xff]  ;;  %3613 = vst.msk [vmem:[#allocation2 + $0xd8] sm:$0xff] %vm1109_vm2, %v3469_v30  ;;  %3614 = vst.msk [vmem:[#allocation2 + $0xe0] sm:$0xff] %vm1109_vm2, %v3470_v33 }
 0x2cd   :  { %v3476_v22 = vmul.f32 %v13527_v57, %v13526_v38  ;;  %v13529_v45 = vmax.f32 %v13528_v15, 0.0  ;;  %v13531_v27 = vld [vmem:[#allocation115_spill] sm:$0xff]  ;;  %3615 = vst.msk [vmem:[#allocation2 + $0xe8] sm:$0xff] %vm1109_vm2, %v3471_v53  ;;  %3616 = vst.msk [vmem:[#allocation2 + $0xf0] sm:$0xff] %vm1109_vm2, %v3472_v50  ;;  %v13537_v19 = vld [vmem:[#allocation45_spill] sm:$0xff] }
 0x2ce   :  { %v13532_v48 = vmax.f32 %v13531_v27, 0.0  ;;  %v13533_v7 = vld [vmem:[#allocation3_spill] sm:$0xff]  ;;  %v3480_v52 = vmul.f32 %v13536_v40, %v13535_v29  ;;  %v13538_v18 = vmax.f32 %v13537_v19, 0.0  ;;  %v13539_v49 = vld [vmem:[#allocation4_spill] sm:$0xff]  ;;  %v13542_v56 = vld [vmem:[#allocation6_spill] sm:$0xff]  ;;  %3617 = vst.msk [vmem:[#allocation2 + $0xf8] sm:$0xff] %vm1109_vm2, %v3473_v62 }
 0x2cf   :  { %v3477_v0 = vmul.f32 %v13530_v35, %v13529_v45  ;;  %v13540_v31 = vld [vmem:[#allocation164_spill] sm:$0xff]  ;;  %3618 = vst.msk [vmem:[#allocation2 + $0x100] sm:$0xff] %vm1109_vm2, %v3474_v3  ;;  %3619 = vst.msk [vmem:[#allocation2 + $0x108] sm:$0xff] %vm1109_vm2, %v3475_v14  ;;  %v13545_v53 = vld [vmem:[#allocation7_spill] sm:$0xff] }
 0x2d0   :  { %v3478_v60 = vmul.f32 %v13533_v7, %v13532_v48  ;;  %v3482_v63 = vmul.f32 %v13539_v49, %v13538_v18  ;;  %v13541_v55 = vmax.f32 %v13540_v31, 0.0  ;;  %3620 = vst.msk [vmem:[#allocation2 + $0x110] sm:$0xff] %vm1109_vm2, %v3476_v22  ;;  %v13543_v30 = vld [vmem:[#allocation120_spill] sm:$0xff]  ;;  %v13546_v6 = vld [vmem:[#allocation126_spill] sm:$0xff]  ;;  %3624 = vst.msk [vmem:[#allocation2 + $0x130] sm:$0xff] %vm1109_vm2, %v3480_v52 }
 0x2d1   :  { %v13544_v33 = vmax.f32 %v13543_v30, 0.0  ;;  %v13547_v13 = vmax.f32 %v13546_v6, 0.0  ;;  %v13548_v8 = vld [vmem:[#allocation8_spill] sm:$0xff]  ;;  %3621 = vst.msk [vmem:[#allocation2 + $0x118] sm:$0xff] %vm1109_vm2, %v3477_v0  ;;  %v13549_v62 = vld [vmem:[#allocation123_spill] sm:$0xff]  ;;  %v13551_v3 = vld [vmem:[#allocation9_spill] sm:$0xff]  ;;  %v3340_v30 = vpop.permute.xlu1 %3339 }
 0x2d2   :  { %v3484_v43 = vmul.f32 %v13542_v56, %v13541_v55  ;;  %3622 = vst.msk [vmem:[#allocation2 + $0x120] sm:$0xff] %vm1109_vm2, %v3478_v60  ;;  %v13550_v34 = vmax.f32 %v13549_v62, 0.0  ;;  %v13552_v54 = vld [vmem:[#allocation130_spill] sm:$0xff]  ;;  %3626 = vst.msk [vmem:[#allocation2 + $0x140] sm:$0xff] %vm1109_vm2, %v3482_v63  ;;  %v13555_v38 = vld [vmem:[#allocation129_spill] sm:$0xff] }
 0x2d3   :  { %v3486_v50 = vmul.f32 %v13545_v53, %v13544_v33  ;;  %v3488_v58 = vmul.f32 %v13548_v8, %v13547_v13  ;;  %v13553_v10 = vmax.f32 %v13552_v54, 0.0  ;;  %v13554_v14 = vld [vmem:[#allocation10_spill] sm:$0xff]  ;;  %v13556_v57 = vmax.f32 %v13555_v38, 0.0  ;;  %v13557_v22 = vld [vmem:[#allocation157_spill] sm:$0xff]  ;;  %v13560_v0 = vld [vmem:[#allocation11_spill] sm:$0xff] }
 0x2d4   :  { %v3490_v20 = vmul.f32 %v13551_v3, %v13550_v34  ;;  %3628 = vst.msk [vmem:[#allocation2 + $0x150] sm:$0xff] %vm1109_vm2, %v3484_v43  ;;  %v13558_v45 = vld [vmem:[#allocation142_spill] sm:$0xff]  ;;  %v13561_v48 = vld [vmem:[#allocation141_spill] sm:$0xff]  ;;  %v13563_v60 = vld [vmem:[#allocation12_spill] sm:$0xff]  ;;  %v3330_v43 = vpop.permute.xlu0 %3329 }
 0x2d5   :  { %v3492_v24 = vmul.f32 %v13554_v14, %v13553_v10  ;;  %v3494_v15 = vmul.f32 %v13557_v22, %v13556_v57  ;;  %v13559_v35 = vmax.f32 %v13558_v45, 0.0  ;;  %3630 = vst.msk [vmem:[#allocation2 + $0x160] sm:$0xff] %vm1109_vm2, %v3486_v50  ;;  %3632 = vst.msk [vmem:[#allocation2 + $0x170] sm:$0xff] %vm1109_vm2, %v3488_v58  ;;  %v13562_v7 = vmax.f32 %v13561_v48, 0.0  ;;  %v13564_v29 = vld [vmem:[#allocation152_spill] sm:$0xff]  ;;  %v13566_v52 = vld [vmem:[#allocation13_spill] sm:$0xff] }
 0x2d6   :  { %v13565_v40 = vmax.f32 %v13564_v29, 0.0  ;;  %3634 = vst.msk [vmem:[#allocation2 + $0x180] sm:$0xff] %vm1109_vm2, %v3490_v20  ;;  %v13567_v46 = vld [vmem:[#allocation48_spill] sm:$0xff]  ;;  %v13569_v18 = vld [vmem:[#allocation14_spill] sm:$0xff]  ;;  %v13572_v55 = vld [vmem:[#allocation15_spill] sm:$0xff] }
 0x2d7   :  { %v3496_v27 = vmul.f32 %v13560_v0, %v13559_v35  ;;  %v3498_v11 = vmul.f32 %v13563_v60, %v13562_v7  ;;  %3636 = vst.msk [vmem:[#allocation2 + $0x190] sm:$0xff] %vm1109_vm2, %v3492_v24  ;;  %v13568_v19 = vmax.f32 %v13567_v46, 0.0  ;;  %v13570_v63 = vld [vmem:[#allocation52_spill] sm:$0xff]  ;;  %3638 = vst.msk [vmem:[#allocation2 + $0x1a0] sm:$0xff] %vm1109_vm2, %v3494_v15  ;;  %v13573_v33 = vld [vmem:[#allocation51_spill] sm:$0xff] }
 0x2d8   :  { %v3500_v59 = vmul.f32 %v13566_v52, %v13565_v40  ;;  %v13571_v31 = vmax.f32 %v13570_v63, 0.0  ;;  %v13574_v53 = vmax.f32 %v13573_v33, 0.0  ;;  %v13575_v50 = vld [vmem:[#allocation16_spill] sm:$0xff]  ;;  %v13576_v13 = vld [vmem:[#allocation119_spill] sm:$0xff]  ;;  %v13578_v58 = vld [vmem:[#allocation17_spill] sm:$0xff] }
 0x2d9   :  { %v3502_v49 = vmul.f32 %v13569_v18, %v13568_v19  ;;  %3640 = vst.msk [vmem:[#allocation2 + $0x1b0] sm:$0xff] %vm1109_vm2, %v3496_v27  ;;  %v13577_v8 = vmax.f32 %v13576_v13, 0.0  ;;  %3642 = vst.msk [vmem:[#allocation2 + $0x1c0] sm:$0xff] %vm1109_vm2, %v3498_v11  ;;  %v13579_v34 = vld [vmem:[#allocation134_spill] sm:$0xff]  ;;  %v13582_v10 = vld [vmem:[#allocation133_spill] sm:$0xff]  ;;  %v13597_v19 = vmax.f32 %v13422_v36, 0.0 }
 0x2da   :  { %v3504_v56 = vmul.f32 %v13572_v55, %v13571_v31  ;;  %v3506_v6 = vmul.f32 %v13575_v50, %v13574_v53  ;;  %3644 = vst.msk [vmem:[#allocation2 + $0x1d0] sm:$0xff] %vm1109_vm2, %v3500_v59  ;;  %v13580_v3 = vmax.f32 %v13579_v34, 0.0  ;;  %v13581_v20 = vld [vmem:[#allocation18_spill] sm:$0xff]  ;;  %v13583_v14 = vmax.f32 %v13582_v10, 0.0  ;;  %v13587_v15 = vld [vmem:[#allocation63_spill] sm:$0xff]  ;;  %v13588_v35 = vld [vmem:[#allocation145_spill] sm:$0xff] }
 0x2db   :  { %v3508_v62 = vmul.f32 %v13578_v58, %v13577_v8  ;;  %v13584_v24 = vld [vmem:[#allocation42_spill] sm:$0xff]  ;;  %3646 = vst.msk [vmem:[#allocation2 + $0x1e0] sm:$0xff] %vm1109_vm2, %v3502_v49  ;;  %v13589_v0 = vmax.f32 %v13588_v35, 0.0  ;;  %v13590_v27 = vld [vmem:[#allocation128_spill] sm:$0xff]  ;;  %v13591_v7 = vld [vmem:[#allocation149_spill] sm:$0xff]  ;;  %v13618_v35 = vmax.f32 %v13430_v41, 0.0  ;;  %v3350_v41 = vpop.permute.xlu1 %3349 }
 0x2dc   :  { %v3510_v54 = vmul.f32 %v13581_v20, %v13580_v3  ;;  %v3512_v38 = vmul.f32 %v13584_v24, %v13583_v14  ;;  %3648 = vst.msk [vmem:[#allocation2 + $0x1f0] sm:$0xff] %vm1109_vm2, %v3504_v56  ;;  %v13585_v57 = vld [vmem:[#allocation146_spill] sm:$0xff]  ;;  %v13592_v60 = vmax.f32 %v13591_v7, 0.0  ;;  %v13593_v11 = vld [vmem:[#allocation85_spill] sm:$0xff]  ;;  %3650 = vst.msk [vmem:[#allocation2 + $0x200] sm:$0xff] %vm1109_vm2, %v3506_v6  ;;  %v13611_v3 = vmax.f32 %v13427_v23, 0.0 }
 0x2dd   :  { %v13586_v22 = vmax.f32 %v13585_v57, 0.0  ;;  %v3515_v48 = vmul.f32 %v13590_v27, %v13589_v0  ;;  %3652 = vst.msk [vmem:[#allocation2 + $0x210] sm:$0xff] %vm1109_vm2, %v3508_v62  ;;  %v13594_v40 = vld [vmem:[#allocation155_spill] sm:$0xff]  ;;  %v13598_v18 = vld [vmem:[#allocation65_spill] sm:$0xff]  ;;  %v13601_v55 = vld [vmem:[#allocation132_spill] sm:$0xff]  ;;  %v13620_v27 = vmax.f32 %v13431_v51, 0.0 }
 0x2de   :  { %v3516_v29 = vmul.f32 %v13593_v11, %v13592_v60  ;;  %v13595_v52 = vmax.f32 %v13594_v40, 0.0  ;;  %v13596_v59 = vld [vmem:[#allocation147_spill] sm:$0xff]  ;;  %v3518_v49 = vmul.f32 %v13598_v18, %v13597_v19  ;;  %v13602_v43 = vld [vmem:[#allocation58_spill] sm:$0xff]  ;;  %3654 = vst.msk [vmem:[#allocation2 + $0x220] sm:$0xff] %vm1109_vm2, %v3510_v54  ;;  %3656 = vst.msk [vmem:[#allocation2 + $0x230] sm:$0xff] %vm1109_vm2, %v3512_v38  ;;  %v13616_v54 = vmax.f32 %v13429_v5, 0.0  ;;  %v3345_v5 = vpop.permute.xlu0 %3344 }
 0x2df   :  { %v3514_v45 = vmul.f32 %v13587_v15, %v13586_v22  ;;  %v13599_v63 = vld [vmem:[#allocation55_spill] sm:$0xff]  ;;  %v13603_v30 = vmax.f32 %v13602_v43, 0.0  ;;  %v13604_v33 = vld [vmem:[#allocation90_spill] sm:$0xff]  ;;  %v13605_v50 = vld [vmem:[#allocation57_spill] sm:$0xff]  ;;  %3659 = vst.msk [vmem:[#allocation2 + $0x248] sm:$0xff] %vm1109_vm2, %v3515_v48  ;;  %v13622_v11 = vmax.f32 %v13432_v12, 0.0 }
 0x2e0   :  { %v3517_v46 = vmul.f32 %v13596_v59, %v13595_v52  ;;  %v13600_v31 = vmax.f32 %v13599_v63, 0.0  ;;  %v13606_v6 = vmax.f32 %v13605_v50, 0.0  ;;  %v13607_v13 = vld [vmem:[#allocation150_spill] sm:$0xff]  ;;  %v13608_v58 = vld [vmem:[#allocation60_spill] sm:$0xff]  ;;  %v13610_v62 = vld [vmem:[#allocation69_spill] sm:$0xff]  ;;  %3660 = vst.msk [vmem:[#allocation2 + $0x250] sm:$0xff] %vm1109_vm2, %v3516_v29 }
 0x2e1   :  { %v3520_v53 = vmul.f32 %v13604_v33, %v13603_v30  ;;  %v13609_v36 = vmax.f32 %v13608_v58, 0.0  ;;  %v13612_v20 = vld [vmem:[#allocation136_spill] sm:$0xff]  ;;  %v13615_v57 = vld [vmem:[#allocation93_spill] sm:$0xff]  ;;  %3658 = vst.msk [vmem:[#allocation2 + $0x240] sm:$0xff] %vm1109_vm2, %v3514_v45  ;;  %v13621_v7 = vld [vmem:[#allocation138_spill] sm:$0xff]  ;;  %v13627_v59 = vmax.f32 %v13433_v16, 0.0 }
 0x2e2   :  { %v3519_v56 = vmul.f32 %v13601_v55, %v13600_v31  ;;  %v3521_v8 = vmul.f32 %v13607_v13, %v13606_v6  ;;  %v3523_v10 = vmul.f32 %v13612_v20, %v13611_v3  ;;  %v13613_v14 = vld [vmem:[#allocation64_spill] sm:$0xff]  ;;  %v13617_v38 = vld [vmem:[#allocation153_spill] sm:$0xff]  ;;  %v3527_v60 = vmul.f32 %v13621_v7, %v13620_v27  ;;  %v13623_v40 = vld [vmem:[#allocation98_spill] sm:$0xff]  ;;  %3661 = vst.msk [vmem:[#allocation2 + $0x258] sm:$0xff] %vm1109_vm2, %v3517_v46 }
 0x2e3   :  { %v3522_v34 = vmul.f32 %v13610_v62, %v13609_v36  ;;  %v13614_v24 = vmax.f32 %v13613_v14, 0.0  ;;  %v3525_v15 = vmul.f32 %v13617_v38, %v13616_v54  ;;  %v13619_v0 = vld [vmem:[#allocation73_spill] sm:$0xff]  ;;  %v3528_v45 = vmul.f32 %v13623_v40, %v13622_v11  ;;  %3662 = vst.msk [vmem:[#allocation2 + $0x260] sm:$0xff] %vm1109_vm2, %v3518_v49  ;;  %3664 = vst.msk [vmem:[#allocation2 + $0x270] sm:$0xff] %vm1109_vm2, %v3520_v53  ;;  %v13624_v48 = vld [vmem:[#allocation68_spill] sm:$0xff] }
 0x2e4   :  { %v3526_v23 = vmul.f32 %v13619_v0, %v13618_v35  ;;  %3663 = vst.msk [vmem:[#allocation2 + $0x268] sm:$0xff] %vm1109_vm2, %v3519_v56  ;;  %v13625_v29 = vmax.f32 %v13624_v48, 0.0  ;;  %v13626_v52 = vld [vmem:[#allocation156_spill] sm:$0xff]  ;;  %v13629_v18 = vmax.f32 %v13434_v44, 0.0  ;;  %v13631_v31 = vld [vmem:[#allocation71_spill] sm:$0xff]  ;;  %3665 = vst.msk [vmem:[#allocation2 + $0x278] sm:$0xff] %vm1109_vm2, %v3521_v8 }
 0x2e5   :  { %v3524_v22 = vmul.f32 %v13615_v57, %v13614_v24  ;;  %v13628_v19 = vld [vmem:[#allocation76_spill] sm:$0xff]  ;;  %v13632_v49 = vmax.f32 %v13631_v31, 0.0  ;;  %v13633_v55 = vld [vmem:[#allocation103_spill] sm:$0xff]  ;;  %3666 = vst.msk [vmem:[#allocation2 + $0x280] sm:$0xff] %vm1109_vm2, %v3522_v34  ;;  %3667 = vst.msk [vmem:[#allocation2 + $0x288] sm:$0xff] %vm1109_vm2, %v3523_v10  ;;  %v13637_v44 = vmax.f32 %v10697_v1, 0.0 }
 0x2e6   :  { %v3529_v51 = vmul.f32 %v13626_v52, %v13625_v29  ;;  %v3532_v12 = vmul.f32 %v13628_v19, %v13627_v59  ;;  %v13630_v63 = vld [vmem:[#allocation140_spill] sm:$0xff]  ;;  %v13634_v43 = vld [vmem:[#allocation74_spill] sm:$0xff]  ;;  %v13638_v53 = vld [vmem:[#allocation81_spill] sm:$0xff]  ;;  %v13642_v8 = vmax.f32 %v10705_v25, 0.0  ;;  %3669 = vst.msk [vmem:[#allocation2 + $0x298] sm:$0xff] %vm1109_vm2, %v3525_v15  ;;  %v13644_v1 = vmax.f32 %v10709_v9, 0.0 }
 0x2e7   :  { %v3533_v46 = vmul.f32 %v13630_v63, %v13629_v18  ;;  %v3534_v56 = vmul.f32 %v13633_v55, %v13632_v49  ;;  %3668 = vst.msk [vmem:[#allocation2 + $0x290] sm:$0xff] %vm1109_vm2, %v3524_v22  ;;  %v13635_v16 = vmax.f32 %v13634_v43, 0.0  ;;  %v13636_v30 = vld [vmem:[#allocation158_spill] sm:$0xff]  ;;  %v3536_v50 = vmul.f32 %v13638_v53, %v13637_v44  ;;  %v13641_v58 = vld [vmem:[#allocation144_spill] sm:$0xff]  ;;  %3670 = vst.msk [vmem:[#allocation2 + $0x2a0] sm:$0xff] %vm1109_vm2, %v3526_v23 }
 0x2e8   :  { %v13639_v6 = vld [vmem:[#allocation78_spill] sm:$0xff]  ;;  %v13643_v62 = vld [vmem:[#allocation108_spill] sm:$0xff]  ;;  %3671 = vst.msk [vmem:[#allocation2 + $0x2a8] sm:$0xff] %vm1109_vm2, %v3527_v60  ;;  %3672 = vst.msk [vmem:[#allocation2 + $0x2b0] sm:$0xff] %vm1109_vm2, %v3528_v45  ;;  %v13646_v10 = vmax.f32 %v10713_v4, 0.0  ;;  %v13651_v38 = vmax.f32 %v13438_v26, 0.0 }
 0x2e9   :  { %v3535_v33 = vmul.f32 %v13636_v30, %v13635_v16  ;;  %v13640_v13 = vmax.f32 %v13639_v6, 0.0  ;;  %v3538_v34 = vmul.f32 %v13643_v62, %v13642_v8  ;;  %v13645_v3 = vld [vmem:[#allocation160_spill] sm:$0xff]  ;;  %v13647_v14 = vld [vmem:[#allocation86_spill] sm:$0xff]  ;;  %v13652_v15 = vld [vmem:[#allocation113_spill] sm:$0xff]  ;;  %3673 = vst.msk [vmem:[#allocation2 + $0x2b8] sm:$0xff] %vm1109_vm2, %v3529_v51  ;;  %v13653_v9 = vmax.f32 %v10725_v21, 0.0  ;;  %v3360_v8 = vpop.permute.xlu0 %3359  ;;  %v3370_v62 = vpop.permute.xlu1 %3369 }
 0x2ea   :  { %v3539_v20 = vmul.f32 %v13645_v3, %v13644_v1  ;;  %v3540_v24 = vmul.f32 %v13647_v14, %v13646_v10  ;;  %v13648_v57 = vld [vmem:[#allocation82_spill] sm:$0xff]  ;;  %v13650_v22 = vld [vmem:[#allocation148_spill] sm:$0xff]  ;;  %v3542_v35 = vmul.f32 %v13652_v15, %v13651_v38  ;;  %3676 = vst.msk [vmem:[#allocation2 + $0x2d0] sm:$0xff] %vm1109_vm2, %v3532_v12  ;;  %3677 = vst.msk [vmem:[#allocation2 + $0x2d8] sm:$0xff] %vm1109_vm2, %v3533_v46  ;;  %v13655_v23 = vmax.f32 %v10729_v28, 0.0 }
 0x2eb   :  { %v3537_v36 = vmul.f32 %v13641_v58, %v13640_v13  ;;  %v13649_v25 = vmax.f32 %v13648_v57, 0.0  ;;  %3678 = vst.msk [vmem:[#allocation2 + $0x2e0] sm:$0xff] %vm1109_vm2, %v3534_v56  ;;  %v13654_v4 = vld [vmem:[#allocation161_spill] sm:$0xff]  ;;  %v13656_v27 = vld [vmem:[#allocation91_spill] sm:$0xff]  ;;  %v13657_v26 = vmax.f32 %v13439_v61, 0.0  ;;  %v13659_v40 = vmax.f32 %v13440_v32, 0.0 }
 0x2ec   :  { %v3543_v0 = vmul.f32 %v13654_v4, %v13653_v9  ;;  %v3544_v7 = vmul.f32 %v13656_v27, %v13655_v23  ;;  %v13658_v60 = vld [vmem:[#allocation151_spill] sm:$0xff]  ;;  %v13660_v45 = vld [vmem:[#allocation116_spill] sm:$0xff]  ;;  %3679 = vst.msk [vmem:[#allocation2 + $0x2e8] sm:$0xff] %vm1109_vm2, %v3535_v33  ;;  %3680 = vst.msk [vmem:[#allocation2 + $0x2f0] sm:$0xff] %vm1109_vm2, %v3536_v50  ;;  %v13679_v53 = vmax.f32 %v10765_v37, 0.0  ;;  %v13681_v13 = vmax.f32 %v10769_v17, 0.0 }
 0x2ed   :  { %v3541_v54 = vmul.f32 %v13650_v22, %v13649_v25  ;;  %v3545_v11 = vmul.f32 %v13658_v60, %v13657_v26  ;;  %v3546_v5 = vmul.f32 %v13660_v45, %v13659_v40  ;;  %3681 = vst.msk [vmem:[#allocation2 + $0x2f8] sm:$0xff] %vm1109_vm2, %v3537_v36  ;;  %3682 = vst.msk [vmem:[#allocation2 + $0x300] sm:$0xff] %vm1109_vm2, %v3538_v34  ;;  %v13661_v21 = vld [vmem:[#allocation88_spill] sm:$0xff]  ;;  %v13663_v41 = vld [vmem:[#allocation162_spill] sm:$0xff]  ;;  %v13691_v22 = vmax.f32 %v13443_v39, 0.0 }
 0x2ee   :  { %v13662_v28 = vmax.f32 %v13661_v21, 0.0  ;;  %v13664_v29 = vld [vmem:[#allocation83_spill] sm:$0xff]  ;;  %v13666_v52 = vld [vmem:[#allocation94_spill] sm:$0xff]  ;;  %v13667_v59 = vld [vmem:[#allocation165_spill] sm:$0xff]  ;;  %3683 = vst.msk [vmem:[#allocation2 + $0x308] sm:$0xff] %vm1109_vm2, %v3539_v20  ;;  %v13686_v20 = vmax.f32 %v10777_v47, 0.0 }
 0x2ef   :  { %v13665_v61 = vmax.f32 %v13664_v29, 0.0  ;;  %v13668_v32 = vmax.f32 %v13667_v59, 0.0  ;;  %v13669_v19 = vld [vmem:[#allocation121_spill] sm:$0xff]  ;;  %v13670_v18 = vld [vmem:[#allocation166_spill] sm:$0xff]  ;;  %v13672_v46 = vld [vmem:[#allocation99_spill] sm:$0xff]  ;;  %3684 = vst.msk [vmem:[#allocation2 + $0x310] sm:$0xff] %vm1109_vm2, %v3540_v24 }
 0x2f0   :  { %v3547_v48 = vmul.f32 %v13663_v41, %v13662_v28  ;;  %v13671_v63 = vmax.f32 %v13670_v18, 0.0  ;;  %3685 = vst.msk [vmem:[#allocation2 + $0x318] sm:$0xff] %vm1109_vm2, %v3541_v54  ;;  %3686 = vst.msk [vmem:[#allocation2 + $0x320] sm:$0xff] %vm1109_vm2, %v3542_v35  ;;  %v13673_v49 = vld [vmem:[#allocation87_spill] sm:$0xff]  ;;  %v13675_v56 = vld [vmem:[#allocation124_spill] sm:$0xff]  ;;  %v13693_v47 = vmax.f32 %v13444_v42, 0.0  ;;  %v3390_v28 = vpop.permute.xlu1 %3389 }
 0x2f1   :  { %v3550_v51 = vmul.f32 %v13666_v52, %v13665_v61  ;;  %v3552_v12 = vmul.f32 %v13669_v19, %v13668_v32  ;;  %v13674_v55 = vmax.f32 %v13673_v49, 0.0  ;;  %v13676_v16 = vld [vmem:[#allocation89_spill] sm:$0xff]  ;;  %v13678_v33 = vld [vmem:[#allocation104_spill] sm:$0xff]  ;;  %v13680_v50 = vld [vmem:[#allocation127_spill] sm:$0xff]  ;;  %3687 = vst.msk [vmem:[#allocation2 + $0x328] sm:$0xff] %vm1109_vm2, %v3543_v0  ;;  %v13698_v39 = vmax.f32 %v13446_v2, 0.0  ;;  %v3380_v2 = vpop.permute.xlu0 %3379 }
 0x2f2   :  { %v3554_v31 = vmul.f32 %v13672_v46, %v13671_v63  ;;  %v13677_v30 = vmax.f32 %v13676_v16, 0.0  ;;  %v3560_v6 = vmul.f32 %v13680_v50, %v13679_v53  ;;  %v13682_v58 = vld [vmem:[#allocation109_spill] sm:$0xff]  ;;  %3688 = vst.msk [vmem:[#allocation2 + $0x330] sm:$0xff] %vm1109_vm2, %v3544_v7  ;;  %3689 = vst.msk [vmem:[#allocation2 + $0x338] sm:$0xff] %vm1109_vm2, %v3545_v11  ;;  %v13683_v34 = vld [vmem:[#allocation92_spill] sm:$0xff] }
 0x2f3   :  { %v3556_v43 = vmul.f32 %v13675_v56, %v13674_v55  ;;  %v3562_v36 = vmul.f32 %v13682_v58, %v13681_v13  ;;  %3690 = vst.msk [vmem:[#allocation2 + $0x340] sm:$0xff] %vm1109_vm2, %v3546_v5  ;;  %v13684_v1 = vmax.f32 %v13683_v34, 0.0  ;;  %v13685_v3 = vld [vmem:[#allocation131_spill] sm:$0xff]  ;;  %v13687_v10 = vld [vmem:[#allocation114_spill] sm:$0xff]  ;;  %v13692_v54 = vld [vmem:[#allocation117_spill] sm:$0xff] }
 0x2f4   :  { %v3558_v44 = vmul.f32 %v13678_v33, %v13677_v30  ;;  %v3568_v17 = vmul.f32 %v13687_v10, %v13686_v20  ;;  %v13688_v14 = vld [vmem:[#allocation167_spill] sm:$0xff]  ;;  %v3572_v38 = vmul.f32 %v13692_v54, %v13691_v22  ;;  %3691 = vst.msk [vmem:[#allocation2 + $0x348] sm:$0xff] %vm1109_vm2, %v3547_v48  ;;  %3694 = vst.msk [vmem:[#allocation2 + $0x360] sm:$0xff] %vm1109_vm2, %v3550_v51  ;;  %v13694_v15 = vld [vmem:[#allocation137_spill] sm:$0xff]  ;;  %v3410_v48 = vpop.permute.xlu1 %3409 }
 0x2f5   :  { %v3564_v37 = vmul.f32 %v13685_v3, %v13684_v1  ;;  %v13689_v24 = vmax.f32 %v13688_v14, 0.0  ;;  %v13690_v57 = vld [vmem:[#allocation135_spill] sm:$0xff]  ;;  %3696 = vst.msk [vmem:[#allocation2 + $0x370] sm:$0xff] %vm1109_vm2, %v3552_v12  ;;  %3698 = vst.msk [vmem:[#allocation2 + $0x380] sm:$0xff] %vm1109_vm2, %v3554_v31  ;;  %v3574_v35 = vmul.f32 %v13694_v15, %v13693_v47  ;;  %v13695_v9 = vld [vmem:[#allocation169_spill] sm:$0xff]  ;;  %v3400_v41 = vpop.permute.xlu0 %3399 }
 0x2f6   :  { %v13696_v4 = vmax.f32 %v13695_v9, 0.0  ;;  %v13697_v0 = vld [vmem:[#allocation122_spill] sm:$0xff]  ;;  %v13699_v27 = vld [vmem:[#allocation139_spill] sm:$0xff]  ;;  %v13702_v11 = vld [vmem:[#allocation125_spill] sm:$0xff]  ;;  %3700 = vst.msk [vmem:[#allocation2 + $0x390] sm:$0xff] %vm1109_vm2, %v3556_v43 }
 0x2f7   :  { %v3570_v25 = vmul.f32 %v13690_v57, %v13689_v24  ;;  %v3578_v7 = vmul.f32 %v13699_v27, %v13698_v39  ;;  %v13700_v26 = vld [vmem:[#allocation171_spill] sm:$0xff]  ;;  %3702 = vst.msk [vmem:[#allocation2 + $0x3a0] sm:$0xff] %vm1109_vm2, %v3558_v44  ;;  %3704 = vst.msk [vmem:[#allocation2 + $0x3b0] sm:$0xff] %vm1109_vm2, %v3560_v6  ;;  %v13703_v42 = vld [vmem:[#allocation172_spill] sm:$0xff] }
 0x2f8   :  { %v3576_v23 = vmul.f32 %v13697_v0, %v13696_v4  ;;  %v13701_v60 = vmax.f32 %v13700_v26, 0.0  ;;  %3706 = vst.msk [vmem:[#allocation2 + $0x3c0] sm:$0xff] %vm1109_vm2, %v3562_v36  ;;  %v13704_v45 = vmax.f32 %v13703_v42, 0.0  ;;  %v13705_v5 = vld [vmem:[#allocation143_spill] sm:$0xff]  ;;  %3708 = vst.msk [vmem:[#allocation2 + $0x3d0] sm:$0xff] %vm1109_vm2, %v3564_v37  ;;  %v11317_v61 = vld [vmem:[#allocation2 + $0x130] sm:$0xff]  ;;  %v3430_v32 = vpop.permute.xlu1 %3429 }
 0x2f9   :  { %3712 = vst.msk [vmem:[#allocation2 + $0x3f0] sm:$0xff] %vm1109_vm2, %v3568_v17  ;;  %3714 = vst.msk [vmem:[#allocation2 + $0x400] sm:$0xff] %vm1109_vm2, %v3570_v25  ;;  %v3757_v29 = vld [vmem:[#allocation2 + $0x120] sm:$0xff]  ;;  %v11321_v51 = vld [vmem:[#allocation2 + $0x150] sm:$0xff]  ;;  %v3420_v59 = vpop.permute.xlu0 %3419 }
 0x2fa   :  { %v3580_v40 = vmul.f32 %v13702_v11, %v13701_v60  ;;  %v3582_v21 = vmul.f32 %v13705_v5, %v13704_v45  ;;  %3716 = vst.msk [vmem:[#allocation2 + $0x410] sm:$0xff] %vm1109_vm2, %v3572_v38  ;;  %3718 = vst.msk [vmem:[#allocation2 + $0x420] sm:$0xff] %vm1109_vm2, %v3574_v35  ;;  %v11319_v52 = vld [vmem:[#allocation2 + $0x140] sm:$0xff]  ;;  %v11325_v12 = vld [vmem:[#allocation2 + $0x170] sm:$0xff]  ;;  %v3773_v18 = vpack.c.bf16 %v11317_v61, %v3757_v29 }
 0x2fb   :  { %3720 = vst.msk [vmem:[#allocation2 + $0x430] sm:$0xff] %vm1109_vm2, %v3576_v23  ;;  %3722 = vst.msk [vmem:[#allocation2 + $0x440] sm:$0xff] %vm1109_vm2, %v3578_v7  ;;  %v11323_v19 = vld [vmem:[#allocation2 + $0x160] sm:$0xff]  ;;  %v3774_v63 = vpack.c.bf16 %v11321_v51, %v11319_v52  ;;  %v11333_v46 = vld [vmem:[%s12551_s5 + $0x10] sm:$0xff]  }
 0x2fc   :  { %3724 = vst.msk [vmem:[#allocation2 + $0x450] sm:$0xff] %vm1109_vm2, %v3580_v40  ;;  %3726 = vst.msk [vmem:[#allocation2 + $0x460] sm:$0xff] %vm1109_vm2, %v3582_v21  ;;  %6869 = vmatprep.mubr.msk.bf16.mxu1 %vm1109_vm2, %v3773_v18  ;;  %v3775_v31 = vpack.c.bf16 %v11325_v12, %v11323_v19  ;;  %v3440_v55 = vpop.permute.xlu1 %3439  ;;  %v7110_v56 = vld [vmem:[%s12551_s5] sm:$0xff]   ;;  %v11346_v16 = vld [vmem:[#allocation2 + $0x190] sm:$0xff] }
 0x2fd   :  { %6870 = vmatmul.mubr.msk.bf16.vlgmr.msra.gmra.mxu1 %vm1109_vm2, %v3774_v63  ;;  %v3435_v49 = vpop.permute.xlu0 %3434  ;;  %v11344_v43 = vld [vmem:[#allocation2 + $0x180] sm:$0xff]  ;;  %v3765_v30 = vld [vmem:[#allocation2 + $0x1b0] sm:$0xff] }
 0x2fe   :  { %6886 = vmatpush3.bf16.msra.mxu1 %v7110_v56  ;;  %6873 = vmatprep.mubr.msk.bf16.mxu1 %vm1109_vm2, %v3775_v31  ;;  %v11348_v33 = vld [vmem:[#allocation2 + $0x1c0] sm:$0xff]  ;;  %v3776_v44 = vpack.c.bf16 %v11346_v16, %v11344_v43  ;;  %v11352_v53 = vld [vmem:[#allocation2 + $0x10] sm:$0xff] }
 0x2ff   :  { %6903 = vmatprep.subr.bf16.mxu1 %v11333_v46  ;;  %v3777_v50 = vpack.c.bf16 %v11348_v33, %v3765_v30  ;;  %v11355_v6 = vld [vmem:[#allocation2 + $0x20] sm:$0xff]  ;;  %v11357_v13 = vld [vmem:[#allocation2 + $0x30] sm:$0xff] }
 0x300   :  { %v11359_v58 = vld [vmem:[#allocation2 + $0x40] sm:$0xff]  ;;  %v11362_v36 = vld [vmem:[#allocation2 + $0x50] sm:$0xff]  ;;  %v4737_v47 = vpack.c.bf16 %v11355_v6, %v11352_v53 }
 0x301   :  { %v11364_v8 = vld [vmem:[#allocation2 + $0x60] sm:$0xff]  ;;  %v11369_v34 = vld [vmem:[#allocation2 + $0xb0] sm:$0xff]  ;;  %v4738_v15 = vpack.c.bf16 %v11359_v58, %v11357_v13 }
 0x302   :  { %v11366_v62 = vld [vmem:[#allocation2 + $0xa0] sm:$0xff]  ;;  %v11373_v3 = vld [vmem:[#allocation2 + $0xd0] sm:$0xff]  ;;  %v4739_v0 = vpack.c.bf16 %v11364_v8, %v11362_v36 }
 0x303   :  { %v11371_v1 = vld [vmem:[#allocation2 + $0xc0] sm:$0xff]  ;;  %v11377_v20 = vld [vmem:[#allocation2 + $0xf0] sm:$0xff]  ;;  %v4741_v23 = vpack.c.bf16 %v11369_v34, %v11366_v62 }
 0x304   :  { %v11375_v37 = vld [vmem:[#allocation2 + $0xe0] sm:$0xff]  ;;  %v11379_v10 = vld [vmem:[#allocation2 + $0x11] sm:$0xff]  ;;  %v4742_v39 = vpack.c.bf16 %v11373_v3, %v11371_v1 }
 0x305   :  { %6874 = vmatmul.mubr.msk.bf16.gmra.mxu1 %vm1109_vm2, %v3776_v44  ;;  %v11381_v17 = vld [vmem:[#allocation2 + $0x21] sm:$0xff]  ;;  %v11383_v14 = vld [vmem:[#allocation2 + $0x31] sm:$0xff]  ;;  %v3747_v44 = vpack.c.bf16 %v11357_v13, %v11355_v6 }
 0x306   :  { %6877 = vmatprep.mubr.msk.bf16.mxu1 %vm1109_vm2, %v3777_v50  ;;  %v11385_v24 = vld [vmem:[#allocation2 + $0x41] sm:$0xff]  ;;  %v11387_v57 = vld [vmem:[#allocation2 + $0x1d0] sm:$0xff]  ;;  %v7088_v50 = vld [vmem:[%s12551_s5 + $0x18] sm:$0xff]  }
 0x307   :  { %v11389_v25 = vld [vmem:[#allocation2 + $0x1e0] sm:$0xff]  ;;  %v11391_v22 = vld [vmem:[#allocation2 + $0x1f0] sm:$0xff] }
 0x308   :  { %v11393_v54 = vld [vmem:[#allocation2 + $0x51] sm:$0xff]  ;;  %v11395_v38 = vld [vmem:[#allocation2 + $0x61] sm:$0xff]  ;;  %v3778_v42 = vpack.c.bf16 %v11389_v25, %v11387_v57 }
 0x309   :  { %v11401_v35 = vld [vmem:[#allocation2 + $0x200] sm:$0xff]  ;;  %v11403_v9 = vld [vmem:[#allocation2 + $0x210] sm:$0xff] }
 0x30a   :  { %v11405_v4 = vld [vmem:[#allocation2 + $0xa1] sm:$0xff]  ;;  %v11413_v27 = vld [vmem:[#allocation2 + $0xb1] sm:$0xff]  ;;  %v3779_v41 = vpack.c.bf16 %v11401_v35, %v11391_v22 }
 0x30b   :  { %v11415_v7 = vld [vmem:[#allocation2 + $0xc1] sm:$0xff]  ;;  %v11417_v26 = vld [vmem:[#allocation2 + $0xd1] sm:$0xff] }
 0x30c   :  { %v11427_v45 = vld [vmem:[#allocation2 + $0xe1] sm:$0xff]  ;;  %v11429_v5 = vld [vmem:[#allocation2 + $0xf1] sm:$0xff]  ;;  %v4059_v18 = vpack.c.bf16 %v11415_v7, %v11413_v27 }
 0x30d   :  { %6878 = vmatmul.mubr.msk.bf16.gmra.mxu1 %vm1109_vm2, %v3778_v42  ;;  %v11455_v49 = vld [vmem:[#allocation2 + $0x220] sm:$0xff]  ;;  %v3748_v42 = vpack.c.bf16 %v11362_v36, %v11359_v58  ;;  %v4210_v32 = vld [vmem:[#allocation2 + $0x250] sm:$0xff] }
 0x30e   :  { %6881 = vmatprep.mubr.msk.bf16.mxu1 %vm1109_vm2, %v3779_v41  ;;  %v3730_v55 = vld [vmem:[#allocation2] sm:$0xff]  ;;  %v3780_v56 = vpack.c.bf16 %v11455_v49, %v11403_v9  ;;  %v11472_v41 = vld [vmem:[#allocation2 + $0x70] sm:$0xff] }
 0x30f   :  { %v3746_v30 = vpack.c.bf16 %v11352_v53, %v3730_v55  ;;  %v3738_v55 = vld [vmem:[#allocation2 + $0x90] sm:$0xff]  ;;  %v4038_v31 = vld [vmem:[#allocation2 + $0x1] sm:$0xff] }
 0x310   :  { %v4212_v59 = vld [vmem:[#allocation2 + $0x270] sm:$0xff]  ;;  %v4213_v29 = vld [vmem:[#allocation2 + $0x280] sm:$0xff] }
 0x311   :  { %v4214_v48 = vld [vmem:[#allocation2 + $0x290] sm:$0xff]  ;;  %v4380_v11 = vld [vmem:[#allocation2 + $0x360] sm:$0xff] }
 0x312   :  { %v4221_v40 = vld [vmem:[#allocation2 + $0x310] sm:$0xff]  ;;  %v4728_v53 = vld [vmem:[#allocation2 + $0x80] sm:$0xff] }
 0x313   :  { %v4381_v60 = vld [vmem:[#allocation2 + $0x370] sm:$0xff]  ;;  %v4740_v58 = vpack.c.bf16 %v4728_v53, %v11472_v41 }
 0x315   :  { %6882 = vmatmul.mubr.msk.bf16.gmra.mxu1 %vm1109_vm2, %v3780_v56  ;;  %v3749_v56 = vpack.c.bf16 %v11472_v41, %v11364_v8  ;;  %v13706_v41 = vpack.c.bf16 %v11377_v20, %v11375_v37 }
 0x316   :  { %6887 = vmatprep.mubr.msk.bf16.mxu1 %vm1109_vm2, %v3746_v30  ;;  %v3750_v30 = vpack.c.bf16 %v11366_v62, %v3738_v55 }
 0x31d   :  { %6888 = vmatmul.mubr.msk.bf16.vlgmr.msra.gmra.mxu1 %vm1109_vm2, %v3747_v44  ;;  %v3751_v44 = vpack.c.bf16 %v11371_v1, %v11369_v34 }
 0x31e   :  { %6904 = vmatpush3.bf16.msra.mxu1 %v11333_v46  ;;  %6891 = vmatprep.mubr.msk.bf16.mxu1 %vm1109_vm2, %v3748_v42  ;;  %v3752_v46 = vpack.c.bf16 %v11375_v37, %v11373_v3  ;;  %v11485_v42 = vld [vmem:[#allocation2 + $0x100] sm:$0xff] }
 0x31f   :  { %6921 = vmatprep.subr.bf16.mxu1 %v7088_v50  ;;  %v3753_v55 = vpack.c.bf16 %v11485_v42, %v11377_v20  ;;  %v13708_v20 = vpack.c.bf16 %v11323_v19, %v11321_v51 }
 0x325   :  { %6892 = vmatmul.mubr.msk.bf16.gmra.mxu1 %vm1109_vm2, %v3749_v56  ;;  %v4054_v56 = vpack.c.bf16 %v11379_v10, %v4038_v31  ;;  %v11501_v31 = vld [vmem:[#allocation2 + $0x71] sm:$0xff] }
 0x326   :  { %6895 = vmatprep.mubr.msk.bf16.mxu1 %vm1109_vm2, %v3750_v30  ;;  %v4055_v30 = vpack.c.bf16 %v11383_v14, %v11381_v17 }
 0x32d   :  { %6896 = vmatmul.mubr.msk.bf16.gmra.mxu1 %vm1109_vm2, %v3751_v44  ;;  %v7089_v44 = vld [vmem:[%s12551_s5 + $0x20] sm:$0xff]  }
 0x32e   :  { %6899 = vmatprep.mubr.msk.bf16.mxu1 %vm1109_vm2, %v3752_v46  ;;  %v4056_v46 = vpack.c.bf16 %v11393_v54, %v11385_v24 }
 0x335   :  { %6900 = vmatmul.mubr.msk.bf16.gmra.mxu1 %vm1109_vm2, %v3753_v55  ;;  %v4046_v55 = vld [vmem:[#allocation2 + $0x91] sm:$0xff] }
 0x336   :  { %6905 = vmatprep.mubr.msk.bf16.mxu1 %vm1109_vm2, %v4054_v56  ;;  %v4057_v56 = vpack.c.bf16 %v11501_v31, %v11395_v38  ;;  %v4058_v63 = vpack.c.bf16 %v11405_v4, %v4046_v55 }
 0x33d   :  { %6906 = vmatmul.mubr.msk.bf16.vlgmr.msra.gmra.mxu1 %vm1109_vm2, %v4055_v30  ;;  %v11514_v30 = vld [vmem:[#allocation2 + $0x101] sm:$0xff] }
 0x33e   :  { %6922 = vmatpush3.bf16.msra.mxu1 %v7088_v50  ;;  %6909 = vmatprep.mubr.msk.bf16.mxu1 %vm1109_vm2, %v4056_v46  ;;  %v4060_v50 = vpack.c.bf16 %v11427_v45, %v11417_v26  ;;  %v4209_v46 = vld [vmem:[#allocation2 + $0x240] sm:$0xff]  ;;  %v4061_v55 = vpack.c.bf16 %v11514_v30, %v11429_v5 }
 0x33f   :  { %6939 = vmatprep.subr.bf16.mxu1 %v7089_v44 }
 0x345   :  { %6910 = vmatmul.mubr.msk.bf16.gmra.mxu1 %vm1109_vm2, %v4057_v56  ;;  %v4225_v56 = vpack.c.bf16 %v4210_v32, %v4209_v46  ;;  %v4215_v32 = vld [vmem:[#allocation2 + $0x2a0] sm:$0xff]  ;;  %v4216_v46 = vld [vmem:[#allocation2 + $0x2b0] sm:$0xff] }
 0x346   :  { %6913 = vmatprep.mubr.msk.bf16.mxu1 %vm1109_vm2, %v4058_v63  ;;  %v4211_v63 = vld [vmem:[#allocation2 + $0x260] sm:$0xff]  ;;  %v4228_v2 = vpack.c.bf16 %v4216_v46, %v4215_v32  ;;  %v4396_v46 = vpack.c.bf16 %v4381_v60, %v4380_v11  ;;  %v4387_v11 = vld [vmem:[#allocation2 + $0x3d0] sm:$0xff] }
 0x347   :  { %v4226_v28 = vpack.c.bf16 %v4212_v59, %v4211_v63  ;;  %v4219_v59 = vld [vmem:[#allocation2 + $0x2f0] sm:$0xff]  ;;  %v4220_v63 = vld [vmem:[#allocation2 + $0x300] sm:$0xff] }
 0x348   :  { %v4386_v60 = vld [vmem:[#allocation2 + $0x3c0] sm:$0xff] }
 0x34d   :  { %6914 = vmatmul.mubr.msk.bf16.gmra.mxu1 %vm1109_vm2, %v4059_v18  ;;  %v7090_v18 = vld [vmem:[%s12551_s5 + $0x28] sm:$0xff]  }
 0x34e   :  { %6917 = vmatprep.mubr.msk.bf16.mxu1 %vm1109_vm2, %v4060_v50  ;;  %v4227_v50 = vpack.c.bf16 %v4214_v48, %v4213_v29  ;;  %v4222_v48 = vld [vmem:[#allocation2 + $0x320] sm:$0xff]  ;;  %v4230_v29 = vpack.c.bf16 %v4220_v63, %v4219_v59 }
 0x355   :  { %6918 = vmatmul.mubr.msk.bf16.gmra.mxu1 %vm1109_vm2, %v4061_v55  ;;  %v4217_v55 = vld [vmem:[#allocation2 + $0x2d0] sm:$0xff] }
 0x356   :  { %6923 = vmatprep.mubr.msk.bf16.mxu1 %vm1109_vm2, %v4225_v56  ;;  %v4218_v56 = vld [vmem:[#allocation2 + $0x2e0] sm:$0xff] }
 0x357   :  { %v4229_v21 = vpack.c.bf16 %v4218_v56, %v4217_v55  ;;  %v4384_v55 = vld [vmem:[#allocation2 + $0x3a0] sm:$0xff]  ;;  %v4385_v56 = vld [vmem:[#allocation2 + $0x3b0] sm:$0xff] }
 0x358   :  { %v4398_v63 = vpack.c.bf16 %v4385_v56, %v4384_v55  ;;  %v4395_v56 = vld [vmem:[#allocation2 + $0x460] sm:$0xff] }
 0x35d   :  { %6924 = vmatmul.mubr.msk.bf16.vlgmr.msra.gmra.mxu1 %vm1109_vm2, %v4226_v28  ;;  %v4231_v28 = vpack.c.bf16 %v4222_v48, %v4221_v40  ;;  %v7091_v40 = vld [vmem:[%s12551_s5 + $0x30] sm:$0xff]  }
 0x35e   :  { %6940 = vmatpush3.bf16.msra.mxu1 %v7089_v44  ;;  %6927 = vmatprep.mubr.msk.bf16.mxu1 %vm1109_vm2, %v4227_v50  ;;  %v4223_v44 = vld [vmem:[#allocation2 + $0x330] sm:$0xff]  ;;  %v4224_v50 = vld [vmem:[#allocation2 + $0x340] sm:$0xff] }
 0x35f   :  { %6957 = vmatprep.subr.bf16.mxu1 %v7090_v18  ;;  %v4232_v32 = vpack.c.bf16 %v4224_v50, %v4223_v44  ;;  %v4388_v48 = vld [vmem:[#allocation2 + $0x3f0] sm:$0xff] }
 0x360   :  { %v4390_v50 = vld [vmem:[#allocation2 + $0x410] sm:$0xff] }
 0x365   :  { %6928 = vmatmul.mubr.msk.bf16.gmra.mxu1 %vm1109_vm2, %v4228_v2  ;;  %v4383_v2 = vld [vmem:[#allocation2 + $0x390] sm:$0xff] }
 0x366   :  { %6931 = vmatprep.mubr.msk.bf16.mxu1 %vm1109_vm2, %v4229_v21  ;;  %v4382_v21 = vld [vmem:[#allocation2 + $0x380] sm:$0xff] }
 0x367   :  { %v4397_v59 = vpack.c.bf16 %v4383_v2, %v4382_v21  ;;  %v4393_v21 = vld [vmem:[#allocation2 + $0x440] sm:$0xff] }
 0x36d   :  { %6932 = vmatmul.mubr.msk.bf16.gmra.mxu1 %vm1109_vm2, %v4230_v29  ;;  %v4389_v29 = vld [vmem:[#allocation2 + $0x400] sm:$0xff] }
 0x36e   :  { %6935 = vmatprep.mubr.msk.bf16.mxu1 %vm1109_vm2, %v4231_v28  ;;  %v4399_v28 = vpack.c.bf16 %v4387_v11, %v4386_v60  ;;  %v4400_v44 = vpack.c.bf16 %v4389_v29, %v4388_v48  ;;  %v4552_v48 = vld [vmem:[#allocation2 + $0x261] sm:$0xff]  ;;  %v4553_v29 = vld [vmem:[#allocation2 + $0x271] sm:$0xff] }
 0x375   :  { %6936 = vmatmul.mubr.msk.bf16.gmra.mxu1 %vm1109_vm2, %v4232_v32  ;;  %v4391_v32 = vld [vmem:[#allocation2 + $0x420] sm:$0xff] }
 0x376   :  { %6941 = vmatprep.mubr.msk.bf16.mxu1 %vm1109_vm2, %v4396_v46  ;;  %v4392_v46 = vld [vmem:[#allocation2 + $0x430] sm:$0xff]  ;;  %v4401_v2 = vpack.c.bf16 %v4391_v32, %v4390_v50  ;;  %v4567_v50 = vpack.c.bf16 %v4553_v29, %v4552_v48  ;;  %v7092_v32 = vld [vmem:[%s12551_s5 + $0x38] sm:$0xff]   ;;  %v4563_v48 = vld [vmem:[#allocation2 + $0x321] sm:$0xff] }
 0x377   :  { %v4402_v55 = vpack.c.bf16 %v4393_v21, %v4392_v46  ;;  %v4556_v21 = vld [vmem:[#allocation2 + $0x2a1] sm:$0xff] }
 0x37d   :  { %6942 = vmatmul.mubr.msk.bf16.vlgmr.msra.gmra.mxu1 %vm1109_vm2, %v4397_v59  ;;  %v4550_v59 = vld [vmem:[#allocation2 + $0x241] sm:$0xff] }
 0x37e   :  { %6958 = vmatpush3.bf16.msra.mxu1 %v7090_v18  ;;  %6945 = vmatprep.mubr.msk.bf16.mxu1 %vm1109_vm2, %v4398_v63  ;;  %v4394_v18 = vld [vmem:[#allocation2 + $0x450] sm:$0xff] }
 0x37f   :  { %6975 = vmatprep.subr.bf16.mxu1 %v7091_v40  ;;  %v4551_v63 = vld [vmem:[#allocation2 + $0x251] sm:$0xff]  ;;  %v4403_v60 = vpack.c.bf16 %v4395_v56, %v4394_v18  ;;  %v4559_v18 = vld [vmem:[#allocation2 + $0x2e1] sm:$0xff] }
 0x380   :  { %v4566_v11 = vpack.c.bf16 %v4551_v63, %v4550_v59  ;;  %v4560_v63 = vld [vmem:[#allocation2 + $0x2f1] sm:$0xff] }
 0x385   :  { %6946 = vmatmul.mubr.msk.bf16.gmra.mxu1 %vm1109_vm2, %v4399_v28  ;;  %v4554_v28 = vld [vmem:[#allocation2 + $0x281] sm:$0xff] }
 0x386   :  { %6949 = vmatprep.mubr.msk.bf16.mxu1 %vm1109_vm2, %v4400_v44  ;;  %v4555_v44 = vld [vmem:[#allocation2 + $0x291] sm:$0xff] }
 0x387   :  { %v4568_v46 = vpack.c.bf16 %v4555_v44, %v4554_v28  ;;  %v4565_v44 = vld [vmem:[#allocation2 + $0x341] sm:$0xff] }
 0x38d   :  { %6950 = vmatmul.mubr.msk.bf16.gmra.mxu1 %vm1109_vm2, %v4401_v2  ;;  %v4557_v2 = vld [vmem:[#allocation2 + $0x2b1] sm:$0xff] }
 0x38e   :  { %6953 = vmatprep.mubr.msk.bf16.mxu1 %vm1109_vm2, %v4402_v55  ;;  %v4558_v55 = vld [vmem:[#allocation2 + $0x2d1] sm:$0xff]  ;;  %v4569_v56 = vpack.c.bf16 %v4557_v2, %v4556_v21 }
 0x38f   :  { %v4570_v59 = vpack.c.bf16 %v4559_v18, %v4558_v55  ;;  %v7094_v55 = vld [vmem:[%s12552_s8] sm:$0xff]  }
 0x395   :  { %6954 = vmatmul.mubr.msk.bf16.gmra.mxu1 %vm1109_vm2, %v4403_v60  ;;  %v4561_v60 = vld [vmem:[#allocation2 + $0x301] sm:$0xff] }
 0x396   :  { %6959 = vmatprep.mubr.msk.bf16.mxu1 %vm1109_vm2, %v4566_v11  ;;  %v4562_v11 = vld [vmem:[#allocation2 + $0x311] sm:$0xff]  ;;  %v4571_v29 = vpack.c.bf16 %v4561_v60, %v4560_v63  ;;  %v13707_v63 = vpack.c.bf16 %v11319_v52, %v11317_v61  ;;  %v4899_v52 = vld [vmem:[#allocation2 + $0x1a0] sm:$0xff] }
 0x397   :  { %v4572_v28 = vpack.c.bf16 %v4563_v48, %v4562_v11 }
 0x39d   :  { %6960 = vmatmul.mubr.msk.bf16.vlgmr.msra.gmra.mxu1 %vm1109_vm2, %v4567_v50 }
 0x39e   :  { %6976 = vmatpush3.bf16.msra.mxu1 %v7091_v40  ;;  %6963 = vmatprep.mubr.msk.bf16.mxu1 %vm1109_vm2, %v4568_v46  ;;  %v4564_v40 = vld [vmem:[#allocation2 + $0x331] sm:$0xff]  ;;  %v7093_v46 = vld [vmem:[%s12551_s5 + $0x40] sm:$0xff]  }
 0x39f   :  { %6993 = vmatprep.subr.bf16.mxu1 %v7092_v32  ;;  %v4573_v50 = vpack.c.bf16 %v4565_v44, %v4564_v40  ;;  %v4911_v40 = vpack.c.bf16 %v4899_v52, %v11346_v16  ;;  %v13711_v16 = vpack.c.bf16 %v11391_v22, %v11389_v25  ;;  %v13713_v22 = vpack.c.bf16 %v11381_v17, %v11379_v10 }
 0x3a5   :  { %6964 = vmatmul.mubr.msk.bf16.gmra.mxu1 %vm1109_vm2, %v4569_v56  ;;  %v4736_v56 = vld [vmem:[#allocation2 + $0x110] sm:$0xff] }
 0x3a6   :  { %6967 = vmatprep.mubr.msk.bf16.mxu1 %vm1109_vm2, %v4570_v59  ;;  %v4744_v34 = vpack.c.bf16 %v4736_v56, %v11485_v42  ;;  %v13709_v42 = vpack.c.bf16 %v11344_v43, %v11325_v12  ;;  %v13710_v12 = vpack.c.bf16 %v11387_v57, %v11348_v33 }
 0x3ad   :  { %6968 = vmatmul.mubr.msk.bf16.gmra.mxu1 %vm1109_vm2, %v4571_v29 }
 0x3ae   :  { %6971 = vmatprep.mubr.msk.bf16.mxu1 %vm1109_vm2, %v4572_v28 }
 0x3b5   :  { %6972 = vmatmul.mubr.msk.bf16.gmra.mxu1 %vm1109_vm2, %v4573_v50 }
 0x3b6   :  { %6977 = vmatprep.mubr.msk.bf16.mxu1 %vm1109_vm2, %v4737_v47  ;;  %v7112_v47 = vmov 0.0  }
 0x3b7   :  { %7029 = vmatprep.subr.bf16.mxu0 %v7112_v47  ;;  %7031 = vmatprep.mubr.msk.bf16.mxu0 %vm7113_vm3, %v7112_v47 }
 0x3b8   :  { %7030 = vmatpush3.bf16.msra.mxu0 %v7094_v55 }
 0x3bd   :  { %v6871_v21 = vpop.f32.mrf.mxu1  ;;  %6978 = vmatmul.mubr.msk.bf16.vlgmr.msra.gmra.mxu1 %vm1109_vm2, %v4738_v15 }
 0x3be   :  { %6994 = vmatpush3.bf16.msra.mxu1 %v7092_v32  ;;  %6981 = vmatprep.mubr.msk.bf16.mxu1 %vm1109_vm2, %v4739_v0 }
 0x3bf   :  { %v3848_v2 = vpop.f32.mrf.mxu1  ;;  %7011 = vmatprep.subr.bf16.mxu1 %v7093_v46 }
 0x3c1   :  { %v6872_v6 = vpop.f32.mrf.mxu1 }
 0x3c3   :  { %v3851_v13 = vpop.f32.mrf.mxu1 }
 0x3c5   :  { %v6875_v15 = vpop.f32.mrf.mxu1  ;;  %6982 = vmatmul.mubr.msk.bf16.gmra.mxu1 %vm1109_vm2, %v4740_v58  ;;  %v4907_v58 = vld [vmem:[#allocation2 + $0x230] sm:$0xff] }
 0x3c6   :  { %6985 = vmatprep.mubr.msk.bf16.mxu1 %vm1109_vm2, %v4741_v23 }
 0x3c7   :  { %v3864_v36 = vpop.f32.mrf.mxu1 }
 0x3c9   :  { %v6876_v8 = vpop.f32.mrf.mxu1 }
 0x3cb   :  { %v3867_v0 = vpop.f32.mrf.mxu1 }
 0x3cd   :  { %v6879_v32 = vpop.f32.mrf.mxu1  ;;  %6986 = vmatmul.mubr.msk.bf16.gmra.mxu1 %vm1109_vm2, %v4742_v39 }
 0x3ce   :  { %6989 = vmatprep.mubr.msk.bf16.mxu1 %vm1109_vm2, %v13706_v41 }
 0x3cf   :  { %v3880_v18 = vpop.f32.mrf.mxu1 }
 0x3d1   :  { %v6880_v59 = vpop.f32.mrf.mxu1 }
 0x3d3   :  { %v3883_v62 = vpop.f32.mrf.mxu1 }
 0x3d5   :  { %v6883_v23 = vpop.f32.mrf.mxu1  ;;  %6990 = vmatmul.mubr.msk.bf16.gmra.mxu1 %vm1109_vm2, %v4744_v34 }
 0x3d6   :  { %6995 = vmatprep.mubr.msk.bf16.mxu1 %vm1109_vm2, %v13707_v63 }
 0x3d7   :  { %v3896_v1 = vpop.f32.mrf.mxu1 }
 0x3d9   :  { %v6884_v3 = vpop.f32.mrf.mxu1 }
 0x3db   :  { %v3899_v39 = vpop.f32.mrf.mxu1 }
 0x3dd   :  { %v6889_v37 = vpop.f32.mrf.mxu1  ;;  %6996 = vmatmul.mubr.msk.bf16.vlgmr.msra.gmra.mxu1 %vm1109_vm2, %v13708_v20 }
 0x3de   :  { %v3984_v60 = vadd.f32 %v6889_v37, %v6871_v21  ;;  %7012 = vmatpush3.bf16.msra.mxu1 %v7093_v46  ;;  %6999 = vmatprep.mubr.msk.bf16.mxu1 %vm1109_vm2, %v13709_v42 }
 0x3df   :  { %v3975_v11 = vpop.f32.mrf.mxu1  ;;  %7035 = vmatprep.subr.bf16.mxu1 %v7112_v47 }
 0x3e0   :  { %v3976_v61 = vadd.f32 %v3975_v11, %v3848_v2 }
 0x3e1   :  { %v6890_v48 = vpop.f32.mrf.mxu1 }
 0x3e2   :  { %v3987_v29 = vadd.f32 %v6890_v48, %v6872_v6  ;;  %v13717_v48 = vpack.c.bf16 %v11417_v26, %v11415_v7 }
 0x3e3   :  { %v3978_v28 = vpop.f32.mrf.mxu1 }
 0x3e4   :  { %v11601_v51 = vadd.f32 %v3978_v28, %v3851_v13  ;;  %v13712_v13 = vpack.c.bf16 %v11403_v9, %v11401_v35  ;;  %v5077_v28 = vld [vmem:[#allocation2 + $0x111] sm:$0xff] }
 0x3e5   :  { %v6893_v19 = vpop.f32.mrf.mxu1  ;;  %7000 = vmatmul.mubr.msk.bf16.gmra.mxu1 %vm1109_vm2, %v4911_v40 }
 0x3e6   :  { %v4000_v44 = vadd.f32 %v6893_v19, %v6875_v15  ;;  %7003 = vmatprep.mubr.msk.bf16.mxu1 %vm1109_vm2, %v13710_v12  ;;  %v5085_v12 = vpack.c.bf16 %v5077_v28, %v11514_v30 }
 0x3e7   :  { %v3991_v43 = vpop.f32.mrf.mxu1 }
 0x3e8   :  { %v3992_v50 = vadd.f32 %v3991_v43, %v3864_v36 }
 0x3e9   :  { %v6894_v46 = vpop.f32.mrf.mxu1 }
 0x3ea   :  { %v4003_v21 = vadd.f32 %v6894_v46, %v6876_v8 }
 0x3eb   :  { %v3994_v2 = vpop.f32.mrf.mxu1 }
 0x3ec   :  { %v11608_v53 = vadd.f32 %v3994_v2, %v3867_v0  ;;  %v4915_v0 = vpack.c.bf16 %v4907_v58, %v11455_v49  ;;  %v13714_v49 = vpack.c.bf16 %v11385_v24, %v11383_v14  ;;  %v13716_v24 = vpack.c.bf16 %v11413_v27, %v11405_v4 }
 0x3ed   :  { %v6897_v6 = vpop.f32.mrf.mxu1  ;;  %7004 = vmatmul.mubr.msk.bf16.gmra.mxu1 %vm1109_vm2, %v13711_v16 }
 0x3ee   :  { %v4016_v55 = vadd.f32 %v6897_v6, %v6879_v32  ;;  %7007 = vmatprep.mubr.msk.bf16.mxu1 %vm1109_vm2, %v13712_v13 }
 0x3ef   :  { %v4007_v33 = vpop.f32.mrf.mxu1 }
 0x3f0   :  { %v4008_v57 = vadd.f32 %v4007_v33, %v3880_v18 }
 0x3f1   :  { %v6898_v15 = vpop.f32.mrf.mxu1 }
 0x3f2   :  { %v4019_v36 = vadd.f32 %v6898_v15, %v6880_v59 }
 0x3f3   :  { %v4010_v8 = vpop.f32.mrf.mxu1 }
 0x3f4   :  { %v11619_v41 = vadd.f32 %v4010_v8, %v3883_v62 }
 0x3f5   :  { %v6901_v56 = vpop.f32.mrf.mxu1  ;;  %7008 = vmatmul.mubr.msk.bf16.gmra.mxu1 %vm1109_vm2, %v4915_v0 }
 0x3f6   :  { %v4032_v25 = vadd.f32 %v6901_v56, %v6883_v23  ;;  %7013 = vmatprep.mubr.msk.bf16.mxu1 %vm1109_vm2, %v13713_v22  ;;  %v13715_v23 = vpack.c.bf16 %v11395_v38, %v11393_v54 }
 0x3f7   :  { %v4023_v35 = vpop.f32.mrf.mxu1 }
 0x3f8   :  { %v4024_v9 = vadd.f32 %v4023_v35, %v3896_v1  ;;  %v5069_v1 = vld [vmem:[#allocation2 + $0x81] sm:$0xff] }
 0x3f9   :  { %v6902_v32 = vpop.f32.mrf.mxu1 }
 0x3fa   :  { %v4035_v18 = vadd.f32 %v6902_v32, %v6884_v3 }
 0x3fb   :  { %v4026_v34 = vpop.f32.mrf.mxu1 }
 0x3fc   :  { %v11626_v59 = vadd.f32 %v4026_v34, %v3899_v39  ;;  %v5081_v39 = vpack.c.bf16 %v5069_v1, %v11501_v31 }
 0x3fd   :  { %v6907_v63 = vpop.f32.mrf.mxu1  ;;  %7014 = vmatmul.mubr.msk.bf16.vlgmr.msra.gmra.mxu1 %vm1109_vm2, %v13714_v49 }
 0x3fe   :  { %v4194_v62 = vadd.f32 %v6907_v63, %v3984_v60  ;;  %7017 = vmatprep.mubr.msk.bf16.mxu1 %vm1109_vm2, %v13715_v23 }
 0x3ff   :  { %v4129_v10 = vpop.f32.mrf.mxu1 }
 0x400   :  { %v4192_v17 = vadd.f32 %v4129_v10, %v3976_v61 }
 0x401   :  { %v6908_v37 = vpop.f32.mrf.mxu1 }
 0x402   :  { %v4195_v3 = vadd.f32 %v6908_v37, %v3987_v29  ;;  %v13718_v29 = vpack.c.bf16 %v11429_v5, %v11427_v45 }
 0x403   :  { %v11636_v20 = vpop.f32.mrf.mxu1 }
 0x405   :  { %v6911_v42 = vpop.f32.mrf.mxu1  ;;  %7018 = vmatmul.mubr.msk.bf16.gmra.mxu1 %vm1109_vm2, %v5081_v39 }
 0x406   :  { %v4198_v14 = vadd.f32 %v6911_v42, %v4000_v44  ;;  %7021 = vmatprep.mubr.msk.bf16.mxu1 %vm1109_vm2, %v13716_v24 }
 0x407   :  { %v4145_v54 = vpop.f32.mrf.mxu1 }
 0x408   :  { %v4196_v38 = vadd.f32 %v4145_v54, %v3992_v50 }
 0x409   :  { %v6912_v60 = vpop.f32.mrf.mxu1 }
 0x40a   :  { %v4199_v11 = vadd.f32 %v6912_v60, %v4003_v21 }
 0x40b   :  { %v4148_v61 = vpop.f32.mrf.mxu1 }
 0x40c   :  { %v4197_v8 = vadd.f32 %v4148_v61, %v11608_v53 }
 0x40d   :  { %v6915_v52 = vpop.f32.mrf.mxu1  ;;  %7022 = vmatmul.mubr.msk.bf16.gmra.mxu1 %vm1109_vm2, %v13717_v48 }
 0x40e   :  { %v4202_v31 = vadd.f32 %v6915_v52, %v4016_v55  ;;  %7025 = vmatprep.mubr.msk.bf16.mxu1 %vm1109_vm2, %v13718_v29 }
 0x40f   :  { %v4161_v4 = vpop.f32.mrf.mxu1 }
 0x410   :  { %v4200_v27 = vadd.f32 %v4161_v4, %v4008_v57 }
 0x411   :  { %v6916_v40 = vpop.f32.mrf.mxu1 }
 0x412   :  { %v4203_v19 = vadd.f32 %v6916_v40, %v4019_v36 }
 0x413   :  { %v4164_v44 = vpop.f32.mrf.mxu1 }
 0x414   :  { %v4201_v34 = vadd.f32 %v4164_v44, %v11619_v41 }
 0x415   :  { %v6919_v43 = vpop.f32.mrf.mxu1  ;;  %7026 = vmatmul.mubr.msk.bf16.gmra.mxu1 %vm1109_vm2, %v5085_v12 }
 0x416   :  { %v4206_v7 = vadd.f32 %v6919_v43, %v4032_v25  ;;  %7037 = vmatprep.mubr.msk.bf16.mxu1 %vm7113_vm3, %v7112_v47 }
 0x417   :  { %v4177_v26 = vpop.f32.mrf.mxu1 }
 0x418   :  { %v4204_v50 = vadd.f32 %v4177_v26, %v4024_v9 }
 0x419   :  { %v6920_v46 = vpop.f32.mrf.mxu1 }
 0x41a   :  { %v4207_v21 = vadd.f32 %v6920_v46, %v4035_v18 }
 0x41b   :  { %v4180_v2 = vpop.f32.mrf.mxu1 }
 0x41c   :  { %v4205_v53 = vadd.f32 %v4180_v2, %v11626_v59 }
 0x41d   :  { %v6925_v45 = vpop.f32.mrf.mxu1 }
 0x41e   :  { %v4365_v5 = vadd.f32 %v6925_v45, %v4194_v62 }
 0x41f   :  { %v4300_v6 = vpop.f32.mrf.mxu1 }
 0x420   :  { %v4363_v16 = vadd.f32 %v4300_v6, %v4192_v17 }
 0x421   :  { %v6926_v55 = vpop.f32.mrf.mxu1 }
 0x422   :  { %v4366_v13 = vadd.f32 %v6926_v55, %v4195_v3 }
 0x423   :  { %v4303_v33 = vpop.f32.mrf.mxu1 }
 0x425   :  { %v6929_v57 = vpop.f32.mrf.mxu1 }
 0x426   :  { %v4369_v58 = vadd.f32 %v6929_v57, %v4198_v14 }
 0x427   :  { %v4316_v15 = vpop.f32.mrf.mxu1 }
 0x428   :  { %v4367_v30 = vadd.f32 %v4316_v15, %v4196_v38  ;;  %v4193_v38 = vadd.f32 %v11636_v20, %v11601_v51 }
 0x429   :  { %v6930_v36 = vpop.f32.mrf.mxu1 }
 0x42a   :  { %v4370_v0 = vadd.f32 %v6930_v36, %v4199_v11  ;;  %v4364_v11 = vadd.f32 %v4303_v33, %v4193_v38 }
 0x42b   :  { %v4319_v56 = vpop.f32.mrf.mxu1 }
 0x42c   :  { %v4368_v25 = vadd.f32 %v4319_v56, %v4197_v8 }
 0x42d   :  { %v6933_v22 = vpop.f32.mrf.mxu1 }
 0x42e   :  { %v4373_v35 = vadd.f32 %v6933_v22, %v4202_v31 }
 0x42f   :  { %v4332_v9 = vpop.f32.mrf.mxu1 }
 0x430   :  { %v4371_v32 = vadd.f32 %v4332_v9, %v4200_v27 }
 0x431   :  { %v6934_v18 = vpop.f32.mrf.mxu1 }
 0x432   :  { %v4374_v63 = vadd.f32 %v6934_v18, %v4203_v19 }
 0x433   :  { %v4335_v49 = vpop.f32.mrf.mxu1 }
 0x434   :  { %v4372_v62 = vadd.f32 %v4335_v49, %v4201_v34 }
 0x435   :  { %v6937_v23 = vpop.f32.mrf.mxu1 }
 0x436   :  { %v4377_v10 = vadd.f32 %v6937_v23, %v4206_v7 }
 0x437   :  { %v4348_v17 = vpop.f32.mrf.mxu1 }
 0x438   :  { %v4375_v1 = vadd.f32 %v4348_v17, %v4204_v50 }
 0x439   :  { %v6938_v37 = vpop.f32.mrf.mxu1 }
 0x43a   :  { %v4378_v3 = vadd.f32 %v6938_v37, %v4207_v21 }
 0x43b   :  { %v4351_v39 = vpop.f32.mrf.mxu1 }
 0x43c   :  { %v4376_v42 = vadd.f32 %v4351_v39, %v4205_v53 }
 0x43d   :  { %v6943_v14 = vpop.f32.mrf.mxu1 }
 0x43e   :  { %v4536_v24 = vadd.f32 %v6943_v14, %v4365_v5 }
 0x43f   :  { %v4471_v54 = vpop.f32.mrf.mxu1 }
 0x440   :  { %v4534_v41 = vadd.f32 %v4471_v54, %v4363_v16 }
 0x441   :  { %v6944_v60 = vpop.f32.mrf.mxu1 }
 0x442   :  { %v4537_v61 = vadd.f32 %v6944_v60, %v4366_v13 }
 0x443   :  { %v4474_v52 = vpop.f32.mrf.mxu1 }
 0x444   :  { %v4535_v48 = vadd.f32 %v4474_v52, %v4364_v11 }
 0x445   :  { %v6947_v31 = vpop.f32.mrf.mxu1 }
 0x446   :  { %v4540_v29 = vadd.f32 %v6947_v31, %v4369_v58 }
 0x447   :  { %v4487_v4 = vpop.f32.mrf.mxu1 }
 0x448   :  { %v4538_v27 = vadd.f32 %v4487_v4, %v4367_v30 }
 0x449   :  { %v6948_v59 = vpop.f32.mrf.mxu1 }
 0x44a   :  { %v4541_v28 = vadd.f32 %v6948_v59, %v4370_v0 }
 0x44b   :  { %v4490_v40 = vpop.f32.mrf.mxu1 }
 0x44c   :  { %v4539_v19 = vadd.f32 %v4490_v40, %v4368_v25 }
 0x44d   :  { %v6951_v44 = vpop.f32.mrf.mxu1 }
 0x44e   :  { %v4544_v12 = vadd.f32 %v6951_v44, %v4373_v35 }
 0x44f   :  { %v4503_v43 = vpop.f32.mrf.mxu1 }
 0x450   :  { %v4542_v7 = vadd.f32 %v4503_v43, %v4371_v32 }
 0x451   :  { %v6952_v26 = vpop.f32.mrf.mxu1 }
 0x452   :  { %v4545_v51 = vadd.f32 %v6952_v26, %v4374_v63 }
 0x453   :  { %v4506_v20 = vpop.f32.mrf.mxu1 }
 0x454   :  { %v4543_v50 = vadd.f32 %v4506_v20, %v4372_v62 }
 0x455   :  { %v6955_v46 = vpop.f32.mrf.mxu1 }
 0x456   :  { %v4548_v21 = vadd.f32 %v6955_v46, %v4377_v10 }
 0x457   :  { %v4519_v2 = vpop.f32.mrf.mxu1 }
 0x458   :  { %v4546_v45 = vadd.f32 %v4519_v2, %v4375_v1 }
 0x459   :  { %v6956_v5 = vpop.f32.mrf.mxu1 }
 0x45a   :  { %v4549_v6 = vadd.f32 %v6956_v5, %v4378_v3 }
 0x45b   :  { %v4522_v16 = vpop.f32.mrf.mxu1 }
 0x45c   :  { %v4547_v55 = vadd.f32 %v4522_v16, %v4376_v42 }
 0x45d   :  { %v6961_v13 = vpop.f32.mrf.mxu1 }
 0x45e   :  { %v4706_v33 = vadd.f32 %v6961_v13, %v4536_v24 }
 0x45f   :  { %v4641_v57 = vpop.f32.mrf.mxu1 }
 0x460   :  { %v4704_v58 = vadd.f32 %v4641_v57, %v4534_v41 }
 0x461   :  { %v6962_v15 = vpop.f32.mrf.mxu1 }
 0x462   :  { %v4707_v30 = vadd.f32 %v6962_v15, %v4537_v61 }
 0x463   :  { %v4644_v36 = vpop.f32.mrf.mxu1 }
 0x464   :  { %v11659_v8 = vadd.f32 %v4644_v36, %v4535_v48 }
 0x465   :  { %v6965_v0 = vpop.f32.mrf.mxu1 }
 0x466   :  { %v4710_v56 = vadd.f32 %v6965_v0, %v4540_v29 }
 0x467   :  { %v4657_v25 = vpop.f32.mrf.mxu1 }
 0x468   :  { %v11661_v22 = vadd.f32 %v4657_v25, %v4538_v27 }
 0x469   :  { %v6966_v35 = vpop.f32.mrf.mxu1 }
 0x46a   :  { %v4711_v9 = vadd.f32 %v6966_v35, %v4541_v28 }
 0x46b   :  { %v4660_v32 = vpop.f32.mrf.mxu1 }
 0x46c   :  { %v11663_v18 = vadd.f32 %v4660_v32, %v4539_v19 }
 0x46d   :  { %v6969_v34 = vpop.f32.mrf.mxu1 }
 0x46e   :  { %v4714_v63 = vadd.f32 %v6969_v34, %v4544_v12 }
 0x46f   :  { %v4673_v49 = vpop.f32.mrf.mxu1 }
 0x470   :  { %v11665_v62 = vadd.f32 %v4673_v49, %v4542_v7 }
 0x471   :  { %v6970_v23 = vpop.f32.mrf.mxu1 }
 0x472   :  { %v4715_v10 = vadd.f32 %v6970_v23, %v4545_v51 }
 0x473   :  { %v4676_v17 = vpop.f32.mrf.mxu1 }
 0x474   :  { %v11667_v1 = vadd.f32 %v4676_v17, %v4543_v50 }
 0x475   :  { %v6973_v37 = vpop.f32.mrf.mxu1 }
 0x476   :  { %v4718_v53 = vadd.f32 %v6973_v37, %v4548_v21 }
 0x477   :  { %v4689_v3 = vpop.f32.mrf.mxu1 }
 0x478   :  { %v11669_v39 = vadd.f32 %v4689_v3, %v4546_v45 }
 0x479   :  { %v6974_v42 = vpop.f32.mrf.mxu1 }
 0x47a   :  { %v4719_v14 = vadd.f32 %v6974_v42, %v4549_v6 }
 0x47b   :  { %v4692_v24 = vpop.f32.mrf.mxu1 }
 0x47c   :  { %v11671_v54 = vadd.f32 %v4692_v24, %v4547_v55 }
 0x47d   :  { %v6979_v38 = vpop.f32.mrf.mxu1 }
 0x47e   :  { %v4877_v41 = vadd.f32 %v6979_v38, %v4706_v33 }
 0x47f   :  { %v4812_v60 = vpop.f32.mrf.mxu1 }
 0x480   :  { %v4875_v11 = vadd.f32 %v4812_v60, %v4704_v58 }
 0x481   :  { %v6980_v61 = vpop.f32.mrf.mxu1 }
 0x482   :  { %v4878_v52 = vadd.f32 %v6980_v61, %v4707_v30 }
 0x483   :  { %v4815_v48 = vpop.f32.mrf.mxu1 }
 0x484   :  { %v4876_v32 = vadd.f32 %v4815_v48, %v11659_v8 }
 0x485   :  { %v6983_v31 = vpop.f32.mrf.mxu1 }
 0x486   :  { %v4881_v29 = vadd.f32 %v6983_v31, %v4710_v56 }
 0x487   :  { %v4828_v4 = vpop.f32.mrf.mxu1 }
 0x488   :  { %v4879_v37 = vadd.f32 %v4828_v4, %v11661_v22 }
 0x489   :  { %v6984_v27 = vpop.f32.mrf.mxu1 }
 0x48a   :  { %v4882_v59 = vadd.f32 %v6984_v27, %v4711_v9 }
 0x48b   :  { %v4831_v28 = vpop.f32.mrf.mxu1 }
 0x48c   :  { %v4880_v61 = vadd.f32 %v4831_v28, %v11663_v18 }
 0x48d   :  { %v6987_v40 = vpop.f32.mrf.mxu1 }
 0x48e   :  { %v11673_v19 = vadd.f32 %v6987_v40, %v4714_v63 }
 0x48f   :  { %v4844_v44 = vpop.f32.mrf.mxu1 }
 0x491   :  { %v6988_v12 = vpop.f32.mrf.mxu1 }
 0x492   :  { %v11675_v43 = vadd.f32 %v6988_v12, %v4715_v10  ;;  %v4883_v12 = vadd.f32 %v4844_v44, %v11665_v62 }
 0x493   :  { %v11677_v7 = vpop.f32.mrf.mxu1 }
 0x495   :  { %v6991_v26 = vpop.f32.mrf.mxu1 }
 0x496   :  { %v11679_v51 = vadd.f32 %v6991_v26, %v4718_v53 }
 0x497   :  { %v11681_v20 = vpop.f32.mrf.mxu1 }
 0x499   :  { %v6992_v50 = vpop.f32.mrf.mxu1 }
 0x49a   :  { %v11683_v46 = vadd.f32 %v6992_v50, %v4719_v14 }
 0x49b   :  { %v11685_v21 = vpop.f32.mrf.mxu1 }
 0x49d   :  { %v6997_v2 = vpop.f32.mrf.mxu1 }
 0x49e   :  { %v5048_v49 = vadd.f32 %v6997_v2, %v4877_v41 }
 0x49f   :  { %v4983_v45 = vpop.f32.mrf.mxu1 }
 0x4a0   :  { %v5046_v34 = vadd.f32 %v4983_v45, %v4875_v11 }
 0x4a1   :  { %v6998_v5 = vpop.f32.mrf.mxu1 }
 0x4a2   :  { %v5049_v53 = vadd.f32 %v6998_v5, %v4878_v52 }
 0x4a3   :  { %v4986_v6 = vpop.f32.mrf.mxu1 }
 0x4a4   :  { %v5047_v23 = vadd.f32 %v4986_v6, %v4876_v32 }
 0x4a5   :  { %v7001_v16 = vpop.f32.mrf.mxu1 }
 0x4a6   :  { %v5052_v4 = vadd.f32 %v7001_v16, %v4881_v29 }
 0x4a7   :  { %v4999_v55 = vpop.f32.mrf.mxu1 }
 0x4a8   :  { %v5050_v24 = vadd.f32 %v4999_v55, %v4879_v37 }
 0x4a9   :  { %v7002_v13 = vpop.f32.mrf.mxu1 }
 0x4aa   :  { %v5053_v2 = vadd.f32 %v7002_v13, %v4882_v59  ;;  %v4884_v59 = vadd.f32 %v11677_v7, %v11667_v1 }
 0x4ab   :  { %v5002_v33 = vpop.f32.mrf.mxu1 }
 0x4ac   :  { %v5051_v27 = vadd.f32 %v5002_v33, %v4880_v61 }
 0x4ad   :  { %v7005_v57 = vpop.f32.mrf.mxu1 }
 0x4ae   :  { %v5056_v32 = vadd.f32 %v7005_v57, %v11673_v19 }
 0x4af   :  { %v5015_v58 = vpop.f32.mrf.mxu1 }
 0x4b0   :  { %v5054_v55 = vadd.f32 %v5015_v58, %v4883_v12 }
 0x4b1   :  { %v7006_v15 = vpop.f32.mrf.mxu1 }
 0x4b2   :  { %v5057_v1 = vadd.f32 %v7006_v15, %v11675_v43 }
 0x4b3   :  { %v5018_v30 = vpop.f32.mrf.mxu1 }
 0x4b4   :  { %v5055_v58 = vadd.f32 %v5018_v30, %v4884_v59 }
 0x4b5   :  { %v11687_v36 = vpop.f32.mrf.mxu1 }
 0x4b7   :  { %v5031_v0 = vpop.f32.mrf.mxu1 }
 0x4b9   :  { %v11689_v56 = vpop.f32.mrf.mxu1 }
 0x4bb   :  { %v11691_v25 = vpop.f32.mrf.mxu1 }
 0x4bd   :  { %v7015_v35 = vpop.f32.mrf.mxu1 }
 0x4be   :  { %v11697_v3 = vadd.f32 %v7015_v35, %v5048_v49 }
 0x4bf   :  { %v5153_v9 = vpop.f32.mrf.mxu1 }
 0x4c0   :  { %v11694_v10 = vadd.f32 %v5153_v9, %v5046_v34  ;;  %v5237_v22 = vsel %vm1109_vm2, %v11697_v3, 0.0 }
 0x4c1   :  { %v7016_v63 = vpop.f32.mrf.mxu1 }
 0x4c2   :  { %v5234_v38 = vsel %vm1109_vm2, %v11694_v10, 0.0  ;;  %v11703_v8 = vadd.f32 %v7016_v63, %v5049_v53  ;;  %v4887_v63 = vadd.f32 %v11681_v20, %v11669_v39  ;;  %v4888_v39 = vadd.f32 %v11685_v21, %v11671_v54 }
 0x4c3   :  { %v5156_v17 = vpop.f32.mrf.mxu1 }
 0x4c4   :  { %v11699_v42 = vadd.f32 %v5156_v17, %v5047_v23  ;;  %v5239_v40 = vsel %vm1109_vm2, %v11703_v8, 0.0 }
 0x4c5   :  { %v7019_v14 = vpop.f32.mrf.mxu1 }
 0x4c6   :  { %v5235_v41 = vsel %vm1109_vm2, %v11699_v42, 0.0  ;;  %v11715_v45 = vadd.f32 %v7019_v14, %v5052_v4 }
 0x4c7   :  { %v5236_v60 = vadd.f32 %v5235_v41, %v5234_v38  ;;  %v5169_v11 = vpop.f32.mrf.mxu1 }
 0x4c8   :  { %v11710_v52 = vadd.f32 %v5169_v11, %v5050_v24  ;;  %v5245_v44 = vsel %vm1109_vm2, %v11715_v45, 0.0  ;;  %v5058_v24 = vadd.f32 %v5031_v0, %v4887_v63  ;;  %v5059_v11 = vadd.f32 %v11691_v25, %v4888_v39 }
 0x4c9   :  { %v5238_v48 = vadd.f32 %v5237_v22, %v5236_v60  ;;  %v7020_v31 = vpop.f32.mrf.mxu1  ;;  %v5060_v60 = vadd.f32 %v11687_v36, %v11679_v51 }
 0x4ca   :  { %v5241_v18 = vsel %vm1109_vm2, %v11710_v52, 0.0  ;;  %v11721_v29 = vadd.f32 %v7020_v31, %v5053_v2 }
 0x4cb   :  { %v5240_v26 = vadd.f32 %v5239_v40, %v5238_v48  ;;  %v5172_v50 = vpop.f32.mrf.mxu1  ;;  %v5061_v48 = vadd.f32 %v11689_v56, %v11683_v46 }
 0x4cc   :  { %v11719_v28 = vadd.f32 %v5172_v50, %v5051_v27  ;;  %v5247_v34 = vsel %vm1109_vm2, %v11721_v29, 0.0 }
 0x4cd   :  { %v5242_v5 = vadd.f32 %v5241_v18, %v5240_v26  ;;  %v7023_v6 = vpop.f32.mrf.mxu1 }
 0x4ce   :  { %v5243_v16 = vsel %vm1109_vm2, %v11719_v28, 0.0  ;;  %v5226_v7 = vadd.f32 %v7023_v6, %v5056_v32  ;;  %v5535_v6 = vld [vmem:[%s12553_s10] sm:$0x1] }
 0x4cf   :  { %v5244_v33 = vadd.f32 %v5243_v16, %v5242_v5  ;;  %v5185_v62 = vpop.f32.mrf.mxu1 }
 0x4d0   :  { %v11729_v13 = vadd.f32 %v5185_v62, %v5054_v55  ;;  %v5253_v20 = vsel %vm1109_vm2, %v5226_v7, 0.0  ;;  %v5549_v55 = vsel %vm5547_vm4, %v5535_v6, 0 }
 0x4d1   :  { %v5246_v35 = vadd.f32 %v5245_v44, %v5244_v33  ;;  %v7024_v9 = vpop.f32.mrf.mxu1  ;;  %7036 = vmatpush3.bf16.msra.mxu1 %v5549_v55 }
 0x4d2   :  { %v5249_v17 = vsel %vm1109_vm2, %v11729_v13, 0.0  ;;  %v5227_v19 = vadd.f32 %v7024_v9, %v5057_v1 }
 0x4d3   :  { %v5248_v49 = vadd.f32 %v5247_v34, %v5246_v35  ;;  %v5188_v23 = vpop.f32.mrf.mxu1 }
 0x4d4   :  { %v5225_v37 = vadd.f32 %v5188_v23, %v5055_v58  ;;  %v5255_v0 = vsel %vm1109_vm2, %v5227_v19, 0.0 }
 0x4d5   :  { %v5250_v53 = vadd.f32 %v5249_v17, %v5248_v49  ;;  %v7027_v14 = vpop.f32.mrf.mxu1 }
 0x4d6   :  { %v5251_v57 = vsel %vm1109_vm2, %v5225_v37, 0.0  ;;  %v5230_v31 = vadd.f32 %v7027_v14, %v5060_v60 }
 0x4d7   :  { %v5252_v30 = vadd.f32 %v5251_v57, %v5250_v53  ;;  %v5201_v38 = vpop.f32.mrf.mxu1 }
 0x4d8   :  { %v5228_v41 = vadd.f32 %v5201_v38, %v5058_v24  ;;  %v5261_v51 = vsel %vm1109_vm2, %v5230_v31, 0.0 }
 0x4d9   :  { %v5254_v43 = vadd.f32 %v5253_v20, %v5252_v30  ;;  %v7028_v15 = vpop.f32.mrf.mxu1 }
 0x4da   :  { %v5257_v54 = vsel %vm1109_vm2, %v5228_v41, 0.0  ;;  %v5231_v27 = vadd.f32 %v7028_v15, %v5061_v48 }
 0x4db   :  { %v5256_v61 = vadd.f32 %v5255_v0, %v5254_v43  ;;  %v5204_v22 = vpop.f32.mrf.mxu1 }
 0x4dc   :  { %v5229_v21 = vadd.f32 %v5204_v22, %v5059_v11  ;;  %v5263_v25 = vsel %vm1109_vm2, %v5231_v27, 0.0 }
 0x4dd   :  { %v5258_v4 = vadd.f32 %v5257_v54, %v5256_v61 }
 0x4de   :  { %v5259_v40 = vsel %vm1109_vm2, %v5229_v21, 0.0 }
 0x4df   :  { %v5260_v12 = vadd.f32 %v5259_v40, %v5258_v4 }
 0x4e1   :  { %v5262_v36 = vadd.f32 %v5261_v51, %v5260_v12 }
 0x4e3   :  { %v5264_v26 = vadd.f32 %v5263_v25, %v5262_v36 }
 0x4e5   :  { %v5265_v50 = vrot.slane %v5264_v26, 4 }
 0x4e7   :  { %v5266_v2 = vadd.f32 %v5265_v50, %v5264_v26 }
 0x4e9   :  { %v5267_v18 = vrot.slane %v5266_v2, 2 }
 0x4eb   :  { %v5268_v46 = vadd.f32 %v5267_v18, %v5266_v2 }
 0x4ed   :  { %v5269_v56 = vrot.slane %v5268_v46, 1 }
 0x4ef   :  { %v5270_v5 = vadd.f32 %v5269_v56, %v5268_v46 }
 0x4f1   :  { %v5272_v16 = vmul.f32 0.0078125, %v5270_v5 }
 0x4f3   :  { %v11759_v33 = vsub.f32 %v11694_v10, %v5272_v16  ;;  %v11762_v62 = vsub.f32 %v11699_v42, %v5272_v16  ;;  %v11765_v59 = vsub.f32 %v11697_v3, %v5272_v16  ;;  %v11768_v47 = vsub.f32 %v11703_v8, %v5272_v16 }
 0x4f4   :  { %v11771_v44 = vsub.f32 %v11710_v52, %v5272_v16  ;;  %v11774_v35 = vsub.f32 %v11719_v28, %v5272_v16  ;;  %v11777_v9 = vsub.f32 %v11715_v45, %v5272_v16  ;;  %v11780_v10 = vsub.f32 %v11721_v29, %v5272_v16 }
 0x4f5   :  { %v11783_v42 = vsub.f32 %v11729_v13, %v5272_v16  ;;  %v11785_v3 = vsub.f32 %v5225_v37, %v5272_v16  ;;  %v11787_v32 = vsub.f32 %v5226_v7, %v5272_v16  ;;  %v11789_v8 = vsub.f32 %v5227_v19, %v5272_v16 }
 0x4f6   :  { %v11791_v52 = vsub.f32 %v5228_v41, %v5272_v16  ;;  %v11793_v58 = vsub.f32 %v5229_v21, %v5272_v16  ;;  %v11795_v28 = vsub.f32 %v5230_v31, %v5272_v16  ;;  %v11797_v45 = vsub.f32 %v5231_v27, %v5272_v16 }
 0x4f7   :  { %v5289_v29 = vmul.f32 %v11759_v33, %v11759_v33  ;;  %v5290_v13 = vmul.f32 %v11762_v62, %v11762_v62  ;;  %v5291_v34 = vmul.f32 %v11765_v59, %v11765_v59  ;;  %v5292_v63 = vmul.f32 %v11768_v47, %v11768_v47 }
 0x4f8   :  { %v5293_v7 = vmul.f32 %v11771_v44, %v11771_v44  ;;  %v5294_v53 = vmul.f32 %v11774_v35, %v11774_v35  ;;  %v5295_v19 = vmul.f32 %v11777_v9, %v11777_v9  ;;  %v5296_v38 = vmul.f32 %v11780_v10, %v11780_v10 }
 0x4f9   :  { %v5305_v49 = vsel %vm1109_vm2, %v5289_v29, 0.0  ;;  %v5306_v23 = vsel %vm1109_vm2, %v5290_v13, 0.0  ;;  %v5308_v17 = vsel %vm1109_vm2, %v5291_v34, 0.0  ;;  %v5310_v14 = vsel %vm1109_vm2, %v5292_v63, 0.0 }
 0x4fa   :  { %v5307_v1 = vadd.f32 %v5306_v23, %v5305_v49  ;;  %v5312_v57 = vsel %vm1109_vm2, %v5293_v7, 0.0  ;;  %v5314_v39 = vsel %vm1109_vm2, %v5294_v53, 0.0  ;;  %v5297_v41 = vmul.f32 %v11783_v42, %v11783_v42 }
 0x4fb   :  { %v5316_v43 = vsel %vm1109_vm2, %v5295_v19, 0.0  ;;  %v5298_v60 = vmul.f32 %v11785_v3, %v11785_v3  ;;  %v5318_v11 = vsel %vm1109_vm2, %v5296_v38, 0.0  ;;  %v5299_v61 = vmul.f32 %v11787_v32, %v11787_v32 }
 0x4fc   :  { %v5309_v37 = vadd.f32 %v5308_v17, %v5307_v1  ;;  %v5320_v22 = vsel %vm1109_vm2, %v5297_v41, 0.0  ;;  %v5300_v31 = vmul.f32 %v11789_v8, %v11789_v8  ;;  %v5301_v4 = vmul.f32 %v11791_v52, %v11791_v52 }
 0x4fd   :  { %v5322_v54 = vsel %vm1109_vm2, %v5298_v60, 0.0  ;;  %v5324_v27 = vsel %vm1109_vm2, %v5299_v61, 0.0  ;;  %v5302_v12 = vmul.f32 %v11793_v58, %v11793_v58  ;;  %v5303_v25 = vmul.f32 %v11795_v28, %v11795_v28 }
 0x4fe   :  { %v5311_v24 = vadd.f32 %v5310_v14, %v5309_v37  ;;  %v5326_v51 = vsel %vm1109_vm2, %v5300_v31, 0.0  ;;  %v5328_v26 = vsel %vm1109_vm2, %v5301_v4, 0.0  ;;  %v5304_v2 = vmul.f32 %v11797_v45, %v11797_v45 }
 0x4ff   :  { %v5330_v18 = vsel %vm1109_vm2, %v5302_v12, 0.0  ;;  %v5332_v56 = vsel %vm1109_vm2, %v5303_v25, 0.0 }
 0x500   :  { %v5313_v30 = vadd.f32 %v5312_v57, %v5311_v24  ;;  %v5334_v6 = vsel %vm1109_vm2, %v5304_v2, 0.0  ;;  %v6500_v24 = vld [vmem:[%s12554_s6] ss:$0 sm:$0xff] }
 0x502   :  { %v5315_v20 = vadd.f32 %v5314_v39, %v5313_v30 }
 0x504   :  { %v5317_v15 = vadd.f32 %v5316_v43, %v5315_v20 }
 0x506   :  { %v5319_v0 = vadd.f32 %v5318_v11, %v5317_v15 }
 0x508   :  { %v5321_v48 = vadd.f32 %v5320_v22, %v5319_v0 }
 0x50a   :  { %v5323_v21 = vadd.f32 %v5322_v54, %v5321_v48 }
 0x50c   :  { %v5325_v40 = vadd.f32 %v5324_v27, %v5323_v21 }
 0x50e   :  { %v5327_v36 = vadd.f32 %v5326_v51, %v5325_v40 }
 0x510   :  { %v5329_v50 = vadd.f32 %v5328_v26, %v5327_v36 }
 0x512   :  { %v5331_v46 = vadd.f32 %v5330_v18, %v5329_v50 }
 0x514   :  { %v5333_v5 = vadd.f32 %v5332_v56, %v5331_v46 }
 0x516   :  { %v5335_v55 = vadd.f32 %v5334_v6, %v5333_v5 }
 0x518   :  { %v5336_v16 = vrot.slane %v5335_v55, 4 }
 0x51a   :  { %v5337_v29 = vadd.f32 %v5336_v16, %v5335_v55 }
 0x51c   :  { %v5338_v13 = vrot.slane %v5337_v29, 2 }
 0x51e   :  { %v5339_v34 = vadd.f32 %v5338_v13, %v5337_v29 }
 0x520   :  { %v5340_v63 = vrot.slane %v5339_v34, 1 }
 0x522   :  { %v5341_v49 = vadd.f32 %v5340_v63, %v5339_v34 }
 0x524   :  { %v5342_v23 = vmul.f32 0.0078125, %v5341_v49 }
 0x526   :  { %v5343_v1 = vadd.f32 1e-05, %v5342_v23 }
 0x528   :  { %7098 = vrsqrt.f32 %v5343_v1 }
 0x535   :  { %v7099_v7 = vpop.eup %7098 }
 0x536   :  { %v5345_v17 = vmul.f32 %v7099_v7, %v11759_v33  ;;  %v5346_v37 = vmul.f32 %v7099_v7, %v11762_v62  ;;  %v5347_v53 = vmul.f32 %v7099_v7, %v11765_v59  ;;  %v5348_v14 = vmul.f32 %v7099_v7, %v11768_v47 }
 0x537   :  { %v5349_v19 = vmul.f32 %v7099_v7, %v11771_v44  ;;  %v5350_v57 = vmul.f32 %v7099_v7, %v11774_v35  ;;  %v5351_v30 = vmul.f32 %v7099_v7, %v11777_v9  ;;  %v5352_v38 = vmul.f32 %v7099_v7, %v11780_v10  ;;  %v6501_v10 = vld [vmem:[%s12555_s7] ss:$0 sm:$0xff] }
 0x538   :  { %v5353_v33 = vmul.f32 %v7099_v7, %v11783_v42  ;;  %v5354_v62 = vmul.f32 %v7099_v7, %v11785_v3  ;;  %v5355_v59 = vmul.f32 %v7099_v7, %v11787_v32  ;;  %v5356_v47 = vmul.f32 %v7099_v7, %v11789_v8 }
 0x539   :  { %v5357_v39 = vmul.f32 %v7099_v7, %v11791_v52  ;;  %v5358_v20 = vmul.f32 %v7099_v7, %v11793_v58  ;;  %v5359_v44 = vmul.f32 %v7099_v7, %v11795_v28  ;;  %v5360_v35 = vmul.f32 %v7099_v7, %v11797_v45 }
 0x53a   :  { %v5367_v41 = vmul.f32 %v6500_v24, %v5345_v17  ;;  %v5368_v9 = vmul.f32 %v6500_v24, %v5346_v37  ;;  %v5369_v42 = vmul.f32 %v6500_v24, %v5347_v53  ;;  %v5375_v3 = vmul.f32 %v6500_v24, %v5353_v33 }
 0x53b   :  { %v5376_v43 = vmul.f32 %v6500_v24, %v5354_v62  ;;  %v5370_v32 = vmul.f32 %v6500_v24, %v5348_v14  ;;  %v5377_v15 = vmul.f32 %v6500_v24, %v5355_v59  ;;  %v5371_v58 = vmul.f32 %v6500_v24, %v5349_v19 }
 0x53c   :  { %v11869_v8 = vadd.f32 %v6501_v10, %v5367_v41  ;;  %v11871_v52 = vadd.f32 %v6501_v10, %v5368_v9  ;;  %v5378_v60 = vmul.f32 %v6500_v24, %v5356_v47  ;;  %v11873_v28 = vadd.f32 %v6501_v10, %v5369_v42 }
 0x53d   :  { %v11875_v45 = vadd.f32 %v6501_v10, %v5375_v3  ;;  %v11877_v11 = vadd.f32 %v6501_v10, %v5376_v43  ;;  %v5372_v0 = vmul.f32 %v6500_v24, %v5350_v57  ;;  %v5379_v61 = vmul.f32 %v6500_v24, %v5357_v39 }
 0x53e   :  { %v11879_v22 = vadd.f32 %v6501_v10, %v5370_v32  ;;  %v11881_v48 = vadd.f32 %v6501_v10, %v5377_v15  ;;  %v5405_v31 = vmax.f32 %v11869_v8, 0.0  ;;  %v5406_v54 = vmax.f32 %v11871_v52, 0.0 }
 0x53f   :  { %v5373_v21 = vmul.f32 %v6500_v24, %v5351_v30  ;;  %v5374_v4 = vmul.f32 %v6500_v24, %v5352_v38  ;;  %v5380_v27 = vmul.f32 %v6500_v24, %v5358_v20  ;;  %v11885_v40 = vadd.f32 %v6501_v10, %v5371_v58 }
 0x540   :  { %v11887_v12 = vadd.f32 %v6501_v10, %v5378_v60  ;;  %v5407_v51 = vmax.f32 %v11873_v28, 0.0  ;;  %v5413_v36 = vmax.f32 %v11875_v45, 0.0  ;;  %v5414_v25 = vmax.f32 %v11877_v11, 0.0 }
 0x541   :  { %v5381_v26 = vmul.f32 %v6500_v24, %v5359_v44  ;;  %v5382_v50 = vmul.f32 %v6500_v24, %v5360_v35  ;;  %v11892_v2 = vadd.f32 %v6501_v10, %v5372_v0  ;;  %v11894_v18 = vadd.f32 %v6501_v10, %v5379_v61 }
 0x542   :  { %v5408_v46 = vmax.f32 %v11879_v22, 0.0  ;;  %v5415_v56 = vmax.f32 %v11881_v48, 0.0  ;;  %v5421_v5 = vsel %vm1109_vm2, %v5405_v31, 0.0  ;;  %v5422_v6 = vsel %vm1109_vm2, %v5406_v54, 0.0 }
 0x543   :  { %v11904_v55 = vadd.f32 %v6501_v10, %v5373_v21  ;;  %v11906_v16 = vadd.f32 %v6501_v10, %v5380_v27  ;;  %v5409_v29 = vmax.f32 %v11885_v40, 0.0  ;;  %v5423_v13 = vadd.f32 %v5422_v6, %v5421_v5 }
 0x544   :  { %v5416_v34 = vmax.f32 %v11887_v12, 0.0  ;;  %v5424_v63 = vsel %vm1109_vm2, %v5407_v51, 0.0  ;;  %v5442_v49 = vsel %vm1109_vm2, %v5413_v36, 0.0  ;;  %v5443_v23 = vsel %vm1109_vm2, %v5414_v25, 0.0 }
 0x545   :  { %v11919_v1 = vadd.f32 %v6501_v10, %v5374_v4  ;;  %v11921_v7 = vadd.f32 %v6501_v10, %v5381_v26  ;;  %v5425_v17 = vadd.f32 %v5424_v63, %v5423_v13  ;;  %v5444_v37 = vadd.f32 %v5443_v23, %v5442_v49 }
 0x546   :  { %v5410_v53 = vmax.f32 %v11892_v2, 0.0  ;;  %v5417_v14 = vmax.f32 %v11894_v18, 0.0  ;;  %v5426_v24 = vsel %vm1109_vm2, %v5408_v46, 0.0  ;;  %v5445_v19 = vsel %vm1109_vm2, %v5415_v56, 0.0 }
 0x547   :  { %v11931_v57 = vadd.f32 %v6501_v10, %v5382_v50  ;;  %v5427_v30 = vadd.f32 %v5426_v24, %v5425_v17  ;;  %v5446_v38 = vadd.f32 %v5445_v19, %v5444_v37  ;;  %v5411_v33 = vmax.f32 %v11904_v55, 0.0 }
 0x548   :  { %v5418_v62 = vmax.f32 %v11906_v16, 0.0  ;;  %v5428_v59 = vsel %vm1109_vm2, %v5409_v29, 0.0  ;;  %v5447_v47 = vsel %vm1109_vm2, %v5416_v34, 0.0  ;;  %v5412_v44 = vmax.f32 %v11919_v1, 0.0 }
 0x549   :  { %v5429_v39 = vadd.f32 %v5428_v59, %v5427_v30  ;;  %v5448_v20 = vadd.f32 %v5447_v47, %v5446_v38  ;;  %v5419_v35 = vmax.f32 %v11921_v7, 0.0  ;;  %v5430_v41 = vsel %vm1109_vm2, %v5410_v53, 0.0 }
 0x54a   :  { %v5449_v9 = vsel %vm1109_vm2, %v5417_v14, 0.0  ;;  %v5420_v3 = vmax.f32 %v11931_v57, 0.0  ;;  %v5432_v43 = vsel %vm1109_vm2, %v5411_v33, 0.0  ;;  %v5451_v32 = vsel %vm1109_vm2, %v5418_v62, 0.0 }
 0x54b   :  { %v5431_v10 = vadd.f32 %v5430_v41, %v5429_v39  ;;  %v5450_v42 = vadd.f32 %v5449_v9, %v5448_v20  ;;  %v5434_v60 = vsel %vm1109_vm2, %v5412_v44, 0.0  ;;  %v5453_v0 = vsel %vm1109_vm2, %v5419_v35, 0.0 }
 0x54c   :  { %v5455_v4 = vsel %vm1109_vm2, %v5420_v3, 0.0 }
 0x54d   :  { %v5433_v15 = vadd.f32 %v5432_v43, %v5431_v10  ;;  %v5452_v58 = vadd.f32 %v5451_v32, %v5450_v42  ;;  %v6508_v10 = vld [vmem:[%s12763_s19 + $0x360] sm:$0xff]  ;;  %v6509_v42 = vld [vmem:[%s12763_s19 + $0x370] sm:$0xff] }
 0x54e   :  { %v6510_v43 = vld [vmem:[%s12763_s19 + $0x380] sm:$0xff] }
 0x54f   :  { %v5435_v61 = vadd.f32 %v5434_v60, %v5433_v15  ;;  %v5454_v21 = vadd.f32 %v5453_v0, %v5452_v58  ;;  %v5671_v32 = vld [vmem:[%s12556_s15] sm:$0xf]  ;;  %v5663_v15 = vpack.c.bf16 %v6509_v42, %v6508_v10  ;;  %v6511_v58 = vld [vmem:[%s12763_s19 + $0x390] sm:$0xff] }
 0x550   :  { %v6512_v60 = vld [vmem:[%s12763_s19 + $0x3a0] sm:$0xff]  ;;  %7078 = vmatprep.subr.msk.bf16.mxu0 %vm494_vm0, %v5671_v32  ;;  %v5697_v0 = vsel %vm494_vm0, %v5671_v32, 0 }
 0x551   :  { %v5436_v27 = vrot.slane %v5435_v61, 4  ;;  %v5456_v26 = vadd.f32 %v5455_v4, %v5454_v21  ;;  %v6513_v21 = vld [vmem:[%s12763_s19 + $0x3b0] sm:$0xff]  ;;  %v6505_v32 = vld [vmem:[%s12559_s11] ss:$0 sm:$0xff] }
 0x552   :  { %v5665_v4 = vpack.c.bf16 %v6513_v21, %v6512_v60 }
 0x553   :  { %v5457_v50 = vrot.slane %v5456_v26, 4  ;;  %v5437_v5 = vadd.f32 %v5436_v27, %v5435_v61  ;;  %v5664_v61 = vpack.c.bf16 %v6511_v58, %v6510_v43  ;;  %v6514_v27 = vld [vmem:[%s12763_s19 + $0x3c0] sm:$0xff] }
 0x554   :  { %v7095_v43 = vld [vmem:[%s12558_s12] sm:$0xff]  }
 0x555   :  { %v5458_v6 = vadd.f32 %v5457_v50, %v5456_v26  ;;  %v5438_v13 = vrot.slane %v5437_v5, 2  ;;  %v6515_v26 = vld [vmem:[%s12763_s19 + $0x3d0] sm:$0xff]  ;;  %7059 = vmatprep.subr.bf16.mxu1 %v7095_v43 }
 0x556   :  { %v6516_v50 = vld [vmem:[%s12763_s19 + $0x3f0] sm:$0xff] }
 0x557   :  { %v5459_v63 = vrot.slane %v5458_v6, 2  ;;  %v5439_v49 = vadd.f32 %v5438_v13, %v5437_v5  ;;  %v6517_v5 = vld [vmem:[%s12763_s19 + $0x400] sm:$0xff] }
 0x558   :  { %v5667_v13 = vpack.c.bf16 %v6517_v5, %v6516_v50  ;;  %v5601_v5 = vlaneseq }
 0x559   :  { %v5460_v23 = vadd.f32 %v5459_v63, %v5458_v6  ;;  %v5440_v17 = vrot.slane %v5439_v49, 1  ;;  %v5666_v6 = vpack.c.bf16 %v6515_v26, %v6514_v27  ;;  %v6518_v63 = vld [vmem:[%s12763_s19 + $0x410] sm:$0xff]  ;;  %v7114_v26 = vmov 1966171168  }
 0x55a   :  { %v5599_v50 = vunpack.c.l.s4 %v7114_v26 }
 0x55b   :  { %v5461_v37 = vrot.slane %v5460_v23, 1  ;;  %v5441_v24 = vadd.f32 %v5440_v17, %v5439_v49  ;;  %v6519_v49 = vld [vmem:[%s12763_s19 + $0x420] sm:$0xff] }
 0x55c   :  { %v6521_v17 = vld [vmem:[%s12763_s19 + $0x440] sm:$0xff] }
 0x55d   :  { %v5462_v19 = vadd.f32 %v5461_v37, %v5460_v23  ;;  %v5464_v30 = vmul.f32 0.015625, %v5441_v24  ;;  %v6520_v23 = vld [vmem:[%s12763_s19 + $0x430] sm:$0xff]  ;;  %v5668_v37 = vpack.c.bf16 %v6519_v49, %v6518_v63 }
 0x55e   :  { %v5669_v24 = vpack.c.bf16 %v6521_v17, %v6520_v23 }
 0x55f   :  { %v5465_v38 = vmul.f32 0.015625, %v5462_v19  ;;  %v5466_v59 = vpack.c.bf16 %v5464_v30, %v5464_v30  ;;  %v6522_v19 = vld [vmem:[%s12763_s19 + $0x450] sm:$0xff]  ;;  %v6523_v30 = vld [vmem:[%s12763_s19 + $0x460] sm:$0xff] }
 0x561   :  { %v5467_v47 = vpack.c.bf16 %v5465_v38, %v5465_v38  ;;  %v5479_v39 = vunpack.c.l.b16 %v5466_v59  ;;  %v5670_v38 = vpack.c.bf16 %v6523_v30, %v6522_v19  ;;  %v6502_v59 = vld [vmem:[%s12557_s9] ss:$0 sm:$0xff] }
 0x563   :  { %v5480_v20 = vunpack.c.l.b16 %v5467_v47 }
 0x565   :  { %v5482_v41 = vsel %vm5481_vm5, %v5480_v20, %v5479_v39 }
 0x566   :  { %v5483_v9 = vpack.c.b16 %v5482_v41, %v5482_v41 }
 0x568   :  { %7032 = vmatmul.mubr.msk.bf16.vlgmr.msra.gmra.mxu0 %vm1109_vm2, %v5483_v9 }
 0x569   :  { %7042 = vmatpush3.bf16.msra.mxu0 %v5697_v0  ;;  %7043 = vmatprep.mubr.msk.bf16.mxu0 %vm277_vm1, %v5663_v15 }
 0x570   :  { %7044 = vmatmul.mubr.msk.bf16.vlgmr.msra.gmra.mxu0 %vm277_vm1, %v5664_v61 }
 0x571   :  { %7047 = vmatprep.mubr.msk.bf16.mxu0 %vm277_vm1, %v5665_v4 }
 0x578   :  { %7048 = vmatmul.mubr.msk.bf16.gmra.mxu0 %vm277_vm1, %v5666_v6  ;;  %v5600_v6 = vunpack.c.0.s8 %v5599_v50 }
 0x579   :  { %7051 = vmatprep.mubr.msk.bf16.mxu0 %vm277_vm1, %v5667_v13  ;;  %v5602_v13 = vshrl.u32 %v5601_v5, 7 }
 0x57b   :  { %v5603_v63 = vsub.s32 %v5600_v6, %v5602_v13  ;;  %v5622_v17 = vsub.s32 0, %v5602_v13 }
 0x580   :  { %7052 = vmatmul.mubr.msk.bf16.gmra.mxu0 %vm277_vm1, %v5668_v37 }
 0x581   :  { %7055 = vmatprep.mubr.msk.bf16.mxu0 %vm277_vm1, %v5669_v24 }
 0x588   :  { %7056 = vmatmul.mubr.msk.bf16.gmra.mxu0 %vm277_vm1, %v5670_v38 }
 0x628   :  { %v5527_v47 = vpop.f32.mrf.mxu0 }
 0x629   :  { %v5528_v39 = vadd.f32 %v6502_v59, %v5527_v47 }
 0x62a   :  { %v7033_v20 = vpop.f32.mrf.mxu0 }
 0x62b   :  { %v5533_v41 = vmax.f32 %v5528_v39, 0.0 }
 0x62c   :  { %v5530_v9 = vpop.f32.mrf.mxu0 }
 0x62d   :  { %v5534_v10 = vpack.c.bf16 %v5533_v41, %v5533_v41 }
 0x62e   :  { %v7034_v42 = vpop.f32.mrf.mxu0 }
 0x62f   :  { %7038 = vmatmul.mubr.msk.bf16.vlgmr.msra.gmra.mxu1 %vm5543_vm6, %v5534_v10 }
 0x630   :  { %7060 = vmatpush3.bf16.msra.mxu1 %v7095_v43  ;;  %v7045_v18 = vpop.f32.mrf.mxu0 }
 0x631   :  { %v5801_v7 = vsel %vm1109_vm2, %v7045_v18, 0.0 }
 0x6ef   :  { %v5585_v15 = vpop.f32.mrf.mxu1 }
 0x6f0   :  { %v5586_v58 = vadd.f32 %v6505_v32, %v5585_v15 }
 0x6f1   :  { %v7039_v60 = vpop.f32.mrf.mxu1 }
 0x6f2   :  { %v6507_v0 = vmul.f32 -1.442695, %v5586_v58 }
 0x6f3   :  { %v5588_v61 = vpop.f32.mrf.mxu1 }
 0x6f4   :  { %7100 = vpow2.f32 %v6507_v0 }
 0x6f5   :  { %v7040_v21 = vpop.f32.mrf.mxu1 }
 0x701   :  { %v7101_v4 = vpop.eup %7100 }
 0x702   :  { %v5594_v27 = vadd.f32 1.0, %v7101_v4 }
 0x704   :  { %7102 = vrcp.f32 %v5594_v27 }
 0x711   :  { %v7103_v49 = vpop.eup %7102 }
 0x712   :  { %v5604_v23 = vrot.slane %v7103_v49, %v5603_v63 }
 0x714   :  { %v5605_v37 = vcombine.high %v5604_v23, %v5604_v23  ;;  %v5612_v24 = vrot.slane %v5604_v23, %v5603_v63 }
 0x716   :  { %v5623_v19 = vrot.slane %v5612_v24, %v5622_v17  ;;  %v5619_v30 = vrot.slane %v5605_v37, %v5603_v63 }
 0x718   :  { %v5630_v38 = vmul.f32 %v5623_v19, %v5405_v31  ;;  %v5631_v59 = vmul.f32 %v5623_v19, %v5406_v54  ;;  %v5632_v47 = vmul.f32 %v5623_v19, %v5407_v51  ;;  %v5633_v39 = vmul.f32 %v5623_v19, %v5408_v46 }
 0x719   :  { %v5634_v20 = vmul.f32 %v5623_v19, %v5409_v29  ;;  %v5635_v41 = vmul.f32 %v5623_v19, %v5410_v53  ;;  %v5627_v42 = vrot.slane %v5619_v30, %v5622_v17  ;;  %v5636_v52 = vmul.f32 %v5623_v19, %v5411_v33 }
 0x71a   :  { %v5968_v9 = vpack.c.bf16 %v5631_v59, %v5630_v38  ;;  %v5969_v10 = vpack.c.bf16 %v5633_v39, %v5632_v47  ;;  %v5637_v28 = vmul.f32 %v5623_v19, %v5412_v44 }
 0x71b   :  { %v5970_v8 = vpack.c.bf16 %v5635_v41, %v5634_v20  ;;  %v5638_v22 = vmul.f32 %v5627_v42, %v5413_v36  ;;  %v5639_v31 = vmul.f32 %v5627_v42, %v5414_v25  ;;  %v5640_v51 = vmul.f32 %v5627_v42, %v5415_v56  ;;  %v5733_v56 = vpop.f32.mrf.mxu0 }
 0x71c   :  { %7061 = vmatprep.mubr.msk.bf16.mxu1 %vm1109_vm2, %v5968_v9  ;;  %v5971_v54 = vpack.c.bf16 %v5637_v28, %v5636_v52  ;;  %v5641_v2 = vmul.f32 %v5627_v42, %v5416_v34  ;;  %v5642_v46 = vmul.f32 %v5627_v42, %v5417_v14  ;;  %v5643_v45 = vmul.f32 %v5627_v42, %v5418_v62 }
 0x71d   :  { %7062 = vmatmul.mubr.msk.bf16.vlgmr.msra.gmra.mxu1 %vm1109_vm2, %v5969_v10  ;;  %v5972_v40 = vpack.c.bf16 %v5639_v31, %v5638_v22  ;;  %v5644_v25 = vmul.f32 %v5627_v42, %v5419_v35  ;;  %v5645_v48 = vmul.f32 %v5627_v42, %v5420_v3  ;;  %v7046_v55 = vpop.f32.mrf.mxu0  ;;  %v5798_v29 = vsel %vm1109_vm2, %v5733_v56, 0.0 }
 0x71e   :  { %7065 = vmatprep.mubr.msk.bf16.mxu1 %vm1109_vm2, %v5970_v8  ;;  %v5973_v11 = vpack.c.bf16 %v5641_v2, %v5640_v51  ;;  %v5974_v36 = vpack.c.bf16 %v5643_v45, %v5642_v46  ;;  %v5803_v57 = vsel %vm1109_vm2, %v7046_v55, 0.0 }
 0x71f   :  { %v5975_v12 = vpack.c.bf16 %v5645_v48, %v5644_v25  ;;  %v5736_v16 = vpop.f32.mrf.mxu0 }
 0x720   :  { %v5799_v34 = vsel %vm1109_vm2, %v5736_v16, 0.0 }
 0x721   :  { %v12078_v1 = vpop.f32.mrf.mxu0  ;;  %v5800_v53 = vadd.f32 %v5799_v34, %v5798_v29 }
 0x722   :  { %v5809_v60 = vsel %vm1109_vm2, %v12078_v1, 0.0 }
 0x723   :  { %v5749_v14 = vpop.f32.mrf.mxu0  ;;  %v5802_v33 = vadd.f32 %v5801_v7, %v5800_v53 }
 0x724   :  { %v5805_v35 = vsel %vm1109_vm2, %v5749_v14, 0.0 }
 0x725   :  { %7066 = vmatmul.mubr.msk.bf16.gmra.mxu1 %vm1109_vm2, %v5971_v54  ;;  %v12082_v62 = vpop.f32.mrf.mxu0  ;;  %v5804_v44 = vadd.f32 %v5803_v57, %v5802_v33 }
 0x726   :  { %7069 = vmatprep.mubr.msk.bf16.mxu1 %vm1109_vm2, %v5972_v40  ;;  %v5811_v21 = vsel %vm1109_vm2, %v12082_v62, 0.0 }
 0x727   :  { %v5752_v3 = vpop.f32.mrf.mxu0  ;;  %v5806_v43 = vadd.f32 %v5805_v35, %v5804_v44 }
 0x728   :  { %v5807_v32 = vsel %vm1109_vm2, %v5752_v3, 0.0 }
 0x729   :  { %v12086_v15 = vpop.f32.mrf.mxu0  ;;  %v5808_v58 = vadd.f32 %v5807_v32, %v5806_v43 }
 0x72a   :  { %v5817_v49 = vsel %vm1109_vm2, %v12086_v15, 0.0 }
 0x72b   :  { %v12090_v0 = vpop.f32.mrf.mxu0  ;;  %v5810_v61 = vadd.f32 %v5809_v60, %v5808_v58 }
 0x72c   :  { %v5813_v26 = vsel %vm1109_vm2, %v12090_v0, 0.0 }
 0x72d   :  { %7070 = vmatmul.mubr.msk.bf16.gmra.mxu1 %vm1109_vm2, %v5973_v11  ;;  %v12094_v4 = vpop.f32.mrf.mxu0  ;;  %v5812_v27 = vadd.f32 %v5811_v21, %v5810_v61 }
 0x72e   :  { %7073 = vmatprep.mubr.msk.bf16.mxu1 %vm1109_vm2, %v5974_v36  ;;  %v5819_v37 = vsel %vm1109_vm2, %v12094_v4, 0.0 }
 0x72f   :  { %v12098_v50 = vpop.f32.mrf.mxu0  ;;  %v5814_v5 = vadd.f32 %v5813_v26, %v5812_v27 }
 0x730   :  { %v5815_v6 = vsel %vm1109_vm2, %v12098_v50, 0.0 }
 0x731   :  { %v12102_v13 = vpop.f32.mrf.mxu0  ;;  %v5816_v63 = vadd.f32 %v5815_v6, %v5814_v5 }
 0x732   :  { %v5825_v20 = vsel %vm1109_vm2, %v12102_v13, 0.0 }
 0x733   :  { %v12106_v23 = vpop.f32.mrf.mxu0  ;;  %v5818_v17 = vadd.f32 %v5817_v49, %v5816_v63 }
 0x734   :  { %v5821_v30 = vsel %vm1109_vm2, %v12106_v23, 0.0 }
 0x735   :  { %7074 = vmatmul.mubr.msk.bf16.gmra.mxu1 %vm1109_vm2, %v5975_v12  ;;  %v12110_v24 = vpop.f32.mrf.mxu0  ;;  %v5820_v19 = vadd.f32 %v5819_v37, %v5818_v17 }
 0x736   :  { %v5827_v9 = vsel %vm1109_vm2, %v12110_v24, 0.0 }
 0x737   :  { %v12114_v38 = vpop.f32.mrf.mxu0  ;;  %v5822_v59 = vadd.f32 %v5821_v30, %v5820_v19 }
 0x738   :  { %v5823_v47 = vsel %vm1109_vm2, %v12114_v38, 0.0 }
 0x739   :  { %v5824_v39 = vadd.f32 %v5823_v47, %v5822_v59 }
 0x73b   :  { %v5826_v41 = vadd.f32 %v5825_v20, %v5824_v39 }
 0x73d   :  { %v5828_v10 = vadd.f32 %v5827_v9, %v5826_v41 }
 0x73f   :  { %v5829_v42 = vrot.slane %v5828_v10, 4 }
 0x741   :  { %v5830_v8 = vadd.f32 %v5829_v42, %v5828_v10 }
 0x743   :  { %v5831_v52 = vrot.slane %v5830_v8, 2 }
 0x745   :  { %v5832_v28 = vadd.f32 %v5831_v52, %v5830_v8 }
 0x747   :  { %v5833_v22 = vrot.slane %v5832_v28, 1 }
 0x749   :  { %v5834_v31 = vadd.f32 %v5833_v22, %v5832_v28 }
 0x74b   :  { %v12122_v54 = vmul.f32 0.0078125, %v5834_v31 }
 0x74d   :  { %v12125_v40 = vsub.f32 %v5733_v56, %v12122_v54  ;;  %v12128_v51 = vsub.f32 %v5736_v16, %v12122_v54  ;;  %v12131_v2 = vsub.f32 %v7045_v18, %v12122_v54  ;;  %v12138_v11 = vsub.f32 %v7046_v55, %v12122_v54 }
 0x74e   :  { %v12147_v56 = vsub.f32 %v5749_v14, %v12122_v54  ;;  %v12157_v7 = vsub.f32 %v5752_v3, %v12122_v54  ;;  %v12174_v60 = vsub.f32 %v12078_v1, %v12122_v54  ;;  %v12189_v1 = vsub.f32 %v12082_v62, %v12122_v54 }
 0x74f   :  { %v5852_v46 = vmul.f32 %v12125_v40, %v12125_v40  ;;  %v5853_v45 = vmul.f32 %v12128_v51, %v12128_v51  ;;  %v5854_v36 = vmul.f32 %v12131_v2, %v12131_v2  ;;  %v5855_v16 = vmul.f32 %v12138_v11, %v12138_v11 }
 0x750   :  { %v5856_v33 = vmul.f32 %v12147_v56, %v12147_v56  ;;  %v5857_v61 = vmul.f32 %v12157_v7, %v12157_v7  ;;  %v5858_v37 = vmul.f32 %v12174_v60, %v12174_v60  ;;  %v12204_v62 = vsub.f32 %v12090_v0, %v12122_v54 }
 0x751   :  { %v5868_v25 = vsel %vm1109_vm2, %v5852_v46, 0.0  ;;  %v5869_v48 = vsel %vm1109_vm2, %v5853_v45, 0.0  ;;  %v5871_v29 = vsel %vm1109_vm2, %v5854_v36, 0.0  ;;  %v5873_v57 = vsel %vm1109_vm2, %v5855_v16, 0.0 }
 0x752   :  { %v5870_v18 = vadd.f32 %v5869_v48, %v5868_v25  ;;  %v5875_v21 = vsel %vm1109_vm2, %v5856_v33, 0.0  ;;  %v5877_v19 = vsel %vm1109_vm2, %v5857_v61, 0.0  ;;  %v5859_v10 = vmul.f32 %v12189_v1, %v12189_v1 }
 0x753   :  { %v5879_v42 = vsel %vm1109_vm2, %v5858_v37, 0.0  ;;  %v12219_v0 = vsub.f32 %v12098_v50, %v12122_v54  ;;  %v5860_v36 = vmul.f32 %v12204_v62, %v12204_v62  ;;  %v12234_v50 = vsub.f32 %v12086_v15, %v12122_v54 }
 0x754   :  { %v5872_v53 = vadd.f32 %v5871_v29, %v5870_v18  ;;  %v5881_v25 = vsel %vm1109_vm2, %v5859_v10, 0.0  ;;  %v12249_v15 = vsub.f32 %v12094_v4, %v12122_v54  ;;  %v12262_v4 = vsub.f32 %v12106_v23, %v12122_v54 }
 0x756   :  { %v5874_v58 = vadd.f32 %v5873_v57, %v5872_v53 }
 0x758   :  { %v5876_v49 = vadd.f32 %v5875_v21, %v5874_v58 }
 0x75a   :  { %v5878_v41 = vadd.f32 %v5877_v19, %v5876_v49 }
 0x75c   :  { %v5880_v46 = vadd.f32 %v5879_v42, %v5878_v41  ;;  %v5863_v41 = vmul.f32 %v12249_v15, %v12249_v15 }
 0x75e   :  { %v5882_v33 = vadd.f32 %v5881_v25, %v5880_v46  ;;  %v5864_v46 = vmul.f32 %v12262_v4, %v12262_v4  ;;  %v5889_v23 = vsel %vm1109_vm2, %v5863_v41, 0.0 }
 0x7dd   :  { %v12144_v12 = vpop.f32.mrf.mxu1 }
 0x7de   :  { %v6110_v3 = vsel %vm1109_vm2, %v12144_v12, 0.0 }
 0x7df   :  { %v12152_v55 = vpop.f32.mrf.mxu1 }
 0x7e0   :  { %v6107_v44 = vsel %vm1109_vm2, %v12152_v55, 0.0 }
 0x7e1   :  { %v12154_v34 = vpop.f32.mrf.mxu1 }
 0x7e2   :  { %v6112_v5 = vsel %vm1109_vm2, %v12154_v34, 0.0 }
 0x7e3   :  { %v12162_v14 = vpop.f32.mrf.mxu1 }
 0x7e4   :  { %v6108_v35 = vsel %vm1109_vm2, %v12162_v14, 0.0 }
 0x7e5   :  { %v6109_v43 = vadd.f32 %v6108_v35, %v6107_v44  ;;  %v12168_v32 = vpop.f32.mrf.mxu1  ;;  %v5861_v44 = vmul.f32 %v12219_v0, %v12219_v0  ;;  %v5883_v35 = vsel %vm1109_vm2, %v5860_v36, 0.0 }
 0x7e6   :  { %v6118_v9 = vsel %vm1109_vm2, %v12168_v32, 0.0 }
 0x7e7   :  { %v6111_v27 = vadd.f32 %v6110_v3, %v6109_v43  ;;  %v12179_v26 = vpop.f32.mrf.mxu1  ;;  %v5885_v49 = vsel %vm1109_vm2, %v5861_v44, 0.0  ;;  %v12285_v44 = vsub.f32 %v12110_v24, %v12122_v54 }
 0x7e8   :  { %v6114_v17 = vsel %vm1109_vm2, %v12179_v26, 0.0 }
 0x7e9   :  { %v6113_v6 = vadd.f32 %v6112_v5, %v6111_v27  ;;  %v12183_v63 = vpop.f32.mrf.mxu1  ;;  %v5884_v27 = vadd.f32 %v5883_v35, %v5882_v33 }
 0x7ea   :  { %v6120_v28 = vsel %vm1109_vm2, %v12183_v63, 0.0 }
 0x7eb   :  { %v6115_v30 = vadd.f32 %v6114_v17, %v6113_v6  ;;  %v12194_v59 = vpop.f32.mrf.mxu1  ;;  %v5862_v6 = vmul.f32 %v12234_v50, %v12234_v50 }
 0x7ec   :  { %v6116_v47 = vsel %vm1109_vm2, %v12194_v59, 0.0 }
 0x7ed   :  { %v6117_v39 = vadd.f32 %v6116_v47, %v6115_v30  ;;  %v12198_v20 = vpop.f32.mrf.mxu1  ;;  %v5886_v47 = vadd.f32 %v5885_v49, %v5884_v27  ;;  %v5867_v27 = vmul.f32 %v12285_v44, %v12285_v44 }
 0x7ee   :  { %v6126_v57 = vsel %vm1109_vm2, %v12198_v20, 0.0 }
 0x7ef   :  { %v6119_v8 = vadd.f32 %v6118_v9, %v6117_v39  ;;  %v12209_v52 = vpop.f32.mrf.mxu1  ;;  %v5887_v9 = vsel %vm1109_vm2, %v5862_v6, 0.0 }
 0x7f0   :  { %v6122_v45 = vsel %vm1109_vm2, %v12209_v52, 0.0 }
 0x7f1   :  { %v6121_v22 = vadd.f32 %v6120_v28, %v6119_v8  ;;  %v12213_v31 = vpop.f32.mrf.mxu1  ;;  %v5888_v28 = vadd.f32 %v5887_v9, %v5886_v47 }
 0x7f2   :  { %v6128_v3 = vsel %vm1109_vm2, %v12213_v31, 0.0 }
 0x7f3   :  { %v6123_v48 = vadd.f32 %v6122_v45, %v6121_v22  ;;  %v12224_v18 = vpop.f32.mrf.mxu1  ;;  %v12271_v22 = vsub.f32 %v12114_v38, %v12122_v54  ;;  %v5890_v25 = vadd.f32 %v5889_v23, %v5888_v28 }
 0x7f4   :  { %v6124_v16 = vsel %vm1109_vm2, %v12224_v18, 0.0 }
 0x7f5   :  { %v6125_v29 = vadd.f32 %v6124_v16, %v6123_v48  ;;  %v12228_v53 = vpop.f32.mrf.mxu1  ;;  %v12278_v48 = vsub.f32 %v12102_v13, %v12122_v54  ;;  %v5865_v16 = vmul.f32 %v12271_v22, %v12271_v22 }
 0x7f6   :  { %v6134_v39 = vsel %vm1109_vm2, %v12228_v53, 0.0 }
 0x7f7   :  { %v6127_v43 = vadd.f32 %v6126_v57, %v6125_v29  ;;  %v12239_v58 = vpop.f32.mrf.mxu1  ;;  %v5891_v29 = vsel %vm1109_vm2, %v5864_v46, 0.0  ;;  %v5866_v35 = vmul.f32 %v12278_v48, %v12278_v48 }
 0x7f8   :  { %v6130_v5 = vsel %vm1109_vm2, %v12239_v58, 0.0  ;;  %v5892_v57 = vadd.f32 %v5891_v29, %v5890_v25 }
 0x7f9   :  { %v6129_v61 = vadd.f32 %v6128_v3, %v6127_v43  ;;  %v12243_v21 = vpop.f32.mrf.mxu1  ;;  %v5893_v43 = vsel %vm1109_vm2, %v5865_v16, 0.0 }
 0x7fa   :  { %v6136_v42 = vsel %vm1109_vm2, %v12243_v21, 0.0 }
 0x7fb   :  { %v6131_v17 = vadd.f32 %v6130_v5, %v6129_v61  ;;  %v12254_v37 = vpop.f32.mrf.mxu1  ;;  %v5894_v61 = vadd.f32 %v5893_v43, %v5892_v57  ;;  %v5895_v5 = vsel %vm1109_vm2, %v5866_v35, 0.0 }
 0x7fc   :  { %v6132_v19 = vsel %vm1109_vm2, %v12254_v37, 0.0 }
 0x7fd   :  { %v6133_v30 = vadd.f32 %v6132_v19, %v6131_v17  ;;  %v5896_v54 = vadd.f32 %v5895_v5, %v5894_v61  ;;  %v5897_v17 = vsel %vm1109_vm2, %v5867_v27, 0.0 }
 0x7ff   :  { %v6135_v10 = vadd.f32 %v6134_v39, %v6133_v30 }
 0x801   :  { %v6137_v8 = vadd.f32 %v6136_v42, %v6135_v10 }
 0x803   :  { %v6138_v45 = vrot.slane %v6137_v8, 4 }
 0x805   :  { %v6139_v36 = vadd.f32 %v6138_v45, %v6137_v8 }
 0x807   :  { %v6140_v33 = vrot.slane %v6139_v36, 2 }
 0x809   :  { %v6141_v38 = vadd.f32 %v6140_v33, %v6139_v36 }
 0x80b   :  { %v6142_v3 = vrot.slane %v6141_v38, 1 }
 0x80d   :  { %v6143_v13 = vadd.f32 %v6142_v3, %v6141_v38 }
 0x80f   :  { %v6144_v6 = vmul.f32 0.0078125, %v6143_v13 }
 0x811   :  { %v12294_v49 = vsub.f32 %v12152_v55, %v6144_v6  ;;  %v12297_v24 = vsub.f32 %v12162_v14, %v6144_v6  ;;  %v12301_v19 = vsub.f32 %v12144_v12, %v6144_v6  ;;  %v12304_v30 = vsub.f32 %v12154_v34, %v6144_v6 }
 0x812   :  { %v5898_v55 = vadd.f32 %v5897_v17, %v5896_v54  ;;  %v12311_v41 = vsub.f32 %v12179_v26, %v6144_v6  ;;  %v12316_v9 = vsub.f32 %v12194_v59, %v6144_v6  ;;  %v12323_v28 = vsub.f32 %v12168_v32, %v6144_v6 }
 0x813   :  { %v6161_v47 = vmul.f32 %v12294_v49, %v12294_v49  ;;  %v6162_v39 = vmul.f32 %v12297_v24, %v12297_v24  ;;  %v6163_v14 = vmul.f32 %v12301_v19, %v12301_v19  ;;  %v6164_v12 = vmul.f32 %v12304_v30, %v12304_v30 }
 0x814   :  { %v5899_v42 = vrot.slane %v5898_v55, 4  ;;  %v6165_v26 = vmul.f32 %v12311_v41, %v12311_v41  ;;  %v12329_v59 = vsub.f32 %v12183_v63, %v6144_v6  ;;  %v6166_v45 = vmul.f32 %v12316_v9, %v12316_v9 }
 0x815   :  { %v6177_v34 = vsel %vm1109_vm2, %v6161_v47, 0.0  ;;  %v6178_v10 = vsel %vm1109_vm2, %v6162_v39, 0.0  ;;  %v6180_v46 = vsel %vm1109_vm2, %v6163_v14, 0.0  ;;  %v6182_v36 = vsel %vm1109_vm2, %v6164_v12, 0.0 }
 0x816   :  { %v6179_v8 = vadd.f32 %v6178_v10, %v6177_v34  ;;  %v5900_v25 = vadd.f32 %v5899_v42, %v5898_v55  ;;  %v12335_v29 = vsub.f32 %v12209_v52, %v6144_v6  ;;  %v6167_v32 = vmul.f32 %v12323_v28, %v12323_v28 }
 0x817   :  { %v6184_v33 = vsel %vm1109_vm2, %v6165_v26, 0.0  ;;  %v12341_v57 = vsub.f32 %v12224_v18, %v6144_v6  ;;  %v6168_v63 = vmul.f32 %v12329_v59, %v12329_v59  ;;  %v6186_v35 = vsel %vm1109_vm2, %v6166_v45, 0.0 }
 0x818   :  { %v6181_v23 = vadd.f32 %v6180_v46, %v6179_v8  ;;  %v5901_v43 = vrot.slane %v5900_v25, 2  ;;  %v12347_v13 = vsub.f32 %v12198_v20, %v6144_v6  ;;  %v6169_v52 = vmul.f32 %v12335_v29, %v12335_v29 }
 0x819   :  { %v6188_v61 = vsel %vm1109_vm2, %v6167_v32, 0.0  ;;  %v12353_v5 = vsub.f32 %v12213_v31, %v6144_v6  ;;  %v6170_v18 = vmul.f32 %v12341_v57, %v12341_v57  ;;  %v6190_v54 = vsel %vm1109_vm2, %v6168_v63, 0.0 }
 0x81a   :  { %v6183_v16 = vadd.f32 %v6182_v36, %v6181_v23  ;;  %v5902_v17 = vadd.f32 %v5901_v43, %v5900_v25  ;;  %v12359_v39 = vsub.f32 %v12239_v58, %v6144_v6  ;;  %v6171_v20 = vmul.f32 %v12347_v13, %v12347_v13 }
 0x81b   :  { %v6192_v55 = vsel %vm1109_vm2, %v6169_v52, 0.0  ;;  %v12365_v12 = vsub.f32 %v12254_v37, %v6144_v6  ;;  %v6172_v31 = vmul.f32 %v12353_v5, %v12353_v5  ;;  %v6194_v34 = vsel %vm1109_vm2, %v6170_v18, 0.0 }
 0x81c   :  { %v6185_v38 = vadd.f32 %v6184_v33, %v6183_v16  ;;  %v5903_v10 = vrot.slane %v5902_v17, 1  ;;  %v12371_v8 = vsub.f32 %v12228_v53, %v6144_v6  ;;  %v6173_v58 = vmul.f32 %v12359_v39, %v12359_v39 }
 0x81d   :  { %v6196_v26 = vsel %vm1109_vm2, %v6171_v20, 0.0  ;;  %v12377_v23 = vsub.f32 %v12243_v21, %v6144_v6  ;;  %v6174_v37 = vmul.f32 %v12365_v12, %v12365_v12  ;;  %v6198_v45 = vsel %vm1109_vm2, %v6172_v31, 0.0 }
 0x81e   :  { %v6187_v3 = vadd.f32 %v6186_v35, %v6185_v38  ;;  %v5904_v36 = vadd.f32 %v5903_v10, %v5902_v17  ;;  %v6175_v53 = vmul.f32 %v12371_v8, %v12371_v8  ;;  %v6200_v16 = vsel %vm1109_vm2, %v6173_v58, 0.0  ;;  %v6532_v58 = vld [vmem:[%s12560_s16] ss:$0 sm:$0xff] }
 0x81f   :  { %v6176_v33 = vmul.f32 %v12377_v23, %v12377_v23  ;;  %v6202_v38 = vsel %vm1109_vm2, %v6174_v37, 0.0 }
 0x820   :  { %v6189_v27 = vadd.f32 %v6188_v61, %v6187_v3  ;;  %v5905_v21 = vmul.f32 0.0078125, %v5904_v36  ;;  %v6204_v63 = vsel %vm1109_vm2, %v6175_v53, 0.0 }
 0x821   :  { %v6206_v43 = vsel %vm1109_vm2, %v6176_v33, 0.0 }
 0x822   :  { %v6191_v47 = vadd.f32 %v6190_v54, %v6189_v27  ;;  %v5906_v3 = vadd.f32 1e-05, %v5905_v21 }
 0x824   :  { %v6193_v14 = vadd.f32 %v6192_v55, %v6191_v47  ;;  %7104 = vrsqrt.f32 %v5906_v3 }
 0x826   :  { %v6195_v42 = vadd.f32 %v6194_v34, %v6193_v14 }
 0x828   :  { %v6197_v46 = vadd.f32 %v6196_v26, %v6195_v42 }
 0x82a   :  { %v6199_v25 = vadd.f32 %v6198_v45, %v6197_v46 }
 0x82c   :  { %v6201_v32 = vadd.f32 %v6200_v16, %v6199_v25 }
 0x82e   :  { %v6203_v6 = vadd.f32 %v6202_v38, %v6201_v32 }
 0x830   :  { %v6205_v35 = vadd.f32 %v6204_v63, %v6203_v6 }
 0x831   :  { %v7105_v14 = vpop.eup %7104 }
 0x832   :  { %v6207_v52 = vadd.f32 %v6206_v43, %v6205_v35  ;;  %v5908_v31 = vmul.f32 %v7105_v14, %v12125_v40  ;;  %v5909_v34 = vmul.f32 %v7105_v14, %v12128_v51  ;;  %v5910_v10 = vmul.f32 %v7105_v14, %v12131_v2 }
 0x833   :  { %v5911_v42 = vmul.f32 %v7105_v14, %v12138_v11  ;;  %v5912_v26 = vmul.f32 %v7105_v14, %v12147_v56  ;;  %v5913_v46 = vmul.f32 %v7105_v14, %v12157_v7  ;;  %v5914_v37 = vmul.f32 %v7105_v14, %v12174_v60 }
 0x834   :  { %v6208_v61 = vrot.slane %v6207_v52, 4  ;;  %v5915_v45 = vmul.f32 %v7105_v14, %v12189_v1  ;;  %v5916_v40 = vmul.f32 %v7105_v14, %v12204_v62  ;;  %v5917_v51 = vmul.f32 %v7105_v14, %v12219_v0  ;;  %v6533_v62 = vld [vmem:[%s12561_s17] ss:$0 sm:$0xff] }
 0x835   :  { %v5918_v2 = vmul.f32 %v7105_v14, %v12234_v50  ;;  %v5919_v11 = vmul.f32 %v7105_v14, %v12249_v15  ;;  %v5920_v36 = vmul.f32 %v7105_v14, %v12262_v4  ;;  %v5921_v25 = vmul.f32 %v7105_v14, %v12271_v22 }
 0x836   :  { %v6209_v27 = vadd.f32 %v6208_v61, %v6207_v52  ;;  %v5922_v56 = vmul.f32 %v7105_v14, %v12278_v48  ;;  %v5923_v7 = vmul.f32 %v7105_v14, %v12285_v44  ;;  %v5930_v53 = vmul.f32 %v6532_v58, %v5908_v31 }
 0x837   :  { %v5931_v60 = vmul.f32 %v6532_v58, %v5909_v34  ;;  %v5932_v16 = vmul.f32 %v6532_v58, %v5910_v10  ;;  %v5933_v1 = vmul.f32 %v6532_v58, %v5911_v42  ;;  %v5934_v0 = vmul.f32 %v6532_v58, %v5912_v26 }
 0x838   :  { %v6210_v18 = vrot.slane %v6209_v27, 2  ;;  %v5935_v50 = vmul.f32 %v6532_v58, %v5913_v46  ;;  %v5936_v32 = vmul.f32 %v6532_v58, %v5914_v37  ;;  %v5937_v15 = vmul.f32 %v6532_v58, %v5915_v45  ;;  %v6543_v37 = vld [vmem:[%s12562_s13] ss:$0 sm:$0xff] }
 0x839   :  { %v5938_v33 = vmul.f32 %v6532_v58, %v5916_v40  ;;  %v5939_v4 = vmul.f32 %v6532_v58, %v5917_v51  ;;  %v5940_v38 = vmul.f32 %v6532_v58, %v5918_v2  ;;  %v5941_v22 = vmul.f32 %v6532_v58, %v5919_v11 }
 0x83a   :  { %v6211_v54 = vadd.f32 %v6210_v18, %v6209_v27  ;;  %v5942_v21 = vmul.f32 %v6532_v58, %v5920_v36  ;;  %v5943_v48 = vmul.f32 %v6532_v58, %v5921_v25  ;;  %v5944_v6 = vmul.f32 %v6532_v58, %v5922_v56 }
 0x83b   :  { %v5945_v44 = vmul.f32 %v6532_v58, %v5923_v7  ;;  %v12412_v63 = vadd.f32 %v6533_v62, %v5930_v53  ;;  %v12414_v35 = vadd.f32 %v6533_v62, %v5931_v60  ;;  %v12416_v43 = vadd.f32 %v6533_v62, %v5932_v16 }
 0x83c   :  { %v6212_v17 = vrot.slane %v6211_v54, 1  ;;  %v12418_v3 = vadd.f32 %v6533_v62, %v5933_v1  ;;  %v12420_v52 = vadd.f32 %v6533_v62, %v5934_v0  ;;  %v12422_v61 = vadd.f32 %v6533_v62, %v5935_v50 }
 0x83d   :  { %v12424_v27 = vadd.f32 %v6533_v62, %v5936_v32  ;;  %v12426_v18 = vadd.f32 %v6533_v62, %v5937_v15  ;;  %v12436_v14 = vadd.f32 %v6533_v62, %v5942_v21  ;;  %v12438_v31 = vadd.f32 %v6533_v62, %v5943_v48 }
 0x83e   :  { %v6213_v47 = vadd.f32 %v6212_v17, %v6211_v54  ;;  %v12428_v54 = vadd.f32 %v6533_v62, %v5938_v33  ;;  %v12430_v17 = vadd.f32 %v6533_v62, %v5939_v4  ;;  %v12440_v34 = vadd.f32 %v6533_v62, %v5944_v6 }
 0x83f   :  { %v12442_v10 = vadd.f32 %v6533_v62, %v5945_v44 }
 0x840   :  { %v6214_v20 = vmul.f32 0.0078125, %v6213_v47  ;;  %v12432_v47 = vadd.f32 %v6533_v62, %v5940_v38 }
 0x842   :  { %v6215_v55 = vadd.f32 1e-05, %v6214_v20  ;;  %v12434_v20 = vadd.f32 %v6533_v62, %v5941_v22 }
 0x844   :  { %7106 = vrsqrt.f32 %v6215_v55 }
 0x851   :  { %v7107_v55 = vpop.eup %7106 }
 0x852   :  { %v6217_v42 = vmul.f32 %v7107_v55, %v12294_v49  ;;  %v6218_v58 = vmul.f32 %v7107_v55, %v12297_v24  ;;  %v6219_v26 = vmul.f32 %v7107_v55, %v12301_v19  ;;  %v6220_v46 = vmul.f32 %v7107_v55, %v12304_v30 }
 0x853   :  { %v6221_v45 = vmul.f32 %v7107_v55, %v12311_v41  ;;  %v6222_v40 = vmul.f32 %v7107_v55, %v12316_v9  ;;  %v6223_v51 = vmul.f32 %v7107_v55, %v12323_v28  ;;  %v6224_v2 = vmul.f32 %v7107_v55, %v12329_v59 }
 0x854   :  { %v6225_v49 = vmul.f32 %v7107_v55, %v12335_v29  ;;  %v6226_v24 = vmul.f32 %v7107_v55, %v12341_v57  ;;  %v6227_v19 = vmul.f32 %v7107_v55, %v12347_v13  ;;  %v6228_v30 = vmul.f32 %v7107_v55, %v12353_v5  ;;  %v6544_v29 = vld [vmem:[%s12563_s14] ss:$0 sm:$0xff] }
 0x855   :  { %v6229_v11 = vmul.f32 %v7107_v55, %v12359_v39  ;;  %v6230_v36 = vmul.f32 %v7107_v55, %v12365_v12  ;;  %v6231_v41 = vmul.f32 %v7107_v55, %v12371_v8  ;;  %v6232_v9 = vmul.f32 %v7107_v55, %v12377_v23 }
 0x856   :  { %v6239_v25 = vmul.f32 %v6543_v37, %v6217_v42  ;;  %v6240_v28 = vmul.f32 %v6543_v37, %v6218_v58  ;;  %v6241_v56 = vmul.f32 %v6543_v37, %v6219_v26  ;;  %v6242_v59 = vmul.f32 %v6543_v37, %v6220_v46 }
 0x857   :  { %v6243_v57 = vmul.f32 %v6543_v37, %v6221_v45  ;;  %v6244_v13 = vmul.f32 %v6543_v37, %v6222_v40  ;;  %v6245_v7 = vmul.f32 %v6543_v37, %v6223_v51  ;;  %v6246_v5 = vmul.f32 %v6543_v37, %v6224_v2 }
 0x858   :  { %v6247_v53 = vmul.f32 %v6543_v37, %v6225_v49  ;;  %v6248_v39 = vmul.f32 %v6543_v37, %v6226_v24  ;;  %v6249_v60 = vmul.f32 %v6543_v37, %v6227_v19  ;;  %v6250_v12 = vmul.f32 %v6543_v37, %v6228_v30 }
 0x859   :  { %v6251_v16 = vmul.f32 %v6543_v37, %v6229_v11  ;;  %v6252_v8 = vmul.f32 %v6543_v37, %v6230_v36  ;;  %v6253_v1 = vmul.f32 %v6543_v37, %v6231_v41  ;;  %v6254_v23 = vmul.f32 %v6543_v37, %v6232_v9 }
 0x85a   :  { %v6261_v62 = vadd.f32 %v6544_v29, %v6239_v25  ;;  %v6262_v0 = vadd.f32 %v6544_v29, %v6240_v28  ;;  %v6263_v50 = vadd.f32 %v6544_v29, %v6241_v56  ;;  %v6264_v32 = vadd.f32 %v6544_v29, %v6242_v59 }
 0x85b   :  { %v6265_v15 = vadd.f32 %v6544_v29, %v6243_v57  ;;  %v6266_v33 = vadd.f32 %v6544_v29, %v6244_v13  ;;  %v6267_v4 = vadd.f32 %v6544_v29, %v6245_v7  ;;  %v6268_v38 = vadd.f32 %v6544_v29, %v6246_v5 }
 0x85c   :  { %v6269_v22 = vadd.f32 %v6544_v29, %v6247_v53  ;;  %v6270_v21 = vadd.f32 %v6544_v29, %v6248_v39  ;;  %v6271_v48 = vadd.f32 %v6544_v29, %v6249_v60  ;;  %v6272_v6 = vadd.f32 %v6544_v29, %v6250_v12 }
 0x85d   :  { %v6273_v44 = vadd.f32 %v6544_v29, %v6251_v16  ;;  %v6274_v55 = vadd.f32 %v6544_v29, %v6252_v8  ;;  %v6275_v42 = vadd.f32 %v6544_v29, %v6253_v1  ;;  %v6276_v58 = vadd.f32 %v6544_v29, %v6254_v23 }
 0x85e   :  { %v6277_v26 = vadd.f32 %v6261_v62, %v12412_v63  ;;  %v6278_v46 = vadd.f32 %v6262_v0, %v12414_v35  ;;  %v6279_v37 = vadd.f32 %v6263_v50, %v12416_v43  ;;  %v6280_v45 = vadd.f32 %v6264_v32, %v12418_v3 }
 0x85f   :  { %v6281_v40 = vadd.f32 %v6265_v15, %v12420_v52  ;;  %v6282_v51 = vadd.f32 %v6266_v33, %v12422_v61  ;;  %v6283_v2 = vadd.f32 %v6267_v4, %v12424_v27  ;;  %v6284_v49 = vadd.f32 %v6268_v38, %v12426_v18 }
 0x860   :  { %v6285_v24 = vadd.f32 %v6269_v22, %v12428_v54  ;;  %v6286_v19 = vadd.f32 %v6270_v21, %v12430_v17  ;;  %v6287_v63 = vadd.f32 %v6271_v48, %v12432_v47  ;;  %v6288_v35 = vadd.f32 %v6272_v6, %v12434_v20 }
 0x861   :  { %v6289_v43 = vadd.f32 %v6273_v44, %v12436_v14  ;;  %v6290_v3 = vadd.f32 %v6274_v55, %v12438_v31  ;;  %v6291_v52 = vadd.f32 %v6275_v42, %v12440_v34  ;;  %v6292_v61 = vadd.f32 %v6276_v58, %v12442_v10 }
 0x862   :  { %v6293_v30 = vmax.f32 %v6277_v26, 0.0  ;;  %v6294_v27 = vmax.f32 %v6278_v46, 0.0  ;;  %v6295_v11 = vmax.f32 %v6279_v37, 0.0  ;;  %v6296_v18 = vmax.f32 %v6280_v45, 0.0 }
 0x863   :  { %v6297_v36 = vmax.f32 %v6281_v40, 0.0  ;;  %v6298_v54 = vmax.f32 %v6282_v51, 0.0  ;;  %v6299_v41 = vmax.f32 %v6283_v2, 0.0  ;;  %v6300_v17 = vmax.f32 %v6284_v49, 0.0 }
 0x864   :  { %v6301_v9 = vmax.f32 %v6285_v24, 0.0  ;;  %v6302_v47 = vmax.f32 %v6286_v19, 0.0  ;;  %v6303_v25 = vmax.f32 %v6287_v63, 0.0  ;;  %v6304_v20 = vmax.f32 %v6288_v35, 0.0  ;;  %6309 = vst.msk [vmem:[%s12564_s18] sm:$0xff] %vm1109_vm2, %v6293_v30  ;;  %6310 = vst.msk [vmem:[%s12564_s18 + $0x8] sm:$0xff] %vm1109_vm2, %v6294_v27 }
 0x865   :  { %6311 = vst.msk [vmem:[%s12564_s18 + $0x10] sm:$0xff] %vm1109_vm2, %v6295_v11  ;;  %6312 = vst.msk [vmem:[%s12564_s18 + $0x18] sm:$0xff] %vm1109_vm2, %v6296_v18  ;;  %v6305_v14 = vmax.f32 %v6289_v43, 0.0  ;;  %v6306_v31 = vmax.f32 %v6290_v3, 0.0  ;;  %v6307_v34 = vmax.f32 %v6291_v52, 0.0  ;;  %v6308_v10 = vmax.f32 %v6292_v61, 0.0 }
 0x866   :  { %6313 = vst.msk [vmem:[%s12564_s18 + $0x20] sm:$0xff] %vm1109_vm2, %v6297_v36  ;;  %6314 = vst.msk [vmem:[%s12564_s18 + $0x28] sm:$0xff] %vm1109_vm2, %v6298_v54 }
 0x867   :  { %6315 = vst.msk [vmem:[%s12564_s18 + $0x30] sm:$0xff] %vm1109_vm2, %v6299_v41  ;;  %6316 = vst.msk [vmem:[%s12564_s18 + $0x38] sm:$0xff] %vm1109_vm2, %v6300_v17 }
 0x868   :  { %6317 = vst.msk [vmem:[%s12564_s18 + $0x40] sm:$0xff] %vm1109_vm2, %v6301_v9  ;;  %6318 = vst.msk [vmem:[%s12564_s18 + $0x48] sm:$0xff] %vm1109_vm2, %v6302_v47 }
 0x869   :  { %6319 = vst.msk [vmem:[%s12564_s18 + $0x50] sm:$0xff] %vm1109_vm2, %v6303_v25  ;;  %6320 = vst.msk [vmem:[%s12564_s18 + $0x58] sm:$0xff] %vm1109_vm2, %v6304_v20 }
 0x86a   :  { %6321 = vst.msk [vmem:[%s12564_s18 + $0x60] sm:$0xff] %vm1109_vm2, %v6305_v14  ;;  %6322 = vst.msk [vmem:[%s12564_s18 + $0x68] sm:$0xff] %vm1109_vm2, %v6306_v31 }
 0x86b   :  { %6323 = vst.msk [vmem:[%s12564_s18 + $0x70] sm:$0xff] %vm1109_vm2, %v6307_v34  ;;  %6324 = vst.msk [vmem:[%s12564_s18 + $0x78] sm:$0xff] %vm1109_vm2, %v6308_v10 }

</bundles_post_ra>
